<compile_context>
chip_gen: v7x
topology: tpu7x:2x2x1
jax: 0.10.0
libtpu: 0.0.40
codegen_flags: <defaults>
</compile_context>

<pallas_src>
import jax
import jax.numpy as jnp
from jax.experimental import pallas as pl
from jax.experimental.pallas import tpu as pltpu

IN_FEATURES = 784
K1_PAD = 896            # 784 padded up to a multiple of 128 (lane-dense first matmul)
OUT_FEATURES = 10
OUT_PAD = 128           # 10 padded up to one full lane (unmasked output stores)
TILE_B = 128            # batch tile: fills MXU rows; fine on v5e/v6e/v7x


def mlp_kernel(x_ref,
               w1_ref, b1_ref,
               w2_ref, b2_ref,
               w3_ref, b3_ref,
               w4_ref, b4_ref,
               o_ref):
    # All dots: bf16 operands, f32 accumulation on the MXU.
    # Bias-add / ReLU stay in f32 (v5e VPU has no bf16 support).
    h = jnp.dot(x_ref[...], w1_ref[...], preferred_element_type=jnp.float32)
    h = jnp.maximum(h + b1_ref[...], 0.0)

    h = jnp.dot(h.astype(jnp.bfloat16), w2_ref[...],
                preferred_element_type=jnp.float32)
    h = jnp.maximum(h + b2_ref[...], 0.0)

    h = jnp.dot(h.astype(jnp.bfloat16), w3_ref[...],
                preferred_element_type=jnp.float32)
    h = jnp.maximum(h + b3_ref[...], 0.0)

    o = jnp.dot(h.astype(jnp.bfloat16), w4_ref[...],
                preferred_element_type=jnp.float32)
    o_ref[...] = (o + b4_ref[...]).astype(o_ref.dtype)


def init_params(key):
    """Deterministic f32 init mirroring nn.Linear's U(-1/sqrt(in), 1/sqrt(in)).
    Weights are stored transposed vs torch, i.e. (in_features, out_features)."""
    dims = [(784, 1024), (1024, 512), (512, 512), (512, 10)]
    params = []
    for (din, dout) in dims:
        key, kw, kb = jax.random.split(key, 3)
        bound = 1.0 / (din ** 0.5)
        w = jax.random.uniform(kw, (din, dout), jnp.float32, -bound, bound)
        b = jax.random.uniform(kb, (dout,), jnp.float32, -bound, bound)
        params.append((w, b))
    return params


def prepare_params(params):
    """Pad + cast f32 params into kernel layout: bf16 weights, f32 (1, N) biases.
    Zero-padding of w1 rows / w4 cols keeps the math identical."""
    (w1, b1), (w2, b2), (w3, b3), (w4, b4) = params
    w1p = jnp.pad(w1, ((0, K1_PAD - IN_FEATURES), (0, 0))).astype(jnp.bfloat16)
    w4p = jnp.pad(w4, ((0, 0), (0, OUT_PAD - OUT_FEATURES))).astype(jnp.bfloat16)
    b4p = jnp.pad(b4, (0, OUT_PAD - OUT_FEATURES))
    return ((w1p, b1.reshape(1, -1).astype(jnp.float32)),
            (w2.astype(jnp.bfloat16), b2.reshape(1, -1).astype(jnp.float32)),
            (w3.astype(jnp.bfloat16), b3.reshape(1, -1).astype(jnp.float32)),
            (w4p, b4p.reshape(1, -1).astype(jnp.float32)))


def mlp_forward(x_nchw, prepared_params, *, tb=TILE_B):
    """x_nchw: (B, 1, 28, 28) float32. Returns logits (B, 10) float32."""
    B = x_nchw.shape[0]
    x = x_nchw.reshape(B, -1)  # nn.Flatten(): (B, 784)
    assert x.shape[1] == IN_FEATURES

    bp = pl.cdiv(B, tb) * tb
    # Zero-pad batch to a tile multiple and features 784 -> 896; cast the
    # activation stream to bf16 (halves x DMA, native MXU operand dtype).
    x = jnp.pad(x, ((0, bp - B), (0, K1_PAD - IN_FEATURES))).astype(jnp.bfloat16)

    (w1, b1), (w2, b2), (w3, b3), (w4, b4) = prepared_params

    def resident(shape):
        # Constant index_map -> stays in VMEM across all batch tiles.
        return pl.BlockSpec(shape, lambda i: (0, 0))

    out = pl.pallas_call(
        mlp_kernel,
        out_shape=jax.ShapeDtypeStruct((bp, OUT_PAD), jnp.float32),
        grid=(bp // tb,),
        in_specs=[
            pl.BlockSpec((tb, K1_PAD), lambda i: (i, 0)),   # x: streamed per batch tile
            resident((K1_PAD, 1024)), resident((1, 1024)),
            resident((1024, 512)),    resident((1, 512)),
            resident((512, 512)),     resident((1, 512)),
            resident((512, OUT_PAD)), resident((1, OUT_PAD)),
        ],
        out_specs=pl.BlockSpec((tb, OUT_PAD), lambda i: (i, 0)),
        compiler_params=pltpu.CompilerParams(
            dimension_semantics=("parallel",),   # megacore sharding on v7x
            vmem_limit_bytes=32 << 20,
        ),
    )(x, w1, b1, w2, b2, w3, b3, w4, b4)

    return out[:B, :OUT_FEATURES]


def mlp_reference(x_nchw, params):
    """Plain-JAX reference mirroring the kernel math (bf16 operands, f32 accumulation)."""
    x = x_nchw.reshape(x_nchw.shape[0], -1)
    (w1, b1), (w2, b2), (w3, b3), (w4, b4) = params

    def lin(h, w, b):
        return jnp.dot(h.astype(jnp.bfloat16), w.astype(jnp.bfloat16),
                       preferred_element_type=jnp.float32) + b

    h = jnp.maximum(lin(x, w1, b1), 0.0)
    h = jnp.maximum(lin(h, w2, b2), 0.0)
    h = jnp.maximum(lin(h, w3, b3), 0.0)
    return lin(h, w4, b4)


if __name__ == "__main__":
    key = jax.random.PRNGKey(0)
    key, kx = jax.random.split(key)

    B = 8
    x = jax.random.normal(kx, (B, 1, 28, 28), jnp.float32)  # NCHW, 28*28 = 784
    params = init_params(key)
    prepared = prepare_params(params)

    out = jax.block_until_ready(mlp_forward(x, prepared))
    ref = mlp_reference(x, params)

    assert out.shape == (B, 10), out.shape
    assert jnp.allclose(out, ref, atol=2e-2, rtol=2e-2), "mismatch vs reference"

    print("KERNEL_OK")
</pallas_src>

<mosaic_0001>
module attributes {stable_mosaic.version = 11 : i64} {
  func.func @mlp_kernel(%arg0: i32, %arg1: memref<128x896xbf16, #tpu.memory_space<vmem>>, %arg2: memref<896x1024xbf16, #tpu.memory_space<vmem>>, %arg3: memref<1x1024xf32, #tpu.memory_space<vmem>>, %arg4: memref<1024x512xbf16, #tpu.memory_space<vmem>>, %arg5: memref<1x512xf32, #tpu.memory_space<vmem>>, %arg6: memref<512x512xbf16, #tpu.memory_space<vmem>>, %arg7: memref<1x512xf32, #tpu.memory_space<vmem>>, %arg8: memref<512x128xbf16, #tpu.memory_space<vmem>>, %arg9: memref<1x128xf32, #tpu.memory_space<vmem>>, %arg10: memref<128x128xf32, #tpu.memory_space<vmem>>) attributes {dimension_semantics = [#tpu.dimension_semantics<parallel>], iteration_bounds = array<i64: 1>, scalar_prefetch = 0 : i64, scratch_operands = 0 : i64, tpu.core_type = #tpu.core_type<tc>, window_params = [{transform_indices = @transform_0, window_bounds = array<i64: 128, 896>}, {pipeline_mode = #tpu.pipeline_mode<synchronous>, transform_indices = @transform_1, window_bounds = array<i64: 896, 1024>}, {pipeline_mode = #tpu.pipeline_mode<synchronous>, transform_indices = @transform_2, window_bounds = array<i64: 1, 1024>}, {pipeline_mode = #tpu.pipeline_mode<synchronous>, transform_indices = @transform_3, window_bounds = array<i64: 1024, 512>}, {pipeline_mode = #tpu.pipeline_mode<synchronous>, transform_indices = @transform_4, window_bounds = array<i64: 1, 512>}, {pipeline_mode = #tpu.pipeline_mode<synchronous>, transform_indices = @transform_5, window_bounds = array<i64: 512, 512>}, {pipeline_mode = #tpu.pipeline_mode<synchronous>, transform_indices = @transform_6, window_bounds = array<i64: 1, 512>}, {pipeline_mode = #tpu.pipeline_mode<synchronous>, transform_indices = @transform_7, window_bounds = array<i64: 512, 128>}, {pipeline_mode = #tpu.pipeline_mode<synchronous>, transform_indices = @transform_8, window_bounds = array<i64: 1, 128>}, {transform_indices = @transform_9, window_bounds = array<i64: 128, 128>}]} {
    %c0 = arith.constant 0 : index
    %c0_0 = arith.constant 0 : index
    %0 = vector.load %arg1[%c0, %c0_0] : memref<128x896xbf16, #tpu.memory_space<vmem>>, vector<128x896xbf16>
    %c0_1 = arith.constant 0 : index
    %c0_2 = arith.constant 0 : index
    %1 = vector.load %arg2[%c0_1, %c0_2] : memref<896x1024xbf16, #tpu.memory_space<vmem>>, vector<896x1024xbf16>
    %cst = arith.constant dense<0.000000e+00> : vector<128x1024xf32>
    %2 = tpu.matmul %0, %1, %cst {dimension_numbers = #tpu.dot_dimension_numbers<[1], [0], [0], [1], [0, 0, 1, 1], [], []>} : vector<128x896xbf16>, vector<896x1024xbf16>, vector<128x1024xf32> -> vector<128x1024xf32>
    %c0_3 = arith.constant 0 : index
    %c0_4 = arith.constant 0 : index
    %3 = vector.load %arg3[%c0_3, %c0_4] : memref<1x1024xf32, #tpu.memory_space<vmem>>, vector<1x1024xf32>
    %4 = vector.broadcast %3 : vector<1x1024xf32> to vector<128x1024xf32>
    %5 = arith.addf %2, %4 : vector<128x1024xf32>
    %cst_5 = arith.constant 0.000000e+00 : f32
    %6 = vector.broadcast %cst_5 : f32 to vector<128x1024xf32>
    %7 = arith.maximumf %5, %6 : vector<128x1024xf32>
    %8 = arith.truncf %7 : vector<128x1024xf32> to vector<128x1024xbf16>
    %c0_6 = arith.constant 0 : index
    %c0_7 = arith.constant 0 : index
    %9 = vector.load %arg4[%c0_6, %c0_7] : memref<1024x512xbf16, #tpu.memory_space<vmem>>, vector<1024x512xbf16>
    %cst_8 = arith.constant dense<0.000000e+00> : vector<128x512xf32>
    %10 = tpu.matmul %8, %9, %cst_8 {dimension_numbers = #tpu.dot_dimension_numbers<[1], [0], [0], [1], [0, 0, 1, 1], [], []>} : vector<128x1024xbf16>, vector<1024x512xbf16>, vector<128x512xf32> -> vector<128x512xf32>
    %c0_9 = arith.constant 0 : index
    %c0_10 = arith.constant 0 : index
    %11 = vector.load %arg5[%c0_9, %c0_10] : memref<1x512xf32, #tpu.memory_space<vmem>>, vector<1x512xf32>
    %12 = vector.broadcast %11 : vector<1x512xf32> to vector<128x512xf32>
    %13 = arith.addf %10, %12 : vector<128x512xf32>
    %cst_11 = arith.constant 0.000000e+00 : f32
    %14 = vector.broadcast %cst_11 : f32 to vector<128x512xf32>
    %15 = arith.maximumf %13, %14 : vector<128x512xf32>
    %16 = arith.truncf %15 : vector<128x512xf32> to vector<128x512xbf16>
    %c0_12 = arith.constant 0 : index
    %c0_13 = arith.constant 0 : index
    %17 = vector.load %arg6[%c0_12, %c0_13] : memref<512x512xbf16, #tpu.memory_space<vmem>>, vector<512x512xbf16>
    %cst_14 = arith.constant dense<0.000000e+00> : vector<128x512xf32>
    %18 = tpu.matmul %16, %17, %cst_14 {dimension_numbers = #tpu.dot_dimension_numbers<[1], [0], [0], [1], [0, 0, 1, 1], [], []>} : vector<128x512xbf16>, vector<512x512xbf16>, vector<128x512xf32> -> vector<128x512xf32>
    %c0_15 = arith.constant 0 : index
    %c0_16 = arith.constant 0 : index
    %19 = vector.load %arg7[%c0_15, %c0_16] : memref<1x512xf32, #tpu.memory_space<vmem>>, vector<1x512xf32>
    %20 = vector.broadcast %19 : vector<1x512xf32> to vector<128x512xf32>
    %21 = arith.addf %18, %20 : vector<128x512xf32>
    %cst_17 = arith.constant 0.000000e+00 : f32
    %22 = vector.broadcast %cst_17 : f32 to vector<128x512xf32>
    %23 = arith.maximumf %21, %22 : vector<128x512xf32>
    %24 = arith.truncf %23 : vector<128x512xf32> to vector<128x512xbf16>
    %c0_18 = arith.constant 0 : index
    %c0_19 = arith.constant 0 : index
    %25 = vector.load %arg8[%c0_18, %c0_19] : memref<512x128xbf16, #tpu.memory_space<vmem>>, vector<512x128xbf16>
    %cst_20 = arith.constant dense<0.000000e+00> : vector<128x128xf32>
    %26 = tpu.matmul %24, %25, %cst_20 {dimension_numbers = #tpu.dot_dimension_numbers<[1], [0], [0], [1], [0, 0, 1, 1], [], []>} : vector<128x512xbf16>, vector<512x128xbf16>, vector<128x128xf32> -> vector<128x128xf32>
    %c0_21 = arith.constant 0 : index
    %c0_22 = arith.constant 0 : index
    %27 = vector.load %arg9[%c0_21, %c0_22] : memref<1x128xf32, #tpu.memory_space<vmem>>, vector<1x128xf32>
    %28 = vector.broadcast %27 : vector<1x128xf32> to vector<128x128xf32>
    %29 = arith.addf %26, %28 : vector<128x128xf32>
    %c0_23 = arith.constant 0 : index
    %c0_24 = arith.constant 0 : index
    %30 = vector.load %arg10[%c0_23, %c0_24] : memref<128x128xf32, #tpu.memory_space<vmem>>, vector<128x128xf32>
    tpu.vector_store %arg10[%c0_23, %c0_24], %29 {strides = array<i32>} : memref<128x128xf32, #tpu.memory_space<vmem>>, vector<128x128xf32>,
    return
  }
  func.func @transform_0(%arg0: i32) -> (i32, i32) {
    %c0_i32 = arith.constant 0 : i32
    %c0_i32_0 = arith.constant 0 : i32
    return %arg0, %c0_i32 : i32, i32
  }
  func.func @transform_1(%arg0: i32) -> (i32, i32) {
    %c0_i32 = arith.constant 0 : i32
    %c0_i32_0 = arith.constant 0 : i32
    %c0_i32_1 = arith.constant 0 : i32
    return %c0_i32, %c0_i32_0 : i32, i32
  }
  func.func @transform_2(%arg0: i32) -> (i32, i32) {
    %c0_i32 = arith.constant 0 : i32
    %c0_i32_0 = arith.constant 0 : i32
    %c0_i32_1 = arith.constant 0 : i32
    return %c0_i32, %c0_i32_0 : i32, i32
  }
  func.func @transform_3(%arg0: i32) -> (i32, i32) {
    %c0_i32 = arith.constant 0 : i32
    %c0_i32_0 = arith.constant 0 : i32
    %c0_i32_1 = arith.constant 0 : i32
    return %c0_i32, %c0_i32_0 : i32, i32
  }
  func.func @transform_4(%arg0: i32) -> (i32, i32) {
    %c0_i32 = arith.constant 0 : i32
    %c0_i32_0 = arith.constant 0 : i32
    %c0_i32_1 = arith.constant 0 : i32
    return %c0_i32, %c0_i32_0 : i32, i32
  }
  func.func @transform_5(%arg0: i32) -> (i32, i32) {
    %c0_i32 = arith.constant 0 : i32
    %c0_i32_0 = arith.constant 0 : i32
    %c0_i32_1 = arith.constant 0 : i32
    return %c0_i32, %c0_i32_0 : i32, i32
  }
  func.func @transform_6(%arg0: i32) -> (i32, i32) {
    %c0_i32 = arith.constant 0 : i32
    %c0_i32_0 = arith.constant 0 : i32
    %c0_i32_1 = arith.constant 0 : i32
    return %c0_i32, %c0_i32_0 : i32, i32
  }
  func.func @transform_7(%arg0: i32) -> (i32, i32) {
    %c0_i32 = arith.constant 0 : i32
    %c0_i32_0 = arith.constant 0 : i32
    %c0_i32_1 = arith.constant 0 : i32
    return %c0_i32, %c0_i32_0 : i32, i32
  }
  func.func @transform_8(%arg0: i32) -> (i32, i32) {
    %c0_i32 = arith.constant 0 : i32
    %c0_i32_0 = arith.constant 0 : i32
    %c0_i32_1 = arith.constant 0 : i32
    return %c0_i32, %c0_i32_0 : i32, i32
  }
  func.func @transform_9(%arg0: i32) -> (i32, i32) {
    %c0_i32 = arith.constant 0 : i32
    %c0_i32_0 = arith.constant 0 : i32
    return %arg0, %c0_i32 : i32, i32
  }
}

</mosaic_0001>

<bundles_post_ra>
// kernel: tpu_custom_call.1
= control target key start
LH: loop header
LB: loop body
LE: loop exit
PB: predicated region body
PF: predicated region fallthrough
CT: control target
= control target key end

     0   :  { %14 = vsyncpa [#allocation3], 0  ;;  %s13405_s0 = inlined_call_operand.hbm [shape: bf16[128,896], index: 0, kind: input, shape index: {}]   ;;  %s13406_s1 = inlined_call_operand.hbm [shape: bf16[896,1024], index: 1, kind: input, shape index: {}]   ;;  %s13407_s2 = inlined_call_operand.hbm [shape: f32[1,1024], index: 2, kind: input, shape index: {}]   ;;  %s13408_s3 = inlined_call_operand.hbm [shape: bf16[1024,512], index: 3, kind: input, shape index: {}]   ;;  %s13409_s4 = inlined_call_operand.hbm [shape: f32[1,512], index: 4, kind: input, shape index: {}]   ;;  %s13410_s5 = inlined_call_operand.hbm [shape: bf16[512,512], index: 5, kind: input, shape index: {}]   ;;  %s13411_s6 = inlined_call_operand.hbm [shape: f32[1,512], index: 6, kind: input, shape index: {}]   ;;  %s13412_s7 = inlined_call_operand.hbm [shape: bf16[512,128], index: 7, kind: input, shape index: {}]   ;;  %s13413_s8 = inlined_call_operand.hbm [shape: f32[1,128], index: 8, kind: input, shape index: {}]   ;;  %s13414_s9 = inlined_call_operand.hbm [shape: f32[128,128], index: 9, kind: output, shape index: {}]  }
   0x1   :  { %15 = vsyncpa [#allocation6], 0 }
   0x2   :  { %16 = vsyncpa [#allocation9], 0 }
   0x3   :  { %17 = vsyncpa [#allocation12], 0 }
   0x4   :  { %18 = vsyncpa [#allocation15], 0 }
   0x5   :  { %19 = vsyncpa [#allocation4], 0  ;;  %s12563_s30 = smov [#allocation5]   ;;  %s12331_s13 = scalar_lea.hbm %s13406_s1, 57344 }
   0x6   :  { %s37_s10 = sshll.u32 %s12563_s30, 4  ;;  %p12332_p0 = scmp.ne.s32.totalorder %s13406_s1, %s12331_s13  ;;  %s38_s10 = int_to_ptr.vmem [resolvable:$true] %s37_s10 }
   0x7   :  { %p12335_p1 = scmp.lt.u32.totalorder %s12331_s13, %s13406_s1 }
   0x9   :  { %p12337_p2 = pnand %p12335_p1, %p12332_p0 }
   0xb   :  { %12340 = shalt.err (!%p12337_p2)
}
   0xc   :  { %s12341_s18 = scalar_lea.vmem %s38_s10, 57344  ;;  %p12346_p4 = scmp.lt.s32.totalorder %s38_s10, %s38_s10 }
   0xd   :  { %p12342_p3 = scmp.ne.s32.totalorder %s38_s10, %s12341_s18  ;;  %p12347_p5 = scmp.lt.s32.totalorder %s12341_s18, %s12341_s18 }
   0xf   :  { %p12348_p6 = por %p12347_p5, %p12346_p4 }
  0x11   :  { %p12349_p7 = pnand %p12348_p6, %p12342_p3 }
  0x13   :  { %12352 = shalt.err (!%p12349_p7)
}
  0x14   :  { %s12564_s19 = smov 512   ;;  %s12565_s20 = smov 32  }
  0x15   :  { %43 = dma.hbm_to_vmem [thread:$0]  %s13406_s1, 57344, %s38_s10, [#allocation6], %s12564_s19, %s12564_s19, %s12565_s20  }
  0x16   :  { %s12566_s23 = smov [#allocation8]   ;;  %s12353_s27 = scalar_lea.hbm %s13408_s3, 32768 }
  0x17   :  { %s59_s24 = sshll.u32 %s12566_s23, 4  ;;  %p12354_p8 = scmp.ne.s32.totalorder %s13408_s3, %s12353_s27  ;;  %s60_s24 = int_to_ptr.vmem [resolvable:$true] %s59_s24 }
  0x18   :  { %p12357_p9 = scmp.lt.u32.totalorder %s12353_s27, %s13408_s3 }
  0x1a   :  { %p12359_p10 = pnand %p12357_p9, %p12354_p8 }
  0x1c   :  { %12362 = shalt.err (!%p12359_p10)
}
  0x1d   :  { %s12363_s12 = scalar_lea.vmem %s60_s24, 32768  ;;  %p12368_p12 = scmp.lt.s32.totalorder %s60_s24, %s60_s24 }
  0x1e   :  { %p12364_p11 = scmp.ne.s32.totalorder %s60_s24, %s12363_s12  ;;  %p12369_p13 = scmp.lt.s32.totalorder %s12363_s12, %s12363_s12 }
  0x20   :  { %p12370_p0 = por %p12369_p13, %p12368_p12 }
  0x22   :  { %p12371_p1 = pnand %p12370_p0, %p12364_p11 }
  0x24   :  { %12374 = shalt.err (!%p12371_p1)
}
  0x25   :  { %s12567_s1 = smov 256   ;;  %s12568_s10 = smov 16  }
  0x26   :  { %65 = dma.hbm_to_vmem [thread:$0]  %s13408_s3, 32768, %s60_s24, [#allocation9], %s12567_s1, %s12567_s1, %s12568_s10  }
  0x27   :  { %s12569_s15 = smov [#allocation11]   ;;  %s12570_s17 = smov [#allocation14]  }
  0x28   :  { %s81_s16 = sshll.u32 %s12569_s15, 4  ;;  %s103_s18 = sshll.u32 %s12570_s17, 4  ;;  %s82_s16 = int_to_ptr.vmem [resolvable:$true] %s81_s16  ;;  %s12658_s18 = int_to_ptr.vmem [resolvable:$true] %s103_s18 }
  0x29   :  { %s12375_s21 = scalar_lea.hbm %s13410_s5, 16384 }
  0x2a   :  { %p12376_p2 = scmp.ne.s32.totalorder %s13410_s5, %s12375_s21  ;;  %p12379_p3 = scmp.lt.u32.totalorder %s12375_s21, %s13410_s5 }
  0x2c   :  { %p12381_p4 = pnand %p12379_p3, %p12376_p2 }
  0x2e   :  { %12384 = shalt.err (!%p12381_p4)
}
  0x2f   :  { %s12385_s3 = scalar_lea.vmem %s82_s16, 16384  ;;  %p12390_p6 = scmp.lt.s32.totalorder %s82_s16, %s82_s16 }
  0x30   :  { %p12386_p5 = scmp.ne.s32.totalorder %s82_s16, %s12385_s3  ;;  %p12391_p7 = scmp.lt.s32.totalorder %s12385_s3, %s12385_s3 }
  0x32   :  { %p12392_p8 = por %p12391_p7, %p12390_p6 }
  0x34   :  { %p12393_p9 = pnand %p12392_p8, %p12386_p5 }
  0x36   :  { %12396 = shalt.err (!%p12393_p9)
}
  0x37   :  { %87 = dma.hbm_to_vmem [thread:$0]  %s13410_s5, 16384, %s82_s16, [#allocation12], %s12567_s1, %s12567_s1, %s12568_s10  }
  0x38   :  { %s12397_s30 = scalar_lea.hbm %s13412_s7, 4096 }
  0x39   :  { %p12398_p10 = scmp.ne.s32.totalorder %s13412_s7, %s12397_s30  ;;  %p12401_p11 = scmp.lt.u32.totalorder %s12397_s30, %s13412_s7 }
  0x3b   :  { %p12403_p12 = pnand %p12401_p11, %p12398_p10 }
  0x3d   :  { %12406 = shalt.err (!%p12403_p12)
}
  0x3e   :  { %s12407_s15 = scalar_lea.vmem %s12658_s18, 4096  ;;  %p12412_p0 = scmp.lt.s32.totalorder %s12658_s18, %s12658_s18 }
  0x3f   :  { %p12408_p13 = scmp.ne.s32.totalorder %s12658_s18, %s12407_s15  ;;  %p12413_p1 = scmp.lt.s32.totalorder %s12407_s15, %s12407_s15 }
  0x41   :  { %p12414_p2 = por %p12413_p1, %p12412_p0 }
  0x43   :  { %p12415_p3 = pnand %p12414_p2, %p12408_p13 }
  0x45   :  { %12418 = shalt.err (!%p12415_p3)
}
  0x46   :  { %s12571_s5 = smov 64   ;;  %s12572_s1 = smov 4  }
  0x47   :  { %109 = dma.hbm_to_vmem [thread:$0]  %s13412_s7, 4096, %s12658_s18, [#allocation15], %s12571_s5, %s12571_s5, %s12572_s1  }
  0x48   :  { %s12573_s17 = smov [#allocation2]   ;;  %s12419_s22 = scalar_lea.hbm %s13405_s0, 7168 }
  0x49   :  { %s25_s19 = sshll.u32 %s12573_s17, 4  ;;  %p12420_p4 = scmp.ne.s32.totalorder %s13405_s0, %s12419_s22  ;;  %s26_s19 = int_to_ptr.vmem [resolvable:$true] %s25_s19 }
  0x4a   :  { %p12423_p5 = scmp.lt.u32.totalorder %s12419_s22, %s13405_s0 }
  0x4c   :  { %p12425_p6 = pnand %p12423_p5, %p12420_p4 }
  0x4e   :  { %12428 = shalt.err (!%p12425_p6)
}
  0x4f   :  { %s12429_s24 = scalar_lea.vmem %s26_s19, 7168  ;;  %p12434_p8 = scmp.lt.s32.totalorder %s26_s19, %s26_s19 }
  0x50   :  { %p12430_p7 = scmp.ne.s32.totalorder %s26_s19, %s12429_s24  ;;  %p12435_p9 = scmp.lt.s32.totalorder %s12429_s24, %s12429_s24 }
  0x52   :  { %p12436_p10 = por %p12435_p9, %p12434_p8 }
  0x54   :  { %p12437_p11 = pnand %p12436_p10, %p12430_p7 }
  0x56   :  { %12440 = shalt.err (!%p12437_p11)
}
  0x57   :  { %s12574_s7 = smov 448   ;;  %s12575_s18 = smov 28  }
  0x58   :  { %31 = dma.hbm_to_vmem [thread:$0]  %s13405_s0, 7168, %s26_s19, [#allocation3], %s12574_s7, %s12574_s7, %s12575_s18  }
  0x59   :  { %s12576_s29 = smov [#allocation7]   ;;  %s12577_s11 = smov [#allocation10]  }
  0x5a   :  { %s50_s30 = sshll.u32 %s12576_s29, 4  ;;  %s72_s12 = sshll.u32 %s12577_s11, 4  ;;  %s51_s30 = int_to_ptr.vmem [resolvable:$true] %s50_s30  ;;  %s73_s12 = int_to_ptr.vmem [resolvable:$true] %s72_s12 }
  0x5b   :  { %s12441_s15 = scalar_lea.hbm %s13407_s2, 128 }
  0x5c   :  { %p12442_p12 = scmp.ne.s32.totalorder %s13407_s2, %s12441_s15  ;;  %p12445_p13 = scmp.lt.u32.totalorder %s12441_s15, %s13407_s2 }
  0x5e   :  { %p12447_p0 = pnand %p12445_p13, %p12442_p12 }
  0x60   :  { %12450 = shalt.err (!%p12447_p0)
}
  0x61   :  { %s12451_s0 = scalar_lea.vmem %s51_s30, 128  ;;  %p12456_p2 = scmp.lt.s32.totalorder %s51_s30, %s51_s30 }
  0x62   :  { %p12452_p1 = scmp.ne.s32.totalorder %s51_s30, %s12451_s0  ;;  %p12457_p3 = scmp.lt.s32.totalorder %s12451_s0, %s12451_s0 }
  0x64   :  { %p12458_p4 = por %p12457_p3, %p12456_p2 }
  0x66   :  { %p12459_p5 = pnand %p12458_p4, %p12452_p1 }
  0x68   :  { %12462 = shalt.err (!%p12459_p5)
}
  0x69   :  { %53 = dma.hbm_to_vmem [thread:$0]  %s13407_s2, 128, %s51_s30, [#allocation6]  }
  0x6a   :  { %s12463_s22 = scalar_lea.hbm %s13409_s4, 64 }
  0x6b   :  { %p12464_p6 = scmp.ne.s32.totalorder %s13409_s4, %s12463_s22  ;;  %p12467_p7 = scmp.lt.u32.totalorder %s12463_s22, %s13409_s4 }
  0x6d   :  { %p12469_p8 = pnand %p12467_p7, %p12464_p6 }
  0x6f   :  { %12472 = shalt.err (!%p12469_p8)
}
  0x70   :  { %s12473_s24 = scalar_lea.vmem %s73_s12, 64  ;;  %p12478_p10 = scmp.lt.s32.totalorder %s73_s12, %s73_s12 }
  0x71   :  { %p12474_p9 = scmp.ne.s32.totalorder %s73_s12, %s12473_s24  ;;  %p12479_p11 = scmp.lt.s32.totalorder %s12473_s24, %s12473_s24 }
  0x73   :  { %p12480_p12 = por %p12479_p11, %p12478_p10 }
  0x75   :  { %p12481_p13 = pnand %p12480_p12, %p12474_p9 }
  0x77   :  { %12484 = shalt.err (!%p12481_p13)
}
  0x78   :  { %75 = dma.hbm_to_vmem [thread:$0]  %s13409_s4, 64, %s73_s12, [#allocation9]  }
  0x79   :  { %s12578_s18 = smov [#allocation13]   ;;  %s12579_s28 = smov [#allocation16]  }
  0x7a   :  { %s94_s27 = sshll.u32 %s12578_s18, 4  ;;  %s116_s29 = sshll.u32 %s12579_s28, 4  ;;  %s95_s27 = int_to_ptr.vmem [resolvable:$true] %s94_s27  ;;  %s117_s29 = int_to_ptr.vmem [resolvable:$true] %s116_s29 }
  0x7b   :  { %s12485_s13 = scalar_lea.hbm %s13411_s6, 64 }
  0x7c   :  { %p12486_p0 = scmp.ne.s32.totalorder %s13411_s6, %s12485_s13  ;;  %p12489_p1 = scmp.lt.u32.totalorder %s12485_s13, %s13411_s6 }
  0x7e   :  { %p12491_p2 = pnand %p12489_p1, %p12486_p0 }
  0x80   :  { %12494 = shalt.err (!%p12491_p2)
}
  0x81   :  { %s12495_s4 = scalar_lea.vmem %s95_s27, 64  ;;  %p12500_p4 = scmp.lt.s32.totalorder %s95_s27, %s95_s27 }
  0x82   :  { %p12496_p3 = scmp.ne.s32.totalorder %s95_s27, %s12495_s4  ;;  %p12501_p5 = scmp.lt.s32.totalorder %s12495_s4, %s12495_s4 }
  0x84   :  { %p12502_p6 = por %p12501_p5, %p12500_p4 }
  0x86   :  { %p12503_p7 = pnand %p12502_p6, %p12496_p3 }
  0x88   :  { %12506 = shalt.err (!%p12503_p7)
}
  0x89   :  { %97 = dma.hbm_to_vmem [thread:$0]  %s13411_s6, 64, %s95_s27, [#allocation12]  }
  0x8a   :  { %s12507_s17 = scalar_lea.hbm %s13413_s8, 16 }
  0x8b   :  { %p12508_p8 = scmp.ne.s32.totalorder %s13413_s8, %s12507_s17  ;;  %p12511_p9 = scmp.lt.u32.totalorder %s12507_s17, %s13413_s8 }
  0x8d   :  { %p12513_p10 = pnand %p12511_p9, %p12508_p8 }
  0x8f   :  { %12516 = shalt.err (!%p12513_p10)
}
  0x90   :  { %s12517_s23 = scalar_lea.vmem %s117_s29, 16  ;;  %s12521_s25 = scalar_lea.vmem %s117_s29, 32 }
  0x91   :  { %p12518_p11 = scmp.ne.s32.totalorder %s117_s29, %s12517_s23  ;;  %p12522_p12 = scmp.lt.s32.totalorder %s117_s29, %s117_s29 }
  0x92   :  { %p12523_p13 = scmp.lt.s32.totalorder %s12521_s25, %s12517_s23 }
  0x94   :  { %p12524_p0 = por %p12523_p13, %p12522_p12 }
  0x96   :  { %p12525_p1 = pnand %p12524_p0, %p12518_p11 }
  0x98   :  { %12528 = shalt.err (!%p12525_p1)
}
  0x99   :  { %119 = dma.hbm_to_vmem [thread:$0]  %s13413_s8, 16, %s117_s29, [#allocation15]  }
  0x9a   :  { %12551 = dma.done.wait [#allocation3], 7168  }
  0x9b   :  { %12552 = vsyncadd [#allocation3], 4294960128 }
  0x9c   :  { %12553 = dma.done.wait [#allocation6], 57472  }
  0x9d   :  { %12554 = vsyncadd [#allocation6], 4294909824 }
  0x9e   :  { %12555 = dma.done.wait [#allocation9], 32832  }
  0x9f   :  { %12556 = vsyncadd [#allocation9], 4294934464 }
  0xa0   :  { %12557 = dma.done.wait [#allocation12], 16448  }
  0xa1   :  { %12558 = vsyncadd [#allocation12], 4294950848 }
  0xa2   :  { %12559 = dma.done.wait [#allocation15], 4112  }
  0xa3   :  { %12560 = vsyncadd [#allocation15], 4294963184  ;;  %v212_v0 = vld [vmem:[#allocation5] sm:$0xff]  ;;  %v213_v2 = vld [vmem:[#allocation5 + $0x8] sm:$0xff]  ;;  %s12581_s8 = smov [#allocation17]  }
  0xa4   :  { %v216_v1 = vld [vmem:[#allocation5 + $0x20] sm:$0xff]  ;;  %v217_v4 = vld [vmem:[#allocation5 + $0x28] sm:$0xff]  ;;  %s9604_s3 = sshll.u32 %s12581_s8, 4  ;;  %s9605_s3 = int_to_ptr.vmem [resolvable:$true] %s9604_s3 }
  0xa5   :  { %v9677_v3 = vcombine.high %v212_v0, %v216_v1  ;;  %v9676_v5 = vcombine.low %v212_v0, %v216_v1  ;;  %v220_v6 = vld [vmem:[#allocation5 + $0x40] sm:$0xff]  ;;  %v9679_v8 = vcombine.high %v213_v2, %v217_v4  ;;  %v9678_v9 = vcombine.low %v213_v2, %v217_v4  ;;  %v221_v11 = vld [vmem:[#allocation5 + $0x48] sm:$0xff]  ;;  %s12529_s24 = scalar_lea.vmem %s9605_s3, 2048  ;;  %p12534_p3 = scmp.lt.s32.totalorder %s9605_s3, %s9605_s3 }
  0xa6   :  { %v224_v7 = vld [vmem:[#allocation5 + $0x60] sm:$0xff]  ;;  %v225_v12 = vld [vmem:[#allocation5 + $0x68] sm:$0xff]  ;;  %p12530_p2 = scmp.ne.s32.totalorder %s9605_s3, %s12529_s24  ;;  %p12535_p4 = scmp.lt.s32.totalorder %s12529_s24, %s12529_s24 }
  0xa7   :  { %v9685_v10 = vcombine.high %v220_v6, %v224_v7  ;;  %v228_v13 = vld [vmem:[#allocation5 + $0x80] sm:$0xff]  ;;  %3230 = vmatprep.subr.bf16.mxu0 %v9677_v3  ;;  %v9687_v14 = vcombine.high %v221_v11, %v225_v12  ;;  %v229_v16 = vld [vmem:[#allocation5 + $0x88] sm:$0xff]  ;;  %3682 = vmatprep.subr.bf16.mxu1 %v9679_v8  ;;  %v9684_v18 = vcombine.low %v220_v6, %v224_v7 }
  0xa8   :  { %v232_v15 = vld [vmem:[#allocation5 + $0xa0] sm:$0xff]  ;;  %v233_v17 = vld [vmem:[#allocation5 + $0xa8] sm:$0xff]  ;;  %3231 = vmatpush1.bf16.msra.mxu0 %v9676_v5  ;;  %3683 = vmatpush1.bf16.msra.mxu1 %v9678_v9  ;;  %v9686_v19 = vcombine.low %v221_v11, %v225_v12  ;;  %p12536_p5 = por %p12535_p4, %p12534_p3 }
  0xa9   :  { %3232 = vmatprep.subr.bf16.mxu0 %v9685_v10  ;;  %v9693_v20 = vcombine.high %v228_v13, %v232_v15  ;;  %3684 = vmatprep.subr.bf16.mxu1 %v9687_v14  ;;  %v9695_v21 = vcombine.high %v229_v16, %v233_v17  ;;  %v236_v22 = vld [vmem:[#allocation5 + $0xc0] sm:$0xff]  ;;  %v237_v24 = vld [vmem:[#allocation5 + $0xc8] sm:$0xff]  ;;  %v9692_v26 = vcombine.low %v228_v13, %v232_v15 }
  0xaa   :  { %v240_v23 = vld [vmem:[#allocation5 + $0xe0] sm:$0xff]  ;;  %v241_v25 = vld [vmem:[#allocation5 + $0xe8] sm:$0xff]  ;;  %v9694_v27 = vcombine.low %v229_v16, %v233_v17  ;;  %p12537_p6 = pnand %p12536_p5, %p12530_p2 }
  0xab   :  { %v9701_v28 = vcombine.high %v236_v22, %v240_v23  ;;  %v9703_v29 = vcombine.high %v237_v24, %v241_v25  ;;  %v244_v30 = vld [vmem:[#allocation5 + $0x100] sm:$0xff]  ;;  %v245_v32 = vld [vmem:[#allocation5 + $0x108] sm:$0xff]  ;;  %v9700_v34 = vcombine.low %v236_v22, %v240_v23  ;;  %v9702_v35 = vcombine.low %v237_v24, %v241_v25 }
  0xac   :  { %3233 = vmatpush1.bf16.msra.mxu0 %v9684_v18  ;;  %3685 = vmatpush1.bf16.msra.mxu1 %v9686_v19  ;;  %v248_v31 = vld [vmem:[#allocation5 + $0x120] sm:$0xff]  ;;  %v249_v33 = vld [vmem:[#allocation5 + $0x128] sm:$0xff] }
  0xad   :  { %3234 = vmatprep.subr.bf16.mxu0 %v9693_v20  ;;  %3686 = vmatprep.subr.bf16.mxu1 %v9695_v21  ;;  %v9709_v36 = vcombine.high %v244_v30, %v248_v31  ;;  %v9711_v37 = vcombine.high %v245_v32, %v249_v33  ;;  %v252_v38 = vld [vmem:[#allocation5 + $0x140] sm:$0xff]  ;;  %v253_v40 = vld [vmem:[#allocation5 + $0x148] sm:$0xff]  ;;  %v9708_v42 = vcombine.low %v244_v30, %v248_v31 }
  0xae   :  { %v256_v39 = vld [vmem:[#allocation5 + $0x160] sm:$0xff]  ;;  %v257_v41 = vld [vmem:[#allocation5 + $0x168] sm:$0xff]  ;;  %v9710_v43 = vcombine.low %v245_v32, %v249_v33 }
  0xaf   :  { %v9717_v44 = vcombine.high %v252_v38, %v256_v39  ;;  %v9719_v45 = vcombine.high %v253_v40, %v257_v41  ;;  %v260_v46 = vld [vmem:[#allocation5 + $0x180] sm:$0xff]  ;;  %v261_v48 = vld [vmem:[#allocation5 + $0x188] sm:$0xff]  ;;  %v9716_v50 = vcombine.low %v252_v38, %v256_v39  ;;  %v9718_v51 = vcombine.low %v253_v40, %v257_v41 }
  0xb0   :  { %3235 = vmatpush1.bf16.msra.mxu0 %v9692_v26  ;;  %3687 = vmatpush1.bf16.msra.mxu1 %v9694_v27  ;;  %v264_v47 = vld [vmem:[#allocation5 + $0x1a0] sm:$0xff]  ;;  %v265_v49 = vld [vmem:[#allocation5 + $0x1a8] sm:$0xff] }
  0xb1   :  { %3236 = vmatprep.subr.bf16.mxu0 %v9701_v28  ;;  %3688 = vmatprep.subr.bf16.mxu1 %v9703_v29  ;;  %v9725_v52 = vcombine.high %v260_v46, %v264_v47  ;;  %v9727_v53 = vcombine.high %v261_v48, %v265_v49  ;;  %v268_v54 = vld [vmem:[#allocation5 + $0x1c0] sm:$0xff]  ;;  %v269_v57 = vld [vmem:[#allocation5 + $0x1c8] sm:$0xff]  ;;  %v9724_v59 = vcombine.low %v260_v46, %v264_v47 }
  0xb2   :  { %v272_v55 = vld [vmem:[#allocation5 + $0x1e0] sm:$0xff]  ;;  %v273_v58 = vld [vmem:[#allocation5 + $0x1e8] sm:$0xff]  ;;  %v9726_v60 = vcombine.low %v261_v48, %v265_v49 }
  0xb3   :  { %v11586_v56 = vld [vmem:[#allocation2 + $0x4] ss:$28 sps:$4 sm:$0xff]   ;;  %v9733_v61 = vcombine.high %v268_v54, %v272_v55  ;;  %v9735_v62 = vcombine.high %v269_v57, %v273_v58  ;;  %v277_v1 = vld [vmem:[#allocation5 + $0x208] sm:$0xff]  ;;  %v9732_v3 = vcombine.low %v268_v54, %v272_v55  ;;  %v9734_v4 = vcombine.low %v269_v57, %v273_v58 }
  0xb4   :  { %3237 = vmatpush1.bf16.msra.mxu0 %v9700_v34  ;;  %3689 = vmatpush1.bf16.msra.mxu1 %v9702_v35  ;;  %v276_v63 = vld [vmem:[#allocation5 + $0x200] sm:$0xff]  ;;  %v281_v2 = vld [vmem:[#allocation5 + $0x228] sm:$0xff] }
  0xb5   :  { %3238 = vmatprep.subr.bf16.mxu0 %v9709_v36  ;;  %3690 = vmatprep.subr.bf16.mxu1 %v9711_v37  ;;  %v280_v0 = vld [vmem:[#allocation5 + $0x220] sm:$0xff]  ;;  %v9743_v6 = vcombine.high %v277_v1, %v281_v2  ;;  %v285_v9 = vld [vmem:[#allocation5 + $0x248] sm:$0xff]  ;;  %v9742_v12 = vcombine.low %v277_v1, %v281_v2 }
  0xb6   :  { %3262 = vmatprep.mubr.bf16.mxu0 %v11586_v56  ;;  %3714 = vmatprep.mubr.bf16.mxu1 %v11586_v56  ;;  %v9741_v5 = vcombine.high %v276_v63, %v280_v0  ;;  %v284_v7 = vld [vmem:[#allocation5 + $0x240] sm:$0xff]  ;;  %v289_v10 = vld [vmem:[#allocation5 + $0x268] sm:$0xff]  ;;  %v9740_v11 = vcombine.low %v276_v63, %v280_v0 }
  0xb7   :  { %v288_v8 = vld [vmem:[#allocation5 + $0x260] sm:$0xff]  ;;  %v9751_v14 = vcombine.high %v285_v9, %v289_v10  ;;  %v293_v17 = vld [vmem:[#allocation5 + $0x288] sm:$0xff]  ;;  %v9750_v20 = vcombine.low %v285_v9, %v289_v10 }
  0xb8   :  { %3239 = vmatpush1.bf16.msra.mxu0 %v9708_v42  ;;  %3691 = vmatpush1.bf16.msra.mxu1 %v9710_v43  ;;  %v9749_v13 = vcombine.high %v284_v7, %v288_v8  ;;  %v292_v15 = vld [vmem:[#allocation5 + $0x280] sm:$0xff]  ;;  %v297_v18 = vld [vmem:[#allocation5 + $0x2a8] sm:$0xff]  ;;  %v9748_v19 = vcombine.low %v284_v7, %v288_v8 }
  0xb9   :  { %3240 = vmatprep.subr.bf16.mxu0 %v9717_v44  ;;  %3692 = vmatprep.subr.bf16.mxu1 %v9719_v45  ;;  %v296_v16 = vld [vmem:[#allocation5 + $0x2a0] sm:$0xff]  ;;  %v9759_v22 = vcombine.high %v293_v17, %v297_v18  ;;  %v301_v25 = vld [vmem:[#allocation5 + $0x2c8] sm:$0xff]  ;;  %v9758_v28 = vcombine.low %v293_v17, %v297_v18 }
  0xba   :  { %v9757_v21 = vcombine.high %v292_v15, %v296_v16  ;;  %v300_v23 = vld [vmem:[#allocation5 + $0x2c0] sm:$0xff]  ;;  %v305_v26 = vld [vmem:[#allocation5 + $0x2e8] sm:$0xff]  ;;  %v9756_v27 = vcombine.low %v292_v15, %v296_v16  ;;  %v11589_v16 = vld [vmem:[#allocation2 + $0x3c] ss:$28 sps:$4 sm:$0xff]  }
  0xbb   :  { %v304_v24 = vld [vmem:[#allocation5 + $0x2e0] sm:$0xff]  ;;  %v9767_v30 = vcombine.high %v301_v25, %v305_v26  ;;  %v309_v33 = vld [vmem:[#allocation5 + $0x308] sm:$0xff]  ;;  %v9766_v36 = vcombine.low %v301_v25, %v305_v26 }
  0xbc   :  { %3241 = vmatpush1.bf16.msra.mxu0 %v9716_v50  ;;  %3693 = vmatpush1.bf16.msra.mxu1 %v9718_v51  ;;  %v9765_v29 = vcombine.high %v300_v23, %v304_v24  ;;  %v308_v31 = vld [vmem:[#allocation5 + $0x300] sm:$0xff]  ;;  %v313_v34 = vld [vmem:[#allocation5 + $0x328] sm:$0xff]  ;;  %v9764_v35 = vcombine.low %v300_v23, %v304_v24 }
  0xbd   :  { %3242 = vmatprep.subr.bf16.mxu0 %v9725_v52  ;;  %3694 = vmatprep.subr.bf16.mxu1 %v9727_v53  ;;  %v312_v32 = vld [vmem:[#allocation5 + $0x320] sm:$0xff]  ;;  %v9775_v38 = vcombine.high %v309_v33, %v313_v34  ;;  %v317_v41 = vld [vmem:[#allocation5 + $0x348] sm:$0xff]  ;;  %v9774_v44 = vcombine.low %v309_v33, %v313_v34  ;;  %v11592_v34 = vld [vmem:[#allocation2 + $0x74] ss:$28 sps:$4 sm:$0xff]  }
  0xbe   :  { %v9773_v37 = vcombine.high %v308_v31, %v312_v32  ;;  %v316_v39 = vld [vmem:[#allocation5 + $0x340] sm:$0xff]  ;;  %v321_v42 = vld [vmem:[#allocation5 + $0x368] sm:$0xff]  ;;  %v9772_v43 = vcombine.low %v308_v31, %v312_v32 }
  0xbf   :  { %v320_v40 = vld [vmem:[#allocation5 + $0x360] sm:$0xff]  ;;  %v9783_v46 = vcombine.high %v317_v41, %v321_v42  ;;  %v325_v49 = vld [vmem:[#allocation5 + $0x388] sm:$0xff]  ;;  %v9782_v52 = vcombine.low %v317_v41, %v321_v42 }
  0xc0   :  { %3243 = vmatpush1.bf16.msra.mxu0 %v9724_v59  ;;  %3695 = vmatpush1.bf16.msra.mxu1 %v9726_v60  ;;  %v9781_v45 = vcombine.high %v316_v39, %v320_v40  ;;  %v324_v47 = vld [vmem:[#allocation5 + $0x380] sm:$0xff]  ;;  %v329_v50 = vld [vmem:[#allocation5 + $0x3a8] sm:$0xff]  ;;  %v9780_v51 = vcombine.low %v316_v39, %v320_v40 }
  0xc1   :  { %3244 = vmatprep.subr.bf16.mxu0 %v9733_v61  ;;  %3696 = vmatprep.subr.bf16.mxu1 %v9735_v62  ;;  %v328_v48 = vld [vmem:[#allocation5 + $0x3a0] sm:$0xff]  ;;  %v9791_v54 = vcombine.high %v325_v49, %v329_v50  ;;  %v333_v57 = vld [vmem:[#allocation5 + $0x3c8] sm:$0xff]  ;;  %v9790_v60 = vcombine.low %v325_v49, %v329_v50 }
  0xc2   :  { %v9789_v53 = vcombine.high %v324_v47, %v328_v48  ;;  %v332_v55 = vld [vmem:[#allocation5 + $0x3c0] sm:$0xff]  ;;  %v337_v58 = vld [vmem:[#allocation5 + $0x3e8] sm:$0xff]  ;;  %v9788_v59 = vcombine.low %v324_v47, %v328_v48 }
  0xc3   :  { %v336_v56 = vld [vmem:[#allocation5 + $0x3e0] sm:$0xff]  ;;  %v9799_v62 = vcombine.high %v333_v57, %v337_v58  ;;  %v341_v1 = vld [vmem:[#allocation5 + $0x408] sm:$0xff] }
  0xc4   :  { %3245 = vmatpush1.bf16.msra.mxu0 %v9732_v3  ;;  %3697 = vmatpush1.bf16.msra.mxu1 %v9734_v4  ;;  %v9797_v61 = vcombine.high %v332_v55, %v336_v56  ;;  %v340_v63 = vld [vmem:[#allocation5 + $0x400] sm:$0xff]  ;;  %v345_v2 = vld [vmem:[#allocation5 + $0x428] sm:$0xff]  ;;  %v9796_v3 = vcombine.low %v332_v55, %v336_v56  ;;  %v9798_v4 = vcombine.low %v333_v57, %v337_v58 }
  0xc5   :  { %3246 = vmatprep.subr.bf16.mxu0 %v9741_v5  ;;  %3698 = vmatprep.subr.bf16.mxu1 %v9743_v6  ;;  %v344_v0 = vld [vmem:[#allocation5 + $0x420] sm:$0xff]  ;;  %v9807_v6 = vcombine.high %v341_v1, %v345_v2  ;;  %v349_v10 = vld [vmem:[#allocation5 + $0x448] sm:$0xff] }
  0xc6   :  { %v9805_v5 = vcombine.high %v340_v63, %v344_v0  ;;  %v348_v7 = vld [vmem:[#allocation5 + $0x440] sm:$0xff]  ;;  %v385_v47 = vld [vmem:[#allocation5 + $0x568] sm:$0xff] }
  0xc7   :  { %v352_v8 = vld [vmem:[#allocation5 + $0x460] sm:$0xff]  ;;  %v389_v55 = vld [vmem:[#allocation5 + $0x588] sm:$0xff] }
  0xc8   :  { %3247 = vmatpush1.bf16.msra.mxu0 %v9740_v11  ;;  %3699 = vmatpush1.bf16.msra.mxu1 %v9742_v12  ;;  %v11588_v9 = vld [vmem:[#allocation2] ss:$28 sps:$4 sm:$0xff]   ;;  %v353_v11 = vld [vmem:[#allocation5 + $0x468] sm:$0xff]  ;;  %v9804_v12 = vcombine.low %v340_v63, %v344_v0 }
  0xc9   :  { %3248 = vmatprep.subr.bf16.mxu0 %v9749_v13  ;;  %3700 = vmatprep.subr.bf16.mxu1 %v9751_v14  ;;  %v9806_v13 = vcombine.low %v341_v1, %v345_v2  ;;  %v9813_v14 = vcombine.high %v348_v7, %v352_v8  ;;  %v9815_v15 = vcombine.high %v349_v10, %v353_v11  ;;  %v356_v17 = vld [vmem:[#allocation5 + $0x480] sm:$0xff]  ;;  %v393_v56 = vld [vmem:[#allocation5 + $0x5a8] sm:$0xff] }
  0xca   :  { %v360_v18 = vld [vmem:[#allocation5 + $0x4a0] sm:$0xff]  ;;  %v397_v0 = vld [vmem:[#allocation5 + $0x5c8] sm:$0xff] }
  0xcb   :  { %v9821_v23 = vcombine.high %v356_v17, %v360_v18  ;;  %v364_v25 = vld [vmem:[#allocation5 + $0x4c0] sm:$0xff]  ;;  %v401_v1 = vld [vmem:[#allocation5 + $0x5e8] sm:$0xff] }
  0xcc   :  { %3249 = vmatpush1.bf16.msra.mxu0 %v9748_v19  ;;  %3701 = vmatpush1.bf16.msra.mxu1 %v9750_v20  ;;  %v357_v19 = vld [vmem:[#allocation5 + $0x488] sm:$0xff]  ;;  %v368_v26 = vld [vmem:[#allocation5 + $0x4e0] sm:$0xff] }
  0xcd   :  { %3250 = vmatprep.subr.bf16.mxu0 %v9757_v21  ;;  %3702 = vmatprep.subr.bf16.mxu1 %v9759_v22  ;;  %v361_v20 = vld [vmem:[#allocation5 + $0x4a8] sm:$0xff]  ;;  %v9812_v21 = vcombine.low %v348_v7, %v352_v8  ;;  %v9814_v22 = vcombine.low %v349_v10, %v353_v11  ;;  %v9829_v32 = vcombine.high %v364_v25, %v368_v26  ;;  %v400_v63 = vld [vmem:[#allocation5 + $0x5e0] sm:$0xff] }
  0xce   :  { %v9823_v24 = vcombine.high %v357_v19, %v361_v20  ;;  %v9822_v31 = vcombine.low %v357_v19, %v361_v20  ;;  %v9828_v39 = vcombine.low %v364_v25, %v368_v26  ;;  %v404_v7 = vld [vmem:[#allocation5 + $0x600] sm:$0xff]  ;;  %v409_v10 = vld [vmem:[#allocation5 + $0x628] sm:$0xff] }
  0xcf   :  { %v408_v8 = vld [vmem:[#allocation5 + $0x620] sm:$0xff]  ;;  %v417_v19 = vld [vmem:[#allocation5 + $0x668] sm:$0xff] }
  0xd0   :  { %3251 = vmatpush1.bf16.msra.mxu0 %v9756_v27  ;;  %3703 = vmatpush1.bf16.msra.mxu1 %v9758_v28  ;;  %v11591_v27 = vld [vmem:[#allocation2 + $0x38] ss:$28 sps:$4 sm:$0xff]   ;;  %v365_v28 = vld [vmem:[#allocation5 + $0x4c8] sm:$0xff]  ;;  %v9868_v20 = vcombine.low %v404_v7, %v408_v8  ;;  %v424_v25 = vld [vmem:[#allocation5 + $0x6a0] sm:$0xff] }
  0xd1   :  { %3252 = vmatprep.subr.bf16.mxu0 %v9765_v29  ;;  %3704 = vmatprep.subr.bf16.mxu1 %v9767_v30  ;;  %v369_v29 = vld [vmem:[#allocation5 + $0x4e8] sm:$0xff]  ;;  %v9820_v30 = vcombine.low %v356_v17, %v360_v18 }
  0xd2   :  { %v9831_v33 = vcombine.high %v365_v28, %v369_v29  ;;  %v9830_v40 = vcombine.low %v365_v28, %v369_v29  ;;  %v413_v18 = vld [vmem:[#allocation5 + $0x648] sm:$0xff] }
  0xd3   :  { %v9879_v26 = vcombine.high %v413_v18, %v417_v19  ;;  %v425_v28 = vld [vmem:[#allocation5 + $0x6a8] sm:$0xff] }
  0xd4   :  { %3253 = vmatpush1.bf16.msra.mxu0 %v9764_v35  ;;  %3705 = vmatpush1.bf16.msra.mxu1 %v9766_v36  ;;  %v372_v35 = vld [vmem:[#allocation5 + $0x500] sm:$0xff] }
  0xd5   :  { %3254 = vmatprep.subr.bf16.mxu0 %v9773_v37  ;;  %3706 = vmatprep.subr.bf16.mxu1 %v9775_v38  ;;  %v376_v36 = vld [vmem:[#allocation5 + $0x520] sm:$0xff]  ;;  %v373_v37 = vld [vmem:[#allocation5 + $0x508] sm:$0xff] }
  0xd6   :  { %v377_v38 = vld [vmem:[#allocation5 + $0x528] sm:$0xff]  ;;  %v9837_v41 = vcombine.high %v372_v35, %v376_v36  ;;  %v9836_v48 = vcombine.low %v372_v35, %v376_v36 }
  0xd7   :  { %v9839_v42 = vcombine.high %v373_v37, %v377_v38  ;;  %v9838_v49 = vcombine.low %v373_v37, %v377_v38  ;;  %v429_v35 = vld [vmem:[#allocation5 + $0x6c8] sm:$0xff] }
  0xd8   :  { %3255 = vmatpush1.bf16.msra.mxu0 %v9772_v43  ;;  %3707 = vmatpush1.bf16.msra.mxu1 %v9774_v44  ;;  %v380_v43 = vld [vmem:[#allocation5 + $0x540] sm:$0xff]  ;;  %v433_v36 = vld [vmem:[#allocation5 + $0x6e8] sm:$0xff] }
  0xd9   :  { %3256 = vmatprep.subr.bf16.mxu0 %v9781_v45  ;;  %3708 = vmatprep.subr.bf16.mxu1 %v9783_v46  ;;  %v384_v44 = vld [vmem:[#allocation5 + $0x560] sm:$0xff]  ;;  %v11594_v45 = vld [vmem:[#allocation2 + $0x70] ss:$28 sps:$4 sm:$0xff]  }
  0xda   :  { %v381_v46 = vld [vmem:[#allocation5 + $0x548] sm:$0xff]  ;;  %v9845_v50 = vcombine.high %v380_v43, %v384_v44  ;;  %v9844_v57 = vcombine.low %v380_v43, %v384_v44  ;;  %v440_v43 = vld [vmem:[#allocation5 + $0x720] sm:$0xff]  ;;  %v9895_v44 = vcombine.high %v429_v35, %v433_v36 }
  0xdb   :  { %v9846_v58 = vcombine.low %v381_v46, %v385_v47 }
  0xdc   :  { %3257 = vmatpush1.bf16.msra.mxu0 %v9780_v51  ;;  %3709 = vmatpush1.bf16.msra.mxu1 %v9782_v52  ;;  %v9847_v51 = vcombine.high %v381_v46, %v385_v47  ;;  %v11595_v52 = vld [vmem:[#allocation2 + $0xac] ss:$28 sps:$4 sm:$0xff]  }
  0xdd   :  { %3258 = vmatprep.subr.bf16.mxu0 %v9789_v53  ;;  %3710 = vmatprep.subr.bf16.mxu1 %v9791_v54  ;;  %v388_v53 = vld [vmem:[#allocation5 + $0x580] sm:$0xff]  ;;  %v441_v46 = vld [vmem:[#allocation5 + $0x728] sm:$0xff] }
  0xde   :  { %v392_v54 = vld [vmem:[#allocation5 + $0x5a0] sm:$0xff] }
  0xdf   :  { %v9852_v2 = vcombine.low %v388_v53, %v392_v54 }
  0xe0   :  { %3259 = vmatpush1.bf16.msra.mxu0 %v9788_v59  ;;  %3711 = vmatpush1.bf16.msra.mxu1 %v9790_v60  ;;  %v11597_v59 = vld [vmem:[#allocation2 + $0xa8] ss:$28 sps:$4 sm:$0xff]   ;;  %v9853_v60 = vcombine.high %v388_v53, %v392_v54 }
  0xe1   :  { %3260 = vmatprep.subr.bf16.mxu0 %v9797_v61  ;;  %3712 = vmatprep.subr.bf16.mxu1 %v9799_v62  ;;  %v9855_v61 = vcombine.high %v389_v55, %v393_v56  ;;  %v396_v62 = vld [vmem:[#allocation5 + $0x5c0] sm:$0xff]  ;;  %v445_v53 = vld [vmem:[#allocation5 + $0x748] sm:$0xff] }
  0xe2   :  { %v9860_v11 = vcombine.low %v396_v62, %v400_v63  ;;  %v449_v54 = vld [vmem:[#allocation5 + $0x768] sm:$0xff] }
  0xe4   :  { %3261 = vmatpush1.bf16.msra.mxu0 %v9796_v3  ;;  %3713 = vmatpush1.bf16.msra.mxu1 %v9798_v4  ;;  %v9854_v3 = vcombine.low %v389_v55, %v393_v56  ;;  %v9861_v4 = vcombine.high %v396_v62, %v400_v63  ;;  %v9911_v62 = vcombine.high %v445_v53, %v449_v54  ;;  %v453_v63 = vld [vmem:[#allocation5 + $0x788] sm:$0xff] }
  0xe5   :  { %3343 = vmatprep.subr.bf16.mxu0 %v9805_v5  ;;  %3795 = vmatprep.subr.bf16.mxu1 %v9807_v6  ;;  %v11598_v5 = vld [vmem:[#allocation2 + $0xe4] ss:$28 sps:$4 sm:$0xff]   ;;  %v9863_v6 = vcombine.high %v397_v0, %v401_v1 }
  0xe7   :  { %3263 = vmatmul.mubr.bf16.vlgmr.msra.gmra.mrb[0].mxu0 %v11588_v9  ;;  %3715 = vmatmul.mubr.bf16.vlgmr.msra.gmra.mrb[0].mxu1 %v11588_v9  ;;  %v405_v9 = vld [vmem:[#allocation5 + $0x608] sm:$0xff] }
  0xe8   :  { %3344 = vmatpush1.bf16.msra.mxu0 %v9804_v12  ;;  %3796 = vmatpush1.bf16.msra.mxu1 %v9806_v13  ;;  %v412_v12 = vld [vmem:[#allocation5 + $0x640] sm:$0xff]  ;;  %v9862_v13 = vcombine.low %v397_v0, %v401_v1  ;;  %v9871_v17 = vcombine.high %v405_v9, %v409_v10  ;;  %v457_v0 = vld [vmem:[#allocation5 + $0x7a8] sm:$0xff] }
  0xe9   :  { %3345 = vmatprep.subr.bf16.mxu0 %v9813_v14  ;;  %3797 = vmatprep.subr.bf16.mxu1 %v9815_v15  ;;  %v11600_v14 = vld [vmem:[#allocation2 + $0xe0] ss:$28 sps:$4 sm:$0xff]   ;;  %v9869_v15 = vcombine.high %v404_v7, %v408_v8  ;;  %v461_v7 = vld [vmem:[#allocation5 + $0x7c8] sm:$0xff] }
  0xea   :  { %3272 = vmatprep.mubr.bf16.mxu0 %v11589_v16  ;;  %3724 = vmatprep.mubr.bf16.mxu1 %v11589_v16  ;;  %v416_v16 = vld [vmem:[#allocation5 + $0x660] sm:$0xff]  ;;  %v465_v8 = vld [vmem:[#allocation5 + $0x7e8] sm:$0xff] }
  0xeb   :  { %v9876_v29 = vcombine.low %v412_v12, %v416_v16 }
  0xec   :  { %3346 = vmatpush1.bf16.msra.mxu0 %v9812_v21  ;;  %3798 = vmatpush1.bf16.msra.mxu1 %v9814_v22  ;;  %v11601_v21 = vld [vmem:[#allocation2 + $0x11c] ss:$28 sps:$4 sm:$0xff]   ;;  %v9870_v22 = vcombine.low %v405_v9, %v409_v10  ;;  %v9919_v9 = vcombine.high %v453_v63, %v457_v0 }
  0xed   :  { %3347 = vmatprep.subr.bf16.mxu0 %v9821_v23  ;;  %3799 = vmatprep.subr.bf16.mxu1 %v9823_v24  ;;  %v9877_v23 = vcombine.high %v412_v12, %v416_v16  ;;  %v420_v24 = vld [vmem:[#allocation5 + $0x680] sm:$0xff]  ;;  %v9918_v12 = vcombine.low %v453_v63, %v457_v0  ;;  %v9927_v16 = vcombine.high %v461_v7, %v465_v8  ;;  %v513_v63 = vld [vmem:[#allocation5 + $0x968] sm:$0xff] }
  0xee   :  { %v9884_v38 = vcombine.low %v420_v24, %v424_v25 }
  0xef   :  { %3273 = vmatmul.mubr.bf16.gmra.mrb[4].mxu0 %v11591_v27  ;;  %3725 = vmatmul.mubr.bf16.gmra.mrb[4].mxu1 %v11591_v27  ;;  %v421_v27 = vld [vmem:[#allocation5 + $0x688] sm:$0xff] }
  0xf0   :  { %3348 = vmatpush1.bf16.msra.mxu0 %v9820_v30  ;;  %3800 = vmatpush1.bf16.msra.mxu1 %v9822_v31  ;;  %v428_v30 = vld [vmem:[#allocation5 + $0x6c0] sm:$0xff]  ;;  %v9887_v37 = vcombine.high %v421_v27, %v425_v28 }
  0xf1   :  { %3349 = vmatprep.subr.bf16.mxu0 %v9829_v32  ;;  %3801 = vmatprep.subr.bf16.mxu1 %v9831_v33  ;;  %v432_v31 = vld [vmem:[#allocation5 + $0x6e0] sm:$0xff]  ;;  %v9878_v32 = vcombine.low %v413_v18, %v417_v19  ;;  %v11603_v33 = vld [vmem:[#allocation2 + $0x118] ss:$28 sps:$4 sm:$0xff]   ;;  %v473_v18 = vld [vmem:[#allocation5 + $0x828] sm:$0xff] }
  0xf2   :  { %3282 = vmatprep.mubr.bf16.mxu0 %v11592_v34  ;;  %3734 = vmatprep.mubr.bf16.mxu1 %v11592_v34  ;;  %v9885_v34 = vcombine.high %v420_v24, %v424_v25  ;;  %v9892_v47 = vcombine.low %v428_v30, %v432_v31  ;;  %v477_v25 = vld [vmem:[#allocation5 + $0x848] sm:$0xff] }
  0xf4   :  { %3350 = vmatpush1.bf16.msra.mxu0 %v9828_v39  ;;  %3802 = vmatpush1.bf16.msra.mxu1 %v9830_v40  ;;  %v11604_v39 = vld [vmem:[#allocation2 + $0x154] ss:$28 sps:$4 sm:$0xff]   ;;  %v9886_v40 = vcombine.low %v421_v27, %v425_v28 }
  0xf5   :  { %3351 = vmatprep.subr.bf16.mxu0 %v9837_v41  ;;  %3803 = vmatprep.subr.bf16.mxu1 %v9839_v42  ;;  %v9893_v41 = vcombine.high %v428_v30, %v432_v31  ;;  %v436_v42 = vld [vmem:[#allocation5 + $0x700] sm:$0xff] }
  0xf6   :  { %v9900_v56 = vcombine.low %v436_v42, %v440_v43 }
  0xf7   :  { %3283 = vmatmul.mubr.bf16.gmra.mrb[8].mxu0 %v11594_v45  ;;  %3735 = vmatmul.mubr.bf16.gmra.mrb[8].mxu1 %v11594_v45  ;;  %v437_v45 = vld [vmem:[#allocation5 + $0x708] sm:$0xff] }
  0xf8   :  { %3352 = vmatpush1.bf16.msra.mxu0 %v9836_v48  ;;  %3804 = vmatpush1.bf16.msra.mxu1 %v9838_v49  ;;  %v444_v48 = vld [vmem:[#allocation5 + $0x740] sm:$0xff]  ;;  %v9903_v55 = vcombine.high %v437_v45, %v441_v46 }
  0xf9   :  { %3353 = vmatprep.subr.bf16.mxu0 %v9845_v50  ;;  %3805 = vmatprep.subr.bf16.mxu1 %v9847_v51  ;;  %v448_v49 = vld [vmem:[#allocation5 + $0x760] sm:$0xff]  ;;  %v9894_v50 = vcombine.low %v429_v35, %v433_v36  ;;  %v11606_v51 = vld [vmem:[#allocation2 + $0x150] ss:$28 sps:$4 sm:$0xff]  }
  0xfa   :  { %3292 = vmatprep.mubr.bf16.mxu0 %v11595_v52  ;;  %3744 = vmatprep.mubr.bf16.mxu1 %v11595_v52  ;;  %v9901_v52 = vcombine.high %v436_v42, %v440_v43  ;;  %v9908_v1 = vcombine.low %v444_v48, %v448_v49  ;;  %v489_v36 = vld [vmem:[#allocation5 + $0x8a8] sm:$0xff]  ;;  %v496_v42 = vld [vmem:[#allocation5 + $0x8e0] sm:$0xff] }
  0xfb   :  { %v493_v43 = vld [vmem:[#allocation5 + $0x8c8] sm:$0xff] }
  0xfc   :  { %3354 = vmatpush1.bf16.msra.mxu0 %v9844_v57  ;;  %3806 = vmatpush1.bf16.msra.mxu1 %v9846_v58  ;;  %v11607_v57 = vld [vmem:[#allocation2 + $0x18c] ss:$28 sps:$4 sm:$0xff]   ;;  %v9902_v58 = vcombine.low %v437_v45, %v441_v46 }
  0xfd   :  { %3355 = vmatprep.subr.bf16.mxu0 %v9853_v60  ;;  %3807 = vmatprep.subr.bf16.mxu1 %v9855_v61  ;;  %v452_v60 = vld [vmem:[#allocation5 + $0x780] sm:$0xff]  ;;  %v497_v45 = vld [vmem:[#allocation5 + $0x8e8] sm:$0xff] }
  0xfe   :  { %v456_v61 = vld [vmem:[#allocation5 + $0x7a0] sm:$0xff] }
  0xff   :  { %3293 = vmatmul.mubr.bf16.gmra.mrb[12].mxu0 %v11597_v59  ;;  %3745 = vmatmul.mubr.bf16.gmra.mrb[12].mxu1 %v11597_v59  ;;  %v9909_v59 = vcombine.high %v444_v48, %v448_v49  ;;  %v9916_v10 = vcombine.low %v452_v60, %v456_v61  ;;  %v11616_v49 = vld [vmem:[#allocation2 + $0x7c] ss:$28 sps:$4 sm:$0xff]  }
 0x100   :  { %3356 = vmatpush1.bf16.msra.mxu0 %v9852_v2  ;;  %3808 = vmatpush1.bf16.msra.mxu1 %v9854_v3  ;;  %v460_v2 = vld [vmem:[#allocation5 + $0x7c0] sm:$0xff] }
 0x101   :  { %3357 = vmatprep.subr.bf16.mxu0 %v9861_v4  ;;  %3809 = vmatprep.subr.bf16.mxu1 %v9863_v6  ;;  %v464_v3 = vld [vmem:[#allocation5 + $0x7e0] sm:$0xff]  ;;  %v9910_v4 = vcombine.low %v445_v53, %v449_v54  ;;  %v9917_v6 = vcombine.high %v452_v60, %v456_v61  ;;  %v501_v53 = vld [vmem:[#allocation5 + $0x908] sm:$0xff] }
 0x102   :  { %3302 = vmatprep.mubr.bf16.mxu0 %v11598_v5  ;;  %3754 = vmatprep.mubr.bf16.mxu1 %v11598_v5  ;;  %v11609_v5 = vld [vmem:[#allocation2 + $0x188] ss:$28 sps:$4 sm:$0xff]   ;;  %v9924_v19 = vcombine.low %v460_v2, %v464_v3 }
 0x103   :  { %v505_v54 = vld [vmem:[#allocation5 + $0x928] sm:$0xff]  ;;  %v512_v60 = vld [vmem:[#allocation5 + $0x960] sm:$0xff] }
 0x104   :  { %3358 = vmatpush1.bf16.msra.mxu0 %v9860_v11  ;;  %3810 = vmatpush1.bf16.msra.mxu1 %v9862_v13  ;;  %v11612_v11 = vld [vmem:[#allocation2 + $0xc] ss:$28 sps:$4 sm:$0xff]   ;;  %v9925_v13 = vcombine.high %v460_v2, %v464_v3  ;;  %v11619_v3 = vld [vmem:[#allocation2 + $0xb4] ss:$28 sps:$4 sm:$0xff]  }
 0x105   :  { %3359 = vmatprep.subr.bf16.mxu0 %v9869_v15  ;;  %3811 = vmatprep.subr.bf16.mxu1 %v9871_v17  ;;  %v472_v15 = vld [vmem:[#allocation5 + $0x820] sm:$0xff]  ;;  %v469_v17 = vld [vmem:[#allocation5 + $0x808] sm:$0xff] }
 0x106   :  { %v9935_v27 = vcombine.high %v469_v17, %v473_v18  ;;  %v9934_v30 = vcombine.low %v469_v17, %v473_v18  ;;  %v509_v61 = vld [vmem:[#allocation5 + $0x948] sm:$0xff] }
 0x107   :  { %3303 = vmatmul.mubr.bf16.gmra.mrb[16].mxu0 %v11600_v14  ;;  %3755 = vmatmul.mubr.bf16.gmra.mrb[16].mxu1 %v11600_v14  ;;  %v468_v14 = vld [vmem:[#allocation5 + $0x800] sm:$0xff]  ;;  %v529_v17 = vld [vmem:[#allocation5 + $0x9e8] sm:$0xff] }
 0x108   :  { %3360 = vmatpush1.bf16.msra.mxu0 %v9868_v20  ;;  %3812 = vmatpush1.bf16.msra.mxu1 %v9870_v22  ;;  %v476_v20 = vld [vmem:[#allocation5 + $0x840] sm:$0xff]  ;;  %v9926_v22 = vcombine.low %v461_v7, %v465_v8  ;;  %v9933_v24 = vcombine.high %v468_v14, %v472_v15  ;;  %v9932_v28 = vcombine.low %v468_v14, %v472_v15  ;;  %v517_v7 = vld [vmem:[#allocation5 + $0x988] sm:$0xff] }
 0x109   :  { %3361 = vmatprep.subr.bf16.mxu0 %v9877_v23  ;;  %3813 = vmatprep.subr.bf16.mxu1 %v9879_v26  ;;  %v11610_v23 = vld [vmem:[#allocation2 + $0x8] ss:$28 sps:$4 sm:$0xff]  }
 0x10a   :  { %3312 = vmatprep.mubr.bf16.mxu0 %v11601_v21  ;;  %3764 = vmatprep.mubr.bf16.mxu1 %v11601_v21  ;;  %v480_v21 = vld [vmem:[#allocation5 + $0x860] sm:$0xff]  ;;  %v481_v26 = vld [vmem:[#allocation5 + $0x868] sm:$0xff] }
 0x10b   :  { %v9941_v31 = vcombine.high %v476_v20, %v480_v21  ;;  %v9943_v35 = vcombine.high %v477_v25, %v481_v26  ;;  %v521_v8 = vld [vmem:[#allocation5 + $0x9a8] sm:$0xff]  ;;  %v528_v14 = vld [vmem:[#allocation5 + $0x9e0] sm:$0xff] }
 0x10c   :  { %3362 = vmatpush1.bf16.msra.mxu0 %v9876_v29  ;;  %3814 = vmatpush1.bf16.msra.mxu1 %v9878_v32  ;;  %v11613_v29 = vld [vmem:[#allocation2 + $0x44] ss:$28 sps:$4 sm:$0xff]   ;;  %v525_v15 = vld [vmem:[#allocation5 + $0x9c8] sm:$0xff] }
 0x10d   :  { %3363 = vmatprep.subr.bf16.mxu0 %v9885_v34  ;;  %3815 = vmatprep.subr.bf16.mxu1 %v9887_v37  ;;  %v484_v32 = vld [vmem:[#allocation5 + $0x880] sm:$0xff]  ;;  %v485_v34 = vld [vmem:[#allocation5 + $0x888] sm:$0xff]  ;;  %v9940_v37 = vcombine.low %v476_v20, %v480_v21 }
 0x10e   :  { %v11622_v21 = vld [vmem:[#allocation2 + $0xec] ss:$28 sps:$4 sm:$0xff]  }
 0x10f   :  { %3313 = vmatmul.mubr.bf16.gmra.mrb[20].mxu0 %v11603_v33  ;;  %3765 = vmatmul.mubr.bf16.gmra.mrb[20].mxu1 %v11603_v33  ;;  %v488_v33 = vld [vmem:[#allocation5 + $0x8a0] sm:$0xff] }
 0x110   :  { %3364 = vmatpush1.bf16.msra.mxu0 %v9884_v38  ;;  %3816 = vmatpush1.bf16.msra.mxu1 %v9886_v40  ;;  %v9942_v38 = vcombine.low %v477_v25, %v481_v26  ;;  %v9949_v40 = vcombine.high %v484_v32, %v488_v33  ;;  %v9948_v46 = vcombine.low %v484_v32, %v488_v33  ;;  %v533_v25 = vld [vmem:[#allocation5 + $0xa08] sm:$0xff]  ;;  %v544_v32 = vld [vmem:[#allocation5 + $0xa60] sm:$0xff] }
 0x111   :  { %3365 = vmatprep.subr.bf16.mxu0 %v9893_v41  ;;  %3817 = vmatprep.subr.bf16.mxu1 %v9895_v44  ;;  %v492_v41 = vld [vmem:[#allocation5 + $0x8c0] sm:$0xff]  ;;  %v9951_v44 = vcombine.high %v485_v34, %v489_v36  ;;  %v537_v26 = vld [vmem:[#allocation5 + $0xa28] sm:$0xff] }
 0x112   :  { %3322 = vmatprep.mubr.bf16.mxu0 %v11604_v39  ;;  %3774 = vmatprep.mubr.bf16.mxu1 %v11604_v39  ;;  %v11615_v39 = vld [vmem:[#allocation2 + $0x40] ss:$28 sps:$4 sm:$0xff]   ;;  %v9957_v48 = vcombine.high %v492_v41, %v496_v42  ;;  %v541_v33 = vld [vmem:[#allocation5 + $0xa48] sm:$0xff] }
 0x114   :  { %3366 = vmatpush1.bf16.msra.mxu0 %v9892_v47  ;;  %3818 = vmatpush1.bf16.msra.mxu1 %v9894_v50  ;;  %v9950_v47 = vcombine.low %v485_v34, %v489_v36  ;;  %v500_v50 = vld [vmem:[#allocation5 + $0x900] sm:$0xff]  ;;  %v9999_v34 = vcombine.high %v533_v25, %v537_v26 }
 0x115   :  { %3367 = vmatprep.subr.bf16.mxu0 %v9901_v52  ;;  %3819 = vmatprep.subr.bf16.mxu1 %v9903_v55  ;;  %v9959_v52 = vcombine.high %v493_v43, %v497_v45  ;;  %v9956_v55 = vcombine.low %v492_v41, %v496_v42  ;;  %v552_v41 = vld [vmem:[#allocation5 + $0xaa0] sm:$0xff] }
 0x117   :  { %3323 = vmatmul.mubr.bf16.gmra.mrb[24].mxu0 %v11606_v51  ;;  %3775 = vmatmul.mubr.bf16.gmra.mrb[24].mxu1 %v11606_v51  ;;  %v504_v51 = vld [vmem:[#allocation5 + $0x920] sm:$0xff] }
 0x118   :  { %3368 = vmatpush1.bf16.msra.mxu0 %v9900_v56  ;;  %3820 = vmatpush1.bf16.msra.mxu1 %v9902_v58  ;;  %v9958_v56 = vcombine.low %v493_v43, %v497_v45  ;;  %v9965_v58 = vcombine.high %v500_v50, %v504_v51  ;;  %v9964_v0 = vcombine.low %v500_v50, %v504_v51  ;;  %v549_v43 = vld [vmem:[#allocation5 + $0xa88] sm:$0xff]  ;;  %v560_v50 = vld [vmem:[#allocation5 + $0xae0] sm:$0xff] }
 0x119   :  { %3369 = vmatprep.subr.bf16.mxu0 %v9909_v59  ;;  %3821 = vmatprep.subr.bf16.mxu1 %v9911_v62  ;;  %v508_v59 = vld [vmem:[#allocation5 + $0x940] sm:$0xff]  ;;  %v9967_v62 = vcombine.high %v501_v53, %v505_v54  ;;  %v557_v51 = vld [vmem:[#allocation5 + $0xac8] sm:$0xff] }
 0x11a   :  { %3332 = vmatprep.mubr.bf16.mxu0 %v11607_v57  ;;  %3784 = vmatprep.mubr.bf16.mxu1 %v11607_v57  ;;  %v11618_v57 = vld [vmem:[#allocation2 + $0x78] ss:$28 sps:$4 sm:$0xff]   ;;  %v9973_v2 = vcombine.high %v508_v59, %v512_v60 }
 0x11c   :  { %3370 = vmatpush1.bf16.msra.mxu0 %v9908_v1  ;;  %3822 = vmatpush1.bf16.msra.mxu1 %v9910_v4  ;;  %v9966_v1 = vcombine.low %v501_v53, %v505_v54  ;;  %v516_v4 = vld [vmem:[#allocation5 + $0x980] sm:$0xff]  ;;  %v561_v53 = vld [vmem:[#allocation5 + $0xae8] sm:$0xff] }
 0x11d   :  { %3371 = vmatprep.subr.bf16.mxu0 %v9917_v6  ;;  %3823 = vmatprep.subr.bf16.mxu1 %v9919_v9  ;;  %v9975_v6 = vcombine.high %v509_v61, %v513_v63  ;;  %v9972_v9 = vcombine.low %v508_v59, %v512_v60  ;;  %v568_v59 = vld [vmem:[#allocation5 + $0xb20] sm:$0xff]  ;;  %v10023_v60 = vcombine.high %v557_v51, %v561_v53 }
 0x11f   :  { %3333 = vmatmul.mubr.bf16.gmra.mrb[28].mxu0 %v11609_v5  ;;  %3785 = vmatmul.mubr.bf16.gmra.mrb[28].mxu1 %v11609_v5  ;;  %v520_v5 = vld [vmem:[#allocation5 + $0x9a0] sm:$0xff] }
 0x120   :  { %3372 = vmatpush1.bf16.msra.mxu0 %v9916_v10  ;;  %3824 = vmatpush1.bf16.msra.mxu1 %v9918_v12  ;;  %v9974_v10 = vcombine.low %v509_v61, %v513_v63  ;;  %v9981_v12 = vcombine.high %v516_v4, %v520_v5  ;;  %v9980_v18 = vcombine.low %v516_v4, %v520_v5  ;;  %v565_v61 = vld [vmem:[#allocation5 + $0xb08] sm:$0xff]  ;;  %v576_v4 = vld [vmem:[#allocation5 + $0xb60] sm:$0xff] }
 0x121   :  { %3373 = vmatprep.subr.bf16.mxu0 %v9925_v13  ;;  %3825 = vmatprep.subr.bf16.mxu1 %v9927_v16  ;;  %v524_v13 = vld [vmem:[#allocation5 + $0x9c0] sm:$0xff]  ;;  %v9983_v16 = vcombine.high %v517_v7, %v521_v8  ;;  %v573_v5 = vld [vmem:[#allocation5 + $0xb48] sm:$0xff] }
 0x122   :  { %3375 = vmatprep.mubr.bf16.mxu0 %v11612_v11  ;;  %3827 = vmatprep.mubr.bf16.mxu1 %v11612_v11  ;;  %v11621_v11 = vld [vmem:[#allocation2 + $0xb0] ss:$28 sps:$4 sm:$0xff]   ;;  %v9989_v20 = vcombine.high %v524_v13, %v528_v14 }
 0x124   :  { %3374 = vmatpush1.bf16.msra.mxu0 %v9924_v19  ;;  %3826 = vmatpush1.bf16.msra.mxu1 %v9926_v22  ;;  %v9982_v19 = vcombine.low %v517_v7, %v521_v8  ;;  %v532_v22 = vld [vmem:[#allocation5 + $0xa00] sm:$0xff]  ;;  %v577_v7 = vld [vmem:[#allocation5 + $0xb68] sm:$0xff] }
 0x125   :  { %3456 = vmatprep.subr.bf16.mxu0 %v9933_v24  ;;  %3908 = vmatprep.subr.bf16.mxu1 %v9935_v27  ;;  %v9991_v24 = vcombine.high %v525_v15, %v529_v17  ;;  %v9988_v27 = vcombine.low %v524_v13, %v528_v14  ;;  %v584_v13 = vld [vmem:[#allocation5 + $0xba0] sm:$0xff]  ;;  %v10039_v14 = vcombine.high %v573_v5, %v577_v7 }
 0x127   :  { %3376 = vmatmul.mubr.bf16.vlgmr.msra.gmra.mrb[0].mxu0 %v11610_v23  ;;  %3828 = vmatmul.mubr.bf16.vlgmr.msra.gmra.mrb[0].mxu1 %v11610_v23  ;;  %v536_v23 = vld [vmem:[#allocation5 + $0xa20] sm:$0xff] }
 0x128   :  { %3457 = vmatpush1.bf16.msra.mxu0 %v9932_v28  ;;  %3909 = vmatpush1.bf16.msra.mxu1 %v9934_v30  ;;  %v9990_v28 = vcombine.low %v525_v15, %v529_v17  ;;  %v9997_v30 = vcombine.high %v532_v22, %v536_v23  ;;  %v9996_v36 = vcombine.low %v532_v22, %v536_v23  ;;  %v581_v15 = vld [vmem:[#allocation5 + $0xb88] sm:$0xff]  ;;  %v592_v22 = vld [vmem:[#allocation5 + $0xbe0] sm:$0xff] }
 0x129   :  { %3458 = vmatprep.subr.bf16.mxu0 %v9941_v31  ;;  %3910 = vmatprep.subr.bf16.mxu1 %v9943_v35  ;;  %v540_v31 = vld [vmem:[#allocation5 + $0xa40] sm:$0xff]  ;;  %v545_v35 = vld [vmem:[#allocation5 + $0xa68] sm:$0xff] }
 0x12a   :  { %3385 = vmatprep.mubr.bf16.mxu0 %v11613_v29  ;;  %3837 = vmatprep.mubr.bf16.mxu1 %v11613_v29  ;;  %v11624_v29 = vld [vmem:[#allocation2 + $0xe8] ss:$28 sps:$4 sm:$0xff]   ;;  %v10007_v42 = vcombine.high %v541_v33, %v545_v35  ;;  %v10004_v45 = vcombine.low %v540_v31, %v544_v32 }
 0x12b   :  { %v589_v23 = vld [vmem:[#allocation5 + $0xbc8] sm:$0xff] }
 0x12c   :  { %3459 = vmatpush1.bf16.msra.mxu0 %v9940_v37  ;;  %3911 = vmatpush1.bf16.msra.mxu1 %v9942_v38  ;;  %v9998_v37 = vcombine.low %v533_v25, %v537_v26  ;;  %v10005_v38 = vcombine.high %v540_v31, %v544_v32  ;;  %v593_v25 = vld [vmem:[#allocation5 + $0xbe8] sm:$0xff]  ;;  %v600_v31 = vld [vmem:[#allocation5 + $0xc20] sm:$0xff] }
 0x12d   :  { %3460 = vmatprep.subr.bf16.mxu0 %v9949_v40  ;;  %3912 = vmatprep.subr.bf16.mxu1 %v9951_v44  ;;  %v548_v40 = vld [vmem:[#allocation5 + $0xa80] sm:$0xff]  ;;  %v553_v44 = vld [vmem:[#allocation5 + $0xaa8] sm:$0xff]  ;;  %v10055_v32 = vcombine.high %v589_v23, %v593_v25 }
 0x12e   :  { %v10012_v54 = vcombine.low %v548_v40, %v552_v41 }
 0x12f   :  { %3386 = vmatmul.mubr.bf16.gmra.mrb[4].mxu0 %v11615_v39  ;;  %3838 = vmatmul.mubr.bf16.gmra.mrb[4].mxu1 %v11615_v39  ;;  %v11625_v39 = vld [vmem:[#allocation2 + $0x124] ss:$28 sps:$4 sm:$0xff]  }
 0x130   :  { %3461 = vmatpush1.bf16.msra.mxu0 %v9948_v46  ;;  %3913 = vmatpush1.bf16.msra.mxu1 %v9950_v47  ;;  %v10006_v46 = vcombine.low %v541_v33, %v545_v35  ;;  %v11627_v47 = vld [vmem:[#allocation2 + $0x120] ss:$28 sps:$4 sm:$0xff]   ;;  %v597_v33 = vld [vmem:[#allocation5 + $0xc08] sm:$0xff] }
 0x131   :  { %3462 = vmatprep.subr.bf16.mxu0 %v9957_v48  ;;  %3914 = vmatprep.subr.bf16.mxu1 %v9959_v52  ;;  %v10013_v48 = vcombine.high %v548_v40, %v552_v41  ;;  %v10015_v52 = vcombine.high %v549_v43, %v553_v44  ;;  %v608_v40 = vld [vmem:[#allocation5 + $0xc60] sm:$0xff] }
 0x132   :  { %3395 = vmatprep.mubr.bf16.mxu0 %v11616_v49  ;;  %3847 = vmatprep.mubr.bf16.mxu1 %v11616_v49  ;;  %v556_v49 = vld [vmem:[#allocation5 + $0xac0] sm:$0xff] }
 0x133   :  { %v10020_v63 = vcombine.low %v556_v49, %v560_v50 }
 0x134   :  { %3463 = vmatpush1.bf16.msra.mxu0 %v9956_v55  ;;  %3915 = vmatpush1.bf16.msra.mxu1 %v9958_v56  ;;  %v10014_v55 = vcombine.low %v549_v43, %v553_v44  ;;  %v10021_v56 = vcombine.high %v556_v49, %v560_v50  ;;  %v609_v43 = vld [vmem:[#allocation5 + $0xc68] sm:$0xff] }
 0x135   :  { %3464 = vmatprep.subr.bf16.mxu0 %v9965_v58  ;;  %3916 = vmatprep.subr.bf16.mxu1 %v9967_v62  ;;  %v564_v58 = vld [vmem:[#allocation5 + $0xb00] sm:$0xff]  ;;  %v569_v62 = vld [vmem:[#allocation5 + $0xb28] sm:$0xff] }
 0x136   :  { %v10028_v8 = vcombine.low %v564_v58, %v568_v59  ;;  %v613_v50 = vld [vmem:[#allocation5 + $0xc88] sm:$0xff] }
 0x137   :  { %3396 = vmatmul.mubr.bf16.gmra.mrb[8].mxu0 %v11618_v57  ;;  %3848 = vmatmul.mubr.bf16.gmra.mrb[8].mxu1 %v11618_v57  ;;  %v11628_v57 = vld [vmem:[#allocation2 + $0x15c] ss:$28 sps:$4 sm:$0xff]  }
 0x138   :  { %3465 = vmatpush1.bf16.msra.mxu0 %v9964_v0  ;;  %3917 = vmatpush1.bf16.msra.mxu1 %v9966_v1  ;;  %v10022_v0 = vcombine.low %v557_v51, %v561_v53  ;;  %v11630_v1 = vld [vmem:[#allocation2 + $0x158] ss:$28 sps:$4 sm:$0xff]   ;;  %v617_v51 = vld [vmem:[#allocation5 + $0xca8] sm:$0xff] }
 0x139   :  { %3466 = vmatprep.subr.bf16.mxu0 %v9973_v2  ;;  %3918 = vmatprep.subr.bf16.mxu1 %v9975_v6  ;;  %v10029_v2 = vcombine.high %v564_v58, %v568_v59  ;;  %v10031_v6 = vcombine.high %v565_v61, %v569_v62  ;;  %v11640_v58 = vld [vmem:[#allocation2 + $0x84] ss:$28 sps:$4 sm:$0xff]  }
 0x13a   :  { %3405 = vmatprep.mubr.bf16.mxu0 %v11619_v3  ;;  %3857 = vmatprep.mubr.bf16.mxu1 %v11619_v3  ;;  %v572_v3 = vld [vmem:[#allocation5 + $0xb40] sm:$0xff] }
 0x13b   :  { %v10036_v17 = vcombine.low %v572_v3, %v576_v4 }
 0x13c   :  { %3467 = vmatpush1.bf16.msra.mxu0 %v9972_v9  ;;  %3919 = vmatpush1.bf16.msra.mxu1 %v9974_v10  ;;  %v10030_v9 = vcombine.low %v565_v61, %v569_v62  ;;  %v10037_v10 = vcombine.high %v572_v3, %v576_v4  ;;  %v625_v61 = vld [vmem:[#allocation5 + $0xce8] sm:$0xff]  ;;  %v10079_v62 = vcombine.high %v613_v50, %v617_v51 }
 0x13d   :  { %3468 = vmatprep.subr.bf16.mxu0 %v9981_v12  ;;  %3920 = vmatprep.subr.bf16.mxu1 %v9983_v16  ;;  %v580_v12 = vld [vmem:[#allocation5 + $0xb80] sm:$0xff]  ;;  %v585_v16 = vld [vmem:[#allocation5 + $0xba8] sm:$0xff]  ;;  %v10078_v3 = vcombine.low %v613_v50, %v617_v51 }
 0x13e   :  { %v10044_v26 = vcombine.low %v580_v12, %v584_v13  ;;  %v629_v4 = vld [vmem:[#allocation5 + $0xd08] sm:$0xff]  ;;  %v11652_v50 = vld [vmem:[#allocation2 + $0x164] ss:$28 sps:$4 sm:$0xff]  }
 0x13f   :  { %3406 = vmatmul.mubr.bf16.gmra.mrb[12].mxu0 %v11621_v11  ;;  %3858 = vmatmul.mubr.bf16.gmra.mrb[12].mxu1 %v11621_v11  ;;  %v11631_v11 = vld [vmem:[#allocation2 + $0x194] ss:$28 sps:$4 sm:$0xff]   ;;  %v11654_v51 = vld [vmem:[#allocation2 + $0x160] ss:$28 sps:$4 sm:$0xff]  }
 0x140   :  { %3469 = vmatpush1.bf16.msra.mxu0 %v9980_v18  ;;  %3921 = vmatpush1.bf16.msra.mxu1 %v9982_v19  ;;  %v10038_v18 = vcombine.low %v573_v5, %v577_v7  ;;  %v11633_v19 = vld [vmem:[#allocation2 + $0x190] ss:$28 sps:$4 sm:$0xff]   ;;  %v11642_v7 = vld [vmem:[#allocation2 + $0x80] ss:$28 sps:$4 sm:$0xff]  }
 0x141   :  { %3470 = vmatprep.subr.bf16.mxu0 %v9989_v20  ;;  %3922 = vmatprep.subr.bf16.mxu1 %v9991_v24  ;;  %v10045_v20 = vcombine.high %v580_v12, %v584_v13  ;;  %v10047_v24 = vcombine.high %v581_v15, %v585_v16  ;;  %v633_v5 = vld [vmem:[#allocation5 + $0xd28] sm:$0xff] }
 0x142   :  { %3415 = vmatprep.mubr.bf16.mxu0 %v11622_v21  ;;  %3867 = vmatprep.mubr.bf16.mxu1 %v11622_v21  ;;  %v588_v21 = vld [vmem:[#allocation5 + $0xbc0] sm:$0xff] }
 0x143   :  { %v10052_v35 = vcombine.low %v588_v21, %v592_v22 }
 0x144   :  { %3471 = vmatpush1.bf16.msra.mxu0 %v9988_v27  ;;  %3923 = vmatpush1.bf16.msra.mxu1 %v9990_v28  ;;  %v10046_v27 = vcombine.low %v581_v15, %v585_v16  ;;  %v10053_v28 = vcombine.high %v588_v21, %v592_v22  ;;  %v641_v15 = vld [vmem:[#allocation5 + $0xd68] sm:$0xff]  ;;  %v10095_v16 = vcombine.high %v629_v4, %v633_v5 }
 0x145   :  { %3472 = vmatprep.subr.bf16.mxu0 %v9997_v30  ;;  %3924 = vmatprep.subr.bf16.mxu1 %v9999_v34  ;;  %v596_v30 = vld [vmem:[#allocation5 + $0xc00] sm:$0xff]  ;;  %v601_v34 = vld [vmem:[#allocation5 + $0xc28] sm:$0xff]  ;;  %v10094_v21 = vcombine.low %v629_v4, %v633_v5 }
 0x146   :  { %v10063_v41 = vcombine.high %v597_v33, %v601_v34  ;;  %v10060_v44 = vcombine.low %v596_v30, %v600_v31  ;;  %v10062_v49 = vcombine.low %v597_v33, %v601_v34  ;;  %v645_v22 = vld [vmem:[#allocation5 + $0xd88] sm:$0xff] }
 0x147   :  { %3416 = vmatmul.mubr.bf16.gmra.mrb[16].mxu0 %v11624_v29  ;;  %3868 = vmatmul.mubr.bf16.gmra.mrb[16].mxu1 %v11624_v29  ;;  %v11636_v29 = vld [vmem:[#allocation2 + $0x14] ss:$28 sps:$4 sm:$0xff]   ;;  %v657_v33 = vld [vmem:[#allocation5 + $0xde8] sm:$0xff] }
 0x148   :  { %3473 = vmatpush1.bf16.msra.mxu0 %v9996_v36  ;;  %3925 = vmatpush1.bf16.msra.mxu1 %v9998_v37  ;;  %v10054_v36 = vcombine.low %v589_v23, %v593_v25  ;;  %v11634_v37 = vld [vmem:[#allocation2 + $0x10] ss:$28 sps:$4 sm:$0xff]   ;;  %v11645_v25 = vld [vmem:[#allocation2 + $0xb8] ss:$28 sps:$4 sm:$0xff]  }
 0x149   :  { %3474 = vmatprep.subr.bf16.mxu0 %v10005_v38  ;;  %3926 = vmatprep.subr.bf16.mxu1 %v10007_v42  ;;  %v10061_v38 = vcombine.high %v596_v30, %v600_v31  ;;  %v605_v42 = vld [vmem:[#allocation5 + $0xc48] sm:$0xff] }
 0x14a   :  { %3425 = vmatprep.mubr.bf16.mxu0 %v11625_v39  ;;  %3877 = vmatprep.mubr.bf16.mxu1 %v11625_v39  ;;  %v604_v39 = vld [vmem:[#allocation5 + $0xc40] sm:$0xff]  ;;  %v10070_v59 = vcombine.low %v605_v42, %v609_v43  ;;  %v649_v23 = vld [vmem:[#allocation5 + $0xda8] sm:$0xff] }
 0x14b   :  { %v10068_v53 = vcombine.low %v604_v39, %v608_v40  ;;  %v10111_v34 = vcombine.high %v645_v22, %v649_v23 }
 0x14c   :  { %3475 = vmatpush1.bf16.msra.mxu0 %v10004_v45  ;;  %3927 = vmatpush1.bf16.msra.mxu1 %v10006_v46  ;;  %v11637_v45 = vld [vmem:[#allocation2 + $0x4c] ss:$28 sps:$4 sm:$0xff]   ;;  %v612_v46 = vld [vmem:[#allocation5 + $0xc80] sm:$0xff] }
 0x14d   :  { %3476 = vmatprep.subr.bf16.mxu0 %v10013_v48  ;;  %3928 = vmatprep.subr.bf16.mxu1 %v10015_v52  ;;  %v10069_v48 = vcombine.high %v604_v39, %v608_v40  ;;  %v10071_v52 = vcombine.high %v605_v42, %v609_v43  ;;  %v10110_v39 = vcombine.low %v645_v22, %v649_v23  ;;  %v215_v40 = vld [vmem:[#allocation5 + $0x18] sm:$0xff]  ;;  %v11648_v43 = vld [vmem:[#allocation2 + $0xf0] ss:$28 sps:$4 sm:$0xff]   ;;  %v11660_v23 = vld [vmem:[#allocation2 + $0x88] ss:$28 sps:$4 sm:$0xff]  }
 0x14f   :  { %3426 = vmatmul.mubr.bf16.gmra.mrb[20].mxu0 %v11627_v47  ;;  %3878 = vmatmul.mubr.bf16.gmra.mrb[20].mxu1 %v11627_v47  ;;  %v616_v47 = vld [vmem:[#allocation5 + $0xca0] sm:$0xff] }
 0x150   :  { %3477 = vmatpush1.bf16.msra.mxu0 %v10012_v54  ;;  %3929 = vmatpush1.bf16.msra.mxu1 %v10014_v55  ;;  %v11639_v54 = vld [vmem:[#allocation2 + $0x48] ss:$28 sps:$4 sm:$0xff]   ;;  %v10077_v55 = vcombine.high %v612_v46, %v616_v47 }
 0x151   :  { %3478 = vmatprep.subr.bf16.mxu0 %v10021_v56  ;;  %3930 = vmatprep.subr.bf16.mxu1 %v10023_v60  ;;  %v620_v56 = vld [vmem:[#allocation5 + $0xcc0] sm:$0xff]  ;;  %v621_v60 = vld [vmem:[#allocation5 + $0xcc8] sm:$0xff] }
 0x152   :  { %3435 = vmatprep.mubr.bf16.mxu0 %v11628_v57  ;;  %3887 = vmatprep.mubr.bf16.mxu1 %v11628_v57  ;;  %v624_v57 = vld [vmem:[#allocation5 + $0xce0] sm:$0xff]  ;;  %v10086_v13 = vcombine.low %v621_v60, %v625_v61 }
 0x154   :  { %3479 = vmatpush1.bf16.msra.mxu0 %v10020_v63  ;;  %3931 = vmatpush1.bf16.msra.mxu1 %v10022_v0  ;;  %v10076_v63 = vcombine.low %v612_v46, %v616_v47  ;;  %v628_v0 = vld [vmem:[#allocation5 + $0xd00] sm:$0xff] }
 0x155   :  { %3480 = vmatprep.subr.bf16.mxu0 %v10029_v2  ;;  %3932 = vmatprep.subr.bf16.mxu1 %v10031_v6  ;;  %v10085_v2 = vcombine.high %v620_v56, %v624_v57  ;;  %v10087_v6 = vcombine.high %v621_v60, %v625_v61 }
 0x157   :  { %3436 = vmatmul.mubr.bf16.gmra.mrb[24].mxu0 %v11630_v1  ;;  %3888 = vmatmul.mubr.bf16.gmra.mrb[24].mxu1 %v11630_v1  ;;  %v632_v1 = vld [vmem:[#allocation5 + $0xd20] sm:$0xff] }
 0x158   :  { %3481 = vmatpush1.bf16.msra.mxu0 %v10028_v8  ;;  %3933 = vmatpush1.bf16.msra.mxu1 %v10030_v9  ;;  %v10084_v8 = vcombine.low %v620_v56, %v624_v57  ;;  %v636_v9 = vld [vmem:[#allocation5 + $0xd40] sm:$0xff]  ;;  %v10093_v12 = vcombine.high %v628_v0, %v632_v1  ;;  %v222_v56 = vld [vmem:[#allocation5 + $0x50] sm:$0xff] }
 0x159   :  { %3482 = vmatprep.subr.bf16.mxu0 %v10037_v10  ;;  %3934 = vmatprep.subr.bf16.mxu1 %v10039_v14  ;;  %v640_v10 = vld [vmem:[#allocation5 + $0xd60] sm:$0xff]  ;;  %v637_v14 = vld [vmem:[#allocation5 + $0xd48] sm:$0xff]  ;;  %v226_v57 = vld [vmem:[#allocation5 + $0x70] sm:$0xff] }
 0x15a   :  { %3445 = vmatprep.mubr.bf16.mxu0 %v11631_v11  ;;  %3897 = vmatprep.mubr.bf16.mxu1 %v11631_v11  ;;  %v11643_v11 = vld [vmem:[#allocation2 + $0xbc] ss:$28 sps:$4 sm:$0xff]   ;;  %v10102_v31 = vcombine.low %v637_v14, %v641_v15  ;;  %v9688_v4 = vcombine.low %v222_v56, %v226_v57 }
 0x15c   :  { %3483 = vmatpush1.bf16.msra.mxu0 %v10036_v17  ;;  %3935 = vmatpush1.bf16.msra.mxu1 %v10038_v18  ;;  %v10092_v17 = vcombine.low %v628_v0, %v632_v1  ;;  %v644_v18 = vld [vmem:[#allocation5 + $0xd80] sm:$0xff]  ;;  %v234_v0 = vld [vmem:[#allocation5 + $0xb0] sm:$0xff]  ;;  %v231_v1 = vld [vmem:[#allocation5 + $0x98] sm:$0xff] }
 0x15d   :  { %3484 = vmatprep.subr.bf16.mxu0 %v10045_v20  ;;  %3936 = vmatprep.subr.bf16.mxu1 %v10047_v24  ;;  %v10101_v20 = vcombine.high %v636_v9, %v640_v10  ;;  %v10103_v24 = vcombine.high %v637_v14, %v641_v15 }
 0x15f   :  { %3446 = vmatmul.mubr.bf16.gmra.mrb[28].mxu0 %v11633_v19  ;;  %3898 = vmatmul.mubr.bf16.gmra.mrb[28].mxu1 %v11633_v19  ;;  %v648_v19 = vld [vmem:[#allocation5 + $0xda0] sm:$0xff] }
 0x160   :  { %3485 = vmatpush1.bf16.msra.mxu0 %v10044_v26  ;;  %3937 = vmatpush1.bf16.msra.mxu1 %v10046_v27  ;;  %v10100_v26 = vcombine.low %v636_v9, %v640_v10  ;;  %v652_v27 = vld [vmem:[#allocation5 + $0xdc0] sm:$0xff]  ;;  %v10109_v30 = vcombine.high %v644_v18, %v648_v19  ;;  %v242_v9 = vld [vmem:[#allocation5 + $0xf0] sm:$0xff]  ;;  %v239_v10 = vld [vmem:[#allocation5 + $0xd8] sm:$0xff] }
 0x161   :  { %3486 = vmatprep.subr.bf16.mxu0 %v10053_v28  ;;  %3938 = vmatprep.subr.bf16.mxu1 %v10055_v32  ;;  %v656_v28 = vld [vmem:[#allocation5 + $0xde0] sm:$0xff]  ;;  %v653_v32 = vld [vmem:[#allocation5 + $0xdc8] sm:$0xff] }
 0x162   :  { %3488 = vmatprep.mubr.bf16.mxu0 %v11636_v29  ;;  %3940 = vmatprep.mubr.bf16.mxu1 %v11636_v29  ;;  %v11646_v29 = vld [vmem:[#allocation2 + $0xf4] ss:$28 sps:$4 sm:$0xff]   ;;  %v10119_v42 = vcombine.high %v653_v32, %v657_v33  ;;  %v10118_v46 = vcombine.low %v653_v32, %v657_v33 }
 0x163   :  { %v262_v33 = vld [vmem:[#allocation5 + $0x190] sm:$0xff] }
 0x164   :  { %3487 = vmatpush1.bf16.msra.mxu0 %v10052_v35  ;;  %3939 = vmatpush1.bf16.msra.mxu1 %v10054_v36  ;;  %v10108_v35 = vcombine.low %v644_v18, %v648_v19  ;;  %v12749_v36 = vld [vmem:[#allocation5 + $0x10] sm:$0xff]  ;;  %v247_v18 = vld [vmem:[#allocation5 + $0x118] sm:$0xff] }
 0x165   :  { %3569 = vmatprep.subr.bf16.mxu0 %v10061_v38  ;;  %4021 = vmatprep.subr.bf16.mxu1 %v10063_v41  ;;  %v10117_v38 = vcombine.high %v652_v27, %v656_v28  ;;  %v219_v41 = vld [vmem:[#allocation5 + $0x38] sm:$0xff] }
 0x166   :  { %v9682_v61 = vcombine.low %v215_v40, %v219_v41 }
 0x167   :  { %3489 = vmatmul.mubr.bf16.vlgmr.msra.gmra.mrb[0].mxu0 %v11634_v37  ;;  %3941 = vmatmul.mubr.bf16.vlgmr.msra.gmra.mrb[0].mxu1 %v11634_v37  ;;  %v12751_v37 = vld [vmem:[#allocation5 + $0x30] sm:$0xff] }
 0x168   :  { %3570 = vmatpush1.bf16.msra.mxu0 %v10060_v44  ;;  %3498 = vmatprep.mubr.bf16.mxu0 %v11637_v45  ;;  %v10116_v44 = vcombine.low %v652_v27, %v656_v28  ;;  %v9681_v47 = vcombine.high %v12749_v36, %v12751_v37  ;;  %v9680_v60 = vcombine.low %v12749_v36, %v12751_v37  ;;  %v255_v27 = vld [vmem:[#allocation5 + $0x158] sm:$0xff] }
 0x169   :  { %3950 = vmatprep.mubr.bf16.mxu1 %v11637_v45  ;;  %3571 = vmatprep.subr.bf16.mxu0 %v10069_v48  ;;  %v11649_v45 = vld [vmem:[#allocation2 + $0x12c] ss:$28 sps:$4 sm:$0xff]   ;;  %v9683_v48 = vcombine.high %v215_v40, %v219_v41  ;;  %v267_v37 = vld [vmem:[#allocation5 + $0x1b8] sm:$0xff] }
 0x16a   :  { %4022 = vmatpush1.bf16.msra.mxu1 %v10062_v49  ;;  %v11651_v49 = vld [vmem:[#allocation2 + $0x128] ss:$28 sps:$4 sm:$0xff]   ;;  %v11661_v40 = vld [vmem:[#allocation2 + $0xc0] ss:$28 sps:$4 sm:$0xff]  }
 0x16b   :  { %4023 = vmatprep.subr.bf16.mxu1 %v10071_v52  ;;  %v11655_v52 = vld [vmem:[#allocation2 + $0x19c] ss:$28 sps:$4 sm:$0xff]  }
 0x16c   :  { %3572 = vmatpush1.bf16.msra.mxu0 %v10068_v53  ;;  %v11657_v53 = vld [vmem:[#allocation2 + $0x198] ss:$28 sps:$4 sm:$0xff]  }
 0x16d   :  { %3573 = vmatprep.subr.bf16.mxu0 %v10077_v55  ;;  %v11658_v55 = vld [vmem:[#allocation2 + $0x18] ss:$28 sps:$4 sm:$0xff]  }
 0x16e   :  { %4024 = vmatpush1.bf16.msra.mxu1 %v10070_v59  ;;  %v227_v59 = vld [vmem:[#allocation5 + $0x78] sm:$0xff] }
 0x16f   :  { %3499 = vmatmul.mubr.bf16.gmra.mrb[4].mxu0 %v11639_v54  ;;  %4025 = vmatprep.subr.bf16.mxu1 %v10079_v62  ;;  %v9689_v62 = vcombine.high %v222_v56, %v226_v57 }
 0x170   :  { %3951 = vmatmul.mubr.bf16.gmra.mrb[4].mxu1 %v11639_v54  ;;  %3508 = vmatprep.mubr.bf16.mxu0 %v11640_v58  ;;  %v12580_v54 = vmov 0  }
 0x171   :  { %3960 = vmatprep.mubr.bf16.mxu1 %v11640_v58  ;;  %3574 = vmatpush1.bf16.msra.mxu0 %v10076_v63  ;;  %v223_v58 = vld [vmem:[#allocation5 + $0x58] sm:$0xff]  ;;  %v230_v63 = vld [vmem:[#allocation5 + $0x90] sm:$0xff] }
 0x172   :  { %3575 = vmatprep.subr.bf16.mxu0 %v10085_v2  ;;  %4026 = vmatpush1.bf16.msra.mxu1 %v10078_v3  ;;  %v9691_v2 = vcombine.high %v223_v58, %v227_v59  ;;  %v235_v3 = vld [vmem:[#allocation5 + $0xb8] sm:$0xff]  ;;  %v9690_v5 = vcombine.low %v223_v58, %v227_v59 }
 0x173   :  { %4027 = vmatprep.subr.bf16.mxu1 %v10087_v6  ;;  %v11659_v6 = vld [vmem:[#allocation2 + $0x50] ss:$28 sps:$4 sm:$0xff]   ;;  %v9698_v14 = vcombine.low %v231_v1, %v235_v3  ;;  %v11662_v58 = vld [vmem:[#allocation2 + $0xf8] ss:$28 sps:$4 sm:$0xff]  }
 0x175   :  { %3576 = vmatpush1.bf16.msra.mxu0 %v10084_v8  ;;  %v238_v8 = vld [vmem:[#allocation5 + $0xd0] sm:$0xff] }
 0x176   :  { %3577 = vmatprep.subr.bf16.mxu0 %v10093_v12  ;;  %4028 = vmatpush1.bf16.msra.mxu1 %v10086_v13  ;;  %v243_v12 = vld [vmem:[#allocation5 + $0xf8] sm:$0xff]  ;;  %v9696_v13 = vcombine.low %v230_v63, %v234_v0  ;;  %v9705_v15 = vcombine.high %v238_v8, %v242_v9 }
 0x177   :  { %3509 = vmatmul.mubr.bf16.gmra.mrb[8].mxu0 %v11642_v7  ;;  %4029 = vmatprep.subr.bf16.mxu1 %v10095_v16  ;;  %v246_v16 = vld [vmem:[#allocation5 + $0x110] sm:$0xff]  ;;  %v9707_v19 = vcombine.high %v239_v10, %v243_v12  ;;  %v9706_v22 = vcombine.low %v239_v10, %v243_v12 }
 0x178   :  { %3961 = vmatmul.mubr.bf16.gmra.mrb[8].mxu1 %v11642_v7  ;;  %3518 = vmatprep.mubr.bf16.mxu0 %v11643_v11  ;;  %v9697_v7 = vcombine.high %v230_v63, %v234_v0  ;;  %v291_v0 = vld [vmem:[#allocation5 + $0x278] sm:$0xff] }
 0x179   :  { %3970 = vmatprep.mubr.bf16.mxu1 %v11643_v11  ;;  %3578 = vmatpush1.bf16.msra.mxu0 %v10092_v17  ;;  %v9699_v11 = vcombine.high %v231_v1, %v235_v3  ;;  %v250_v17 = vld [vmem:[#allocation5 + $0x130] sm:$0xff] }
 0x17a   :  { %3579 = vmatprep.subr.bf16.mxu0 %v10101_v20  ;;  %4030 = vmatpush1.bf16.msra.mxu1 %v10094_v21  ;;  %v251_v20 = vld [vmem:[#allocation5 + $0x138] sm:$0xff]  ;;  %v9704_v21 = vcombine.low %v238_v8, %v242_v9 }
 0x17b   :  { %4031 = vmatprep.subr.bf16.mxu1 %v10103_v24  ;;  %v9713_v24 = vcombine.high %v246_v16, %v250_v17  ;;  %v9715_v28 = vcombine.high %v247_v18, %v251_v20  ;;  %v299_v8 = vld [vmem:[#allocation5 + $0x2b8] sm:$0xff] }
 0x17d   :  { %3580 = vmatpush1.bf16.msra.mxu0 %v10100_v26  ;;  %v258_v26 = vld [vmem:[#allocation5 + $0x170] sm:$0xff] }
 0x17e   :  { %3581 = vmatprep.subr.bf16.mxu0 %v10109_v30  ;;  %4032 = vmatpush1.bf16.msra.mxu1 %v10102_v31  ;;  %v9712_v30 = vcombine.low %v246_v16, %v250_v17  ;;  %v9714_v31 = vcombine.low %v247_v18, %v251_v20  ;;  %v307_v17 = vld [vmem:[#allocation5 + $0x2f8] sm:$0xff] }
 0x17f   :  { %3519 = vmatmul.mubr.bf16.gmra.mrb[12].mxu0 %v11645_v25  ;;  %4033 = vmatprep.subr.bf16.mxu1 %v10111_v34  ;;  %v266_v34 = vld [vmem:[#allocation5 + $0x1b0] sm:$0xff] }
 0x180   :  { %3971 = vmatmul.mubr.bf16.gmra.mrb[12].mxu1 %v11645_v25  ;;  %3528 = vmatprep.mubr.bf16.mxu0 %v11646_v29  ;;  %v254_v25 = vld [vmem:[#allocation5 + $0x150] sm:$0xff]  ;;  %v9729_v41 = vcombine.high %v262_v33, %v266_v34 }
 0x181   :  { %3980 = vmatprep.mubr.bf16.mxu1 %v11646_v29  ;;  %3582 = vmatpush1.bf16.msra.mxu0 %v10108_v35  ;;  %v259_v29 = vld [vmem:[#allocation5 + $0x178] sm:$0xff]  ;;  %v9721_v32 = vcombine.high %v254_v25, %v258_v26 }
 0x182   :  { %3583 = vmatprep.subr.bf16.mxu0 %v10117_v38  ;;  %4034 = vmatpush1.bf16.msra.mxu1 %v10110_v39  ;;  %v263_v35 = vld [vmem:[#allocation5 + $0x198] sm:$0xff]  ;;  %v9723_v36 = vcombine.high %v255_v27, %v259_v29  ;;  %v9720_v38 = vcombine.low %v254_v25, %v258_v26  ;;  %v9722_v39 = vcombine.low %v255_v27, %v259_v29 }
 0x183   :  { %4035 = vmatprep.subr.bf16.mxu1 %v10119_v42  ;;  %v270_v42 = vld [vmem:[#allocation5 + $0x1d0] sm:$0xff]  ;;  %v315_v25 = vld [vmem:[#allocation5 + $0x338] sm:$0xff] }
 0x185   :  { %3584 = vmatpush1.bf16.msra.mxu0 %v10116_v44  ;;  %v271_v44 = vld [vmem:[#allocation5 + $0x1d8] sm:$0xff] }
 0x186   :  { %4036 = vmatpush1.bf16.msra.mxu1 %v10118_v46  ;;  %4134 = vmatprep.subr.bf16.mxu0 %v9681_v47  ;;  %v275_v46 = vld [vmem:[#allocation5 + $0x1f8] sm:$0xff]  ;;  %v9728_v47 = vcombine.low %v262_v33, %v266_v34 }
 0x187   :  { %3529 = vmatmul.mubr.bf16.gmra.mrb[16].mxu0 %v11648_v43  ;;  %4586 = vmatprep.subr.bf16.mxu1 %v9683_v48  ;;  %v9730_v48 = vcombine.low %v263_v35, %v267_v37  ;;  %v9738_v57 = vcombine.low %v271_v44, %v275_v46  ;;  %v323_v34 = vld [vmem:[#allocation5 + $0x378] sm:$0xff] }
 0x188   :  { %3981 = vmatmul.mubr.bf16.gmra.mrb[16].mxu1 %v11648_v43  ;;  %3538 = vmatprep.mubr.bf16.mxu0 %v11649_v45  ;;  %v274_v43 = vld [vmem:[#allocation5 + $0x1f0] sm:$0xff] }
 0x189   :  { %3990 = vmatprep.mubr.bf16.mxu1 %v11649_v45  ;;  %v9731_v45 = vcombine.high %v263_v35, %v267_v37  ;;  %v9736_v56 = vcombine.low %v270_v42, %v274_v43 }
 0x18f   :  { %3539 = vmatmul.mubr.bf16.gmra.mrb[20].mxu0 %v11651_v49 }
 0x190   :  { %3991 = vmatmul.mubr.bf16.gmra.mrb[20].mxu1 %v11651_v49  ;;  %3548 = vmatprep.mubr.bf16.mxu0 %v11652_v50  ;;  %v9737_v49 = vcombine.high %v270_v42, %v274_v43  ;;  %v331_v42 = vld [vmem:[#allocation5 + $0x3b8] sm:$0xff] }
 0x191   :  { %4000 = vmatprep.mubr.bf16.mxu1 %v11652_v50  ;;  %v278_v50 = vld [vmem:[#allocation5 + $0x210] sm:$0xff] }
 0x197   :  { %3549 = vmatmul.mubr.bf16.gmra.mrb[24].mxu0 %v11654_v51 }
 0x198   :  { %4001 = vmatmul.mubr.bf16.gmra.mrb[24].mxu1 %v11654_v51  ;;  %3558 = vmatprep.mubr.bf16.mxu0 %v11655_v52  ;;  %v282_v51 = vld [vmem:[#allocation5 + $0x230] sm:$0xff] }
 0x199   :  { %4010 = vmatprep.mubr.bf16.mxu1 %v11655_v52  ;;  %v279_v52 = vld [vmem:[#allocation5 + $0x218] sm:$0xff]  ;;  %v9745_v59 = vcombine.high %v278_v50, %v282_v51  ;;  %v9744_v1 = vcombine.low %v278_v50, %v282_v51 }
 0x19a   :  { %v339_v51 = vld [vmem:[#allocation5 + $0x3f8] sm:$0xff] }
 0x19f   :  { %3559 = vmatmul.mubr.bf16.gmra.mrb[28].mxu0 %v11657_v53 }
 0x1a0   :  { %4011 = vmatmul.mubr.bf16.gmra.mrb[28].mxu1 %v11657_v53  ;;  %3601 = vmatprep.mubr.bf16.mxu0 %v12580_v54  ;;  %v9739_v53 = vcombine.high %v271_v44, %v275_v46 }
 0x1a1   :  { %4053 = vmatprep.mubr.bf16.mxu1 %v12580_v54 }
 0x1a7   :  { %3602 = vmatmul.mubr.bf16.vlgmr.msra.gmra.mrb[0].mxu0 %v11658_v55 }
 0x1a8   :  { %4054 = vmatmul.mubr.bf16.vlgmr.msra.gmra.mrb[0].mxu1 %v11658_v55  ;;  %4135 = vmatpush1.bf16.msra.mxu0 %v9680_v60  ;;  %v283_v55 = vld [vmem:[#allocation5 + $0x238] sm:$0xff]  ;;  %v286_v60 = vld [vmem:[#allocation5 + $0x250] sm:$0xff] }
 0x1a9   :  { %4587 = vmatpush1.bf16.msra.mxu1 %v9682_v61  ;;  %4136 = vmatprep.subr.bf16.mxu0 %v9689_v62  ;;  %v290_v61 = vld [vmem:[#allocation5 + $0x270] sm:$0xff]  ;;  %v287_v62 = vld [vmem:[#allocation5 + $0x258] sm:$0xff]  ;;  %v9747_v63 = vcombine.high %v279_v52, %v283_v55 }
 0x1aa   :  { %4588 = vmatprep.subr.bf16.mxu1 %v9691_v2  ;;  %3611 = vmatprep.mubr.bf16.mxu0 %v12580_v54  ;;  %v9746_v2 = vcombine.low %v279_v52, %v283_v55  ;;  %v9753_v3 = vcombine.high %v286_v60, %v290_v61  ;;  %v9752_v9 = vcombine.low %v286_v60, %v290_v61  ;;  %v347_v60 = vld [vmem:[#allocation5 + $0x438] sm:$0xff] }
 0x1ab   :  { %4063 = vmatprep.mubr.bf16.mxu1 %v12580_v54  ;;  %v9754_v10 = vcombine.low %v287_v62, %v291_v0 }
 0x1ac   :  { %4137 = vmatpush1.bf16.msra.mxu0 %v9688_v4  ;;  %v294_v4 = vld [vmem:[#allocation5 + $0x290] sm:$0xff] }
 0x1ad   :  { %4589 = vmatpush1.bf16.msra.mxu1 %v9690_v5  ;;  %4138 = vmatprep.subr.bf16.mxu0 %v9697_v7  ;;  %v298_v5 = vld [vmem:[#allocation5 + $0x2b0] sm:$0xff]  ;;  %v9755_v7 = vcombine.high %v287_v62, %v291_v0 }
 0x1ae   :  { %4590 = vmatprep.subr.bf16.mxu1 %v9699_v11  ;;  %v11663_v11 = vld [vmem:[#allocation2 + $0x130] ss:$28 sps:$4 sm:$0xff]   ;;  %v9761_v12 = vcombine.high %v294_v4, %v298_v5  ;;  %v9760_v18 = vcombine.low %v294_v4, %v298_v5  ;;  %v355_v5 = vld [vmem:[#allocation5 + $0x478] sm:$0xff] }
 0x1af   :  { %3612 = vmatmul.mubr.bf16.gmra.mrb[4].mxu0 %v11659_v6  ;;  %v350_v0 = vld [vmem:[#allocation5 + $0x450] sm:$0xff] }
 0x1b0   :  { %4064 = vmatmul.mubr.bf16.gmra.mrb[4].mxu1 %v11659_v6  ;;  %4139 = vmatpush1.bf16.msra.mxu0 %v9696_v13  ;;  %v295_v6 = vld [vmem:[#allocation5 + $0x298] sm:$0xff]  ;;  %v302_v13 = vld [vmem:[#allocation5 + $0x2d0] sm:$0xff] }
 0x1b1   :  { %4591 = vmatpush1.bf16.msra.mxu1 %v9698_v14  ;;  %4140 = vmatprep.subr.bf16.mxu0 %v9705_v15  ;;  %v306_v14 = vld [vmem:[#allocation5 + $0x2f0] sm:$0xff]  ;;  %v303_v15 = vld [vmem:[#allocation5 + $0x2d8] sm:$0xff]  ;;  %v9763_v16 = vcombine.high %v295_v6, %v299_v8 }
 0x1b2   :  { %4592 = vmatprep.subr.bf16.mxu1 %v9707_v19  ;;  %3621 = vmatprep.mubr.bf16.mxu0 %v12580_v54  ;;  %v9762_v19 = vcombine.low %v295_v6, %v299_v8  ;;  %v9769_v20 = vcombine.high %v302_v13, %v306_v14  ;;  %v9768_v26 = vcombine.low %v302_v13, %v306_v14  ;;  %v362_v8 = vld [vmem:[#allocation5 + $0x4b0] sm:$0xff]  ;;  %v359_v13 = vld [vmem:[#allocation5 + $0x498] sm:$0xff] }
 0x1b3   :  { %4073 = vmatprep.mubr.bf16.mxu1 %v12580_v54  ;;  %v9770_v27 = vcombine.low %v303_v15, %v307_v17  ;;  %v363_v14 = vld [vmem:[#allocation5 + $0x4b8] sm:$0xff] }
 0x1b4   :  { %4141 = vmatpush1.bf16.msra.mxu0 %v9704_v21  ;;  %v310_v21 = vld [vmem:[#allocation5 + $0x310] sm:$0xff] }
 0x1b5   :  { %4593 = vmatpush1.bf16.msra.mxu1 %v9706_v22  ;;  %4142 = vmatprep.subr.bf16.mxu0 %v9713_v24  ;;  %v314_v22 = vld [vmem:[#allocation5 + $0x330] sm:$0xff]  ;;  %v9771_v24 = vcombine.high %v303_v15, %v307_v17 }
 0x1b6   :  { %4594 = vmatprep.subr.bf16.mxu1 %v9715_v28  ;;  %v11664_v28 = vld [vmem:[#allocation2 + $0x168] ss:$28 sps:$4 sm:$0xff]   ;;  %v9777_v29 = vcombine.high %v310_v21, %v314_v22  ;;  %v9776_v35 = vcombine.low %v310_v21, %v314_v22  ;;  %v370_v17 = vld [vmem:[#allocation5 + $0x4f0] sm:$0xff]  ;;  %v371_v21 = vld [vmem:[#allocation5 + $0x4f8] sm:$0xff] }
 0x1b7   :  { %3622 = vmatmul.mubr.bf16.gmra.mrb[8].mxu0 %v11660_v23  ;;  %v12276_v22 = vld [vmem:[#allocation2 + $0x3c] ss:$28 sps:$4 sm:$0xff]  }
 0x1b8   :  { %4074 = vmatmul.mubr.bf16.gmra.mrb[8].mxu1 %v11660_v23  ;;  %4143 = vmatpush1.bf16.msra.mxu0 %v9712_v30  ;;  %v311_v23 = vld [vmem:[#allocation5 + $0x318] sm:$0xff]  ;;  %v318_v30 = vld [vmem:[#allocation5 + $0x350] sm:$0xff] }
 0x1b9   :  { %4595 = vmatpush1.bf16.msra.mxu1 %v9714_v31  ;;  %4144 = vmatprep.subr.bf16.mxu0 %v9721_v32  ;;  %v322_v31 = vld [vmem:[#allocation5 + $0x370] sm:$0xff]  ;;  %v319_v32 = vld [vmem:[#allocation5 + $0x358] sm:$0xff]  ;;  %v9779_v33 = vcombine.high %v311_v23, %v315_v25 }
 0x1ba   :  { %4596 = vmatprep.subr.bf16.mxu1 %v9723_v36  ;;  %3631 = vmatprep.mubr.bf16.mxu0 %v12580_v54  ;;  %v9778_v36 = vcombine.low %v311_v23, %v315_v25  ;;  %v9785_v37 = vcombine.high %v318_v30, %v322_v31  ;;  %v9784_v43 = vcombine.low %v318_v30, %v322_v31  ;;  %v12277_v30 = vld [vmem:[#allocation2 + $0x38] ss:$28 sps:$4 sm:$0xff]  }
 0x1bb   :  { %4083 = vmatprep.mubr.bf16.mxu1 %v12580_v54  ;;  %v9786_v44 = vcombine.low %v319_v32, %v323_v34  ;;  %v9827_v23 = vcombine.high %v359_v13, %v363_v14  ;;  %v9826_v25 = vcombine.low %v359_v13, %v363_v14  ;;  %v375_v31 = vld [vmem:[#allocation5 + $0x518] sm:$0xff] }
 0x1bc   :  { %4145 = vmatpush1.bf16.msra.mxu0 %v9720_v38  ;;  %v326_v38 = vld [vmem:[#allocation5 + $0x390] sm:$0xff]  ;;  %v415_v13 = vld [vmem:[#allocation5 + $0x658] sm:$0xff] }
 0x1bd   :  { %4597 = vmatpush1.bf16.msra.mxu1 %v9722_v39  ;;  %4146 = vmatprep.subr.bf16.mxu0 %v9729_v41  ;;  %v330_v39 = vld [vmem:[#allocation5 + $0x3b0] sm:$0xff]  ;;  %v9787_v41 = vcombine.high %v319_v32, %v323_v34  ;;  %v379_v32 = vld [vmem:[#allocation5 + $0x538] sm:$0xff] }
 0x1be   :  { %4598 = vmatprep.subr.bf16.mxu1 %v9731_v45  ;;  %v11665_v45 = vld [vmem:[#allocation2 + $0x1a0] ss:$28 sps:$4 sm:$0xff]   ;;  %v9793_v46 = vcombine.high %v326_v38, %v330_v39  ;;  %v9792_v52 = vcombine.low %v326_v38, %v330_v39  ;;  %v382_v38 = vld [vmem:[#allocation5 + $0x550] sm:$0xff] }
 0x1bf   :  { %3632 = vmatmul.mubr.bf16.gmra.mrb[12].mxu0 %v11661_v40  ;;  %v386_v39 = vld [vmem:[#allocation5 + $0x570] sm:$0xff]  ;;  %v419_v14 = vld [vmem:[#allocation5 + $0x678] sm:$0xff] }
 0x1c0   :  { %4084 = vmatmul.mubr.bf16.gmra.mrb[12].mxu1 %v11661_v40  ;;  %4147 = vmatpush1.bf16.msra.mxu0 %v9728_v47  ;;  %v327_v40 = vld [vmem:[#allocation5 + $0x398] sm:$0xff]  ;;  %v334_v47 = vld [vmem:[#allocation5 + $0x3d0] sm:$0xff] }
 0x1c1   :  { %4599 = vmatpush1.bf16.msra.mxu1 %v9730_v48  ;;  %4148 = vmatprep.subr.bf16.mxu0 %v9737_v49  ;;  %v338_v48 = vld [vmem:[#allocation5 + $0x3f0] sm:$0xff]  ;;  %v335_v49 = vld [vmem:[#allocation5 + $0x3d8] sm:$0xff]  ;;  %v9795_v50 = vcombine.high %v327_v40, %v331_v42 }
 0x1c2   :  { %4600 = vmatprep.subr.bf16.mxu1 %v9739_v53  ;;  %3641 = vmatprep.mubr.bf16.mxu0 %v12580_v54  ;;  %v9794_v53 = vcombine.low %v327_v40, %v331_v42  ;;  %v9801_v55 = vcombine.high %v334_v47, %v338_v48  ;;  %v9800_v61 = vcombine.low %v334_v47, %v338_v48  ;;  %v383_v40 = vld [vmem:[#allocation5 + $0x558] sm:$0xff]  ;;  %v394_v47 = vld [vmem:[#allocation5 + $0x5b0] sm:$0xff] }
 0x1c3   :  { %4093 = vmatprep.mubr.bf16.mxu1 %v12580_v54  ;;  %v9802_v62 = vcombine.low %v335_v49, %v339_v51  ;;  %v12279_v48 = vld [vmem:[#allocation2 + $0x70] ss:$28 sps:$4 sm:$0xff]  }
 0x1c4   :  { %4149 = vmatpush1.bf16.msra.mxu0 %v9736_v56  ;;  %v342_v56 = vld [vmem:[#allocation5 + $0x410] sm:$0xff] }
 0x1c5   :  { %4601 = vmatpush1.bf16.msra.mxu1 %v9738_v57  ;;  %4150 = vmatprep.subr.bf16.mxu0 %v9745_v59  ;;  %v346_v57 = vld [vmem:[#allocation5 + $0x430] sm:$0xff]  ;;  %v9803_v59 = vcombine.high %v335_v49, %v339_v51  ;;  %v391_v49 = vld [vmem:[#allocation5 + $0x598] sm:$0xff]  ;;  %v9848_v51 = vcombine.low %v382_v38, %v386_v39 }
 0x1c6   :  { %4602 = vmatprep.subr.bf16.mxu1 %v9747_v63  ;;  %v9809_v63 = vcombine.high %v342_v56, %v346_v57  ;;  %v9808_v6 = vcombine.low %v342_v56, %v346_v57  ;;  %v398_v57 = vld [vmem:[#allocation5 + $0x5d0] sm:$0xff] }
 0x1c7   :  { %3642 = vmatmul.mubr.bf16.gmra.mrb[16].mxu0 %v11662_v58 }
 0x1c8   :  { %4094 = vmatmul.mubr.bf16.gmra.mrb[16].mxu1 %v11662_v58  ;;  %4151 = vmatpush1.bf16.msra.mxu0 %v9744_v1  ;;  %v343_v58 = vld [vmem:[#allocation5 + $0x418] sm:$0xff]  ;;  %v354_v1 = vld [vmem:[#allocation5 + $0x470] sm:$0xff] }
 0x1c9   :  { %4603 = vmatpush1.bf16.msra.mxu1 %v9746_v2  ;;  %4152 = vmatprep.subr.bf16.mxu0 %v9753_v3  ;;  %v351_v2 = vld [vmem:[#allocation5 + $0x458] sm:$0xff]  ;;  %v12274_v3 = vld [vmem:[#allocation2 + $0x4] ss:$28 sps:$4 sm:$0xff]   ;;  %v9811_v4 = vcombine.high %v343_v58, %v347_v60  ;;  %v9816_v15 = vcombine.low %v350_v0, %v354_v1 }
 0x1ca   :  { %4604 = vmatprep.subr.bf16.mxu1 %v9755_v7  ;;  %3651 = vmatprep.mubr.bf16.mxu0 %v12580_v54  ;;  %v358_v7 = vld [vmem:[#allocation5 + $0x490] sm:$0xff] }
 0x1cb   :  { %4103 = vmatprep.mubr.bf16.mxu1 %v12580_v54 }
 0x1cc   :  { %4153 = vmatpush1.bf16.msra.mxu0 %v9752_v9  ;;  %v9810_v9 = vcombine.low %v343_v58, %v347_v60  ;;  %v402_v58 = vld [vmem:[#allocation5 + $0x5f0] sm:$0xff]  ;;  %v403_v60 = vld [vmem:[#allocation5 + $0x5f8] sm:$0xff] }
 0x1cd   :  { %4605 = vmatpush1.bf16.msra.mxu1 %v9754_v10  ;;  %4154 = vmatprep.subr.bf16.mxu0 %v9761_v12  ;;  %v9817_v10 = vcombine.high %v350_v0, %v354_v1  ;;  %v12275_v12 = vld [vmem:[#allocation2] ss:$28 sps:$4 sm:$0xff]   ;;  %v406_v1 = vld [vmem:[#allocation5 + $0x610] sm:$0xff] }
 0x1ce   :  { %4606 = vmatprep.subr.bf16.mxu1 %v9763_v16  ;;  %v366_v16 = vld [vmem:[#allocation5 + $0x4d0] sm:$0xff] }
 0x1cf   :  { %3652 = vmatmul.mubr.bf16.gmra.mrb[20].mxu0 %v11663_v11 }
 0x1d0   :  { %4104 = vmatmul.mubr.bf16.gmra.mrb[20].mxu1 %v11663_v11  ;;  %4155 = vmatpush1.bf16.msra.mxu0 %v9760_v18  ;;  %v9819_v11 = vcombine.high %v351_v2, %v355_v5  ;;  %v9818_v18 = vcombine.low %v351_v2, %v355_v5  ;;  %v410_v2 = vld [vmem:[#allocation5 + $0x630] sm:$0xff]  ;;  %v411_v5 = vld [vmem:[#allocation5 + $0x638] sm:$0xff] }
 0x1d1   :  { %4607 = vmatpush1.bf16.msra.mxu1 %v9762_v19  ;;  %4156 = vmatprep.subr.bf16.mxu0 %v9769_v20  ;;  %v9825_v19 = vcombine.high %v358_v7, %v362_v8  ;;  %v367_v20 = vld [vmem:[#allocation5 + $0x4d8] sm:$0xff] }
 0x1d2   :  { %4608 = vmatprep.subr.bf16.mxu1 %v9771_v24  ;;  %3661 = vmatprep.mubr.bf16.mxu0 %v12580_v54  ;;  %v9824_v24 = vcombine.low %v358_v7, %v362_v8  ;;  %v9834_v34 = vcombine.low %v367_v20, %v371_v21  ;;  %v9873_v8 = vcombine.high %v406_v1, %v410_v2 }
 0x1d3   :  { %4113 = vmatprep.mubr.bf16.mxu1 %v12580_v54 }
 0x1d4   :  { %4157 = vmatpush1.bf16.msra.mxu0 %v9768_v26  ;;  %v9833_v26 = vcombine.high %v366_v16, %v370_v17 }
 0x1d5   :  { %4609 = vmatpush1.bf16.msra.mxu1 %v9770_v27  ;;  %4158 = vmatprep.subr.bf16.mxu0 %v9777_v29  ;;  %v9835_v27 = vcombine.high %v367_v20, %v371_v21  ;;  %v378_v29 = vld [vmem:[#allocation5 + $0x530] sm:$0xff]  ;;  %v12283_v21 = vld [vmem:[#allocation2 + $0xe0] ss:$28 sps:$4 sm:$0xff]  }
 0x1d6   :  { %4610 = vmatprep.subr.bf16.mxu1 %v9779_v33  ;;  %v9832_v33 = vcombine.low %v366_v16, %v370_v17  ;;  %v426_v20 = vld [vmem:[#allocation5 + $0x6b0] sm:$0xff] }
 0x1d7   :  { %3662 = vmatmul.mubr.bf16.gmra.mrb[24].mxu0 %v11664_v28 }
 0x1d8   :  { %4114 = vmatmul.mubr.bf16.gmra.mrb[24].mxu1 %v11664_v28  ;;  %4159 = vmatpush1.bf16.msra.mxu0 %v9776_v35  ;;  %v374_v28 = vld [vmem:[#allocation5 + $0x510] sm:$0xff] }
 0x1d9   :  { %4611 = vmatpush1.bf16.msra.mxu1 %v9778_v36  ;;  %4160 = vmatprep.subr.bf16.mxu0 %v9785_v37  ;;  %v9841_v35 = vcombine.high %v374_v28, %v378_v29  ;;  %v12278_v36 = vld [vmem:[#allocation2 + $0x74] ss:$28 sps:$4 sm:$0xff]   ;;  %v9843_v37 = vcombine.high %v375_v31, %v379_v32  ;;  %v9840_v42 = vcombine.low %v374_v28, %v378_v29 }
 0x1da   :  { %4612 = vmatprep.subr.bf16.mxu1 %v9787_v41  ;;  %3671 = vmatprep.mubr.bf16.mxu0 %v12580_v54  ;;  %v387_v41 = vld [vmem:[#allocation5 + $0x578] sm:$0xff]  ;;  %v430_v29 = vld [vmem:[#allocation5 + $0x6d0] sm:$0xff] }
 0x1db   :  { %4123 = vmatprep.mubr.bf16.mxu1 %v12580_v54 }
 0x1dc   :  { %4161 = vmatpush1.bf16.msra.mxu0 %v9784_v43  ;;  %v9842_v43 = vcombine.low %v375_v31, %v379_v32  ;;  %v431_v31 = vld [vmem:[#allocation5 + $0x6d8] sm:$0xff] }
 0x1dd   :  { %4613 = vmatpush1.bf16.msra.mxu1 %v9786_v44  ;;  %4162 = vmatprep.subr.bf16.mxu0 %v9793_v46  ;;  %v9849_v44 = vcombine.high %v382_v38, %v386_v39  ;;  %v390_v46 = vld [vmem:[#allocation5 + $0x590] sm:$0xff]  ;;  %v435_v32 = vld [vmem:[#allocation5 + $0x6f8] sm:$0xff] }
 0x1de   :  { %4614 = vmatprep.subr.bf16.mxu1 %v9795_v50  ;;  %v395_v50 = vld [vmem:[#allocation5 + $0x5b8] sm:$0xff]  ;;  %v442_v38 = vld [vmem:[#allocation5 + $0x730] sm:$0xff] }
 0x1df   :  { %3672 = vmatmul.mubr.bf16.gmra.mrb[28].mxu0 %v11665_v45  ;;  %v9859_v56 = vcombine.high %v391_v49, %v395_v50  ;;  %v12285_v39 = vld [vmem:[#allocation2 + $0x118] ss:$28 sps:$4 sm:$0xff]  }
 0x1e0   :  { %4124 = vmatmul.mubr.bf16.gmra.mrb[28].mxu1 %v11665_v45  ;;  %4163 = vmatpush1.bf16.msra.mxu0 %v9792_v52  ;;  %v9851_v45 = vcombine.high %v383_v40, %v387_v41  ;;  %v9850_v52 = vcombine.low %v383_v40, %v387_v41  ;;  %v439_v40 = vld [vmem:[#allocation5 + $0x718] sm:$0xff] }
 0x1e1   :  { %4615 = vmatpush1.bf16.msra.mxu1 %v9794_v53  ;;  %4164 = vmatprep.subr.bf16.mxu0 %v9801_v55  ;;  %v9857_v53 = vcombine.high %v390_v46, %v394_v47  ;;  %v12280_v55 = vld [vmem:[#allocation2 + $0xac] ss:$28 sps:$4 sm:$0xff]   ;;  %v443_v41 = vld [vmem:[#allocation5 + $0x738] sm:$0xff] }
 0x1e2   :  { %4616 = vmatprep.subr.bf16.mxu1 %v9803_v59  ;;  %4166 = vmatprep.mubr.bf16.mxu0 %v12274_v3  ;;  %v399_v59 = vld [vmem:[#allocation5 + $0x5d8] sm:$0xff] }
 0x1e3   :  { %4618 = vmatprep.mubr.bf16.mxu1 %v12274_v3  ;;  %v9867_v0 = vcombine.high %v399_v59, %v403_v60  ;;  %v12281_v3 = vld [vmem:[#allocation2 + $0xa8] ss:$28 sps:$4 sm:$0xff]   ;;  %v9866_v7 = vcombine.low %v399_v59, %v403_v60  ;;  %v455_v59 = vld [vmem:[#allocation5 + $0x798] sm:$0xff] }
 0x1e4   :  { %4165 = vmatpush1.bf16.msra.mxu0 %v9800_v61  ;;  %v9856_v61 = vcombine.low %v390_v46, %v394_v47  ;;  %v9907_v46 = vcombine.high %v439_v40, %v443_v41  ;;  %v446_v47 = vld [vmem:[#allocation5 + $0x750] sm:$0xff]  ;;  %v459_v60 = vld [vmem:[#allocation5 + $0x7b8] sm:$0xff] }
 0x1e5   :  { %4617 = vmatpush1.bf16.msra.mxu1 %v9802_v62  ;;  %4247 = vmatprep.subr.bf16.mxu0 %v9809_v63  ;;  %v9858_v62 = vcombine.low %v391_v49, %v395_v50  ;;  %v9865_v63 = vcombine.high %v398_v57, %v402_v58  ;;  %v447_v49 = vld [vmem:[#allocation5 + $0x758] sm:$0xff] }
 0x1e6   :  { %4699 = vmatprep.subr.bf16.mxu1 %v9811_v4  ;;  %v407_v4 = vld [vmem:[#allocation5 + $0x618] sm:$0xff] }
 0x1e7   :  { %4167 = vmatmul.mubr.bf16.vlgmr.msra.gmra.mrb[32].mxu0 %v12275_v12  ;;  %v9874_v16 = vcombine.low %v407_v4, %v411_v5  ;;  %v451_v50 = vld [vmem:[#allocation5 + $0x778] sm:$0xff] }
 0x1e8   :  { %4619 = vmatmul.mubr.bf16.vlgmr.msra.gmra.mrb[32].mxu1 %v12275_v12  ;;  %4248 = vmatpush1.bf16.msra.mxu0 %v9808_v6  ;;  %v9864_v6 = vcombine.low %v398_v57, %v402_v58  ;;  %v418_v12 = vld [vmem:[#allocation5 + $0x670] sm:$0xff] }
 0x1e9   :  { %4700 = vmatpush1.bf16.msra.mxu1 %v9810_v9  ;;  %4249 = vmatprep.subr.bf16.mxu0 %v9817_v10  ;;  %v12282_v9 = vld [vmem:[#allocation2 + $0xe4] ss:$28 sps:$4 sm:$0xff]   ;;  %v9875_v10 = vcombine.high %v407_v4, %v411_v5  ;;  %v458_v57 = vld [vmem:[#allocation5 + $0x7b0] sm:$0xff]  ;;  %v463_v4 = vld [vmem:[#allocation5 + $0x7d8] sm:$0xff] }
 0x1ea   :  { %4701 = vmatprep.subr.bf16.mxu1 %v9819_v11  ;;  %4176 = vmatprep.mubr.bf16.mxu0 %v12276_v22  ;;  %v414_v11 = vld [vmem:[#allocation5 + $0x650] sm:$0xff]  ;;  %v467_v5 = vld [vmem:[#allocation5 + $0x7f8] sm:$0xff] }
 0x1eb   :  { %4628 = vmatprep.mubr.bf16.mxu1 %v12276_v22  ;;  %v9881_v17 = vcombine.high %v414_v11, %v418_v12  ;;  %v423_v22 = vld [vmem:[#allocation5 + $0x698] sm:$0xff]  ;;  %v12287_v58 = vld [vmem:[#allocation2 + $0x150] ss:$28 sps:$4 sm:$0xff]  }
 0x1ec   :  { %4250 = vmatpush1.bf16.msra.mxu0 %v9816_v15  ;;  %v9872_v15 = vcombine.low %v406_v1, %v410_v2  ;;  %v9923_v1 = vcombine.high %v455_v59, %v459_v60  ;;  %v462_v2 = vld [vmem:[#allocation5 + $0x7d0] sm:$0xff] }
 0x1ed   :  { %4702 = vmatpush1.bf16.msra.mxu1 %v9818_v18  ;;  %4251 = vmatprep.subr.bf16.mxu0 %v9825_v19  ;;  %v9883_v18 = vcombine.high %v415_v13, %v419_v14  ;;  %v422_v19 = vld [vmem:[#allocation5 + $0x690] sm:$0xff] }
 0x1ee   :  { %4703 = vmatprep.subr.bf16.mxu1 %v9827_v23  ;;  %v427_v23 = vld [vmem:[#allocation5 + $0x6b8] sm:$0xff] }
 0x1ef   :  { %4177 = vmatmul.mubr.bf16.gmra.mrb[36].mxu0 %v12277_v30  ;;  %v9891_v28 = vcombine.high %v423_v22, %v427_v23 }
 0x1f0   :  { %4629 = vmatmul.mubr.bf16.gmra.mrb[36].mxu1 %v12277_v30  ;;  %4252 = vmatpush1.bf16.msra.mxu0 %v9824_v24  ;;  %v9880_v24 = vcombine.low %v414_v11, %v418_v12  ;;  %v434_v30 = vld [vmem:[#allocation5 + $0x6f0] sm:$0xff]  ;;  %v12289_v12 = vld [vmem:[#allocation2 + $0x188] ss:$28 sps:$4 sm:$0xff]  }
 0x1f1   :  { %4704 = vmatpush1.bf16.msra.mxu1 %v9826_v25  ;;  %4253 = vmatprep.subr.bf16.mxu0 %v9833_v26  ;;  %v9882_v25 = vcombine.low %v415_v13, %v419_v14  ;;  %v9889_v26 = vcombine.high %v422_v19, %v426_v20  ;;  %v474_v11 = vld [vmem:[#allocation5 + $0x830] sm:$0xff]  ;;  %v471_v13 = vld [vmem:[#allocation5 + $0x818] sm:$0xff] }
 0x1f2   :  { %4705 = vmatprep.subr.bf16.mxu1 %v9835_v27  ;;  %4186 = vmatprep.mubr.bf16.mxu0 %v12278_v36  ;;  %v12284_v27 = vld [vmem:[#allocation2 + $0x11c] ss:$28 sps:$4 sm:$0xff]  }
 0x1f3   :  { %4638 = vmatprep.mubr.bf16.mxu1 %v12278_v36  ;;  %v9899_v36 = vcombine.high %v431_v31, %v435_v32  ;;  %v475_v14 = vld [vmem:[#allocation5 + $0x838] sm:$0xff] }
 0x1f4   :  { %4254 = vmatpush1.bf16.msra.mxu0 %v9832_v33  ;;  %v9888_v33 = vcombine.low %v422_v19, %v426_v20  ;;  %v9939_v19 = vcombine.high %v471_v13, %v475_v14  ;;  %v478_v20 = vld [vmem:[#allocation5 + $0x850] sm:$0xff] }
 0x1f5   :  { %4706 = vmatpush1.bf16.msra.mxu1 %v9834_v34  ;;  %4255 = vmatprep.subr.bf16.mxu0 %v9841_v35  ;;  %v9890_v34 = vcombine.low %v423_v22, %v427_v23  ;;  %v9897_v35 = vcombine.high %v430_v29, %v434_v30  ;;  %v479_v22 = vld [vmem:[#allocation5 + $0x858] sm:$0xff] }
 0x1f6   :  { %4707 = vmatprep.subr.bf16.mxu1 %v9843_v37  ;;  %v438_v37 = vld [vmem:[#allocation5 + $0x710] sm:$0xff]  ;;  %v483_v23 = vld [vmem:[#allocation5 + $0x878] sm:$0xff] }
 0x1f7   :  { %4187 = vmatmul.mubr.bf16.gmra.mrb[40].mxu0 %v12279_v48 }
 0x1f8   :  { %4639 = vmatmul.mubr.bf16.gmra.mrb[40].mxu1 %v12279_v48  ;;  %4256 = vmatpush1.bf16.msra.mxu0 %v9840_v42  ;;  %v9896_v42 = vcombine.low %v430_v29, %v434_v30  ;;  %v450_v48 = vld [vmem:[#allocation5 + $0x770] sm:$0xff]  ;;  %v12291_v30 = vld [vmem:[#allocation2 + $0x8] ss:$28 sps:$4 sm:$0xff]  }
 0x1f9   :  { %4708 = vmatpush1.bf16.msra.mxu1 %v9842_v43  ;;  %4257 = vmatprep.subr.bf16.mxu0 %v9849_v44  ;;  %v9898_v43 = vcombine.low %v431_v31, %v435_v32  ;;  %v9905_v44 = vcombine.high %v438_v37, %v442_v38  ;;  %v490_v29 = vld [vmem:[#allocation5 + $0x8b0] sm:$0xff]  ;;  %v487_v31 = vld [vmem:[#allocation5 + $0x898] sm:$0xff] }
 0x1fa   :  { %4709 = vmatprep.subr.bf16.mxu1 %v9851_v45  ;;  %4196 = vmatprep.mubr.bf16.mxu0 %v12280_v55  ;;  %v12286_v45 = vld [vmem:[#allocation2 + $0x154] ss:$28 sps:$4 sm:$0xff]   ;;  %v491_v32 = vld [vmem:[#allocation5 + $0x8b8] sm:$0xff] }
 0x1fb   :  { %4648 = vmatprep.mubr.bf16.mxu1 %v12280_v55  ;;  %v9915_v55 = vcombine.high %v447_v49, %v451_v50 }
 0x1fc   :  { %4258 = vmatpush1.bf16.msra.mxu0 %v9848_v51  ;;  %v9904_v51 = vcombine.low %v438_v37, %v442_v38  ;;  %v9955_v37 = vcombine.high %v487_v31, %v491_v32  ;;  %v494_v38 = vld [vmem:[#allocation5 + $0x8d0] sm:$0xff] }
 0x1fd   :  { %4710 = vmatpush1.bf16.msra.mxu1 %v9850_v52  ;;  %4259 = vmatprep.subr.bf16.mxu0 %v9857_v53  ;;  %v9906_v52 = vcombine.low %v439_v40, %v443_v41  ;;  %v9913_v53 = vcombine.high %v446_v47, %v450_v48  ;;  %v495_v40 = vld [vmem:[#allocation5 + $0x8d8] sm:$0xff] }
 0x1fe   :  { %4711 = vmatprep.subr.bf16.mxu1 %v9859_v56  ;;  %v454_v56 = vld [vmem:[#allocation5 + $0x790] sm:$0xff]  ;;  %v499_v41 = vld [vmem:[#allocation5 + $0x8f8] sm:$0xff] }
 0x1ff   :  { %4197 = vmatmul.mubr.bf16.gmra.mrb[44].mxu0 %v12281_v3 }
 0x200   :  { %4649 = vmatmul.mubr.bf16.gmra.mrb[44].mxu1 %v12281_v3  ;;  %4260 = vmatpush1.bf16.msra.mxu0 %v9856_v61  ;;  %v9912_v61 = vcombine.low %v446_v47, %v450_v48  ;;  %v466_v3 = vld [vmem:[#allocation5 + $0x7f0] sm:$0xff]  ;;  %v12293_v48 = vld [vmem:[#allocation2 + $0x40] ss:$28 sps:$4 sm:$0xff]  }
 0x201   :  { %4712 = vmatpush1.bf16.msra.mxu1 %v9858_v62  ;;  %4261 = vmatprep.subr.bf16.mxu0 %v9865_v63  ;;  %v9914_v62 = vcombine.low %v447_v49, %v451_v50  ;;  %v9921_v63 = vcombine.high %v454_v56, %v458_v57  ;;  %v506_v47 = vld [vmem:[#allocation5 + $0x930] sm:$0xff]  ;;  %v503_v49 = vld [vmem:[#allocation5 + $0x918] sm:$0xff] }
 0x202   :  { %4713 = vmatprep.subr.bf16.mxu1 %v9867_v0  ;;  %4206 = vmatprep.mubr.bf16.mxu0 %v12282_v9  ;;  %v12288_v0 = vld [vmem:[#allocation2 + $0x18c] ss:$28 sps:$4 sm:$0xff]   ;;  %v507_v50 = vld [vmem:[#allocation5 + $0x938] sm:$0xff] }
 0x203   :  { %4658 = vmatprep.mubr.bf16.mxu1 %v12282_v9  ;;  %v9931_v9 = vcombine.high %v463_v4, %v467_v5 }
 0x204   :  { %4262 = vmatpush1.bf16.msra.mxu0 %v9864_v6  ;;  %v9920_v6 = vcombine.low %v454_v56, %v458_v57  ;;  %v9971_v56 = vcombine.high %v503_v49, %v507_v50  ;;  %v510_v57 = vld [vmem:[#allocation5 + $0x950] sm:$0xff] }
 0x205   :  { %4714 = vmatpush1.bf16.msra.mxu1 %v9866_v7  ;;  %4263 = vmatprep.subr.bf16.mxu0 %v9873_v8  ;;  %v9922_v7 = vcombine.low %v455_v59, %v459_v60  ;;  %v9929_v8 = vcombine.high %v462_v2, %v466_v3  ;;  %v511_v59 = vld [vmem:[#allocation5 + $0x958] sm:$0xff] }
 0x206   :  { %4715 = vmatprep.subr.bf16.mxu1 %v9875_v10  ;;  %v470_v10 = vld [vmem:[#allocation5 + $0x810] sm:$0xff]  ;;  %v515_v60 = vld [vmem:[#allocation5 + $0x978] sm:$0xff] }
 0x207   :  { %4207 = vmatmul.mubr.bf16.gmra.mrb[48].mxu0 %v12283_v21 }
 0x208   :  { %4659 = vmatmul.mubr.bf16.gmra.mrb[48].mxu1 %v12283_v21  ;;  %4264 = vmatpush1.bf16.msra.mxu0 %v9872_v15  ;;  %v9928_v15 = vcombine.low %v462_v2, %v466_v3  ;;  %v482_v21 = vld [vmem:[#allocation5 + $0x870] sm:$0xff] }
 0x209   :  { %4716 = vmatpush1.bf16.msra.mxu1 %v9874_v16  ;;  %4265 = vmatprep.subr.bf16.mxu0 %v9881_v17  ;;  %v9930_v16 = vcombine.low %v463_v4, %v467_v5  ;;  %v9937_v17 = vcombine.high %v470_v10, %v474_v11  ;;  %v522_v2 = vld [vmem:[#allocation5 + $0x9b0] sm:$0xff]  ;;  %v519_v4 = vld [vmem:[#allocation5 + $0x998] sm:$0xff] }
 0x20a   :  { %4717 = vmatprep.subr.bf16.mxu1 %v9883_v18  ;;  %4216 = vmatprep.mubr.bf16.mxu0 %v12284_v27  ;;  %v12290_v18 = vld [vmem:[#allocation2 + $0xc] ss:$28 sps:$4 sm:$0xff]   ;;  %v12295_v3 = vld [vmem:[#allocation2 + $0x78] ss:$28 sps:$4 sm:$0xff]  }
 0x20b   :  { %4668 = vmatprep.mubr.bf16.mxu1 %v12284_v27  ;;  %v9947_v27 = vcombine.high %v479_v22, %v483_v23  ;;  %v523_v5 = vld [vmem:[#allocation5 + $0x9b8] sm:$0xff] }
 0x20c   :  { %4266 = vmatpush1.bf16.msra.mxu0 %v9880_v24  ;;  %v9936_v24 = vcombine.low %v470_v10, %v474_v11  ;;  %v9987_v10 = vcombine.high %v519_v4, %v523_v5  ;;  %v526_v11 = vld [vmem:[#allocation5 + $0x9d0] sm:$0xff] }
 0x20d   :  { %4718 = vmatpush1.bf16.msra.mxu1 %v9882_v25  ;;  %4267 = vmatprep.subr.bf16.mxu0 %v9889_v26  ;;  %v9938_v25 = vcombine.low %v471_v13, %v475_v14  ;;  %v9945_v26 = vcombine.high %v478_v20, %v482_v21  ;;  %v527_v13 = vld [vmem:[#allocation5 + $0x9d8] sm:$0xff] }
 0x20e   :  { %4719 = vmatprep.subr.bf16.mxu1 %v9891_v28  ;;  %v486_v28 = vld [vmem:[#allocation5 + $0x890] sm:$0xff]  ;;  %v531_v14 = vld [vmem:[#allocation5 + $0x9f8] sm:$0xff] }
 0x20f   :  { %4217 = vmatmul.mubr.bf16.gmra.mrb[52].mxu0 %v12285_v39 }
 0x210   :  { %4669 = vmatmul.mubr.bf16.gmra.mrb[52].mxu1 %v12285_v39  ;;  %4268 = vmatpush1.bf16.msra.mxu0 %v9888_v33  ;;  %v9944_v33 = vcombine.low %v478_v20, %v482_v21  ;;  %v498_v39 = vld [vmem:[#allocation5 + $0x8f0] sm:$0xff] }
 0x211   :  { %4720 = vmatpush1.bf16.msra.mxu1 %v9890_v34  ;;  %4269 = vmatprep.subr.bf16.mxu0 %v9897_v35  ;;  %v9946_v34 = vcombine.low %v479_v22, %v483_v23  ;;  %v9953_v35 = vcombine.high %v486_v28, %v490_v29  ;;  %v538_v20 = vld [vmem:[#allocation5 + $0xa30] sm:$0xff]  ;;  %v535_v22 = vld [vmem:[#allocation5 + $0xa18] sm:$0xff] }
 0x212   :  { %4721 = vmatprep.subr.bf16.mxu1 %v9899_v36  ;;  %4226 = vmatprep.mubr.bf16.mxu0 %v12286_v45  ;;  %v12292_v36 = vld [vmem:[#allocation2 + $0x44] ss:$28 sps:$4 sm:$0xff]   ;;  %v12297_v21 = vld [vmem:[#allocation2 + $0xb0] ss:$28 sps:$4 sm:$0xff]   ;;  %v539_v23 = vld [vmem:[#allocation5 + $0xa38] sm:$0xff] }
 0x213   :  { %4678 = vmatprep.mubr.bf16.mxu1 %v12286_v45  ;;  %v9963_v45 = vcombine.high %v495_v40, %v499_v41 }
 0x214   :  { %4270 = vmatpush1.bf16.msra.mxu0 %v9896_v42  ;;  %v9952_v42 = vcombine.low %v486_v28, %v490_v29  ;;  %v10003_v28 = vcombine.high %v535_v22, %v539_v23  ;;  %v542_v29 = vld [vmem:[#allocation5 + $0xa50] sm:$0xff] }
 0x215   :  { %4722 = vmatpush1.bf16.msra.mxu1 %v9898_v43  ;;  %4271 = vmatprep.subr.bf16.mxu0 %v9905_v44  ;;  %v9954_v43 = vcombine.low %v487_v31, %v491_v32  ;;  %v9961_v44 = vcombine.high %v494_v38, %v498_v39  ;;  %v543_v31 = vld [vmem:[#allocation5 + $0xa58] sm:$0xff] }
 0x216   :  { %4723 = vmatprep.subr.bf16.mxu1 %v9907_v46  ;;  %v502_v46 = vld [vmem:[#allocation5 + $0x910] sm:$0xff]  ;;  %v547_v32 = vld [vmem:[#allocation5 + $0xa78] sm:$0xff] }
 0x217   :  { %4227 = vmatmul.mubr.bf16.gmra.mrb[56].mxu0 %v12287_v58 }
 0x218   :  { %4679 = vmatmul.mubr.bf16.gmra.mrb[56].mxu1 %v12287_v58  ;;  %4272 = vmatpush1.bf16.msra.mxu0 %v9904_v51  ;;  %v9960_v51 = vcombine.low %v494_v38, %v498_v39  ;;  %v514_v58 = vld [vmem:[#allocation5 + $0x970] sm:$0xff]  ;;  %v12299_v39 = vld [vmem:[#allocation2 + $0xe8] ss:$28 sps:$4 sm:$0xff]  }
 0x219   :  { %4724 = vmatpush1.bf16.msra.mxu1 %v9906_v52  ;;  %4273 = vmatprep.subr.bf16.mxu0 %v9913_v53  ;;  %v9962_v52 = vcombine.low %v495_v40, %v499_v41  ;;  %v9969_v53 = vcombine.high %v502_v46, %v506_v47  ;;  %v554_v38 = vld [vmem:[#allocation5 + $0xab0] sm:$0xff]  ;;  %v551_v40 = vld [vmem:[#allocation5 + $0xa98] sm:$0xff] }
 0x21a   :  { %4725 = vmatprep.subr.bf16.mxu1 %v9915_v55  ;;  %4236 = vmatprep.mubr.bf16.mxu0 %v12288_v0  ;;  %v12294_v55 = vld [vmem:[#allocation2 + $0x7c] ss:$28 sps:$4 sm:$0xff]  }
 0x21b   :  { %4688 = vmatprep.mubr.bf16.mxu1 %v12288_v0  ;;  %v9979_v0 = vcombine.high %v511_v59, %v515_v60  ;;  %v555_v41 = vld [vmem:[#allocation5 + $0xab8] sm:$0xff] }
 0x21c   :  { %4274 = vmatpush1.bf16.msra.mxu0 %v9912_v61  ;;  %v9968_v61 = vcombine.low %v502_v46, %v506_v47  ;;  %v10019_v46 = vcombine.high %v551_v40, %v555_v41  ;;  %v558_v47 = vld [vmem:[#allocation5 + $0xad0] sm:$0xff] }
 0x21d   :  { %4726 = vmatpush1.bf16.msra.mxu1 %v9914_v62  ;;  %4275 = vmatprep.subr.bf16.mxu0 %v9921_v63  ;;  %v9970_v62 = vcombine.low %v503_v49, %v507_v50  ;;  %v9977_v63 = vcombine.high %v510_v57, %v514_v58  ;;  %v559_v49 = vld [vmem:[#allocation5 + $0xad8] sm:$0xff] }
 0x21e   :  { %4727 = vmatprep.subr.bf16.mxu1 %v9923_v1  ;;  %v518_v1 = vld [vmem:[#allocation5 + $0x990] sm:$0xff]  ;;  %v563_v50 = vld [vmem:[#allocation5 + $0xaf8] sm:$0xff] }
 0x21f   :  { %4237 = vmatmul.mubr.bf16.gmra.mrb[60].mxu0 %v12289_v12 }
 0x220   :  { %4689 = vmatmul.mubr.bf16.gmra.mrb[60].mxu1 %v12289_v12  ;;  %4276 = vmatpush1.bf16.msra.mxu0 %v9920_v6  ;;  %v9976_v6 = vcombine.low %v510_v57, %v514_v58  ;;  %v530_v12 = vld [vmem:[#allocation5 + $0x9f0] sm:$0xff]  ;;  %v12301_v58 = vld [vmem:[#allocation2 + $0x120] ss:$28 sps:$4 sm:$0xff]  }
 0x221   :  { %4728 = vmatpush1.bf16.msra.mxu1 %v9922_v7  ;;  %4277 = vmatprep.subr.bf16.mxu0 %v9929_v8  ;;  %v9978_v7 = vcombine.low %v511_v59, %v515_v60  ;;  %v9985_v8 = vcombine.high %v518_v1, %v522_v2  ;;  %v570_v57 = vld [vmem:[#allocation5 + $0xb30] sm:$0xff]  ;;  %v567_v59 = vld [vmem:[#allocation5 + $0xb18] sm:$0xff] }
 0x222   :  { %4729 = vmatprep.subr.bf16.mxu1 %v9931_v9  ;;  %4279 = vmatprep.mubr.bf16.mxu0 %v12290_v18  ;;  %v12296_v9 = vld [vmem:[#allocation2 + $0xb4] ss:$28 sps:$4 sm:$0xff]   ;;  %v571_v60 = vld [vmem:[#allocation5 + $0xb38] sm:$0xff] }
 0x223   :  { %4731 = vmatprep.mubr.bf16.mxu1 %v12290_v18  ;;  %v9995_v18 = vcombine.high %v527_v13, %v531_v14 }
 0x224   :  { %4278 = vmatpush1.bf16.msra.mxu0 %v9928_v15  ;;  %v9984_v15 = vcombine.low %v518_v1, %v522_v2  ;;  %v10035_v1 = vcombine.high %v567_v59, %v571_v60  ;;  %v574_v2 = vld [vmem:[#allocation5 + $0xb50] sm:$0xff] }
 0x225   :  { %4730 = vmatpush1.bf16.msra.mxu1 %v9930_v16  ;;  %4360 = vmatprep.subr.bf16.mxu0 %v9937_v17  ;;  %v9986_v16 = vcombine.low %v519_v4, %v523_v5  ;;  %v9993_v17 = vcombine.high %v526_v11, %v530_v12  ;;  %v575_v4 = vld [vmem:[#allocation5 + $0xb58] sm:$0xff] }
 0x226   :  { %4812 = vmatprep.subr.bf16.mxu1 %v9939_v19  ;;  %v534_v19 = vld [vmem:[#allocation5 + $0xa10] sm:$0xff]  ;;  %v579_v5 = vld [vmem:[#allocation5 + $0xb78] sm:$0xff] }
 0x227   :  { %4280 = vmatmul.mubr.bf16.vlgmr.msra.gmra.mrb[32].mxu0 %v12291_v30 }
 0x228   :  { %4732 = vmatmul.mubr.bf16.vlgmr.msra.gmra.mrb[32].mxu1 %v12291_v30  ;;  %4361 = vmatpush1.bf16.msra.mxu0 %v9936_v24  ;;  %v9992_v24 = vcombine.low %v526_v11, %v530_v12  ;;  %v546_v30 = vld [vmem:[#allocation5 + $0xa70] sm:$0xff] }
 0x229   :  { %4813 = vmatpush1.bf16.msra.mxu1 %v9938_v25  ;;  %4362 = vmatprep.subr.bf16.mxu0 %v9945_v26  ;;  %v9994_v25 = vcombine.low %v527_v13, %v531_v14  ;;  %v10001_v26 = vcombine.high %v534_v19, %v538_v20  ;;  %v586_v11 = vld [vmem:[#allocation5 + $0xbb0] sm:$0xff]  ;;  %v583_v13 = vld [vmem:[#allocation5 + $0xb98] sm:$0xff] }
 0x22a   :  { %4814 = vmatprep.subr.bf16.mxu1 %v9947_v27  ;;  %4289 = vmatprep.mubr.bf16.mxu0 %v12292_v36  ;;  %v12298_v27 = vld [vmem:[#allocation2 + $0xec] ss:$28 sps:$4 sm:$0xff]   ;;  %v12303_v12 = vld [vmem:[#allocation2 + $0x158] ss:$28 sps:$4 sm:$0xff]  }
 0x22b   :  { %4741 = vmatprep.mubr.bf16.mxu1 %v12292_v36  ;;  %v10011_v36 = vcombine.high %v543_v31, %v547_v32  ;;  %v587_v14 = vld [vmem:[#allocation5 + $0xbb8] sm:$0xff] }
 0x22c   :  { %4363 = vmatpush1.bf16.msra.mxu0 %v9944_v33  ;;  %v10000_v33 = vcombine.low %v534_v19, %v538_v20  ;;  %v10051_v19 = vcombine.high %v583_v13, %v587_v14  ;;  %v590_v20 = vld [vmem:[#allocation5 + $0xbd0] sm:$0xff] }
 0x22d   :  { %4815 = vmatpush1.bf16.msra.mxu1 %v9946_v34  ;;  %4364 = vmatprep.subr.bf16.mxu0 %v9953_v35  ;;  %v10002_v34 = vcombine.low %v535_v22, %v539_v23  ;;  %v10009_v35 = vcombine.high %v542_v29, %v546_v30  ;;  %v591_v22 = vld [vmem:[#allocation5 + $0xbd8] sm:$0xff] }
 0x22e   :  { %4816 = vmatprep.subr.bf16.mxu1 %v9955_v37  ;;  %v550_v37 = vld [vmem:[#allocation5 + $0xa90] sm:$0xff]  ;;  %v595_v23 = vld [vmem:[#allocation5 + $0xbf8] sm:$0xff] }
 0x22f   :  { %4290 = vmatmul.mubr.bf16.gmra.mrb[36].mxu0 %v12293_v48 }
 0x230   :  { %4742 = vmatmul.mubr.bf16.gmra.mrb[36].mxu1 %v12293_v48  ;;  %4365 = vmatpush1.bf16.msra.mxu0 %v9952_v42  ;;  %v10008_v42 = vcombine.low %v542_v29, %v546_v30  ;;  %v562_v48 = vld [vmem:[#allocation5 + $0xaf0] sm:$0xff] }
 0x231   :  { %4817 = vmatpush1.bf16.msra.mxu1 %v9954_v43  ;;  %4366 = vmatprep.subr.bf16.mxu0 %v9961_v44  ;;  %v10010_v43 = vcombine.low %v543_v31, %v547_v32  ;;  %v10017_v44 = vcombine.high %v550_v37, %v554_v38  ;;  %v602_v29 = vld [vmem:[#allocation5 + $0xc30] sm:$0xff]  ;;  %v599_v31 = vld [vmem:[#allocation5 + $0xc18] sm:$0xff] }
 0x232   :  { %4818 = vmatprep.subr.bf16.mxu1 %v9963_v45  ;;  %4299 = vmatprep.mubr.bf16.mxu0 %v12294_v55  ;;  %v12300_v45 = vld [vmem:[#allocation2 + $0x124] ss:$28 sps:$4 sm:$0xff]   ;;  %v12305_v30 = vld [vmem:[#allocation2 + $0x190] ss:$28 sps:$4 sm:$0xff]   ;;  %v603_v32 = vld [vmem:[#allocation5 + $0xc38] sm:$0xff] }
 0x233   :  { %4751 = vmatprep.mubr.bf16.mxu1 %v12294_v55  ;;  %v10027_v55 = vcombine.high %v559_v49, %v563_v50 }
 0x234   :  { %4367 = vmatpush1.bf16.msra.mxu0 %v9960_v51  ;;  %v10016_v51 = vcombine.low %v550_v37, %v554_v38  ;;  %v10067_v37 = vcombine.high %v599_v31, %v603_v32  ;;  %v606_v38 = vld [vmem:[#allocation5 + $0xc50] sm:$0xff] }
 0x235   :  { %4819 = vmatpush1.bf16.msra.mxu1 %v9962_v52  ;;  %4368 = vmatprep.subr.bf16.mxu0 %v9969_v53  ;;  %v10018_v52 = vcombine.low %v551_v40, %v555_v41  ;;  %v10025_v53 = vcombine.high %v558_v47, %v562_v48  ;;  %v607_v41 = vld [vmem:[#allocation5 + $0xc58] sm:$0xff] }
 0x236   :  { %4820 = vmatprep.subr.bf16.mxu1 %v9971_v56  ;;  %v566_v56 = vld [vmem:[#allocation5 + $0xb10] sm:$0xff] }
 0x237   :  { %4300 = vmatmul.mubr.bf16.gmra.mrb[40].mxu0 %v12295_v3 }
 0x238   :  { %4752 = vmatmul.mubr.bf16.gmra.mrb[40].mxu1 %v12295_v3  ;;  %4369 = vmatpush1.bf16.msra.mxu0 %v9968_v61  ;;  %v10024_v61 = vcombine.low %v558_v47, %v562_v48  ;;  %v578_v3 = vld [vmem:[#allocation5 + $0xb70] sm:$0xff] }
 0x239   :  { %4821 = vmatpush1.bf16.msra.mxu1 %v9970_v62  ;;  %4370 = vmatprep.subr.bf16.mxu0 %v9977_v63  ;;  %v10026_v62 = vcombine.low %v559_v49, %v563_v50  ;;  %v10033_v63 = vcombine.high %v566_v56, %v570_v57  ;;  %v12307_v47 = vld [vmem:[#allocation2 + $0x10] ss:$28 sps:$4 sm:$0xff]   ;;  %v615_v50 = vld [vmem:[#allocation5 + $0xc98] sm:$0xff] }
 0x23a   :  { %4822 = vmatprep.subr.bf16.mxu1 %v9979_v0  ;;  %4309 = vmatprep.mubr.bf16.mxu0 %v12296_v9  ;;  %v12302_v0 = vld [vmem:[#allocation2 + $0x15c] ss:$28 sps:$4 sm:$0xff]  }
 0x23b   :  { %4761 = vmatprep.mubr.bf16.mxu1 %v12296_v9  ;;  %v10043_v9 = vcombine.high %v575_v4, %v579_v5 }
 0x23c   :  { %4371 = vmatpush1.bf16.msra.mxu0 %v9976_v6  ;;  %v10032_v6 = vcombine.low %v566_v56, %v570_v57  ;;  %v662_v56 = vlaneseq  ;;  %v622_v57 = vld [vmem:[#allocation5 + $0xcd0] sm:$0xff] }
 0x23d   :  { %4823 = vmatpush1.bf16.msra.mxu1 %v9978_v7  ;;  %4372 = vmatprep.subr.bf16.mxu0 %v9985_v8  ;;  %v10034_v7 = vcombine.low %v567_v59, %v571_v60  ;;  %v10041_v8 = vcombine.high %v574_v2, %v578_v3  ;;  %v623_v60 = vld [vmem:[#allocation5 + $0xcd8] sm:$0xff] }
 0x23e   :  { %4824 = vmatprep.subr.bf16.mxu1 %v9987_v10  ;;  %v582_v10 = vld [vmem:[#allocation5 + $0xb90] sm:$0xff] }
 0x23f   :  { %4310 = vmatmul.mubr.bf16.gmra.mrb[44].mxu0 %v12297_v21 }
 0x240   :  { %4762 = vmatmul.mubr.bf16.gmra.mrb[44].mxu1 %v12297_v21  ;;  %4373 = vmatpush1.bf16.msra.mxu0 %v9984_v15  ;;  %v10040_v15 = vcombine.low %v574_v2, %v578_v3  ;;  %v594_v21 = vld [vmem:[#allocation5 + $0xbf0] sm:$0xff]  ;;  %v12773_v2 = vshrl.u32 %v662_v56, 7 }
 0x241   :  { %4825 = vmatpush1.bf16.msra.mxu1 %v9986_v16  ;;  %4374 = vmatprep.subr.bf16.mxu0 %v9993_v17  ;;  %v10042_v16 = vcombine.low %v575_v4, %v579_v5  ;;  %v10049_v17 = vcombine.high %v582_v10, %v586_v11  ;;  %v630_v3 = vld [vmem:[#allocation5 + $0xd10] sm:$0xff] }
 0x242   :  { %4826 = vmatprep.subr.bf16.mxu1 %v9995_v18  ;;  %4319 = vmatprep.mubr.bf16.mxu0 %v12298_v27  ;;  %v12304_v18 = vld [vmem:[#allocation2 + $0x194] ss:$28 sps:$4 sm:$0xff]  }
 0x243   :  { %4771 = vmatprep.mubr.bf16.mxu1 %v12298_v27  ;;  %v10059_v27 = vcombine.high %v591_v22, %v595_v23  ;;  %v634_v4 = vld [vmem:[#allocation5 + $0xd30] sm:$0xff] }
 0x244   :  { %4375 = vmatpush1.bf16.msra.mxu0 %v9992_v24  ;;  %v10048_v24 = vcombine.low %v582_v10, %v586_v11  ;;  %v10097_v10 = vcombine.high %v630_v3, %v634_v4 }
 0x245   :  { %4827 = vmatpush1.bf16.msra.mxu1 %v9994_v25  ;;  %4376 = vmatprep.subr.bf16.mxu0 %v10001_v26  ;;  %v10050_v25 = vcombine.low %v583_v13, %v587_v14  ;;  %v10057_v26 = vcombine.high %v590_v20, %v594_v21  ;;  %v638_v13 = vld [vmem:[#allocation5 + $0xd50] sm:$0xff] }
 0x246   :  { %4828 = vmatprep.subr.bf16.mxu1 %v10003_v28  ;;  %v598_v28 = vld [vmem:[#allocation5 + $0xc10] sm:$0xff] }
 0x247   :  { %4320 = vmatmul.mubr.bf16.gmra.mrb[48].mxu0 %v12299_v39  ;;  %v10064_v40 = vcombine.low %v598_v28, %v602_v29  ;;  %v642_v14 = vld [vmem:[#allocation5 + $0xd70] sm:$0xff] }
 0x248   :  { %4772 = vmatmul.mubr.bf16.gmra.mrb[48].mxu1 %v12299_v39  ;;  %4377 = vmatpush1.bf16.msra.mxu0 %v10000_v33  ;;  %v10056_v33 = vcombine.low %v590_v20, %v594_v21  ;;  %v610_v39 = vld [vmem:[#allocation5 + $0xc70] sm:$0xff]  ;;  %v643_v20 = vld [vmem:[#allocation5 + $0xd78] sm:$0xff]  ;;  %v12785_v21 = vsub.s32 3, %v12773_v2 }
 0x249   :  { %4829 = vmatpush1.bf16.msra.mxu1 %v10002_v34  ;;  %4378 = vmatprep.subr.bf16.mxu0 %v10009_v35  ;;  %v10058_v34 = vcombine.low %v591_v22, %v595_v23  ;;  %v10065_v35 = vcombine.high %v598_v28, %v602_v29  ;;  %v10072_v49 = vcombine.low %v606_v38, %v610_v39  ;;  %v12792_v28 = vld [vmem:[#allocation5 + $0xdb0] sm:$0xff] }
 0x24a   :  { %4830 = vmatprep.subr.bf16.mxu1 %v10011_v36  ;;  %4329 = vmatprep.mubr.bf16.mxu0 %v12300_v45  ;;  %v12306_v36 = vld [vmem:[#allocation2 + $0x14] ss:$28 sps:$4 sm:$0xff]   ;;  %v10096_v22 = vcombine.low %v630_v3, %v634_v4  ;;  %v10105_v23 = vcombine.high %v638_v13, %v642_v14 }
 0x24b   :  { %4781 = vmatprep.mubr.bf16.mxu1 %v12300_v45  ;;  %v618_v45 = vld [vmem:[#allocation5 + $0xcb0] sm:$0xff] }
 0x24c   :  { %4379 = vmatpush1.bf16.msra.mxu0 %v10008_v42  ;;  %v611_v42 = vld [vmem:[#allocation5 + $0xc78] sm:$0xff] }
 0x24d   :  { %4831 = vmatpush1.bf16.msra.mxu1 %v10010_v43  ;;  %4380 = vmatprep.subr.bf16.mxu0 %v10017_v44  ;;  %v10073_v43 = vcombine.high %v606_v38, %v610_v39  ;;  %v614_v44 = vld [vmem:[#allocation5 + $0xc90] sm:$0xff]  ;;  %v10075_v48 = vcombine.high %v607_v41, %v611_v42 }
 0x24e   :  { %4832 = vmatprep.subr.bf16.mxu1 %v10019_v46  ;;  %v10066_v46 = vcombine.low %v599_v31, %v603_v32  ;;  %v12312_v32 = vld [vmem:[#allocation2 + $0xbc] ss:$28 sps:$4 sm:$0xff]  }
 0x24f   :  { %4330 = vmatmul.mubr.bf16.gmra.mrb[52].mxu0 %v12301_v58  ;;  %v12313_v3 = vld [vmem:[#allocation2 + $0xb8] ss:$28 sps:$4 sm:$0xff]  }
 0x250   :  { %4782 = vmatmul.mubr.bf16.gmra.mrb[52].mxu1 %v12301_v58  ;;  %4381 = vmatpush1.bf16.msra.mxu0 %v10016_v51  ;;  %v619_v51 = vld [vmem:[#allocation5 + $0xcb8] sm:$0xff]  ;;  %v626_v58 = vld [vmem:[#allocation5 + $0xcf0] sm:$0xff] }
 0x251   :  { %4833 = vmatpush1.bf16.msra.mxu1 %v10018_v52  ;;  %4382 = vmatprep.subr.bf16.mxu0 %v10025_v53  ;;  %v12308_v52 = vld [vmem:[#allocation2 + $0x4c] ss:$28 sps:$4 sm:$0xff]   ;;  %v10081_v53 = vcombine.high %v614_v44, %v618_v45  ;;  %v10083_v59 = vcombine.high %v615_v50, %v619_v51 }
 0x252   :  { %4834 = vmatprep.subr.bf16.mxu1 %v10027_v55  ;;  %4339 = vmatprep.mubr.bf16.mxu0 %v12302_v0  ;;  %v10074_v55 = vcombine.low %v607_v41, %v611_v42 }
 0x253   :  { %4791 = vmatprep.mubr.bf16.mxu1 %v12302_v0  ;;  %v10082_v0 = vcombine.low %v615_v50, %v619_v51  ;;  %v655_v50 = vld [vmem:[#allocation5 + $0xdd8] sm:$0xff] }
 0x254   :  { %4383 = vmatpush1.bf16.msra.mxu0 %v10024_v61  ;;  %v627_v61 = vld [vmem:[#allocation5 + $0xcf8] sm:$0xff] }
 0x255   :  { %4835 = vmatpush1.bf16.msra.mxu1 %v10026_v62  ;;  %4384 = vmatprep.subr.bf16.mxu0 %v10033_v63  ;;  %v10080_v62 = vcombine.low %v614_v44, %v618_v45  ;;  %v10089_v63 = vcombine.high %v622_v57, %v626_v58  ;;  %v10091_v5 = vcombine.high %v623_v60, %v627_v61  ;;  %v658_v44 = vld [vmem:[#allocation5 + $0xdf0] sm:$0xff]  ;;  %v659_v51 = vld [vmem:[#allocation5 + $0xdf8] sm:$0xff] }
 0x256   :  { %4836 = vmatprep.subr.bf16.mxu1 %v10035_v1  ;;  %v12309_v1 = vld [vmem:[#allocation2 + $0x48] ss:$28 sps:$4 sm:$0xff]   ;;  %v10090_v11 = vcombine.low %v623_v60, %v627_v61  ;;  %v10123_v4 = vcombine.high %v655_v50, %v659_v51 }
 0x257   :  { %4340 = vmatmul.mubr.bf16.gmra.mrb[56].mxu0 %v12303_v12 }
 0x258   :  { %4792 = vmatmul.mubr.bf16.gmra.mrb[56].mxu1 %v12303_v12  ;;  %4385 = vmatpush1.bf16.msra.mxu0 %v10032_v6  ;;  %v12310_v6 = vld [vmem:[#allocation2 + $0x84] ss:$28 sps:$4 sm:$0xff]   ;;  %v12776_v12 = vsub.s32 0, %v12773_v2 }
 0x259   :  { %4837 = vmatpush1.bf16.msra.mxu1 %v10034_v7  ;;  %4386 = vmatprep.subr.bf16.mxu0 %v10041_v8  ;;  %v631_v7 = vld [vmem:[#allocation5 + $0xd18] sm:$0xff] }
 0x25a   :  { %4838 = vmatprep.subr.bf16.mxu1 %v10043_v9  ;;  %4349 = vmatprep.mubr.bf16.mxu0 %v12304_v18  ;;  %v635_v8 = vld [vmem:[#allocation5 + $0xd38] sm:$0xff]  ;;  %v10088_v9 = vcombine.low %v622_v57, %v626_v58 }
 0x25b   :  { %4801 = vmatprep.mubr.bf16.mxu1 %v12304_v18  ;;  %v12782_v18 = vsub.s32 1, %v12773_v2 }
 0x25c   :  { %4387 = vmatpush1.bf16.msra.mxu0 %v10040_v15  ;;  %v10099_v15 = vcombine.high %v631_v7, %v635_v8 }
 0x25d   :  { %4839 = vmatpush1.bf16.msra.mxu1 %v10042_v16  ;;  %4388 = vmatprep.subr.bf16.mxu0 %v10049_v17  ;;  %v660_v16 = vld [vmem:[#allocation7] sm:$0xff]  ;;  %v12779_v17 = vsub.s32 2, %v12773_v2 }
 0x25e   :  { %4840 = vmatprep.subr.bf16.mxu1 %v10051_v19  ;;  %v639_v19 = vld [vmem:[#allocation5 + $0xd58] sm:$0xff]  ;;  %v12798_v31 = vrot.slane %v660_v16, %v12782_v18 }
 0x25f   :  { %4350 = vmatmul.mubr.bf16.gmra.mrb[60].mxu0 %v12305_v30  ;;  %v10107_v29 = vcombine.high %v639_v19, %v643_v20  ;;  %v10106_v39 = vcombine.low %v639_v19, %v643_v20  ;;  %v10122_v20 = vcombine.low %v655_v50, %v659_v51  ;;  %v12316_v51 = vld [vmem:[#allocation2 + $0x12c] ss:$28 sps:$4 sm:$0xff]  }
 0x260   :  { %4802 = vmatmul.mubr.bf16.gmra.mrb[60].mxu1 %v12305_v30  ;;  %4389 = vmatpush1.bf16.msra.mxu0 %v10048_v24  ;;  %v10098_v24 = vcombine.low %v631_v7, %v635_v8  ;;  %v12795_v30 = vrot.slane %v660_v16, %v12779_v17 }
 0x261   :  { %4841 = vmatpush1.bf16.msra.mxu1 %v10050_v25  ;;  %4390 = vmatprep.subr.bf16.mxu0 %v10057_v26  ;;  %v12311_v25 = vld [vmem:[#allocation2 + $0x80] ss:$28 sps:$4 sm:$0xff]   ;;  %v12788_v26 = vrot.slane %v660_v16, %v12776_v12 }
 0x262   :  { %4842 = vmatprep.subr.bf16.mxu1 %v10059_v27  ;;  %4392 = vmatprep.mubr.bf16.mxu0 %v12306_v36  ;;  %v12790_v27 = vld [vmem:[#allocation5 + $0xd90] sm:$0xff] }
 0x263   :  { %4844 = vmatprep.mubr.bf16.mxu1 %v12306_v36  ;;  %v10104_v36 = vcombine.low %v638_v13, %v642_v14  ;;  %v10113_v38 = vcombine.high %v12790_v27, %v12792_v28  ;;  %v10112_v57 = vcombine.low %v12790_v27, %v12792_v28  ;;  %v11671_v28 = vld [vmem:[#allocation8 + $0xc] ss:$16 sps:$4 sm:$0xff]  }
 0x264   :  { %4391 = vmatpush1.bf16.msra.mxu0 %v10056_v33  ;;  %v647_v33 = vld [vmem:[#allocation5 + $0xd98] sm:$0xff] }
 0x265   :  { %4843 = vmatpush1.bf16.msra.mxu1 %v10058_v34  ;;  %4473 = vmatprep.subr.bf16.mxu0 %v10065_v35  ;;  %v651_v34 = vld [vmem:[#allocation5 + $0xdb8] sm:$0xff]  ;;  %v12801_v35 = vrot.slane %v660_v16, %v12785_v21 }
 0x266   :  { %4925 = vmatprep.subr.bf16.mxu1 %v10067_v37  ;;  %v10115_v45 = vcombine.high %v647_v33, %v651_v34  ;;  %v10114_v58 = vcombine.low %v647_v33, %v651_v34 }
 0x267   :  { %4393 = vmatmul.mubr.bf16.vlgmr.msra.gmra.mrb[32].mxu0 %v12307_v47 }
 0x268   :  { %4845 = vmatmul.mubr.bf16.vlgmr.msra.gmra.mrb[32].mxu1 %v12307_v47  ;;  %4474 = vmatpush1.bf16.msra.mxu0 %v10064_v40 }
 0x269   :  { %4402 = vmatprep.mubr.bf16.mxu0 %v12308_v52  ;;  %4854 = vmatprep.mubr.bf16.mxu1 %v12308_v52 }
 0x26a   :  { %4475 = vmatprep.subr.bf16.mxu0 %v10073_v43  ;;  %4926 = vmatpush1.bf16.msra.mxu1 %v10066_v46  ;;  %v12806_v43 = vld [vmem:[#allocation5 + $0xdd0] sm:$0xff] }
 0x26b   :  { %4927 = vmatprep.subr.bf16.mxu1 %v10075_v48  ;;  %v10120_v14 = vcombine.low %v12806_v43, %v658_v44 }
 0x26c   :  { %4476 = vmatpush1.bf16.msra.mxu0 %v10072_v49 }
 0x26d   :  { %4477 = vmatprep.subr.bf16.mxu0 %v10081_v53 }
 0x26e   :  { %4928 = vmatpush1.bf16.msra.mxu1 %v10074_v55 }
 0x26f   :  { %4403 = vmatmul.mubr.bf16.gmra.mrb[36].mxu0 %v12309_v1  ;;  %4929 = vmatprep.subr.bf16.mxu1 %v10083_v59 }
 0x270   :  { %4855 = vmatmul.mubr.bf16.gmra.mrb[36].mxu1 %v12309_v1  ;;  %4412 = vmatprep.mubr.bf16.mxu0 %v12310_v6 }
 0x271   :  { %4864 = vmatprep.mubr.bf16.mxu1 %v12310_v6  ;;  %4478 = vmatpush1.bf16.msra.mxu0 %v10080_v62  ;;  %v10121_v62 = vcombine.high %v12806_v43, %v658_v44 }
 0x272   :  { %4479 = vmatprep.subr.bf16.mxu0 %v10089_v63  ;;  %4930 = vmatpush1.bf16.msra.mxu1 %v10082_v0 }
 0x273   :  { %4931 = vmatprep.subr.bf16.mxu1 %v10091_v5 }
 0x275   :  { %4480 = vmatpush1.bf16.msra.mxu0 %v10088_v9  ;;  %v12314_v9 = vld [vmem:[#allocation2 + $0xf4] ss:$28 sps:$4 sm:$0xff]  }
 0x276   :  { %4481 = vmatprep.subr.bf16.mxu0 %v10097_v10  ;;  %4932 = vmatpush1.bf16.msra.mxu1 %v10090_v11 }
 0x277   :  { %4413 = vmatmul.mubr.bf16.gmra.mrb[40].mxu0 %v12311_v25  ;;  %4933 = vmatprep.subr.bf16.mxu1 %v10099_v15 }
 0x278   :  { %4865 = vmatmul.mubr.bf16.gmra.mrb[40].mxu1 %v12311_v25  ;;  %4422 = vmatprep.mubr.bf16.mxu0 %v12312_v32 }
 0x279   :  { %4874 = vmatprep.mubr.bf16.mxu1 %v12312_v32  ;;  %4482 = vmatpush1.bf16.msra.mxu0 %v10096_v22  ;;  %v11668_v22 = vld [vmem:[#allocation8 + $0x4] ss:$16 sps:$4 sm:$0xff]  }
 0x27a   :  { %v3603_v37 = vpop.f32.mrb[0].mxu0  ;;  %4483 = vmatprep.subr.bf16.mxu0 %v10105_v23  ;;  %4934 = vmatpush1.bf16.msra.mxu1 %v10098_v24 }
 0x27b   :  { %v10669_v40 = vadd.f32 %v3603_v37, %v12788_v26  ;;  %v4055_v41 = vpop.f32.mrb[0].mxu1  ;;  %v3605_v42 = vpop.f32.mrb[1].mxu0  ;;  %4935 = vmatprep.subr.bf16.mxu1 %v10107_v29 }
 0x27c   :  { %v10701_v46 = vadd.f32 %v4055_v41, %v12795_v30  ;;  %v10670_v47 = vadd.f32 %v3605_v42, %v12798_v31  ;;  %v4057_v48 = vpop.f32.mrb[1].mxu1  ;;  %v3607_v49 = vpop.f32.mrb[2].mxu0 }
 0x27d   :  { %v10702_v52 = vadd.f32 %v4057_v48, %v12801_v35  ;;  %v10671_v53 = vadd.f32 %v3607_v49, %v12788_v26  ;;  %v4059_v55 = vpop.f32.mrb[2].mxu1  ;;  %v3609_v56 = vpop.f32.mrb[3].mxu0  ;;  %4484 = vmatpush1.bf16.msra.mxu0 %v10104_v36  ;;  %v5038_v63 = vmax.f32 %v10669_v40, 0.0 }
 0x27e   :  { %v10703_v59 = vadd.f32 %v4059_v55, %v12795_v30  ;;  %v10672_v60 = vadd.f32 %v3609_v56, %v12798_v31  ;;  %v4061_v61 = vpop.f32.mrb[3].mxu1  ;;  %4485 = vmatprep.subr.bf16.mxu0 %v10113_v38  ;;  %4936 = vmatpush1.bf16.msra.mxu1 %v10106_v39  ;;  %v5040_v5 = vmax.f32 %v10701_v46, 0.0  ;;  %v5039_v6 = vmax.f32 %v10670_v47, 0.0  ;;  %v12315_v46 = vld [vmem:[#allocation2 + $0xf0] ss:$28 sps:$4 sm:$0xff]  }
 0x27f   :  { %v5046_v0 = vmax.f32 %v10671_v53, 0.0  ;;  %v10704_v1 = vadd.f32 %v4061_v61, %v12801_v35  ;;  %4423 = vmatmul.mubr.bf16.gmra.mrb[44].mxu0 %v12313_v3  ;;  %4937 = vmatprep.subr.bf16.mxu1 %v10115_v45  ;;  %v5041_v10 = vmax.f32 %v10702_v52, 0.0 }
 0x280   :  { %v5048_v7 = vmax.f32 %v10703_v59, 0.0  ;;  %v5047_v8 = vmax.f32 %v10672_v60, 0.0  ;;  %4875 = vmatmul.mubr.bf16.gmra.mrb[44].mxu1 %v12313_v3  ;;  %4432 = vmatprep.mubr.bf16.mxu0 %v12314_v9 }
 0x281   :  { %v12818_v11 = vpack.c.bf16 %v5046_v0, %v5038_v63  ;;  %v5049_v13 = vmax.f32 %v10704_v1, 0.0  ;;  %4884 = vmatprep.mubr.bf16.mxu1 %v12314_v9  ;;  %4486 = vmatpush1.bf16.msra.mxu0 %v10112_v57 }
 0x282   :  { %v12821_v15 = vpack.c.bf16 %v5048_v7, %v5040_v5  ;;  %v12823_v16 = vpack.c.bf16 %v5047_v8, %v5039_v6  ;;  %v3613_v19 = vpop.f32.mrb[4].mxu0  ;;  %4487 = vmatprep.subr.bf16.mxu0 %v10121_v62  ;;  %4938 = vmatpush1.bf16.msra.mxu1 %v10114_v58 }
 0x283   :  { %v12825_v23 = vpack.c.bf16 %v5049_v13, %v5041_v10  ;;  %v10673_v24 = vadd.f32 %v3613_v19, %v12788_v26  ;;  %v4065_v25 = vpop.f32.mrb[4].mxu1  ;;  %v3615_v27 = vpop.f32.mrb[5].mxu0  ;;  %4939 = vmatprep.subr.bf16.mxu1 %v10123_v4 }
 0x284   :  { %v10705_v29 = vadd.f32 %v4065_v25, %v12795_v30  ;;  %v10674_v32 = vadd.f32 %v3615_v27, %v12798_v31  ;;  %v4067_v33 = vpop.f32.mrb[5].mxu1  ;;  %v3617_v34 = vpop.f32.mrb[6].mxu0 }
 0x285   :  { %v10706_v36 = vadd.f32 %v4067_v33, %v12801_v35  ;;  %v10675_v37 = vadd.f32 %v3617_v34, %v12788_v26  ;;  %v4069_v38 = vpop.f32.mrb[6].mxu1  ;;  %v3619_v39 = vpop.f32.mrb[7].mxu0  ;;  %4488 = vmatpush1.bf16.msra.mxu0 %v10120_v14  ;;  %v5054_v43 = vmax.f32 %v10673_v24, 0.0 }
 0x286   :  { %v10707_v40 = vadd.f32 %v4069_v38, %v12795_v30  ;;  %v10676_v41 = vadd.f32 %v3619_v39, %v12798_v31  ;;  %v4071_v42 = vpop.f32.mrb[7].mxu1  ;;  %4940 = vmatpush1.bf16.msra.mxu1 %v10122_v20  ;;  %6788 = vmatprep.subr.bf16.mxu0 %v11668_v22  ;;  %v5056_v47 = vmax.f32 %v10705_v29, 0.0  ;;  %v5055_v48 = vmax.f32 %v10674_v32, 0.0  ;;  %v12317_v20 = vld [vmem:[#allocation2 + $0x128] ss:$28 sps:$4 sm:$0xff]  }
 0x287   :  { %v5062_v44 = vmax.f32 %v10675_v37, 0.0  ;;  %v10708_v45 = vadd.f32 %v4071_v42, %v12801_v35  ;;  %4433 = vmatmul.mubr.bf16.gmra.mrb[48].mxu0 %v12315_v46  ;;  %7240 = vmatprep.subr.bf16.mxu1 %v11671_v28  ;;  %v5057_v52 = vmax.f32 %v10706_v36, 0.0  ;;  %v12318_v28 = vld [vmem:[#allocation2 + $0x164] ss:$28 sps:$4 sm:$0xff]  }
 0x288   :  { %v5064_v49 = vmax.f32 %v10707_v40, 0.0  ;;  %v5063_v50 = vmax.f32 %v10676_v41, 0.0  ;;  %4885 = vmatmul.mubr.bf16.gmra.mrb[48].mxu1 %v12315_v46  ;;  %4442 = vmatprep.mubr.bf16.mxu0 %v12316_v51 }
 0x289   :  { %v12835_v53 = vpack.c.bf16 %v5062_v44, %v5054_v43  ;;  %v5065_v55 = vmax.f32 %v10708_v45, 0.0  ;;  %4894 = vmatprep.mubr.bf16.mxu1 %v12316_v51 }
 0x28a   :  { %v12837_v56 = vpack.c.bf16 %v5064_v49, %v5056_v47  ;;  %v12839_v57 = vpack.c.bf16 %v5063_v50, %v5055_v48  ;;  %v3623_v58 = vpop.f32.mrb[8].mxu0 }
 0x28b   :  { %v12841_v59 = vpack.c.bf16 %v5065_v55, %v5057_v52  ;;  %v10677_v60 = vadd.f32 %v3623_v58, %v12788_v26  ;;  %v4075_v61 = vpop.f32.mrb[8].mxu1  ;;  %v3625_v62 = vpop.f32.mrb[9].mxu0 }
 0x28c   :  { %v10709_v63 = vadd.f32 %v4075_v61, %v12795_v30  ;;  %v10678_v0 = vadd.f32 %v3625_v62, %v12798_v31  ;;  %v4077_v1 = vpop.f32.mrb[9].mxu1  ;;  %v3627_v3 = vpop.f32.mrb[10].mxu0  ;;  %v12319_v61 = vld [vmem:[#allocation2 + $0x160] ss:$28 sps:$4 sm:$0xff]  }
 0x28d   :  { %v10710_v4 = vadd.f32 %v4077_v1, %v12801_v35  ;;  %v10679_v5 = vadd.f32 %v3627_v3, %v12788_v26  ;;  %v4079_v6 = vpop.f32.mrb[10].mxu1  ;;  %v3629_v7 = vpop.f32.mrb[11].mxu0  ;;  %v5070_v13 = vmax.f32 %v10677_v60, 0.0  ;;  %v12320_v3 = vld [vmem:[#allocation2 + $0x19c] ss:$28 sps:$4 sm:$0xff]  }
 0x28e   :  { %v10711_v8 = vadd.f32 %v4079_v6, %v12795_v30  ;;  %v10680_v9 = vadd.f32 %v3629_v7, %v12798_v31  ;;  %v4081_v10 = vpop.f32.mrb[11].mxu1  ;;  %v5072_v22 = vmax.f32 %v10709_v63, 0.0  ;;  %v5071_v24 = vmax.f32 %v10678_v0, 0.0 }
 0x28f   :  { %v5078_v14 = vmax.f32 %v10679_v5, 0.0  ;;  %v10712_v19 = vadd.f32 %v4081_v10, %v12801_v35  ;;  %4443 = vmatmul.mubr.bf16.gmra.mrb[52].mxu0 %v12317_v20  ;;  %v5073_v29 = vmax.f32 %v10710_v4, 0.0 }
 0x290   :  { %v5080_v25 = vmax.f32 %v10711_v8, 0.0  ;;  %v5079_v27 = vmax.f32 %v10680_v9, 0.0  ;;  %4895 = vmatmul.mubr.bf16.gmra.mrb[52].mxu1 %v12317_v20  ;;  %4452 = vmatprep.mubr.bf16.mxu0 %v12318_v28 }
 0x291   :  { %v12851_v32 = vpack.c.bf16 %v5078_v14, %v5070_v13  ;;  %v5081_v33 = vmax.f32 %v10712_v19, 0.0  ;;  %4904 = vmatprep.mubr.bf16.mxu1 %v12318_v28 }
 0x292   :  { %v12853_v34 = vpack.c.bf16 %v5080_v25, %v5072_v22  ;;  %v12855_v36 = vpack.c.bf16 %v5079_v27, %v5071_v24  ;;  %v3633_v37 = vpop.f32.mrb[12].mxu0 }
 0x293   :  { %v12857_v38 = vpack.c.bf16 %v5081_v33, %v5073_v29  ;;  %v10681_v39 = vadd.f32 %v3633_v37, %v12788_v26  ;;  %v4085_v40 = vpop.f32.mrb[12].mxu1  ;;  %v3635_v41 = vpop.f32.mrb[13].mxu0 }
 0x294   :  { %v10713_v42 = vadd.f32 %v4085_v40, %v12795_v30  ;;  %v10682_v43 = vadd.f32 %v3635_v41, %v12798_v31  ;;  %v4087_v44 = vpop.f32.mrb[13].mxu1  ;;  %v3637_v45 = vpop.f32.mrb[14].mxu0 }
 0x295   :  { %v10714_v46 = vadd.f32 %v4087_v44, %v12801_v35  ;;  %v10683_v47 = vadd.f32 %v3637_v45, %v12788_v26  ;;  %v4089_v48 = vpop.f32.mrb[14].mxu1  ;;  %v3639_v49 = vpop.f32.mrb[15].mxu0  ;;  %v5086_v55 = vmax.f32 %v10681_v39, 0.0  ;;  %v12321_v44 = vld [vmem:[#allocation2 + $0x198] ss:$28 sps:$4 sm:$0xff]  }
 0x296   :  { %v10715_v50 = vadd.f32 %v4089_v48, %v12795_v30  ;;  %v10684_v51 = vadd.f32 %v3639_v49, %v12798_v31  ;;  %v4091_v52 = vpop.f32.mrb[15].mxu1  ;;  %v5088_v62 = vmax.f32 %v10713_v42, 0.0  ;;  %v5087_v63 = vmax.f32 %v10682_v43, 0.0 }
 0x297   :  { %v5094_v58 = vmax.f32 %v10683_v47, 0.0  ;;  %v10716_v60 = vadd.f32 %v4091_v52, %v12801_v35  ;;  %4453 = vmatmul.mubr.bf16.gmra.mrb[56].mxu0 %v12319_v61  ;;  %v5089_v4 = vmax.f32 %v10714_v46, 0.0 }
 0x298   :  { %v5096_v0 = vmax.f32 %v10715_v50, 0.0  ;;  %v5095_v1 = vmax.f32 %v10684_v51, 0.0  ;;  %4905 = vmatmul.mubr.bf16.gmra.mrb[56].mxu1 %v12319_v61  ;;  %4462 = vmatprep.mubr.bf16.mxu0 %v12320_v3 }
 0x299   :  { %v12867_v5 = vpack.c.bf16 %v5094_v58, %v5086_v55  ;;  %v5097_v6 = vmax.f32 %v10716_v60, 0.0  ;;  %4914 = vmatprep.mubr.bf16.mxu1 %v12320_v3 }
 0x29a   :  { %v12869_v7 = vpack.c.bf16 %v5096_v0, %v5088_v62  ;;  %v12871_v8 = vpack.c.bf16 %v5095_v1, %v5087_v63  ;;  %v3643_v9 = vpop.f32.mrb[16].mxu0 }
 0x29b   :  { %v12873_v10 = vpack.c.bf16 %v5097_v6, %v5089_v4  ;;  %v10685_v13 = vadd.f32 %v3643_v9, %v12788_v26  ;;  %v4095_v14 = vpop.f32.mrb[16].mxu1  ;;  %v3645_v19 = vpop.f32.mrb[17].mxu0  ;;  %v11666_v6 = vld [vmem:[#allocation8] ss:$16 sps:$4 sm:$0xff]  }
 0x29c   :  { %v10717_v20 = vadd.f32 %v4095_v14, %v12795_v30  ;;  %v10686_v22 = vadd.f32 %v3645_v19, %v12798_v31  ;;  %v4097_v24 = vpop.f32.mrb[17].mxu1  ;;  %v3647_v25 = vpop.f32.mrb[18].mxu0 }
 0x29d   :  { %v10718_v27 = vadd.f32 %v4097_v24, %v12801_v35  ;;  %v10687_v28 = vadd.f32 %v3647_v25, %v12788_v26  ;;  %v4099_v29 = vpop.f32.mrb[18].mxu1  ;;  %v3649_v33 = vpop.f32.mrb[19].mxu0  ;;  %v5102_v41 = vmax.f32 %v10685_v13, 0.0 }
 0x29e   :  { %v10719_v37 = vadd.f32 %v4099_v29, %v12795_v30  ;;  %v10688_v39 = vadd.f32 %v3649_v33, %v12798_v31  ;;  %v4101_v40 = vpop.f32.mrb[19].mxu1  ;;  %v5104_v45 = vmax.f32 %v10717_v20, 0.0  ;;  %v5103_v46 = vmax.f32 %v10686_v22, 0.0  ;;  %v11669_v20 = vld [vmem:[#allocation8 + $0x8] ss:$16 sps:$4 sm:$0xff]  }
 0x29f   :  { %v5110_v42 = vmax.f32 %v10687_v28, 0.0  ;;  %v10720_v43 = vadd.f32 %v4101_v40, %v12801_v35  ;;  %4463 = vmatmul.mubr.bf16.gmra.mrb[60].mxu0 %v12321_v44  ;;  %v5105_v49 = vmax.f32 %v10718_v27, 0.0  ;;  %v11674_v22 = vld [vmem:[#allocation8 + $0x24] ss:$16 sps:$4 sm:$0xff]   ;;  %v11677_v28 = vld [vmem:[#allocation8 + $0x2c] ss:$16 sps:$4 sm:$0xff]  }
 0x2a0   :  { %v5112_v47 = vmax.f32 %v10719_v37, 0.0  ;;  %v5111_v48 = vmax.f32 %v10688_v39, 0.0  ;;  %4915 = vmatmul.mubr.bf16.gmra.mrb[60].mxu1 %v12321_v44  ;;  %4505 = vmatprep.mubr.bf16.mxu0 %v12580_v54  ;;  %v12322_v39 = vld [vmem:[#allocation2 + $0x18] ss:$28 sps:$4 sm:$0xff]  }
 0x2a1   :  { %v12884_v50 = vpack.c.bf16 %v5110_v42, %v5102_v41  ;;  %v5113_v51 = vmax.f32 %v10720_v43, 0.0  ;;  %4957 = vmatprep.mubr.bf16.mxu1 %v12580_v54  ;;  %v11672_v44 = vld [vmem:[#allocation8 + $0x20] ss:$16 sps:$4 sm:$0xff]  }
 0x2a2   :  { %v12887_v52 = vpack.c.bf16 %v5112_v47, %v5104_v45  ;;  %v12889_v55 = vpack.c.bf16 %v5111_v48, %v5103_v46  ;;  %v3653_v58 = vpop.f32.mrb[20].mxu0  ;;  %v11675_v48 = vld [vmem:[#allocation8 + $0x28] ss:$16 sps:$4 sm:$0xff]  }
 0x2a3   :  { %v12891_v60 = vpack.c.bf16 %v5113_v51, %v5105_v49  ;;  %v10689_v61 = vadd.f32 %v3653_v58, %v12788_v26  ;;  %v4105_v62 = vpop.f32.mrb[20].mxu1  ;;  %v3655_v63 = vpop.f32.mrb[21].mxu0  ;;  %v11680_v49 = vld [vmem:[#allocation8 + $0x44] ss:$16 sps:$4 sm:$0xff]  }
 0x2a4   :  { %v10721_v0 = vadd.f32 %v4105_v62, %v12795_v30  ;;  %v10690_v1 = vadd.f32 %v3655_v63, %v12798_v31  ;;  %v4107_v3 = vpop.f32.mrb[21].mxu1  ;;  %v3657_v4 = vpop.f32.mrb[22].mxu0  ;;  %v11683_v62 = vld [vmem:[#allocation8 + $0x4c] ss:$16 sps:$4 sm:$0xff]  }
 0x2a5   :  { %v10722_v9 = vadd.f32 %v4107_v3, %v12801_v35  ;;  %v10691_v13 = vadd.f32 %v3657_v4, %v12788_v26  ;;  %v4109_v14 = vpop.f32.mrb[22].mxu1  ;;  %v3659_v19 = vpop.f32.mrb[23].mxu0  ;;  %v5118_v29 = vmax.f32 %v10689_v61, 0.0 }
 0x2a6   :  { %v10723_v24 = vadd.f32 %v4109_v14, %v12795_v30  ;;  %v10692_v25 = vadd.f32 %v3659_v19, %v12798_v31  ;;  %v4111_v27 = vpop.f32.mrb[23].mxu1  ;;  %v5120_v40 = vmax.f32 %v10721_v0, 0.0  ;;  %v5119_v41 = vmax.f32 %v10690_v1, 0.0  ;;  %v11678_v14 = vld [vmem:[#allocation8 + $0x40] ss:$16 sps:$4 sm:$0xff]  }
 0x2a7   :  { %v5126_v33 = vmax.f32 %v10691_v13, 0.0  ;;  %v10724_v37 = vadd.f32 %v4111_v27, %v12801_v35  ;;  %4506 = vmatmul.mubr.bf16.vlgmr.msra.gmra.mrb[32].mxu0 %v12322_v39  ;;  %v5121_v45 = vmax.f32 %v10722_v9, 0.0  ;;  %v11686_v27 = vld [vmem:[#allocation8 + $0x64] ss:$16 sps:$4 sm:$0xff]  }
 0x2a8   :  { %v5128_v42 = vmax.f32 %v10723_v24, 0.0  ;;  %v5127_v43 = vmax.f32 %v10692_v25, 0.0  ;;  %4958 = vmatmul.mubr.bf16.vlgmr.msra.gmra.mrb[32].mxu1 %v12322_v39  ;;  %6789 = vmatpush1.bf16.msra.mxu0 %v11666_v6  ;;  %v11681_v25 = vld [vmem:[#allocation8 + $0x48] ss:$16 sps:$4 sm:$0xff]  }
 0x2a9   :  { %v12901_v46 = vpack.c.bf16 %v5126_v33, %v5118_v29  ;;  %v5129_v47 = vmax.f32 %v10724_v37, 0.0  ;;  %7241 = vmatpush1.bf16.msra.mxu1 %v11669_v20  ;;  %6790 = vmatprep.subr.bf16.mxu0 %v11674_v22  ;;  %v11689_v37 = vld [vmem:[#allocation8 + $0x6c] ss:$16 sps:$4 sm:$0xff]  }
 0x2aa   :  { %v12903_v51 = vpack.c.bf16 %v5128_v42, %v5120_v40  ;;  %v12905_v58 = vpack.c.bf16 %v5127_v43, %v5119_v41  ;;  %v3663_v61 = vpop.f32.mrb[24].mxu0  ;;  %7242 = vmatprep.subr.bf16.mxu1 %v11677_v28  ;;  %4515 = vmatprep.mubr.bf16.mxu0 %v12580_v54  ;;  %v12323_v42 = vld [vmem:[#allocation2 + $0x50] ss:$28 sps:$4 sm:$0xff]  }
 0x2ab   :  { %v12908_v63 = vpack.c.bf16 %v5129_v47, %v5121_v45  ;;  %v10693_v0 = vadd.f32 %v3663_v61, %v12788_v26  ;;  %v4115_v1 = vpop.f32.mrb[24].mxu1  ;;  %v3665_v3 = vpop.f32.mrb[25].mxu0  ;;  %4967 = vmatprep.mubr.bf16.mxu1 %v12580_v54 }
 0x2ac   :  { %v10725_v4 = vadd.f32 %v4115_v1, %v12795_v30  ;;  %v10694_v6 = vadd.f32 %v3665_v3, %v12798_v31  ;;  %v4117_v9 = vpop.f32.mrb[25].mxu1  ;;  %v3667_v13 = vpop.f32.mrb[26].mxu0  ;;  %6791 = vmatpush1.bf16.msra.mxu0 %v11672_v44 }
 0x2ad   :  { %v10726_v19 = vadd.f32 %v4117_v9, %v12801_v35  ;;  %v10695_v20 = vadd.f32 %v3667_v13, %v12788_v26  ;;  %v4119_v22 = vpop.f32.mrb[26].mxu1  ;;  %7243 = vmatpush1.bf16.msra.mxu1 %v11675_v48  ;;  %v3669_v24 = vpop.f32.mrb[27].mxu0  ;;  %6792 = vmatprep.subr.bf16.mxu0 %v11680_v49  ;;  %v5134_v39 = vmax.f32 %v10693_v0, 0.0  ;;  %v11684_v48 = vld [vmem:[#allocation8 + $0x60] ss:$16 sps:$4 sm:$0xff]  }
 0x2ae   :  { %v10727_v28 = vadd.f32 %v4119_v22, %v12795_v30  ;;  %v10696_v29 = vadd.f32 %v3669_v24, %v12798_v31  ;;  %v4121_v33 = vpop.f32.mrb[27].mxu1  ;;  %7244 = vmatprep.subr.bf16.mxu1 %v11683_v62  ;;  %v5136_v43 = vmax.f32 %v10725_v4, 0.0  ;;  %v5135_v44 = vmax.f32 %v10694_v6, 0.0  ;;  %v11687_v62 = vld [vmem:[#allocation8 + $0x68] ss:$16 sps:$4 sm:$0xff]  }
 0x2af   :  { %v5142_v40 = vmax.f32 %v10695_v20, 0.0  ;;  %v10728_v41 = vadd.f32 %v4121_v33, %v12801_v35  ;;  %4516 = vmatmul.mubr.bf16.gmra.mrb[36].mxu0 %v12323_v42  ;;  %v5137_v49 = vmax.f32 %v10726_v19, 0.0  ;;  %v11692_v0 = vld [vmem:[#allocation8 + $0x84] ss:$16 sps:$4 sm:$0xff]   ;;  %v11695_v4 = vld [vmem:[#allocation8 + $0x8c] ss:$16 sps:$4 sm:$0xff]  }
 0x2b0   :  { %v5144_v45 = vmax.f32 %v10727_v28, 0.0  ;;  %v5143_v47 = vmax.f32 %v10696_v29, 0.0  ;;  %4968 = vmatmul.mubr.bf16.gmra.mrb[36].mxu1 %v12323_v42  ;;  %6793 = vmatpush1.bf16.msra.mxu0 %v11678_v14  ;;  %v11690_v28 = vld [vmem:[#allocation8 + $0x80] ss:$16 sps:$4 sm:$0xff]  }
 0x2b1   :  { %v12919_v61 = vpack.c.bf16 %v5142_v40, %v5134_v39  ;;  %v5145_v1 = vmax.f32 %v10728_v41, 0.0  ;;  %7245 = vmatpush1.bf16.msra.mxu1 %v11681_v25  ;;  %6794 = vmatprep.subr.bf16.mxu0 %v11686_v27  ;;  %v11693_v40 = vld [vmem:[#allocation8 + $0x88] ss:$16 sps:$4 sm:$0xff]   ;;  %v11698_v41 = vld [vmem:[#allocation8 + $0xa4] ss:$16 sps:$4 sm:$0xff]  }
 0x2b2   :  { %v12921_v3 = vpack.c.bf16 %v5144_v45, %v5136_v43  ;;  %v12923_v9 = vpack.c.bf16 %v5143_v47, %v5135_v44  ;;  %v3673_v13 = vpop.f32.mrb[28].mxu0  ;;  %7246 = vmatprep.subr.bf16.mxu1 %v11689_v37  ;;  %4525 = vmatprep.mubr.bf16.mxu0 %v12580_v54  ;;  %v11701_v45 = vld [vmem:[#allocation8 + $0xac] ss:$16 sps:$4 sm:$0xff]  }
 0x2b3   :  { %v12926_v6 = vpack.c.bf16 %v5145_v1, %v5137_v49  ;;  %v10697_v14 = vadd.f32 %v3673_v13, %v12788_v26  ;;  %v4125_v19 = vpop.f32.mrb[28].mxu1  ;;  %v3675_v20 = vpop.f32.mrb[29].mxu0  ;;  %4977 = vmatprep.mubr.bf16.mxu1 %v12580_v54  ;;  %v12324_v1 = vld [vmem:[#allocation2 + $0x88] ss:$28 sps:$4 sm:$0xff]  }
 0x2b4   :  { %v10729_v22 = vadd.f32 %v4125_v19, %v12795_v30  ;;  %v10698_v24 = vadd.f32 %v3675_v20, %v12798_v31  ;;  %v4127_v25 = vpop.f32.mrb[29].mxu1  ;;  %v3677_v27 = vpop.f32.mrb[30].mxu0  ;;  %6795 = vmatpush1.bf16.msra.mxu0 %v11684_v48 }
 0x2b5   :  { %v10730_v29 = vadd.f32 %v4127_v25, %v12801_v35  ;;  %v10699_v33 = vadd.f32 %v3677_v27, %v12788_v26  ;;  %v4129_v37 = vpop.f32.mrb[30].mxu1  ;;  %7247 = vmatpush1.bf16.msra.mxu1 %v11687_v62  ;;  %v3679_v39 = vpop.f32.mrb[31].mxu0  ;;  %6796 = vmatprep.subr.bf16.mxu0 %v11692_v0  ;;  %v5150_v47 = vmax.f32 %v10697_v14, 0.0  ;;  %v11696_v0 = vld [vmem:[#allocation8 + $0xa0] ss:$16 sps:$4 sm:$0xff]  }
 0x2b6   :  { %v10731_v42 = vadd.f32 %v4129_v37, %v12795_v30  ;;  %v10700_v43 = vadd.f32 %v3679_v39, %v12798_v31  ;;  %v4131_v44 = vpop.f32.mrb[31].mxu1  ;;  %7248 = vmatprep.subr.bf16.mxu1 %v11695_v4  ;;  %v5152_v26 = vmax.f32 %v10729_v22, 0.0  ;;  %v5151_v13 = vmax.f32 %v10698_v24, 0.0  ;;  %v11699_v4 = vld [vmem:[#allocation8 + $0xa8] ss:$16 sps:$4 sm:$0xff]  }
 0x2b7   :  { %v5158_v48 = vmax.f32 %v10699_v33, 0.0  ;;  %v10732_v49 = vadd.f32 %v4131_v44, %v12801_v35  ;;  %4526 = vmatmul.mubr.bf16.gmra.mrb[40].mxu0 %v12324_v1  ;;  %v5153_v20 = vmax.f32 %v10730_v29, 0.0  ;;  %v11704_v14 = vld [vmem:[#allocation8 + $0xc4] ss:$16 sps:$4 sm:$0xff]   ;;  %v11707_v22 = vld [vmem:[#allocation8 + $0xcc] ss:$16 sps:$4 sm:$0xff]  }
 0x2b8   :  { %v5160_v62 = vmax.f32 %v10731_v42, 0.0  ;;  %v5159_v19 = vmax.f32 %v10700_v43, 0.0  ;;  %4978 = vmatmul.mubr.bf16.gmra.mrb[40].mxu1 %v12324_v1  ;;  %6797 = vmatpush1.bf16.msra.mxu0 %v11690_v28  ;;  %v11702_v27 = vld [vmem:[#allocation8 + $0xc0] ss:$16 sps:$4 sm:$0xff]   ;;  %v11705_v28 = vld [vmem:[#allocation8 + $0xc8] ss:$16 sps:$4 sm:$0xff]  }
 0x2b9   :  { %v12937_v30 = vpack.c.bf16 %v5158_v48, %v5150_v47  ;;  %v5161_v31 = vmax.f32 %v10732_v49, 0.0  ;;  %7249 = vmatpush1.bf16.msra.mxu1 %v11693_v40  ;;  %6798 = vmatprep.subr.bf16.mxu0 %v11698_v41  ;;  %v11710_v29 = vld [vmem:[#allocation8 + $0xe4] ss:$16 sps:$4 sm:$0xff]   ;;  %v11713_v33 = vld [vmem:[#allocation8 + $0xec] ss:$16 sps:$4 sm:$0xff]  }
 0x2ba   :  { %v12939_v25 = vpack.c.bf16 %v5160_v62, %v5152_v26  ;;  %v12941_v35 = vpack.c.bf16 %v5159_v19, %v5151_v13  ;;  %7250 = vmatprep.subr.bf16.mxu1 %v11701_v45  ;;  %4535 = vmatprep.mubr.bf16.mxu0 %v12580_v54  ;;  %v12325_v37 = vld [vmem:[#allocation2 + $0xc0] ss:$28 sps:$4 sm:$0xff]   ;;  %v11708_v39 = vld [vmem:[#allocation8 + $0xe0] ss:$16 sps:$4 sm:$0xff]   ;;  %v11719_v42 = vld [vmem:[#allocation8 + $0x10c] ss:$16 sps:$4 sm:$0xff]  }
 0x2bb   :  { %v12944_v24 = vpack.c.bf16 %v5161_v31, %v5153_v20  ;;  %4987 = vmatprep.mubr.bf16.mxu1 %v12580_v54  ;;  %v11711_v40 = vld [vmem:[#allocation8 + $0xe8] ss:$16 sps:$4 sm:$0xff]   ;;  %v11716_v41 = vld [vmem:[#allocation8 + $0x104] ss:$16 sps:$4 sm:$0xff]   ;;  %v11714_v43 = vld [vmem:[#allocation8 + $0x100] ss:$16 sps:$4 sm:$0xff]  }
 0x2bc   :  { %6799 = vmatpush1.bf16.msra.mxu0 %v11696_v0  ;;  %v11717_v44 = vld [vmem:[#allocation8 + $0x108] ss:$16 sps:$4 sm:$0xff]   ;;  %v11722_v45 = vld [vmem:[#allocation8 + $0x124] ss:$16 sps:$4 sm:$0xff]   ;;  %v11725_v47 = vld [vmem:[#allocation8 + $0x12c] ss:$16 sps:$4 sm:$0xff]  }
 0x2bd   :  { %7251 = vmatpush1.bf16.msra.mxu1 %v11699_v4  ;;  %6800 = vmatprep.subr.bf16.mxu0 %v11704_v14  ;;  %v12326_v48 = vld [vmem:[#allocation2 + $0xf8] ss:$28 sps:$4 sm:$0xff]   ;;  %v11723_v1 = vld [vmem:[#allocation8 + $0x128] ss:$16 sps:$4 sm:$0xff]   ;;  %v11728_v26 = vld [vmem:[#allocation8 + $0x144] ss:$16 sps:$4 sm:$0xff]  }
 0x2be   :  { %7252 = vmatprep.subr.bf16.mxu1 %v11707_v22  ;;  %v11720_v49 = vld [vmem:[#allocation8 + $0x120] ss:$16 sps:$4 sm:$0xff]   ;;  %v11731_v13 = vld [vmem:[#allocation8 + $0x14c] ss:$16 sps:$4 sm:$0xff]   ;;  %v11729_v19 = vld [vmem:[#allocation8 + $0x148] ss:$16 sps:$4 sm:$0xff]  }
 0x2bf   :  { %4536 = vmatmul.mubr.bf16.gmra.mrb[44].mxu0 %v12325_v37  ;;  %v11726_v62 = vld [vmem:[#allocation8 + $0x140] ss:$16 sps:$4 sm:$0xff]   ;;  %v11734_v0 = vld [vmem:[#allocation8 + $0x164] ss:$16 sps:$4 sm:$0xff]   ;;  %v11737_v20 = vld [vmem:[#allocation8 + $0x16c] ss:$16 sps:$4 sm:$0xff]  }
 0x2c0   :  { %4988 = vmatmul.mubr.bf16.gmra.mrb[44].mxu1 %v12325_v37  ;;  %6801 = vmatpush1.bf16.msra.mxu0 %v11702_v27  ;;  %v12327_v31 = vld [vmem:[#allocation2 + $0x130] ss:$28 sps:$4 sm:$0xff]   ;;  %v11732_v4 = vld [vmem:[#allocation8 + $0x160] ss:$16 sps:$4 sm:$0xff]   ;;  %v11743_v27 = vld [vmem:[#allocation8 + $0x18c] ss:$16 sps:$4 sm:$0xff]  }
 0x2c1   :  { %7253 = vmatpush1.bf16.msra.mxu1 %v11705_v28  ;;  %6802 = vmatprep.subr.bf16.mxu0 %v11710_v29  ;;  %v11735_v14 = vld [vmem:[#allocation8 + $0x168] ss:$16 sps:$4 sm:$0xff]   ;;  %v11740_v22 = vld [vmem:[#allocation8 + $0x184] ss:$16 sps:$4 sm:$0xff]   ;;  %v11738_v28 = vld [vmem:[#allocation8 + $0x180] ss:$16 sps:$4 sm:$0xff]  }
 0x2c2   :  { %7254 = vmatprep.subr.bf16.mxu1 %v11713_v33  ;;  %4545 = vmatprep.mubr.bf16.mxu0 %v12580_v54  ;;  %v11741_v29 = vld [vmem:[#allocation8 + $0x188] ss:$16 sps:$4 sm:$0xff]   ;;  %v11746_v33 = vld [vmem:[#allocation8 + $0x1a4] ss:$16 sps:$4 sm:$0xff]   ;;  %v11749_v37 = vld [vmem:[#allocation8 + $0x1ac] ss:$16 sps:$4 sm:$0xff]  }
 0x2c3   :  { %4997 = vmatprep.mubr.bf16.mxu1 %v12580_v54 }
 0x2c4   :  { %6803 = vmatpush1.bf16.msra.mxu0 %v11708_v39  ;;  %v12328_v39 = vld [vmem:[#allocation2 + $0x168] ss:$28 sps:$4 sm:$0xff]  }
 0x2c5   :  { %7255 = vmatpush1.bf16.msra.mxu1 %v11711_v40  ;;  %6804 = vmatprep.subr.bf16.mxu0 %v11716_v41  ;;  %v11744_v40 = vld [vmem:[#allocation8 + $0x1a0] ss:$16 sps:$4 sm:$0xff]   ;;  %v11747_v41 = vld [vmem:[#allocation8 + $0x1a8] ss:$16 sps:$4 sm:$0xff]  }
 0x2c6   :  { %7256 = vmatprep.subr.bf16.mxu1 %v11719_v42  ;;  %v11752_v42 = vld [vmem:[#allocation8 + $0x1c4] ss:$16 sps:$4 sm:$0xff]  }
 0x2c7   :  { %4546 = vmatmul.mubr.bf16.gmra.mrb[48].mxu0 %v12326_v48 }
 0x2c8   :  { %4998 = vmatmul.mubr.bf16.gmra.mrb[48].mxu1 %v12326_v48  ;;  %6805 = vmatpush1.bf16.msra.mxu0 %v11714_v43  ;;  %v11755_v43 = vld [vmem:[#allocation8 + $0x1cc] ss:$16 sps:$4 sm:$0xff]   ;;  %v12329_v48 = vld [vmem:[#allocation2 + $0x1a0] ss:$28 sps:$4 sm:$0xff]  }
 0x2c9   :  { %7257 = vmatpush1.bf16.msra.mxu1 %v11717_v44  ;;  %6806 = vmatprep.subr.bf16.mxu0 %v11722_v45  ;;  %v11750_v44 = vld [vmem:[#allocation8 + $0x1c0] ss:$16 sps:$4 sm:$0xff]   ;;  %v11753_v45 = vld [vmem:[#allocation8 + $0x1c8] ss:$16 sps:$4 sm:$0xff]  }
 0x2ca   :  { %7258 = vmatprep.subr.bf16.mxu1 %v11725_v47  ;;  %4555 = vmatprep.mubr.bf16.mxu0 %v12580_v54  ;;  %v11758_v47 = vld [vmem:[#allocation8 + $0x1e4] ss:$16 sps:$4 sm:$0xff]  }
 0x2cb   :  { %5007 = vmatprep.mubr.bf16.mxu1 %v12580_v54 }
 0x2cc   :  { %6807 = vmatpush1.bf16.msra.mxu0 %v11720_v49  ;;  %v11761_v49 = vld [vmem:[#allocation8 + $0x1ec] ss:$16 sps:$4 sm:$0xff]  }
 0x2cd   :  { %7259 = vmatpush1.bf16.msra.mxu1 %v11723_v1  ;;  %6808 = vmatprep.subr.bf16.mxu0 %v11728_v26  ;;  %v11756_v1 = vld [vmem:[#allocation8 + $0x1e0] ss:$16 sps:$4 sm:$0xff]   ;;  %v11759_v26 = vld [vmem:[#allocation8 + $0x1e8] ss:$16 sps:$4 sm:$0xff]  }
 0x2ce   :  { %7260 = vmatprep.subr.bf16.mxu1 %v11731_v13  ;;  %v11764_v13 = vld [vmem:[#allocation8 + $0x204] ss:$16 sps:$4 sm:$0xff]  }
 0x2cf   :  { %4556 = vmatmul.mubr.bf16.gmra.mrb[52].mxu0 %v12327_v31 }
 0x2d0   :  { %5008 = vmatmul.mubr.bf16.gmra.mrb[52].mxu1 %v12327_v31  ;;  %6809 = vmatpush1.bf16.msra.mxu0 %v11726_v62  ;;  %v11762_v62 = vld [vmem:[#allocation8 + $0x200] ss:$16 sps:$4 sm:$0xff]   ;;  %v11771_v31 = vld [vmem:[#allocation8 + $0x228] ss:$16 sps:$4 sm:$0xff]  }
 0x2d1   :  { %7261 = vmatpush1.bf16.msra.mxu1 %v11729_v19  ;;  %6810 = vmatprep.subr.bf16.mxu0 %v11734_v0  ;;  %v11765_v19 = vld [vmem:[#allocation8 + $0x208] ss:$16 sps:$4 sm:$0xff]   ;;  %v11770_v0 = vld [vmem:[#allocation8 + $0x224] ss:$16 sps:$4 sm:$0xff]  }
 0x2d2   :  { %7262 = vmatprep.subr.bf16.mxu1 %v11737_v20  ;;  %4565 = vmatprep.mubr.bf16.mxu0 %v12580_v54  ;;  %v11773_v20 = vld [vmem:[#allocation8 + $0x22c] ss:$16 sps:$4 sm:$0xff]  }
 0x2d3   :  { %5017 = vmatprep.mubr.bf16.mxu1 %v12580_v54 }
 0x2d4   :  { %6811 = vmatpush1.bf16.msra.mxu0 %v11732_v4  ;;  %v11776_v4 = vld [vmem:[#allocation8 + $0x244] ss:$16 sps:$4 sm:$0xff]  }
 0x2d5   :  { %7263 = vmatpush1.bf16.msra.mxu1 %v11735_v14  ;;  %6812 = vmatprep.subr.bf16.mxu0 %v11740_v22  ;;  %v11779_v14 = vld [vmem:[#allocation8 + $0x24c] ss:$16 sps:$4 sm:$0xff]   ;;  %v11774_v22 = vld [vmem:[#allocation8 + $0x240] ss:$16 sps:$4 sm:$0xff]  }
 0x2d6   :  { %7264 = vmatprep.subr.bf16.mxu1 %v11743_v27  ;;  %v11777_v27 = vld [vmem:[#allocation8 + $0x248] ss:$16 sps:$4 sm:$0xff]  }
 0x2d7   :  { %4566 = vmatmul.mubr.bf16.gmra.mrb[56].mxu0 %v12328_v39 }
 0x2d8   :  { %5018 = vmatmul.mubr.bf16.gmra.mrb[56].mxu1 %v12328_v39  ;;  %6813 = vmatpush1.bf16.msra.mxu0 %v11738_v28  ;;  %v11782_v28 = vld [vmem:[#allocation8 + $0x264] ss:$16 sps:$4 sm:$0xff]   ;;  %v11786_v39 = vld [vmem:[#allocation8 + $0x280] ss:$16 sps:$4 sm:$0xff]  }
 0x2d9   :  { %7265 = vmatpush1.bf16.msra.mxu1 %v11741_v29  ;;  %6814 = vmatprep.subr.bf16.mxu0 %v11746_v33  ;;  %v11783_v29 = vld [vmem:[#allocation8 + $0x268] ss:$16 sps:$4 sm:$0xff]   ;;  %v11788_v33 = vld [vmem:[#allocation8 + $0x284] ss:$16 sps:$4 sm:$0xff]  }
 0x2da   :  { %7266 = vmatprep.subr.bf16.mxu1 %v11749_v37  ;;  %4575 = vmatprep.mubr.bf16.mxu0 %v12580_v54  ;;  %v11791_v37 = vld [vmem:[#allocation8 + $0x28c] ss:$16 sps:$4 sm:$0xff]  }
 0x2db   :  { %5027 = vmatprep.mubr.bf16.mxu1 %v12580_v54  ;;  %v11767_v54 = vld [vmem:[#allocation8 + $0x20c] ss:$16 sps:$4 sm:$0xff]  }
 0x2dc   :  { %6815 = vmatpush1.bf16.msra.mxu0 %v11744_v40  ;;  %v11789_v40 = vld [vmem:[#allocation8 + $0x288] ss:$16 sps:$4 sm:$0xff]  }
 0x2dd   :  { %7267 = vmatpush1.bf16.msra.mxu1 %v11747_v41  ;;  %6816 = vmatprep.subr.bf16.mxu0 %v11752_v42  ;;  %v11794_v41 = vld [vmem:[#allocation8 + $0x2a4] ss:$16 sps:$4 sm:$0xff]   ;;  %v11795_v42 = vld [vmem:[#allocation8 + $0x2a8] ss:$16 sps:$4 sm:$0xff]  }
 0x2de   :  { %7268 = vmatprep.subr.bf16.mxu1 %v11755_v43  ;;  %v11800_v43 = vld [vmem:[#allocation8 + $0x2c4] ss:$16 sps:$4 sm:$0xff]  }
 0x2df   :  { %4576 = vmatmul.mubr.bf16.gmra.mrb[60].mxu0 %v12329_v48 }
 0x2e0   :  { %5028 = vmatmul.mubr.bf16.gmra.mrb[60].mxu1 %v12329_v48  ;;  %6817 = vmatpush1.bf16.msra.mxu0 %v11750_v44  ;;  %v11803_v44 = vld [vmem:[#allocation8 + $0x2cc] ss:$16 sps:$4 sm:$0xff]   ;;  %v11806_v48 = vld [vmem:[#allocation8 + $0x2e4] ss:$16 sps:$4 sm:$0xff]  }
 0x2e1   :  { %6820 = vmatprep.mubr.bf16.mxu0 %v12823_v16  ;;  %7269 = vmatpush1.bf16.msra.mxu1 %v11753_v45  ;;  %v11798_v45 = vld [vmem:[#allocation8 + $0x2c0] ss:$16 sps:$4 sm:$0xff]  }
 0x2e2   :  { %7272 = vmatprep.mubr.bf16.mxu1 %v12823_v16  ;;  %6818 = vmatprep.subr.bf16.mxu0 %v11758_v47  ;;  %v11768_v16 = vld [vmem:[#allocation8 + $0x220] ss:$16 sps:$4 sm:$0xff]   ;;  %v11801_v47 = vld [vmem:[#allocation8 + $0x2c8] ss:$16 sps:$4 sm:$0xff]  }
 0x2e3   :  { %7270 = vmatprep.subr.bf16.mxu1 %v11761_v49  ;;  %v11807_v49 = vld [vmem:[#allocation8 + $0x2e8] ss:$16 sps:$4 sm:$0xff]  }
 0x2e4   :  { %6819 = vmatpush1.bf16.msra.mxu0 %v11756_v1  ;;  %v11812_v1 = vld [vmem:[#allocation8 + $0x304] ss:$16 sps:$4 sm:$0xff]  }
 0x2e5   :  { %7271 = vmatpush1.bf16.msra.mxu1 %v11759_v26  ;;  %6901 = vmatprep.subr.bf16.mxu0 %v11764_v13  ;;  %v11815_v26 = vld [vmem:[#allocation8 + $0x30c] ss:$16 sps:$4 sm:$0xff]   ;;  %v11810_v13 = vld [vmem:[#allocation8 + $0x300] ss:$16 sps:$4 sm:$0xff]  }
 0x2e6   :  { %7353 = vmatprep.subr.bf16.mxu1 %v11767_v54  ;;  %v11813_v54 = vld [vmem:[#allocation8 + $0x308] ss:$16 sps:$4 sm:$0xff]  }
 0x2e7   :  { %6821 = vmatmul.mubr.bf16.vlgmr.msra.gmra.mrb[64].mxu0 %v12818_v11 }
 0x2e8   :  { %7273 = vmatmul.mubr.bf16.vlgmr.msra.gmra.mrb[64].mxu1 %v12818_v11  ;;  %6830 = vmatprep.mubr.bf16.mxu0 %v12839_v57  ;;  %v11785_v11 = vld [vmem:[#allocation8 + $0x26c] ss:$16 sps:$4 sm:$0xff]  }
 0x2e9   :  { %6902 = vmatpush1.bf16.msra.mxu0 %v11762_v62  ;;  %7282 = vmatprep.mubr.bf16.mxu1 %v12839_v57  ;;  %v11780_v57 = vld [vmem:[#allocation8 + $0x260] ss:$16 sps:$4 sm:$0xff]   ;;  %v11818_v62 = vld [vmem:[#allocation8 + $0x324] ss:$16 sps:$4 sm:$0xff]  }
 0x2ea   :  { %7354 = vmatpush1.bf16.msra.mxu1 %v11765_v19  ;;  %6903 = vmatprep.subr.bf16.mxu0 %v11770_v0  ;;  %v11819_v19 = vld [vmem:[#allocation8 + $0x328] ss:$16 sps:$4 sm:$0xff]   ;;  %v11824_v0 = vld [vmem:[#allocation8 + $0x344] ss:$16 sps:$4 sm:$0xff]  }
 0x2eb   :  { %7355 = vmatprep.subr.bf16.mxu1 %v11773_v20  ;;  %v11827_v20 = vld [vmem:[#allocation8 + $0x34c] ss:$16 sps:$4 sm:$0xff]  }
 0x2ed   :  { %6904 = vmatpush1.bf16.msra.mxu0 %v11768_v16  ;;  %v11822_v16 = vld [vmem:[#allocation8 + $0x340] ss:$16 sps:$4 sm:$0xff]  }
 0x2ee   :  { %7356 = vmatpush1.bf16.msra.mxu1 %v11771_v31  ;;  %6905 = vmatprep.subr.bf16.mxu0 %v11776_v4  ;;  %v11825_v31 = vld [vmem:[#allocation8 + $0x348] ss:$16 sps:$4 sm:$0xff]   ;;  %v11830_v4 = vld [vmem:[#allocation8 + $0x364] ss:$16 sps:$4 sm:$0xff]  }
 0x2ef   :  { %6831 = vmatmul.mubr.bf16.gmra.mrb[68].mxu0 %v12835_v53  ;;  %7357 = vmatprep.subr.bf16.mxu1 %v11779_v14  ;;  %v11831_v14 = vld [vmem:[#allocation8 + $0x368] ss:$16 sps:$4 sm:$0xff]  }
 0x2f0   :  { %7283 = vmatmul.mubr.bf16.gmra.mrb[68].mxu1 %v12835_v53  ;;  %6840 = vmatprep.mubr.bf16.mxu0 %v12855_v36  ;;  %v11797_v53 = vld [vmem:[#allocation8 + $0x2ac] ss:$16 sps:$4 sm:$0xff]  }
 0x2f1   :  { %6906 = vmatpush1.bf16.msra.mxu0 %v11774_v22  ;;  %7292 = vmatprep.mubr.bf16.mxu1 %v12855_v36  ;;  %v11792_v36 = vld [vmem:[#allocation8 + $0x2a0] ss:$16 sps:$4 sm:$0xff]   ;;  %v11836_v22 = vld [vmem:[#allocation8 + $0x384] ss:$16 sps:$4 sm:$0xff]  }
 0x2f2   :  { %7358 = vmatpush1.bf16.msra.mxu1 %v11777_v27  ;;  %6907 = vmatprep.subr.bf16.mxu0 %v11782_v28  ;;  %v11839_v27 = vld [vmem:[#allocation8 + $0x38c] ss:$16 sps:$4 sm:$0xff]   ;;  %v11834_v28 = vld [vmem:[#allocation8 + $0x380] ss:$16 sps:$4 sm:$0xff]  }
 0x2f3   :  { %7359 = vmatprep.subr.bf16.mxu1 %v11785_v11  ;;  %v11837_v11 = vld [vmem:[#allocation8 + $0x388] ss:$16 sps:$4 sm:$0xff]  }
 0x2f5   :  { %6908 = vmatpush1.bf16.msra.mxu0 %v11780_v57  ;;  %v11842_v57 = vld [vmem:[#allocation8 + $0x3a4] ss:$16 sps:$4 sm:$0xff]  }
 0x2f6   :  { %7360 = vmatpush1.bf16.msra.mxu1 %v11783_v29  ;;  %6909 = vmatprep.subr.bf16.mxu0 %v11788_v33  ;;  %v11843_v29 = vld [vmem:[#allocation8 + $0x3a8] ss:$16 sps:$4 sm:$0xff]   ;;  %v11848_v33 = vld [vmem:[#allocation8 + $0x3c4] ss:$16 sps:$4 sm:$0xff]  }
 0x2f7   :  { %6841 = vmatmul.mubr.bf16.gmra.mrb[72].mxu0 %v12851_v32  ;;  %7361 = vmatprep.subr.bf16.mxu1 %v11791_v37  ;;  %v11851_v37 = vld [vmem:[#allocation8 + $0x3cc] ss:$16 sps:$4 sm:$0xff]  }
 0x2f8   :  { %7293 = vmatmul.mubr.bf16.gmra.mrb[72].mxu1 %v12851_v32  ;;  %6850 = vmatprep.mubr.bf16.mxu0 %v12871_v8  ;;  %v11809_v32 = vld [vmem:[#allocation8 + $0x2ec] ss:$16 sps:$4 sm:$0xff]  }
 0x2f9   :  { %6910 = vmatpush1.bf16.msra.mxu0 %v11786_v39  ;;  %7302 = vmatprep.mubr.bf16.mxu1 %v12871_v8  ;;  %v11804_v8 = vld [vmem:[#allocation8 + $0x2e0] ss:$16 sps:$4 sm:$0xff]  }
 0x2fa   :  { %7362 = vmatpush1.bf16.msra.mxu1 %v11789_v40  ;;  %6911 = vmatprep.subr.bf16.mxu0 %v11794_v41  ;;  %v11846_v39 = vld [vmem:[#allocation8 + $0x3c0] ss:$16 sps:$4 sm:$0xff]   ;;  %v11849_v40 = vld [vmem:[#allocation8 + $0x3c8] ss:$16 sps:$4 sm:$0xff]   ;;  %v11854_v41 = vld [vmem:[#allocation8 + $0x3e4] ss:$16 sps:$4 sm:$0xff]  }
 0x2fb   :  { %7363 = vmatprep.subr.bf16.mxu1 %v11797_v53  ;;  %v11855_v53 = vld [vmem:[#allocation8 + $0x3e8] ss:$16 sps:$4 sm:$0xff]  }
 0x2fd   :  { %6912 = vmatpush1.bf16.msra.mxu0 %v11792_v36  ;;  %v11860_v36 = vld [vmem:[#allocation8 + $0x404] ss:$16 sps:$4 sm:$0xff]  }
 0x2fe   :  { %7364 = vmatpush1.bf16.msra.mxu1 %v11795_v42  ;;  %6913 = vmatprep.subr.bf16.mxu0 %v11800_v43  ;;  %v11863_v42 = vld [vmem:[#allocation8 + $0x40c] ss:$16 sps:$4 sm:$0xff]   ;;  %v11858_v43 = vld [vmem:[#allocation8 + $0x400] ss:$16 sps:$4 sm:$0xff]  }
 0x2ff   :  { %6851 = vmatmul.mubr.bf16.gmra.mrb[76].mxu0 %v12867_v5  ;;  %7365 = vmatprep.subr.bf16.mxu1 %v11803_v44  ;;  %v11861_v44 = vld [vmem:[#allocation8 + $0x408] ss:$16 sps:$4 sm:$0xff]  }
 0x300   :  { %7303 = vmatmul.mubr.bf16.gmra.mrb[76].mxu1 %v12867_v5  ;;  %6860 = vmatprep.mubr.bf16.mxu0 %v12889_v55  ;;  %v11821_v5 = vld [vmem:[#allocation8 + $0x32c] ss:$16 sps:$4 sm:$0xff]  }
 0x301   :  { %6914 = vmatpush1.bf16.msra.mxu0 %v11798_v45  ;;  %7312 = vmatprep.mubr.bf16.mxu1 %v12889_v55  ;;  %v11816_v55 = vld [vmem:[#allocation8 + $0x320] ss:$16 sps:$4 sm:$0xff]   ;;  %v11866_v45 = vld [vmem:[#allocation8 + $0x424] ss:$16 sps:$4 sm:$0xff]  }
 0x302   :  { %7366 = vmatpush1.bf16.msra.mxu1 %v11801_v47  ;;  %6915 = vmatprep.subr.bf16.mxu0 %v11806_v48  ;;  %v11867_v47 = vld [vmem:[#allocation8 + $0x428] ss:$16 sps:$4 sm:$0xff]   ;;  %v11872_v48 = vld [vmem:[#allocation8 + $0x444] ss:$16 sps:$4 sm:$0xff]  }
 0x303   :  { %7367 = vmatprep.subr.bf16.mxu1 %v11809_v32  ;;  %v11875_v32 = vld [vmem:[#allocation8 + $0x44c] ss:$16 sps:$4 sm:$0xff]  }
 0x305   :  { %6916 = vmatpush1.bf16.msra.mxu0 %v11804_v8  ;;  %v11870_v8 = vld [vmem:[#allocation8 + $0x440] ss:$16 sps:$4 sm:$0xff]  }
 0x306   :  { %7368 = vmatpush1.bf16.msra.mxu1 %v11807_v49  ;;  %6917 = vmatprep.subr.bf16.mxu0 %v11812_v1  ;;  %v11873_v49 = vld [vmem:[#allocation8 + $0x448] ss:$16 sps:$4 sm:$0xff]   ;;  %v11878_v1 = vld [vmem:[#allocation8 + $0x464] ss:$16 sps:$4 sm:$0xff]  }
 0x307   :  { %6861 = vmatmul.mubr.bf16.gmra.mrb[80].mxu0 %v12884_v50  ;;  %7369 = vmatprep.subr.bf16.mxu1 %v11815_v26  ;;  %v11879_v26 = vld [vmem:[#allocation8 + $0x468] ss:$16 sps:$4 sm:$0xff]  }
 0x308   :  { %7313 = vmatmul.mubr.bf16.gmra.mrb[80].mxu1 %v12884_v50  ;;  %6870 = vmatprep.mubr.bf16.mxu0 %v12905_v58  ;;  %v11833_v50 = vld [vmem:[#allocation8 + $0x36c] ss:$16 sps:$4 sm:$0xff]  }
 0x309   :  { %6918 = vmatpush1.bf16.msra.mxu0 %v11810_v13  ;;  %7322 = vmatprep.mubr.bf16.mxu1 %v12905_v58  ;;  %v11828_v58 = vld [vmem:[#allocation8 + $0x360] ss:$16 sps:$4 sm:$0xff]   ;;  %v11884_v13 = vld [vmem:[#allocation8 + $0x484] ss:$16 sps:$4 sm:$0xff]  }
 0x30a   :  { %7370 = vmatpush1.bf16.msra.mxu1 %v11813_v54  ;;  %6919 = vmatprep.subr.bf16.mxu0 %v11818_v62  ;;  %v11887_v54 = vld [vmem:[#allocation8 + $0x48c] ss:$16 sps:$4 sm:$0xff]   ;;  %v11882_v62 = vld [vmem:[#allocation8 + $0x480] ss:$16 sps:$4 sm:$0xff]  }
 0x30b   :  { %7371 = vmatprep.subr.bf16.mxu1 %v11821_v5  ;;  %v11885_v5 = vld [vmem:[#allocation8 + $0x488] ss:$16 sps:$4 sm:$0xff]  }
 0x30d   :  { %6920 = vmatpush1.bf16.msra.mxu0 %v11816_v55  ;;  %v11890_v55 = vld [vmem:[#allocation8 + $0x4a4] ss:$16 sps:$4 sm:$0xff]  }
 0x30e   :  { %7372 = vmatpush1.bf16.msra.mxu1 %v11819_v19  ;;  %6921 = vmatprep.subr.bf16.mxu0 %v11824_v0  ;;  %v11891_v19 = vld [vmem:[#allocation8 + $0x4a8] ss:$16 sps:$4 sm:$0xff]   ;;  %v11896_v0 = vld [vmem:[#allocation8 + $0x4c4] ss:$16 sps:$4 sm:$0xff]  }
 0x30f   :  { %6871 = vmatmul.mubr.bf16.gmra.mrb[84].mxu0 %v12901_v46  ;;  %7373 = vmatprep.subr.bf16.mxu1 %v11827_v20  ;;  %v11899_v20 = vld [vmem:[#allocation8 + $0x4cc] ss:$16 sps:$4 sm:$0xff]  }
 0x310   :  { %7323 = vmatmul.mubr.bf16.gmra.mrb[84].mxu1 %v12901_v46  ;;  %6880 = vmatprep.mubr.bf16.mxu0 %v12923_v9  ;;  %v11845_v46 = vld [vmem:[#allocation8 + $0x3ac] ss:$16 sps:$4 sm:$0xff]  }
 0x311   :  { %6922 = vmatpush1.bf16.msra.mxu0 %v11822_v16  ;;  %7332 = vmatprep.mubr.bf16.mxu1 %v12923_v9  ;;  %v11840_v9 = vld [vmem:[#allocation8 + $0x3a0] ss:$16 sps:$4 sm:$0xff]  }
 0x312   :  { %7374 = vmatpush1.bf16.msra.mxu1 %v11825_v31  ;;  %6923 = vmatprep.subr.bf16.mxu0 %v11830_v4  ;;  %v11894_v16 = vld [vmem:[#allocation8 + $0x4c0] ss:$16 sps:$4 sm:$0xff]   ;;  %v11897_v31 = vld [vmem:[#allocation8 + $0x4c8] ss:$16 sps:$4 sm:$0xff]   ;;  %v11902_v4 = vld [vmem:[#allocation8 + $0x4e4] ss:$16 sps:$4 sm:$0xff]  }
 0x313   :  { %7375 = vmatprep.subr.bf16.mxu1 %v11833_v50  ;;  %v11903_v50 = vld [vmem:[#allocation8 + $0x4e8] ss:$16 sps:$4 sm:$0xff]  }
 0x315   :  { %6924 = vmatpush1.bf16.msra.mxu0 %v11828_v58  ;;  %v11908_v58 = vld [vmem:[#allocation8 + $0x504] ss:$16 sps:$4 sm:$0xff]  }
 0x316   :  { %7376 = vmatpush1.bf16.msra.mxu1 %v11831_v14  ;;  %6925 = vmatprep.subr.bf16.mxu0 %v11836_v22  ;;  %v11911_v14 = vld [vmem:[#allocation8 + $0x50c] ss:$16 sps:$4 sm:$0xff]   ;;  %v11906_v22 = vld [vmem:[#allocation8 + $0x500] ss:$16 sps:$4 sm:$0xff]  }
 0x317   :  { %6881 = vmatmul.mubr.bf16.gmra.mrb[88].mxu0 %v12919_v61  ;;  %7377 = vmatprep.subr.bf16.mxu1 %v11839_v27  ;;  %v11909_v27 = vld [vmem:[#allocation8 + $0x508] ss:$16 sps:$4 sm:$0xff]  }
 0x318   :  { %7333 = vmatmul.mubr.bf16.gmra.mrb[88].mxu1 %v12919_v61  ;;  %6890 = vmatprep.mubr.bf16.mxu0 %v12941_v35  ;;  %v11857_v61 = vld [vmem:[#allocation8 + $0x3ec] ss:$16 sps:$4 sm:$0xff]  }
 0x319   :  { %6926 = vmatpush1.bf16.msra.mxu0 %v11834_v28  ;;  %7342 = vmatprep.mubr.bf16.mxu1 %v12941_v35  ;;  %v11852_v35 = vld [vmem:[#allocation8 + $0x3e0] ss:$16 sps:$4 sm:$0xff]   ;;  %v11914_v28 = vld [vmem:[#allocation8 + $0x524] ss:$16 sps:$4 sm:$0xff]  }
 0x31a   :  { %7378 = vmatpush1.bf16.msra.mxu1 %v11837_v11  ;;  %6927 = vmatprep.subr.bf16.mxu0 %v11842_v57  ;;  %v11915_v11 = vld [vmem:[#allocation8 + $0x528] ss:$16 sps:$4 sm:$0xff]   ;;  %v11920_v57 = vld [vmem:[#allocation8 + $0x544] ss:$16 sps:$4 sm:$0xff]  }
 0x31b   :  { %7379 = vmatprep.subr.bf16.mxu1 %v11845_v46  ;;  %v11923_v46 = vld [vmem:[#allocation8 + $0x54c] ss:$16 sps:$4 sm:$0xff]  }
 0x31d   :  { %6928 = vmatpush1.bf16.msra.mxu0 %v11840_v9  ;;  %v11918_v9 = vld [vmem:[#allocation8 + $0x540] ss:$16 sps:$4 sm:$0xff]  }
 0x31e   :  { %7380 = vmatpush1.bf16.msra.mxu1 %v11843_v29  ;;  %6929 = vmatprep.subr.bf16.mxu0 %v11848_v33  ;;  %v11921_v29 = vld [vmem:[#allocation8 + $0x548] ss:$16 sps:$4 sm:$0xff]   ;;  %v11926_v33 = vld [vmem:[#allocation8 + $0x564] ss:$16 sps:$4 sm:$0xff]  }
 0x31f   :  { %6891 = vmatmul.mubr.bf16.gmra.mrb[92].mxu0 %v12937_v30  ;;  %7381 = vmatprep.subr.bf16.mxu1 %v11851_v37  ;;  %v11927_v37 = vld [vmem:[#allocation8 + $0x568] ss:$16 sps:$4 sm:$0xff]  }
 0x320   :  { %7343 = vmatmul.mubr.bf16.gmra.mrb[92].mxu1 %v12937_v30  ;;  %6933 = vmatprep.mubr.bf16.mxu0 %v12825_v23  ;;  %v11869_v30 = vld [vmem:[#allocation8 + $0x42c] ss:$16 sps:$4 sm:$0xff]  }
 0x321   :  { %6930 = vmatpush1.bf16.msra.mxu0 %v11846_v39  ;;  %7385 = vmatprep.mubr.bf16.mxu1 %v12825_v23  ;;  %v11864_v23 = vld [vmem:[#allocation8 + $0x420] ss:$16 sps:$4 sm:$0xff]   ;;  %v11932_v39 = vld [vmem:[#allocation8 + $0x584] ss:$16 sps:$4 sm:$0xff]  }
 0x322   :  { %7382 = vmatpush1.bf16.msra.mxu1 %v11849_v40  ;;  %6931 = vmatprep.subr.bf16.mxu0 %v11854_v41  ;;  %v11935_v40 = vld [vmem:[#allocation8 + $0x58c] ss:$16 sps:$4 sm:$0xff]   ;;  %v11930_v41 = vld [vmem:[#allocation8 + $0x580] ss:$16 sps:$4 sm:$0xff]  }
 0x323   :  { %7383 = vmatprep.subr.bf16.mxu1 %v11857_v61  ;;  %v11933_v61 = vld [vmem:[#allocation8 + $0x588] ss:$16 sps:$4 sm:$0xff]  }
 0x325   :  { %6932 = vmatpush1.bf16.msra.mxu0 %v11852_v35  ;;  %v11938_v35 = vld [vmem:[#allocation8 + $0x5a4] ss:$16 sps:$4 sm:$0xff]  }
 0x326   :  { %7384 = vmatpush1.bf16.msra.mxu1 %v11855_v53  ;;  %7014 = vmatprep.subr.bf16.mxu0 %v11860_v36  ;;  %v11939_v53 = vld [vmem:[#allocation8 + $0x5a8] ss:$16 sps:$4 sm:$0xff]   ;;  %v11944_v36 = vld [vmem:[#allocation8 + $0x5c4] ss:$16 sps:$4 sm:$0xff]  }
 0x327   :  { %7466 = vmatprep.subr.bf16.mxu1 %v11863_v42  ;;  %v11947_v42 = vld [vmem:[#allocation8 + $0x5cc] ss:$16 sps:$4 sm:$0xff]  }
 0x328   :  { %6934 = vmatmul.mubr.bf16.vlgmr.msra.gmra.mrb[64].mxu0 %v12821_v15 }
 0x329   :  { %7386 = vmatmul.mubr.bf16.vlgmr.msra.gmra.mrb[64].mxu1 %v12821_v15  ;;  %6943 = vmatprep.mubr.bf16.mxu0 %v12841_v59  ;;  %v11881_v15 = vld [vmem:[#allocation8 + $0x46c] ss:$16 sps:$4 sm:$0xff]  }
 0x32a   :  { %7395 = vmatprep.mubr.bf16.mxu1 %v12841_v59  ;;  %7015 = vmatpush1.bf16.msra.mxu0 %v11858_v43  ;;  %v11876_v59 = vld [vmem:[#allocation8 + $0x460] ss:$16 sps:$4 sm:$0xff]  }
 0x32b   :  { %7467 = vmatpush1.bf16.msra.mxu1 %v11861_v44  ;;  %7016 = vmatprep.subr.bf16.mxu0 %v11866_v45  ;;  %v11942_v43 = vld [vmem:[#allocation8 + $0x5c0] ss:$16 sps:$4 sm:$0xff]   ;;  %v11945_v44 = vld [vmem:[#allocation8 + $0x5c8] ss:$16 sps:$4 sm:$0xff]   ;;  %v11950_v45 = vld [vmem:[#allocation8 + $0x5e4] ss:$16 sps:$4 sm:$0xff]  }
 0x32c   :  { %7468 = vmatprep.subr.bf16.mxu1 %v11869_v30  ;;  %v11951_v30 = vld [vmem:[#allocation8 + $0x5e8] ss:$16 sps:$4 sm:$0xff]  }
 0x32e   :  { %7017 = vmatpush1.bf16.msra.mxu0 %v11864_v23  ;;  %v11956_v23 = vld [vmem:[#allocation8 + $0x604] ss:$16 sps:$4 sm:$0xff]  }
 0x32f   :  { %7469 = vmatpush1.bf16.msra.mxu1 %v11867_v47  ;;  %7018 = vmatprep.subr.bf16.mxu0 %v11872_v48  ;;  %v11959_v47 = vld [vmem:[#allocation8 + $0x60c] ss:$16 sps:$4 sm:$0xff]   ;;  %v680_v48 = vsub.s32 4, %v12773_v2 }
 0x330   :  { %6944 = vmatmul.mubr.bf16.gmra.mrb[68].mxu0 %v12837_v56  ;;  %7470 = vmatprep.subr.bf16.mxu1 %v11875_v32  ;;  %v688_v32 = vsub.s32 6, %v12773_v2 }
 0x331   :  { %7396 = vmatmul.mubr.bf16.gmra.mrb[68].mxu1 %v12837_v56  ;;  %6953 = vmatprep.mubr.bf16.mxu0 %v12857_v38  ;;  %v11893_v56 = vld [vmem:[#allocation8 + $0x4ac] ss:$16 sps:$4 sm:$0xff]  }
 0x332   :  { %7405 = vmatprep.mubr.bf16.mxu1 %v12857_v38  ;;  %7019 = vmatpush1.bf16.msra.mxu0 %v11870_v8  ;;  %v11888_v38 = vld [vmem:[#allocation8 + $0x4a0] ss:$16 sps:$4 sm:$0xff]   ;;  %v684_v8 = vsub.s32 5, %v12773_v2 }
 0x333   :  { %7471 = vmatpush1.bf16.msra.mxu1 %v11873_v49  ;;  %7020 = vmatprep.subr.bf16.mxu0 %v11878_v1  ;;  %v12330_v49 = vld [vmem:[#allocation7] sm:$0xff] }
 0x334   :  { %7472 = vmatprep.subr.bf16.mxu1 %v11881_v15  ;;  %v13023_v1 = vrot.slane %v12330_v49, %v680_v48  ;;  %v13025_v15 = vrot.slane %v12330_v49, %v688_v32  ;;  %v11968_v32 = vld [vmem:[#allocation8 + $0x644] ss:$16 sps:$4 sm:$0xff]  }
 0x336   :  { %7021 = vmatpush1.bf16.msra.mxu0 %v11876_v59  ;;  %v13027_v59 = vrot.slane %v12330_v49, %v684_v8  ;;  %v11971_v8 = vld [vmem:[#allocation8 + $0x64c] ss:$16 sps:$4 sm:$0xff]  }
 0x337   :  { %7473 = vmatpush1.bf16.msra.mxu1 %v11879_v26  ;;  %7022 = vmatprep.subr.bf16.mxu0 %v11884_v13 }
 0x338   :  { %6954 = vmatmul.mubr.bf16.gmra.mrb[72].mxu0 %v12853_v34  ;;  %7474 = vmatprep.subr.bf16.mxu1 %v11887_v54 }
 0x339   :  { %7406 = vmatmul.mubr.bf16.gmra.mrb[72].mxu1 %v12853_v34  ;;  %6963 = vmatprep.mubr.bf16.mxu0 %v12873_v10  ;;  %v11905_v34 = vld [vmem:[#allocation8 + $0x4ec] ss:$16 sps:$4 sm:$0xff]  }
 0x33a   :  { %7415 = vmatprep.mubr.bf16.mxu1 %v12873_v10  ;;  %7023 = vmatpush1.bf16.msra.mxu0 %v11882_v62  ;;  %v11900_v10 = vld [vmem:[#allocation8 + $0x4e0] ss:$16 sps:$4 sm:$0xff]  }
 0x33b   :  { %7475 = vmatpush1.bf16.msra.mxu1 %v11885_v5  ;;  %7024 = vmatprep.subr.bf16.mxu0 %v11890_v55 }
 0x33c   :  { %7476 = vmatprep.subr.bf16.mxu1 %v11893_v56 }
 0x33e   :  { %7025 = vmatpush1.bf16.msra.mxu0 %v11888_v38 }
 0x33f   :  { %7477 = vmatpush1.bf16.msra.mxu1 %v11891_v19  ;;  %7026 = vmatprep.subr.bf16.mxu0 %v11896_v0 }
 0x340   :  { %6964 = vmatmul.mubr.bf16.gmra.mrb[76].mxu0 %v12869_v7  ;;  %7478 = vmatprep.subr.bf16.mxu1 %v11899_v20 }
 0x341   :  { %7416 = vmatmul.mubr.bf16.gmra.mrb[76].mxu1 %v12869_v7  ;;  %6973 = vmatprep.mubr.bf16.mxu0 %v12891_v60  ;;  %v11917_v7 = vld [vmem:[#allocation8 + $0x52c] ss:$16 sps:$4 sm:$0xff]  }
 0x342   :  { %7425 = vmatprep.mubr.bf16.mxu1 %v12891_v60  ;;  %7027 = vmatpush1.bf16.msra.mxu0 %v11894_v16  ;;  %v11912_v60 = vld [vmem:[#allocation8 + $0x520] ss:$16 sps:$4 sm:$0xff]  }
 0x343   :  { %7479 = vmatpush1.bf16.msra.mxu1 %v11897_v31  ;;  %7028 = vmatprep.subr.bf16.mxu0 %v11902_v4 }
 0x344   :  { %7480 = vmatprep.subr.bf16.mxu1 %v11905_v34 }
 0x346   :  { %7029 = vmatpush1.bf16.msra.mxu0 %v11900_v10 }
 0x347   :  { %7481 = vmatpush1.bf16.msra.mxu1 %v11903_v50  ;;  %7030 = vmatprep.subr.bf16.mxu0 %v11908_v58 }
 0x348   :  { %6974 = vmatmul.mubr.bf16.gmra.mrb[80].mxu0 %v12887_v52  ;;  %7482 = vmatprep.subr.bf16.mxu1 %v11911_v14 }
 0x349   :  { %7426 = vmatmul.mubr.bf16.gmra.mrb[80].mxu1 %v12887_v52  ;;  %6983 = vmatprep.mubr.bf16.mxu0 %v12908_v63  ;;  %v11929_v52 = vld [vmem:[#allocation8 + $0x56c] ss:$16 sps:$4 sm:$0xff]  }
 0x34a   :  { %7435 = vmatprep.mubr.bf16.mxu1 %v12908_v63  ;;  %7031 = vmatpush1.bf16.msra.mxu0 %v11906_v22  ;;  %v11924_v63 = vld [vmem:[#allocation8 + $0x560] ss:$16 sps:$4 sm:$0xff]  }
 0x34b   :  { %7483 = vmatpush1.bf16.msra.mxu1 %v11909_v27  ;;  %7032 = vmatprep.subr.bf16.mxu0 %v11914_v28 }
 0x34c   :  { %7484 = vmatprep.subr.bf16.mxu1 %v11917_v7 }
 0x34e   :  { %7033 = vmatpush1.bf16.msra.mxu0 %v11912_v60 }
 0x34f   :  { %7485 = vmatpush1.bf16.msra.mxu1 %v11915_v11  ;;  %7034 = vmatprep.subr.bf16.mxu0 %v11920_v57 }
 0x350   :  { %6984 = vmatmul.mubr.bf16.gmra.mrb[84].mxu0 %v12903_v51  ;;  %7486 = vmatprep.subr.bf16.mxu1 %v11923_v46 }
 0x351   :  { %7436 = vmatmul.mubr.bf16.gmra.mrb[84].mxu1 %v12903_v51  ;;  %6993 = vmatprep.mubr.bf16.mxu0 %v12926_v6  ;;  %v11941_v51 = vld [vmem:[#allocation8 + $0x5ac] ss:$16 sps:$4 sm:$0xff]  }
 0x352   :  { %7445 = vmatprep.mubr.bf16.mxu1 %v12926_v6  ;;  %7035 = vmatpush1.bf16.msra.mxu0 %v11918_v9  ;;  %v11936_v6 = vld [vmem:[#allocation8 + $0x5a0] ss:$16 sps:$4 sm:$0xff]  }
 0x353   :  { %7487 = vmatpush1.bf16.msra.mxu1 %v11921_v29  ;;  %7036 = vmatprep.subr.bf16.mxu0 %v11926_v33  ;;  %v11954_v29 = vld [vmem:[#allocation8 + $0x600] ss:$16 sps:$4 sm:$0xff]   ;;  %v11957_v33 = vld [vmem:[#allocation8 + $0x608] ss:$16 sps:$4 sm:$0xff]  }
 0x354   :  { %7488 = vmatprep.subr.bf16.mxu1 %v11929_v52 }
 0x356   :  { %7037 = vmatpush1.bf16.msra.mxu0 %v11924_v63 }
 0x357   :  { %7489 = vmatpush1.bf16.msra.mxu1 %v11927_v37  ;;  %7038 = vmatprep.subr.bf16.mxu0 %v11932_v39 }
 0x358   :  { %6994 = vmatmul.mubr.bf16.gmra.mrb[88].mxu0 %v12921_v3  ;;  %7490 = vmatprep.subr.bf16.mxu1 %v11935_v40  ;;  %v11962_v40 = vld [vmem:[#allocation8 + $0x624] ss:$16 sps:$4 sm:$0xff]  }
 0x359   :  { %7446 = vmatmul.mubr.bf16.gmra.mrb[88].mxu1 %v12921_v3  ;;  %7003 = vmatprep.mubr.bf16.mxu0 %v12944_v24  ;;  %v11953_v3 = vld [vmem:[#allocation8 + $0x5ec] ss:$16 sps:$4 sm:$0xff]  }
 0x35a   :  { %7455 = vmatprep.mubr.bf16.mxu1 %v12944_v24  ;;  %7039 = vmatpush1.bf16.msra.mxu0 %v11930_v41  ;;  %v11948_v24 = vld [vmem:[#allocation8 + $0x5e0] ss:$16 sps:$4 sm:$0xff]   ;;  %v11965_v41 = vld [vmem:[#allocation8 + $0x62c] ss:$16 sps:$4 sm:$0xff]  }
 0x35b   :  { %7491 = vmatpush1.bf16.msra.mxu1 %v11933_v61  ;;  %7040 = vmatprep.subr.bf16.mxu0 %v11938_v35 }
 0x35c   :  { %7492 = vmatprep.subr.bf16.mxu1 %v11941_v51 }
 0x35e   :  { %7041 = vmatpush1.bf16.msra.mxu0 %v11936_v6 }
 0x35f   :  { %7493 = vmatpush1.bf16.msra.mxu1 %v11939_v53  ;;  %7042 = vmatprep.subr.bf16.mxu0 %v11944_v36 }
 0x360   :  { %7004 = vmatmul.mubr.bf16.gmra.mrb[92].mxu0 %v12939_v25  ;;  %7494 = vmatprep.subr.bf16.mxu1 %v11947_v42 }
 0x361   :  { %7456 = vmatmul.mubr.bf16.gmra.mrb[92].mxu1 %v12939_v25  ;;  %v692_v25 = vsub.s32 7, %v12773_v2 }
 0x362   :  { %7043 = vmatpush1.bf16.msra.mxu0 %v11942_v43 }
 0x363   :  { %7495 = vmatpush1.bf16.msra.mxu1 %v11945_v44  ;;  %7044 = vmatprep.subr.bf16.mxu0 %v11950_v45  ;;  %v13029_v26 = vrot.slane %v12330_v49, %v692_v25 }
 0x364   :  { %7496 = vmatprep.subr.bf16.mxu1 %v11953_v3 }
 0x366   :  { %7045 = vmatpush1.bf16.msra.mxu0 %v11948_v24  ;;  %v11960_v24 = vld [vmem:[#allocation8 + $0x620] ss:$16 sps:$4 sm:$0xff]  }
 0x367   :  { %7497 = vmatpush1.bf16.msra.mxu1 %v11951_v30  ;;  %7127 = vmatprep.subr.bf16.mxu0 %v11956_v23  ;;  %v11963_v30 = vld [vmem:[#allocation8 + $0x628] ss:$16 sps:$4 sm:$0xff]  }
 0x368   :  { %7579 = vmatprep.subr.bf16.mxu1 %v11959_v47 }
 0x37a   :  { %v4507_v13 = vpop.f32.mrb[32].mxu0 }
 0x37b   :  { %v10733_v54 = vadd.f32 %v4507_v13, %v13023_v1  ;;  %v4959_v62 = vpop.f32.mrb[32].mxu1  ;;  %v4509_v5 = vpop.f32.mrb[33].mxu0 }
 0x37c   :  { %v10765_v55 = vadd.f32 %v4959_v62, %v13025_v15  ;;  %v10734_v56 = vadd.f32 %v4509_v5, %v13027_v59  ;;  %v4961_v38 = vpop.f32.mrb[33].mxu1  ;;  %v4511_v2 = vpop.f32.mrb[34].mxu0 }
 0x37d   :  { %v10766_v19 = vadd.f32 %v4961_v38, %v13029_v26  ;;  %v10735_v0 = vadd.f32 %v4511_v2, %v13023_v1  ;;  %v4963_v20 = vpop.f32.mrb[34].mxu1  ;;  %v4513_v16 = vpop.f32.mrb[35].mxu0  ;;  %v5042_v10 = vmax.f32 %v10733_v54, 0.0 }
 0x37e   :  { %v10767_v31 = vadd.f32 %v4963_v20, %v13025_v15  ;;  %v10736_v4 = vadd.f32 %v4513_v16, %v13027_v59  ;;  %v4965_v34 = vpop.f32.mrb[35].mxu1  ;;  %v5044_v14 = vmax.f32 %v10765_v55, 0.0  ;;  %v5043_v22 = vmax.f32 %v10734_v56, 0.0 }
 0x37f   :  { %v5050_v50 = vmax.f32 %v10735_v0, 0.0  ;;  %v10768_v58 = vadd.f32 %v4965_v34, %v13029_v26  ;;  %v5045_v7 = vmax.f32 %v10766_v19, 0.0  ;;  %v11966_v19 = vld [vmem:[#allocation8 + $0x640] ss:$16 sps:$4 sm:$0xff]   ;;  %v11969_v0 = vld [vmem:[#allocation8 + $0x648] ss:$16 sps:$4 sm:$0xff]  }
 0x380   :  { %v5052_v27 = vmax.f32 %v10767_v31, 0.0  ;;  %v5051_v28 = vmax.f32 %v10736_v4, 0.0  ;;  %v11974_v34 = vld [vmem:[#allocation8 + $0x664] ss:$16 sps:$4 sm:$0xff]  }
 0x381   :  { %v5170_v60 = vpack.c.bf16 %v5050_v50, %v5042_v10  ;;  %v5053_v11 = vmax.f32 %v10768_v58, 0.0  ;;  %v11977_v10 = vld [vmem:[#allocation8 + $0x66c] ss:$16 sps:$4 sm:$0xff]  }
 0x382   :  { %v13039_v57 = vpack.c.bf16 %v5052_v27, %v5044_v14  ;;  %v5171_v46 = vpack.c.bf16 %v5051_v28, %v5043_v22  ;;  %v4517_v9 = vpop.f32.mrb[36].mxu0 }
 0x383   :  { %v13041_v52 = vpack.c.bf16 %v5053_v11, %v5045_v7  ;;  %v10737_v63 = vadd.f32 %v4517_v9, %v13023_v1  ;;  %v4969_v37 = vpop.f32.mrb[36].mxu1  ;;  %v4519_v39 = vpop.f32.mrb[37].mxu0 }
 0x384   :  { %v10769_v61 = vadd.f32 %v4969_v37, %v13025_v15  ;;  %v10738_v35 = vadd.f32 %v4519_v39, %v13027_v59  ;;  %v4971_v51 = vpop.f32.mrb[37].mxu1  ;;  %v4521_v6 = vpop.f32.mrb[38].mxu0  ;;  %7046 = vmatprep.mubr.bf16.mxu0 %v5171_v46  ;;  %7498 = vmatprep.mubr.bf16.mxu1 %v5171_v46 }
 0x385   :  { %v10770_v53 = vadd.f32 %v4971_v51, %v13029_v26  ;;  %v10739_v36 = vadd.f32 %v4521_v6, %v13023_v1  ;;  %v4973_v42 = vpop.f32.mrb[38].mxu1  ;;  %v4523_v43 = vpop.f32.mrb[39].mxu0  ;;  %7047 = vmatmul.mubr.bf16.vlgmr.msra.gmra.mrb[64].mxu0 %v5170_v60  ;;  %7499 = vmatmul.mubr.bf16.vlgmr.msra.gmra.mrb[64].mxu1 %v5170_v60  ;;  %v5058_v23 = vmax.f32 %v10737_v63, 0.0 }
 0x386   :  { %v10771_v44 = vadd.f32 %v4973_v42, %v13025_v15  ;;  %v10740_v45 = vadd.f32 %v4523_v43, %v13027_v59  ;;  %v4975_v3 = vpop.f32.mrb[39].mxu1  ;;  %7128 = vmatpush1.bf16.msra.mxu0 %v11954_v29  ;;  %7580 = vmatpush1.bf16.msra.mxu1 %v11957_v33  ;;  %v5060_v25 = vmax.f32 %v10769_v61, 0.0  ;;  %v5059_v49 = vmax.f32 %v10738_v35, 0.0  ;;  %v11972_v29 = vld [vmem:[#allocation8 + $0x660] ss:$16 sps:$4 sm:$0xff]  }
 0x387   :  { %v5066_v47 = vmax.f32 %v10739_v36, 0.0  ;;  %v10772_v48 = vadd.f32 %v4975_v3, %v13029_v26  ;;  %7129 = vmatprep.subr.bf16.mxu0 %v11962_v40  ;;  %7581 = vmatprep.subr.bf16.mxu1 %v11965_v41  ;;  %v5061_v62 = vmax.f32 %v10770_v53, 0.0  ;;  %v11975_v33 = vld [vmem:[#allocation8 + $0x668] ss:$16 sps:$4 sm:$0xff]   ;;  %v11980_v40 = vld [vmem:[#allocation8 + $0x684] ss:$16 sps:$4 sm:$0xff]  }
 0x388   :  { %v5068_v13 = vmax.f32 %v10771_v44, 0.0  ;;  %v5067_v54 = vmax.f32 %v10740_v45, 0.0  ;;  %v11983_v41 = vld [vmem:[#allocation8 + $0x68c] ss:$16 sps:$4 sm:$0xff]   ;;  %v11978_v3 = vld [vmem:[#allocation8 + $0x680] ss:$16 sps:$4 sm:$0xff]  }
 0x389   :  { %v5178_v5 = vpack.c.bf16 %v5066_v47, %v5058_v23  ;;  %v5069_v55 = vmax.f32 %v10772_v48, 0.0 }
 0x38a   :  { %v13051_v56 = vpack.c.bf16 %v5068_v13, %v5060_v25  ;;  %v5179_v38 = vpack.c.bf16 %v5067_v54, %v5059_v49  ;;  %v4527_v2 = vpop.f32.mrb[40].mxu0  ;;  %7130 = vmatpush1.bf16.msra.mxu0 %v11960_v24  ;;  %7582 = vmatpush1.bf16.msra.mxu1 %v11963_v30  ;;  %v11981_v24 = vld [vmem:[#allocation8 + $0x688] ss:$16 sps:$4 sm:$0xff]  }
 0x38b   :  { %v13053_v20 = vpack.c.bf16 %v5069_v55, %v5061_v62  ;;  %v10741_v16 = vadd.f32 %v4527_v2, %v13023_v1  ;;  %v4979_v31 = vpop.f32.mrb[40].mxu1  ;;  %v4529_v4 = vpop.f32.mrb[41].mxu0  ;;  %7131 = vmatprep.subr.bf16.mxu0 %v11968_v32  ;;  %7583 = vmatprep.subr.bf16.mxu1 %v11971_v8  ;;  %v11986_v32 = vld [vmem:[#allocation8 + $0x6a4] ss:$16 sps:$4 sm:$0xff]   ;;  %v11989_v8 = vld [vmem:[#allocation8 + $0x6ac] ss:$16 sps:$4 sm:$0xff]  }
 0x38c   :  { %v10773_v50 = vadd.f32 %v4979_v31, %v13025_v15  ;;  %v10742_v58 = vadd.f32 %v4529_v4, %v13027_v59  ;;  %v4981_v14 = vpop.f32.mrb[41].mxu1  ;;  %v4531_v22 = vpop.f32.mrb[42].mxu0  ;;  %7056 = vmatprep.mubr.bf16.mxu0 %v5179_v38  ;;  %7508 = vmatprep.mubr.bf16.mxu1 %v5179_v38  ;;  %v11987_v31 = vld [vmem:[#allocation8 + $0x6a8] ss:$16 sps:$4 sm:$0xff]  }
 0x38d   :  { %v10774_v27 = vadd.f32 %v4981_v14, %v13029_v26  ;;  %v10743_v28 = vadd.f32 %v4531_v22, %v13023_v1  ;;  %v4983_v7 = vpop.f32.mrb[42].mxu1  ;;  %v4533_v60 = vpop.f32.mrb[43].mxu0  ;;  %7057 = vmatmul.mubr.bf16.gmra.mrb[68].mxu0 %v5178_v5  ;;  %7509 = vmatmul.mubr.bf16.gmra.mrb[68].mxu1 %v5178_v5  ;;  %v5074_v63 = vmax.f32 %v10741_v16, 0.0  ;;  %v11984_v16 = vld [vmem:[#allocation8 + $0x6a0] ss:$16 sps:$4 sm:$0xff]  }
 0x38e   :  { %v10775_v11 = vadd.f32 %v4983_v7, %v13025_v15  ;;  %v10744_v46 = vadd.f32 %v4533_v60, %v13027_v59  ;;  %v4985_v9 = vpop.f32.mrb[43].mxu1  ;;  %7132 = vmatpush1.bf16.msra.mxu0 %v11966_v19  ;;  %7584 = vmatpush1.bf16.msra.mxu1 %v11969_v0  ;;  %v5076_v61 = vmax.f32 %v10773_v50, 0.0  ;;  %v5075_v35 = vmax.f32 %v10742_v58, 0.0  ;;  %v11992_v50 = vld [vmem:[#allocation8 + $0x6c4] ss:$16 sps:$4 sm:$0xff]  }
 0x38f   :  { %v5082_v37 = vmax.f32 %v10743_v28, 0.0  ;;  %v10776_v39 = vadd.f32 %v4985_v9, %v13029_v26  ;;  %7133 = vmatprep.subr.bf16.mxu0 %v11974_v34  ;;  %7585 = vmatprep.subr.bf16.mxu1 %v11977_v10  ;;  %v5077_v53 = vmax.f32 %v10774_v27, 0.0  ;;  %v11995_v58 = vld [vmem:[#allocation8 + $0x6cc] ss:$16 sps:$4 sm:$0xff]  }
 0x390   :  { %v5084_v51 = vmax.f32 %v10775_v11, 0.0  ;;  %v5083_v6 = vmax.f32 %v10744_v46, 0.0 }
 0x391   :  { %v5186_v36 = vpack.c.bf16 %v5082_v37, %v5074_v63  ;;  %v5085_v42 = vmax.f32 %v10776_v39, 0.0  ;;  %v11993_v63 = vld [vmem:[#allocation8 + $0x6c8] ss:$16 sps:$4 sm:$0xff]  }
 0x392   :  { %v13063_v43 = vpack.c.bf16 %v5084_v51, %v5076_v61  ;;  %v5187_v44 = vpack.c.bf16 %v5083_v6, %v5075_v35  ;;  %v4537_v45 = vpop.f32.mrb[44].mxu0  ;;  %7134 = vmatpush1.bf16.msra.mxu0 %v11972_v29  ;;  %7586 = vmatpush1.bf16.msra.mxu1 %v11975_v33  ;;  %v11990_v33 = vld [vmem:[#allocation8 + $0x6c0] ss:$16 sps:$4 sm:$0xff]   ;;  %v11998_v61 = vld [vmem:[#allocation8 + $0x6e4] ss:$16 sps:$4 sm:$0xff]  }
 0x393   :  { %v13065_v30 = vpack.c.bf16 %v5085_v42, %v5077_v53  ;;  %v10745_v23 = vadd.f32 %v4537_v45, %v13023_v1  ;;  %v4989_v47 = vpop.f32.mrb[44].mxu1  ;;  %v4539_v48 = vpop.f32.mrb[45].mxu0  ;;  %7135 = vmatprep.subr.bf16.mxu0 %v11980_v40  ;;  %7587 = vmatprep.subr.bf16.mxu1 %v11983_v41  ;;  %v12001_v35 = vld [vmem:[#allocation8 + $0x6ec] ss:$16 sps:$4 sm:$0xff]  }
 0x394   :  { %v10777_v25 = vadd.f32 %v4989_v47, %v13025_v15  ;;  %v10746_v49 = vadd.f32 %v4539_v48, %v13027_v59  ;;  %v4991_v13 = vpop.f32.mrb[45].mxu1  ;;  %v4541_v54 = vpop.f32.mrb[46].mxu0  ;;  %7066 = vmatprep.mubr.bf16.mxu0 %v5187_v44  ;;  %7518 = vmatprep.mubr.bf16.mxu1 %v5187_v44  ;;  %v11996_v48 = vld [vmem:[#allocation8 + $0x6e0] ss:$16 sps:$4 sm:$0xff]  }
 0x395   :  { %v10778_v62 = vadd.f32 %v4991_v13, %v13029_v26  ;;  %v10747_v5 = vadd.f32 %v4541_v54, %v13023_v1  ;;  %v4993_v55 = vpop.f32.mrb[46].mxu1  ;;  %v4543_v38 = vpop.f32.mrb[47].mxu0  ;;  %7067 = vmatmul.mubr.bf16.gmra.mrb[72].mxu0 %v5186_v36  ;;  %7519 = vmatmul.mubr.bf16.gmra.mrb[72].mxu1 %v5186_v36  ;;  %v5090_v4 = vmax.f32 %v10745_v23, 0.0  ;;  %v12004_v13 = vld [vmem:[#allocation8 + $0x704] ss:$16 sps:$4 sm:$0xff]  }
 0x396   :  { %v10779_v2 = vadd.f32 %v4993_v55, %v13025_v15  ;;  %v10748_v19 = vadd.f32 %v4543_v38, %v13027_v59  ;;  %v4995_v0 = vpop.f32.mrb[47].mxu1  ;;  %7136 = vmatpush1.bf16.msra.mxu0 %v11978_v3  ;;  %7588 = vmatpush1.bf16.msra.mxu1 %v11981_v24  ;;  %v5092_v14 = vmax.f32 %v10777_v25, 0.0  ;;  %v5091_v22 = vmax.f32 %v10746_v49, 0.0  ;;  %v12007_v54 = vld [vmem:[#allocation8 + $0x70c] ss:$16 sps:$4 sm:$0xff]  }
 0x397   :  { %v5098_v34 = vmax.f32 %v10747_v5, 0.0  ;;  %v10780_v10 = vadd.f32 %v4995_v0, %v13029_v26  ;;  %7137 = vmatprep.subr.bf16.mxu0 %v11986_v32  ;;  %7589 = vmatprep.subr.bf16.mxu1 %v11989_v8  ;;  %v5093_v7 = vmax.f32 %v10778_v62, 0.0  ;;  %v11999_v32 = vld [vmem:[#allocation8 + $0x6e8] ss:$16 sps:$4 sm:$0xff]  }
 0x398   :  { %v5100_v27 = vmax.f32 %v10779_v2, 0.0  ;;  %v5099_v28 = vmax.f32 %v10748_v19, 0.0 }
 0x399   :  { %v5194_v60 = vpack.c.bf16 %v5098_v34, %v5090_v4  ;;  %v5101_v11 = vmax.f32 %v10780_v10, 0.0  ;;  %v12002_v34 = vld [vmem:[#allocation8 + $0x700] ss:$16 sps:$4 sm:$0xff]   ;;  %v12005_v10 = vld [vmem:[#allocation8 + $0x708] ss:$16 sps:$4 sm:$0xff]  }
 0x39a   :  { %v13075_v46 = vpack.c.bf16 %v5100_v27, %v5092_v14  ;;  %v5195_v9 = vpack.c.bf16 %v5099_v28, %v5091_v22  ;;  %v4547_v29 = vpop.f32.mrb[48].mxu0  ;;  %7138 = vmatpush1.bf16.msra.mxu0 %v11984_v16  ;;  %7590 = vmatpush1.bf16.msra.mxu1 %v11987_v31  ;;  %v12010_v27 = vld [vmem:[#allocation8 + $0x724] ss:$16 sps:$4 sm:$0xff]   ;;  %v12013_v28 = vld [vmem:[#allocation8 + $0x72c] ss:$16 sps:$4 sm:$0xff]  }
 0x39b   :  { %v13077_v37 = vpack.c.bf16 %v5101_v11, %v5093_v7  ;;  %v10749_v39 = vadd.f32 %v4547_v29, %v13023_v1  ;;  %v4999_v40 = vpop.f32.mrb[48].mxu1  ;;  %v4549_v41 = vpop.f32.mrb[49].mxu0  ;;  %7139 = vmatprep.subr.bf16.mxu0 %v11992_v50  ;;  %7591 = vmatprep.subr.bf16.mxu1 %v11995_v58 }
 0x39c   :  { %v10781_v51 = vadd.f32 %v4999_v40, %v13025_v15  ;;  %v10750_v6 = vadd.f32 %v4549_v41, %v13027_v59  ;;  %v5001_v53 = vpop.f32.mrb[49].mxu1  ;;  %v4551_v36 = vpop.f32.mrb[50].mxu0  ;;  %7076 = vmatprep.mubr.bf16.mxu0 %v5195_v9  ;;  %7528 = vmatprep.mubr.bf16.mxu1 %v5195_v9 }
 0x39d   :  { %v10782_v42 = vadd.f32 %v5001_v53, %v13029_v26  ;;  %v10751_v44 = vadd.f32 %v4551_v36, %v13023_v1  ;;  %v5003_v45 = vpop.f32.mrb[50].mxu1  ;;  %v4553_v3 = vpop.f32.mrb[51].mxu0  ;;  %7077 = vmatmul.mubr.bf16.gmra.mrb[76].mxu0 %v5194_v60  ;;  %7529 = vmatmul.mubr.bf16.gmra.mrb[76].mxu1 %v5194_v60  ;;  %v5106_v8 = vmax.f32 %v10749_v39, 0.0 }
 0x39e   :  { %v10783_v24 = vadd.f32 %v5003_v45, %v13025_v15  ;;  %v10752_v23 = vadd.f32 %v4553_v3, %v13027_v59  ;;  %v5005_v47 = vpop.f32.mrb[51].mxu1  ;;  %7140 = vmatpush1.bf16.msra.mxu0 %v11990_v33  ;;  %7592 = vmatpush1.bf16.msra.mxu1 %v11993_v63  ;;  %v5108_v62 = vmax.f32 %v10781_v51, 0.0  ;;  %v5107_v5 = vmax.f32 %v10750_v6, 0.0  ;;  %v12011_v51 = vld [vmem:[#allocation8 + $0x728] ss:$16 sps:$4 sm:$0xff]  }
 0x39f   :  { %v5114_v25 = vmax.f32 %v10751_v44, 0.0  ;;  %v10784_v49 = vadd.f32 %v5005_v47, %v13029_v26  ;;  %7141 = vmatprep.subr.bf16.mxu0 %v11998_v61  ;;  %7593 = vmatprep.subr.bf16.mxu1 %v12001_v35  ;;  %v5109_v2 = vmax.f32 %v10782_v42, 0.0  ;;  %v12008_v35 = vld [vmem:[#allocation8 + $0x720] ss:$16 sps:$4 sm:$0xff]   ;;  %v12016_v42 = vld [vmem:[#allocation8 + $0x744] ss:$16 sps:$4 sm:$0xff]  }
 0x3a0   :  { %v5116_v55 = vmax.f32 %v10783_v24, 0.0  ;;  %v5115_v38 = vmax.f32 %v10752_v23, 0.0  ;;  %v12019_v44 = vld [vmem:[#allocation8 + $0x74c] ss:$16 sps:$4 sm:$0xff]  }
 0x3a1   :  { %v5202_v19 = vpack.c.bf16 %v5114_v25, %v5106_v8  ;;  %v5117_v0 = vmax.f32 %v10784_v49, 0.0 }
 0x3a2   :  { %v13087_v16 = vpack.c.bf16 %v5116_v55, %v5108_v62  ;;  %v5203_v31 = vpack.c.bf16 %v5115_v38, %v5107_v5  ;;  %v4557_v4 = vpop.f32.mrb[52].mxu0  ;;  %7142 = vmatpush1.bf16.msra.mxu0 %v11996_v48  ;;  %7594 = vmatpush1.bf16.msra.mxu1 %v11999_v32 }
 0x3a3   :  { %v13089_v50 = vpack.c.bf16 %v5117_v0, %v5109_v2  ;;  %v10753_v58 = vadd.f32 %v4557_v4, %v13023_v1  ;;  %v5009_v14 = vpop.f32.mrb[52].mxu1  ;;  %v4559_v22 = vpop.f32.mrb[53].mxu0  ;;  %7143 = vmatprep.subr.bf16.mxu0 %v12004_v13  ;;  %7595 = vmatprep.subr.bf16.mxu1 %v12007_v54  ;;  %v12014_v13 = vld [vmem:[#allocation8 + $0x740] ss:$16 sps:$4 sm:$0xff]   ;;  %v12017_v54 = vld [vmem:[#allocation8 + $0x748] ss:$16 sps:$4 sm:$0xff]  }
 0x3a4   :  { %v10785_v7 = vadd.f32 %v5009_v14, %v13025_v15  ;;  %v10754_v60 = vadd.f32 %v4559_v22, %v13027_v59  ;;  %v5011_v11 = vpop.f32.mrb[53].mxu1  ;;  %v4561_v9 = vpop.f32.mrb[54].mxu0  ;;  %7086 = vmatprep.mubr.bf16.mxu0 %v5203_v31  ;;  %7538 = vmatprep.mubr.bf16.mxu1 %v5203_v31  ;;  %v12022_v2 = vld [vmem:[#allocation8 + $0x764] ss:$16 sps:$4 sm:$0xff]  }
 0x3a5   :  { %v10786_v29 = vadd.f32 %v5011_v11, %v13029_v26  ;;  %v10755_v33 = vadd.f32 %v4561_v9, %v13023_v1  ;;  %v5013_v63 = vpop.f32.mrb[54].mxu1  ;;  %v4563_v39 = vpop.f32.mrb[55].mxu0  ;;  %7087 = vmatmul.mubr.bf16.gmra.mrb[80].mxu0 %v5202_v19  ;;  %7539 = vmatmul.mubr.bf16.gmra.mrb[80].mxu1 %v5202_v19  ;;  %v5122_v6 = vmax.f32 %v10753_v58, 0.0  ;;  %v12025_v19 = vld [vmem:[#allocation8 + $0x76c] ss:$16 sps:$4 sm:$0xff]  }
 0x3a6   :  { %v10787_v40 = vadd.f32 %v5013_v63, %v13025_v15  ;;  %v10756_v41 = vadd.f32 %v4563_v39, %v13027_v59  ;;  %v5015_v61 = vpop.f32.mrb[55].mxu1  ;;  %7144 = vmatpush1.bf16.msra.mxu0 %v12002_v34  ;;  %7596 = vmatpush1.bf16.msra.mxu1 %v12005_v10  ;;  %v5124_v45 = vmax.f32 %v10785_v7, 0.0  ;;  %v5123_v3 = vmax.f32 %v10754_v60, 0.0  ;;  %v12020_v60 = vld [vmem:[#allocation8 + $0x760] ss:$16 sps:$4 sm:$0xff]  }
 0x3a7   :  { %v5130_v53 = vmax.f32 %v10755_v33, 0.0  ;;  %v10788_v36 = vadd.f32 %v5015_v61, %v13029_v26  ;;  %7145 = vmatprep.subr.bf16.mxu0 %v12010_v27  ;;  %7597 = vmatprep.subr.bf16.mxu1 %v12013_v28  ;;  %v5125_v47 = vmax.f32 %v10786_v29, 0.0  ;;  %v12023_v11 = vld [vmem:[#allocation8 + $0x768] ss:$16 sps:$4 sm:$0xff]   ;;  %v12028_v63 = vld [vmem:[#allocation8 + $0x784] ss:$16 sps:$4 sm:$0xff]  }
 0x3a8   :  { %v5132_v24 = vmax.f32 %v10787_v40, 0.0  ;;  %v5131_v23 = vmax.f32 %v10756_v41, 0.0  ;;  %v12031_v39 = vld [vmem:[#allocation8 + $0x78c] ss:$16 sps:$4 sm:$0xff]  }
 0x3a9   :  { %v5210_v48 = vpack.c.bf16 %v5130_v53, %v5122_v6  ;;  %v5133_v32 = vmax.f32 %v10788_v36, 0.0 }
 0x3aa   :  { %v13099_v8 = vpack.c.bf16 %v5132_v24, %v5124_v45  ;;  %v5211_v25 = vpack.c.bf16 %v5131_v23, %v5123_v3  ;;  %v4567_v49 = vpop.f32.mrb[56].mxu0  ;;  %7146 = vmatpush1.bf16.msra.mxu0 %v12008_v35  ;;  %7598 = vmatpush1.bf16.msra.mxu1 %v12011_v51  ;;  %v12026_v45 = vld [vmem:[#allocation8 + $0x780] ss:$16 sps:$4 sm:$0xff]   ;;  %v12029_v3 = vld [vmem:[#allocation8 + $0x788] ss:$16 sps:$4 sm:$0xff]  }
 0x3ab   :  { %v13101_v62 = vpack.c.bf16 %v5133_v32, %v5125_v47  ;;  %v10757_v5 = vadd.f32 %v4567_v49, %v13023_v1  ;;  %v5019_v55 = vpop.f32.mrb[56].mxu1  ;;  %v4569_v38 = vpop.f32.mrb[57].mxu0  ;;  %7147 = vmatprep.subr.bf16.mxu0 %v12016_v42  ;;  %7599 = vmatprep.subr.bf16.mxu1 %v12019_v44  ;;  %v12034_v32 = vld [vmem:[#allocation8 + $0x7a4] ss:$16 sps:$4 sm:$0xff]  }
 0x3ac   :  { %v10789_v0 = vadd.f32 %v5019_v55, %v13025_v15  ;;  %v10758_v31 = vadd.f32 %v4569_v38, %v13027_v59  ;;  %v5021_v4 = vpop.f32.mrb[57].mxu1  ;;  %v4571_v34 = vpop.f32.mrb[58].mxu0  ;;  %7096 = vmatprep.mubr.bf16.mxu0 %v5211_v25  ;;  %7548 = vmatprep.mubr.bf16.mxu1 %v5211_v25  ;;  %v12037_v25 = vld [vmem:[#allocation8 + $0x7ac] ss:$16 sps:$4 sm:$0xff]  }
 0x3ad   :  { %v10790_v10 = vadd.f32 %v5021_v4, %v13029_v26  ;;  %v10759_v58 = vadd.f32 %v4571_v34, %v13023_v1  ;;  %v5023_v14 = vpop.f32.mrb[58].mxu1  ;;  %v4573_v22 = vpop.f32.mrb[59].mxu0  ;;  %7097 = vmatmul.mubr.bf16.gmra.mrb[84].mxu0 %v5210_v48  ;;  %7549 = vmatmul.mubr.bf16.gmra.mrb[84].mxu1 %v5210_v48  ;;  %v5138_v9 = vmax.f32 %v10757_v5, 0.0  ;;  %v12032_v34 = vld [vmem:[#allocation8 + $0x7a0] ss:$16 sps:$4 sm:$0xff]  }
 0x3ae   :  { %v10791_v27 = vadd.f32 %v5023_v14, %v13025_v15  ;;  %v10760_v28 = vadd.f32 %v4573_v22, %v13027_v59  ;;  %v5025_v7 = vpop.f32.mrb[59].mxu1  ;;  %7148 = vmatpush1.bf16.msra.mxu0 %v12014_v13  ;;  %7600 = vmatpush1.bf16.msra.mxu1 %v12017_v54  ;;  %v5140_v40 = vmax.f32 %v10789_v0, 0.0  ;;  %v5139_v41 = vmax.f32 %v10758_v31, 0.0 }
 0x3af   :  { %v5146_v29 = vmax.f32 %v10759_v58, 0.0  ;;  %v10792_v33 = vadd.f32 %v5025_v7, %v13029_v26  ;;  %7149 = vmatprep.subr.bf16.mxu0 %v12022_v2  ;;  %7601 = vmatprep.subr.bf16.mxu1 %v12025_v19  ;;  %v5141_v51 = vmax.f32 %v10790_v10, 0.0  ;;  %v12035_v10 = vld [vmem:[#allocation8 + $0x7a8] ss:$16 sps:$4 sm:$0xff]  }
 0x3b0   :  { %v5148_v61 = vmax.f32 %v10791_v27, 0.0  ;;  %v5147_v35 = vmax.f32 %v10760_v28, 0.0  ;;  %v12043_v27 = vld [vmem:[#allocation8 + $0x7cc] ss:$16 sps:$4 sm:$0xff]  }
 0x3b1   :  { %v5218_v6 = vpack.c.bf16 %v5146_v29, %v5138_v9  ;;  %v5149_v53 = vmax.f32 %v10792_v33, 0.0 }
 0x3b2   :  { %v13111_v36 = vpack.c.bf16 %v5148_v61, %v5140_v40  ;;  %v5219_v42 = vpack.c.bf16 %v5147_v35, %v5139_v41  ;;  %v4577_v44 = vpop.f32.mrb[60].mxu0  ;;  %7150 = vmatpush1.bf16.msra.mxu0 %v12020_v60  ;;  %7602 = vmatpush1.bf16.msra.mxu1 %v12023_v11  ;;  %v12046_v40 = vld [vmem:[#allocation8 + $0x7e4] ss:$16 sps:$4 sm:$0xff]   ;;  %v12049_v41 = vld [vmem:[#allocation8 + $0x7ec] ss:$16 sps:$4 sm:$0xff]  }
 0x3b3   :  { %v13113_v24 = vpack.c.bf16 %v5149_v53, %v5141_v51  ;;  %v10761_v23 = vadd.f32 %v4577_v44, %v13023_v1  ;;  %v5029_v47 = vpop.f32.mrb[60].mxu1  ;;  %v4579_v48 = vpop.f32.mrb[61].mxu0  ;;  %7151 = vmatprep.subr.bf16.mxu0 %v12028_v63  ;;  %7603 = vmatprep.subr.bf16.mxu1 %v12031_v39  ;;  %v12038_v63 = vld [vmem:[#allocation8 + $0x7c0] ss:$16 sps:$4 sm:$0xff]   ;;  %v12047_v35 = vld [vmem:[#allocation8 + $0x7e8] ss:$16 sps:$4 sm:$0xff]  }
 0x3b4   :  { %v10793_v49 = vadd.f32 %v5029_v47, %v13025_v15  ;;  %v10762_v13 = vadd.f32 %v4579_v48, %v13027_v59  ;;  %v5031_v54 = vpop.f32.mrb[61].mxu1  ;;  %v4581_v5 = vpop.f32.mrb[62].mxu0  ;;  %7106 = vmatprep.mubr.bf16.mxu0 %v5219_v42  ;;  %7558 = vmatprep.mubr.bf16.mxu1 %v5219_v42  ;;  %v12044_v61 = vld [vmem:[#allocation8 + $0x7e0] ss:$16 sps:$4 sm:$0xff]   ;;  %v12052_v51 = vld [vmem:[#allocation11 + $0x4] ss:$16 sps:$4 sm:$0xff]  }
 0x3b5   :  { %v10794_v55 = vadd.f32 %v5031_v54, %v13029_v26  ;;  %v10763_v38 = vadd.f32 %v4581_v5, %v13023_v1  ;;  %v5033_v2 = vpop.f32.mrb[62].mxu1  ;;  %v4583_v19 = vpop.f32.mrb[63].mxu0  ;;  %7107 = vmatmul.mubr.bf16.gmra.mrb[88].mxu0 %v5218_v6  ;;  %7559 = vmatmul.mubr.bf16.gmra.mrb[88].mxu1 %v5218_v6  ;;  %v5154_v58 = vmax.f32 %v10761_v23, 0.0  ;;  %v12040_v1 = vld [vmem:[#allocation8 + $0x7c4] ss:$16 sps:$4 sm:$0xff]  }
 0x3b6   :  { %v10795_v0 = vadd.f32 %v5033_v2, %v13025_v15  ;;  %v10764_v31 = vadd.f32 %v4583_v19, %v13027_v59  ;;  %v5035_v4 = vpop.f32.mrb[63].mxu1  ;;  %7152 = vmatpush1.bf16.msra.mxu0 %v12026_v45  ;;  %7604 = vmatpush1.bf16.msra.mxu1 %v12029_v3  ;;  %v5156_v28 = vmax.f32 %v10793_v49, 0.0  ;;  %v5155_v7 = vmax.f32 %v10762_v13, 0.0  ;;  %v12055_v6 = vld [vmem:[#allocation11 + $0xc] ss:$16 sps:$4 sm:$0xff]  }
 0x3b7   :  { %v5162_v14 = vmax.f32 %v10763_v38, 0.0  ;;  %v10796_v22 = vadd.f32 %v5035_v4, %v13029_v26  ;;  %7153 = vmatprep.subr.bf16.mxu0 %v12034_v32  ;;  %7605 = vmatprep.subr.bf16.mxu1 %v12037_v25  ;;  %v5157_v15 = vmax.f32 %v10794_v55, 0.0  ;;  %v12041_v26 = vld [vmem:[#allocation8 + $0x7c8] ss:$16 sps:$4 sm:$0xff]   ;;  %v12050_v53 = vld [vmem:[#allocation11] ss:$16 sps:$4 sm:$0xff]  }
 0x3b8   :  { %v5164_v60 = vmax.f32 %v10795_v0, 0.0  ;;  %v5163_v11 = vmax.f32 %v10764_v31, 0.0  ;;  %v12053_v42 = vld [vmem:[#allocation11 + $0x8] ss:$16 sps:$4 sm:$0xff]   ;;  %v12058_v44 = vld [vmem:[#allocation11 + $0x24] ss:$16 sps:$4 sm:$0xff]  }
 0x3b9   :  { %v5226_v9 = vpack.c.bf16 %v5162_v14, %v5154_v58  ;;  %v5165_v59 = vmax.f32 %v10796_v22, 0.0  ;;  %v12061_v45 = vld [vmem:[#allocation11 + $0x2c] ss:$16 sps:$4 sm:$0xff]   ;;  %v12059_v3 = vld [vmem:[#allocation11 + $0x28] ss:$16 sps:$4 sm:$0xff]  }
 0x3ba   :  { %v13123_v29 = vpack.c.bf16 %v5164_v60, %v5156_v28  ;;  %v5227_v33 = vpack.c.bf16 %v5163_v11, %v5155_v7  ;;  %7154 = vmatpush1.bf16.msra.mxu0 %v12032_v34  ;;  %7606 = vmatpush1.bf16.msra.mxu1 %v12035_v10  ;;  %v12064_v23 = vld [vmem:[#allocation11 + $0x44] ss:$16 sps:$4 sm:$0xff]   ;;  %v12067_v47 = vld [vmem:[#allocation11 + $0x4c] ss:$16 sps:$4 sm:$0xff]   ;;  %v12062_v48 = vld [vmem:[#allocation11 + $0x40] ss:$16 sps:$4 sm:$0xff]  }
 0x3bb   :  { %v13125_v39 = vpack.c.bf16 %v5165_v59, %v5157_v15  ;;  %7155 = vmatprep.subr.bf16.mxu0 %v12040_v1  ;;  %7607 = vmatprep.subr.bf16.mxu1 %v12043_v27  ;;  %v12065_v32 = vld [vmem:[#allocation11 + $0x48] ss:$16 sps:$4 sm:$0xff]   ;;  %v12070_v25 = vld [vmem:[#allocation11 + $0x64] ss:$16 sps:$4 sm:$0xff]   ;;  %v12079_v54 = vld [vmem:[#allocation11 + $0x8c] ss:$16 sps:$4 sm:$0xff]  }
 0x3bc   :  { %7116 = vmatprep.mubr.bf16.mxu0 %v5227_v33  ;;  %7568 = vmatprep.mubr.bf16.mxu1 %v5227_v33  ;;  %v12071_v49 = vld [vmem:[#allocation11 + $0x68] ss:$16 sps:$4 sm:$0xff]   ;;  %v12076_v13 = vld [vmem:[#allocation11 + $0x84] ss:$16 sps:$4 sm:$0xff]   ;;  %v12074_v5 = vld [vmem:[#allocation11 + $0x80] ss:$16 sps:$4 sm:$0xff]  }
 0x3bd   :  { %7117 = vmatmul.mubr.bf16.gmra.mrb[92].mxu0 %v5226_v9  ;;  %7569 = vmatmul.mubr.bf16.gmra.mrb[92].mxu1 %v5226_v9  ;;  %v12077_v55 = vld [vmem:[#allocation11 + $0x88] ss:$16 sps:$4 sm:$0xff]   ;;  %v12082_v38 = vld [vmem:[#allocation11 + $0xa4] ss:$16 sps:$4 sm:$0xff]   ;;  %v12091_v0 = vld [vmem:[#allocation11 + $0xcc] ss:$16 sps:$4 sm:$0xff]  }
 0x3be   :  { %7156 = vmatpush1.bf16.msra.mxu0 %v12038_v63  ;;  %7159 = vmatprep.mubr.bf16.mxu0 %v13041_v52  ;;  %v12083_v2 = vld [vmem:[#allocation11 + $0xa8] ss:$16 sps:$4 sm:$0xff]   ;;  %v12088_v19 = vld [vmem:[#allocation11 + $0xc4] ss:$16 sps:$4 sm:$0xff]   ;;  %v12086_v31 = vld [vmem:[#allocation11 + $0xc0] ss:$16 sps:$4 sm:$0xff]  }
 0x3bf   :  { %7608 = vmatpush1.bf16.msra.mxu1 %v12041_v26  ;;  %7611 = vmatprep.mubr.bf16.mxu1 %v13041_v52  ;;  %v12056_v52 = vld [vmem:[#allocation11 + $0x20] ss:$16 sps:$4 sm:$0xff]   ;;  %v12089_v4 = vld [vmem:[#allocation11 + $0xc8] ss:$16 sps:$4 sm:$0xff]   ;;  %v12094_v34 = vld [vmem:[#allocation11 + $0xe4] ss:$16 sps:$4 sm:$0xff]  }
 0x3c0   :  { %7157 = vmatprep.subr.bf16.mxu0 %v12046_v40  ;;  %7609 = vmatprep.subr.bf16.mxu1 %v12049_v41  ;;  %v12095_v10 = vld [vmem:[#allocation11 + $0xe8] ss:$16 sps:$4 sm:$0xff]   ;;  %v12100_v58 = vld [vmem:[#allocation11 + $0x104] ss:$16 sps:$4 sm:$0xff]   ;;  %v12103_v14 = vld [vmem:[#allocation11 + $0x10c] ss:$16 sps:$4 sm:$0xff]  }
 0x3c1   :  { %v12098_v22 = vld [vmem:[#allocation11 + $0x100] ss:$16 sps:$4 sm:$0xff]   ;;  %v12101_v1 = vld [vmem:[#allocation11 + $0x108] ss:$16 sps:$4 sm:$0xff]   ;;  %v12106_v27 = vld [vmem:[#allocation11 + $0x124] ss:$16 sps:$4 sm:$0xff]  }
 0x3c2   :  { %7158 = vmatpush1.bf16.msra.mxu0 %v12044_v61  ;;  %v12107_v28 = vld [vmem:[#allocation11 + $0x128] ss:$16 sps:$4 sm:$0xff]   ;;  %v12112_v7 = vld [vmem:[#allocation11 + $0x144] ss:$16 sps:$4 sm:$0xff]   ;;  %v12115_v60 = vld [vmem:[#allocation11 + $0x14c] ss:$16 sps:$4 sm:$0xff]  }
 0x3c3   :  { %7610 = vmatpush1.bf16.msra.mxu1 %v12047_v35  ;;  %8578 = vmatprep.subr.bf16.mxu0 %v12052_v51  ;;  %v12110_v11 = vld [vmem:[#allocation11 + $0x140] ss:$16 sps:$4 sm:$0xff]   ;;  %v12113_v15 = vld [vmem:[#allocation11 + $0x148] ss:$16 sps:$4 sm:$0xff]   ;;  %v12118_v9 = vld [vmem:[#allocation11 + $0x164] ss:$16 sps:$4 sm:$0xff]  }
 0x3c4   :  { %8804 = vmatprep.subr.bf16.mxu1 %v12055_v6  ;;  %v12119_v59 = vld [vmem:[#allocation11 + $0x168] ss:$16 sps:$4 sm:$0xff]   ;;  %v12124_v33 = vld [vmem:[#allocation11 + $0x184] ss:$16 sps:$4 sm:$0xff]   ;;  %v12127_v63 = vld [vmem:[#allocation11 + $0x18c] ss:$16 sps:$4 sm:$0xff]  }
 0x3c5   :  { %7160 = vmatmul.mubr.bf16.vlgmr.msra.gmra.mrb[64].mxu0 %v13039_v57  ;;  %v12122_v26 = vld [vmem:[#allocation11 + $0x180] ss:$16 sps:$4 sm:$0xff]   ;;  %v12125_v40 = vld [vmem:[#allocation11 + $0x188] ss:$16 sps:$4 sm:$0xff]   ;;  %v12130_v41 = vld [vmem:[#allocation11 + $0x1a4] ss:$16 sps:$4 sm:$0xff]  }
 0x3c6   :  { %7612 = vmatmul.mubr.bf16.vlgmr.msra.gmra.mrb[64].mxu1 %v13039_v57  ;;  %7169 = vmatprep.mubr.bf16.mxu0 %v13053_v20  ;;  %v12073_v57 = vld [vmem:[#allocation11 + $0x6c] ss:$16 sps:$4 sm:$0xff]   ;;  %v12131_v61 = vld [vmem:[#allocation11 + $0x1a8] ss:$16 sps:$4 sm:$0xff]   ;;  %v12136_v35 = vld [vmem:[#allocation11 + $0x1c4] ss:$16 sps:$4 sm:$0xff]  }
 0x3c7   :  { %7621 = vmatprep.mubr.bf16.mxu1 %v13053_v20  ;;  %8579 = vmatpush1.bf16.msra.mxu0 %v12050_v53  ;;  %v12068_v20 = vld [vmem:[#allocation11 + $0x60] ss:$16 sps:$4 sm:$0xff]   ;;  %v12139_v51 = vld [vmem:[#allocation11 + $0x1cc] ss:$16 sps:$4 sm:$0xff]  }
 0x3c8   :  { %8805 = vmatpush1.bf16.msra.mxu1 %v12053_v42  ;;  %8580 = vmatprep.subr.bf16.mxu0 %v12058_v44  ;;  %v12134_v6 = vld [vmem:[#allocation11 + $0x1c0] ss:$16 sps:$4 sm:$0xff]   ;;  %v12145_v53 = vld [vmem:[#allocation11 + $0x1ec] ss:$16 sps:$4 sm:$0xff]   ;;  %v12143_v44 = vld [vmem:[#allocation11 + $0x1e8] ss:$16 sps:$4 sm:$0xff]  }
 0x3c9   :  { %8806 = vmatprep.subr.bf16.mxu1 %v12061_v45  ;;  %v12140_v42 = vld [vmem:[#allocation11 + $0x1e0] ss:$16 sps:$4 sm:$0xff]   ;;  %v12148_v45 = vld [vmem:[#allocation11 + $0x204] ss:$16 sps:$4 sm:$0xff]  }
 0x3cb   :  { %8581 = vmatpush1.bf16.msra.mxu0 %v12056_v52  ;;  %v12151_v52 = vld [vmem:[#allocation11 + $0x20c] ss:$16 sps:$4 sm:$0xff]  }
 0x3cc   :  { %8807 = vmatpush1.bf16.msra.mxu1 %v12059_v3  ;;  %8582 = vmatprep.subr.bf16.mxu0 %v12064_v23 }
 0x3cd   :  { %7170 = vmatmul.mubr.bf16.gmra.mrb[68].mxu0 %v13051_v56  ;;  %8808 = vmatprep.subr.bf16.mxu1 %v12067_v47 }
 0x3ce   :  { %7622 = vmatmul.mubr.bf16.gmra.mrb[68].mxu1 %v13051_v56  ;;  %7179 = vmatprep.mubr.bf16.mxu0 %v13065_v30  ;;  %v12085_v56 = vld [vmem:[#allocation11 + $0xac] ss:$16 sps:$4 sm:$0xff]  }
 0x3cf   :  { %7631 = vmatprep.mubr.bf16.mxu1 %v13065_v30  ;;  %8583 = vmatpush1.bf16.msra.mxu0 %v12062_v48  ;;  %v12080_v30 = vld [vmem:[#allocation11 + $0xa0] ss:$16 sps:$4 sm:$0xff]  }
 0x3d0   :  { %8809 = vmatpush1.bf16.msra.mxu1 %v12065_v32  ;;  %8584 = vmatprep.subr.bf16.mxu0 %v12070_v25 }
 0x3d1   :  { %8810 = vmatprep.subr.bf16.mxu1 %v12073_v57 }
 0x3d3   :  { %8585 = vmatpush1.bf16.msra.mxu0 %v12068_v20 }
 0x3d4   :  { %8811 = vmatpush1.bf16.msra.mxu1 %v12071_v49  ;;  %8586 = vmatprep.subr.bf16.mxu0 %v12076_v13 }
 0x3d5   :  { %7180 = vmatmul.mubr.bf16.gmra.mrb[72].mxu0 %v13063_v43  ;;  %8812 = vmatprep.subr.bf16.mxu1 %v12079_v54 }
 0x3d6   :  { %7632 = vmatmul.mubr.bf16.gmra.mrb[72].mxu1 %v13063_v43  ;;  %7189 = vmatprep.mubr.bf16.mxu0 %v13077_v37  ;;  %v12097_v43 = vld [vmem:[#allocation11 + $0xec] ss:$16 sps:$4 sm:$0xff]  }
 0x3d7   :  { %7641 = vmatprep.mubr.bf16.mxu1 %v13077_v37  ;;  %8587 = vmatpush1.bf16.msra.mxu0 %v12074_v5  ;;  %v12092_v37 = vld [vmem:[#allocation11 + $0xe0] ss:$16 sps:$4 sm:$0xff]  }
 0x3d8   :  { %8813 = vmatpush1.bf16.msra.mxu1 %v12077_v55  ;;  %8588 = vmatprep.subr.bf16.mxu0 %v12082_v38 }
 0x3d9   :  { %8814 = vmatprep.subr.bf16.mxu1 %v12085_v56 }
 0x3db   :  { %8589 = vmatpush1.bf16.msra.mxu0 %v12080_v30 }
 0x3dc   :  { %8815 = vmatpush1.bf16.msra.mxu1 %v12083_v2  ;;  %8590 = vmatprep.subr.bf16.mxu0 %v12088_v19 }
 0x3dd   :  { %7190 = vmatmul.mubr.bf16.gmra.mrb[76].mxu0 %v13075_v46  ;;  %8816 = vmatprep.subr.bf16.mxu1 %v12091_v0 }
 0x3de   :  { %7642 = vmatmul.mubr.bf16.gmra.mrb[76].mxu1 %v13075_v46  ;;  %7199 = vmatprep.mubr.bf16.mxu0 %v13089_v50  ;;  %v12109_v46 = vld [vmem:[#allocation11 + $0x12c] ss:$16 sps:$4 sm:$0xff]  }
 0x3df   :  { %7651 = vmatprep.mubr.bf16.mxu1 %v13089_v50  ;;  %8591 = vmatpush1.bf16.msra.mxu0 %v12086_v31  ;;  %v12104_v50 = vld [vmem:[#allocation11 + $0x120] ss:$16 sps:$4 sm:$0xff]  }
 0x3e0   :  { %8817 = vmatpush1.bf16.msra.mxu1 %v12089_v4  ;;  %8592 = vmatprep.subr.bf16.mxu0 %v12094_v34 }
 0x3e1   :  { %8818 = vmatprep.subr.bf16.mxu1 %v12097_v43 }
 0x3e3   :  { %8593 = vmatpush1.bf16.msra.mxu0 %v12092_v37 }
 0x3e4   :  { %8819 = vmatpush1.bf16.msra.mxu1 %v12095_v10  ;;  %8594 = vmatprep.subr.bf16.mxu0 %v12100_v58 }
 0x3e5   :  { %7200 = vmatmul.mubr.bf16.gmra.mrb[80].mxu0 %v13087_v16  ;;  %8820 = vmatprep.subr.bf16.mxu1 %v12103_v14 }
 0x3e6   :  { %7652 = vmatmul.mubr.bf16.gmra.mrb[80].mxu1 %v13087_v16  ;;  %7209 = vmatprep.mubr.bf16.mxu0 %v13101_v62  ;;  %v12121_v16 = vld [vmem:[#allocation11 + $0x16c] ss:$16 sps:$4 sm:$0xff]  }
 0x3e7   :  { %7661 = vmatprep.mubr.bf16.mxu1 %v13101_v62  ;;  %8595 = vmatpush1.bf16.msra.mxu0 %v12098_v22  ;;  %v12116_v62 = vld [vmem:[#allocation11 + $0x160] ss:$16 sps:$4 sm:$0xff]  }
 0x3e8   :  { %8821 = vmatpush1.bf16.msra.mxu1 %v12101_v1  ;;  %8596 = vmatprep.subr.bf16.mxu0 %v12106_v27 }
 0x3e9   :  { %8822 = vmatprep.subr.bf16.mxu1 %v12109_v46 }
 0x3eb   :  { %8597 = vmatpush1.bf16.msra.mxu0 %v12104_v50 }
 0x3ec   :  { %8823 = vmatpush1.bf16.msra.mxu1 %v12107_v28  ;;  %8598 = vmatprep.subr.bf16.mxu0 %v12112_v7  ;;  %v12146_v28 = vld [vmem:[#allocation11 + $0x200] ss:$16 sps:$4 sm:$0xff]   ;;  %v12149_v7 = vld [vmem:[#allocation11 + $0x208] ss:$16 sps:$4 sm:$0xff]  }
 0x3ed   :  { %7210 = vmatmul.mubr.bf16.gmra.mrb[84].mxu0 %v13099_v8  ;;  %8824 = vmatprep.subr.bf16.mxu1 %v12115_v60 }
 0x3ee   :  { %7662 = vmatmul.mubr.bf16.gmra.mrb[84].mxu1 %v13099_v8  ;;  %7219 = vmatprep.mubr.bf16.mxu0 %v13113_v24  ;;  %v12133_v8 = vld [vmem:[#allocation11 + $0x1ac] ss:$16 sps:$4 sm:$0xff]  }
 0x3ef   :  { %7671 = vmatprep.mubr.bf16.mxu1 %v13113_v24  ;;  %8599 = vmatpush1.bf16.msra.mxu0 %v12110_v11  ;;  %v12128_v24 = vld [vmem:[#allocation11 + $0x1a0] ss:$16 sps:$4 sm:$0xff]  }
 0x3f0   :  { %8825 = vmatpush1.bf16.msra.mxu1 %v12113_v15  ;;  %8600 = vmatprep.subr.bf16.mxu0 %v12118_v9 }
 0x3f1   :  { %8826 = vmatprep.subr.bf16.mxu1 %v12121_v16  ;;  %v12154_v16 = vld [vmem:[#allocation11 + $0x224] ss:$16 sps:$4 sm:$0xff]  }
 0x3f3   :  { %8601 = vmatpush1.bf16.msra.mxu0 %v12116_v62  ;;  %v12157_v62 = vld [vmem:[#allocation11 + $0x22c] ss:$16 sps:$4 sm:$0xff]  }
 0x3f4   :  { %8827 = vmatpush1.bf16.msra.mxu1 %v12119_v59  ;;  %8602 = vmatprep.subr.bf16.mxu0 %v12124_v33 }
 0x3f5   :  { %7220 = vmatmul.mubr.bf16.gmra.mrb[88].mxu0 %v13111_v36  ;;  %8828 = vmatprep.subr.bf16.mxu1 %v12127_v63 }
 0x3f6   :  { %7672 = vmatmul.mubr.bf16.gmra.mrb[88].mxu1 %v13111_v36  ;;  %7229 = vmatprep.mubr.bf16.mxu0 %v13125_v39  ;;  %v12137_v36 = vld [vmem:[#allocation11 + $0x1c8] ss:$16 sps:$4 sm:$0xff]  }
 0x3f7   :  { %7681 = vmatprep.mubr.bf16.mxu1 %v13125_v39  ;;  %8603 = vmatpush1.bf16.msra.mxu0 %v12122_v26  ;;  %v12142_v39 = vld [vmem:[#allocation11 + $0x1e4] ss:$16 sps:$4 sm:$0xff]  }
 0x3f8   :  { %8829 = vmatpush1.bf16.msra.mxu1 %v12125_v40  ;;  %8604 = vmatprep.subr.bf16.mxu0 %v12130_v41 }
 0x3f9   :  { %8830 = vmatprep.subr.bf16.mxu1 %v12133_v8 }
 0x3fb   :  { %8605 = vmatpush1.bf16.msra.mxu0 %v12128_v24 }
 0x3fc   :  { %8831 = vmatpush1.bf16.msra.mxu1 %v12131_v61  ;;  %8606 = vmatprep.subr.bf16.mxu0 %v12136_v35 }
 0x3fd   :  { %7230 = vmatmul.mubr.bf16.gmra.mrb[92].mxu0 %v13123_v29  ;;  %8832 = vmatprep.subr.bf16.mxu1 %v12139_v51 }
 0x3fe   :  { %7682 = vmatmul.mubr.bf16.gmra.mrb[92].mxu1 %v13123_v29  ;;  %v5486_v29 = vld [vmem:[#allocation10] sm:$0xf] }
 0x3ff   :  { %8607 = vmatpush1.bf16.msra.mxu0 %v12134_v6  ;;  %v13160_v3 = vrot.slane %v5486_v29, %v12776_v12  ;;  %v13163_v23 = vrot.slane %v5486_v29, %v12779_v17  ;;  %v13166_v47 = vrot.slane %v5486_v29, %v12782_v18  ;;  %v13169_v48 = vrot.slane %v5486_v29, %v12785_v21  ;;  %v12152_v6 = vld [vmem:[#allocation11 + $0x220] ss:$16 sps:$4 sm:$0xff]  }
 0x400   :  { %8833 = vmatpush1.bf16.msra.mxu1 %v12137_v36  ;;  %8608 = vmatprep.subr.bf16.mxu0 %v12142_v39  ;;  %v12155_v36 = vld [vmem:[#allocation11 + $0x228] ss:$16 sps:$4 sm:$0xff]  }
 0x401   :  { %8834 = vmatprep.subr.bf16.mxu1 %v12145_v53 }
 0x403   :  { %8609 = vmatpush1.bf16.msra.mxu0 %v12140_v42 }
 0x404   :  { %8835 = vmatpush1.bf16.msra.mxu1 %v12143_v44  ;;  %8691 = vmatprep.subr.bf16.mxu0 %v12148_v45  ;;  %v12160_v44 = vld [vmem:[#allocation11 + $0x244] ss:$16 sps:$4 sm:$0xff]   ;;  %v12163_v45 = vld [vmem:[#allocation11 + $0x24c] ss:$16 sps:$4 sm:$0xff]  }
 0x405   :  { %8917 = vmatprep.subr.bf16.mxu1 %v12151_v52 }
 0x498   :  { %v7161_v32 = vpop.f32.mrb[64].mxu0 }
 0x499   :  { %v10797_v25 = vadd.f32 %v7161_v32, %v13160_v3  ;;  %v7613_v57 = vpop.f32.mrb[64].mxu1  ;;  %v7163_v20 = vpop.f32.mrb[65].mxu0 }
 0x49a   :  { %v10829_v49 = vadd.f32 %v7613_v57, %v13163_v23  ;;  %v10798_v13 = vadd.f32 %v7163_v20, %v13166_v47  ;;  %v7615_v54 = vpop.f32.mrb[65].mxu1  ;;  %v7165_v5 = vpop.f32.mrb[66].mxu0 }
 0x49b   :  { %v10830_v55 = vadd.f32 %v7615_v54, %v13169_v48  ;;  %v10799_v38 = vadd.f32 %v7165_v5, %v13160_v3  ;;  %v7617_v56 = vpop.f32.mrb[66].mxu1  ;;  %v7167_v30 = vpop.f32.mrb[67].mxu0  ;;  %v7692_v31 = vmax.f32 %v10797_v25, 0.0 }
 0x49c   :  { %v10831_v2 = vadd.f32 %v7617_v56, %v13163_v23  ;;  %v10800_v19 = vadd.f32 %v7167_v30, %v13166_v47  ;;  %v7619_v0 = vpop.f32.mrb[67].mxu1  ;;  %v7694_v43 = vmax.f32 %v10829_v49, 0.0  ;;  %v7693_v37 = vmax.f32 %v10798_v13, 0.0 }
 0x49d   :  { %v7696_v4 = vmax.f32 %v10799_v38, 0.0  ;;  %v10832_v34 = vadd.f32 %v7619_v0, %v13169_v48  ;;  %v7695_v14 = vmax.f32 %v10830_v55, 0.0  ;;  %v12158_v55 = vld [vmem:[#allocation11 + $0x240] ss:$16 sps:$4 sm:$0xff]   ;;  %v12161_v38 = vld [vmem:[#allocation11 + $0x248] ss:$16 sps:$4 sm:$0xff]  }
 0x49e   :  { %v7698_v10 = vmax.f32 %v10831_v2, 0.0  ;;  %v7697_v58 = vmax.f32 %v10800_v19, 0.0  ;;  %v12166_v0 = vld [vmem:[#allocation11 + $0x264] ss:$16 sps:$4 sm:$0xff]  }
 0x49f   :  { %v7756_v22 = vpack.c.bf16 %v7696_v4, %v7692_v31  ;;  %v7699_v1 = vmax.f32 %v10832_v34, 0.0  ;;  %v12169_v31 = vld [vmem:[#allocation11 + $0x26c] ss:$16 sps:$4 sm:$0xff]  }
 0x4a0   :  { %v13179_v27 = vpack.c.bf16 %v7698_v10, %v7694_v43  ;;  %v7757_v46 = vpack.c.bf16 %v7697_v58, %v7693_v37  ;;  %v7171_v50 = vpop.f32.mrb[68].mxu0 }
 0x4a1   :  { %v13181_v60 = vpack.c.bf16 %v7699_v1, %v7695_v14  ;;  %v10801_v11 = vadd.f32 %v7171_v50, %v13160_v3  ;;  %v7623_v15 = vpop.f32.mrb[68].mxu1  ;;  %v7173_v9 = vpop.f32.mrb[69].mxu0 }
 0x4a2   :  { %v10833_v59 = vadd.f32 %v7623_v15, %v13163_v23  ;;  %v10802_v33 = vadd.f32 %v7173_v9, %v13166_v47  ;;  %v7625_v63 = vpop.f32.mrb[69].mxu1  ;;  %v7175_v26 = vpop.f32.mrb[70].mxu0  ;;  %8610 = vmatprep.mubr.bf16.mxu0 %v7757_v46  ;;  %8836 = vmatprep.mubr.bf16.mxu1 %v7757_v46 }
 0x4a3   :  { %v10834_v40 = vadd.f32 %v7625_v63, %v13169_v48  ;;  %v10803_v41 = vadd.f32 %v7175_v26, %v13160_v3  ;;  %v7627_v8 = vpop.f32.mrb[70].mxu1  ;;  %v7177_v24 = vpop.f32.mrb[71].mxu0  ;;  %8611 = vmatmul.mubr.bf16.vlgmr.msra.gmra.mrb[96].mxu0 %v7756_v22  ;;  %8837 = vmatmul.mubr.bf16.vlgmr.msra.gmra.mrb[96].mxu1 %v7756_v22  ;;  %v7700_v39 = vmax.f32 %v10801_v11, 0.0 }
 0x4a4   :  { %v10835_v61 = vadd.f32 %v7627_v8, %v13163_v23  ;;  %v10804_v35 = vadd.f32 %v7177_v24, %v13166_v47  ;;  %v7629_v51 = vpop.f32.mrb[71].mxu1  ;;  %8692 = vmatpush1.bf16.msra.mxu0 %v12146_v28  ;;  %8918 = vmatpush1.bf16.msra.mxu1 %v12149_v7  ;;  %v7702_v52 = vmax.f32 %v10833_v59, 0.0  ;;  %v7701_v29 = vmax.f32 %v10802_v33, 0.0  ;;  %v12164_v28 = vld [vmem:[#allocation11 + $0x260] ss:$16 sps:$4 sm:$0xff]  }
 0x4a5   :  { %v7704_v53 = vmax.f32 %v10803_v41, 0.0  ;;  %v10836_v42 = vadd.f32 %v7629_v51, %v13169_v48  ;;  %8693 = vmatprep.subr.bf16.mxu0 %v12154_v16  ;;  %8919 = vmatprep.subr.bf16.mxu1 %v12157_v62  ;;  %v7703_v57 = vmax.f32 %v10834_v40, 0.0  ;;  %v12167_v7 = vld [vmem:[#allocation11 + $0x268] ss:$16 sps:$4 sm:$0xff]   ;;  %v12172_v16 = vld [vmem:[#allocation11 + $0x284] ss:$16 sps:$4 sm:$0xff]  }
 0x4a6   :  { %v7706_v32 = vmax.f32 %v10835_v61, 0.0  ;;  %v7705_v25 = vmax.f32 %v10804_v35, 0.0  ;;  %v12175_v62 = vld [vmem:[#allocation11 + $0x28c] ss:$16 sps:$4 sm:$0xff]   ;;  %v12170_v51 = vld [vmem:[#allocation11 + $0x280] ss:$16 sps:$4 sm:$0xff]  }
 0x4a7   :  { %v7760_v20 = vpack.c.bf16 %v7704_v53, %v7700_v39  ;;  %v7707_v49 = vmax.f32 %v10836_v42, 0.0 }
 0x4a8   :  { %v13191_v13 = vpack.c.bf16 %v7706_v32, %v7702_v52  ;;  %v7761_v54 = vpack.c.bf16 %v7705_v25, %v7701_v29  ;;  %v7181_v5 = vpop.f32.mrb[72].mxu0  ;;  %8694 = vmatpush1.bf16.msra.mxu0 %v12152_v6  ;;  %8920 = vmatpush1.bf16.msra.mxu1 %v12155_v36  ;;  %v12173_v6 = vld [vmem:[#allocation11 + $0x288] ss:$16 sps:$4 sm:$0xff]  }
 0x4a9   :  { %v13193_v56 = vpack.c.bf16 %v7707_v49, %v7703_v57  ;;  %v10805_v30 = vadd.f32 %v7181_v5, %v13160_v3  ;;  %v7633_v2 = vpop.f32.mrb[72].mxu1  ;;  %v7183_v19 = vpop.f32.mrb[73].mxu0  ;;  %8695 = vmatprep.subr.bf16.mxu0 %v12160_v44  ;;  %8921 = vmatprep.subr.bf16.mxu1 %v12163_v45  ;;  %v12178_v44 = vld [vmem:[#allocation11 + $0x2a4] ss:$16 sps:$4 sm:$0xff]   ;;  %v12181_v45 = vld [vmem:[#allocation11 + $0x2ac] ss:$16 sps:$4 sm:$0xff]  }
 0x4aa   :  { %v10837_v4 = vadd.f32 %v7633_v2, %v13163_v23  ;;  %v10806_v34 = vadd.f32 %v7183_v19, %v13166_v47  ;;  %v7635_v43 = vpop.f32.mrb[73].mxu1  ;;  %v7185_v37 = vpop.f32.mrb[74].mxu0  ;;  %8620 = vmatprep.mubr.bf16.mxu0 %v7761_v54  ;;  %8846 = vmatprep.mubr.bf16.mxu1 %v7761_v54  ;;  %v12179_v2 = vld [vmem:[#allocation11 + $0x2a8] ss:$16 sps:$4 sm:$0xff]  }
 0x4ab   :  { %v10838_v10 = vadd.f32 %v7635_v43, %v13169_v48  ;;  %v10807_v58 = vadd.f32 %v7185_v37, %v13160_v3  ;;  %v7637_v14 = vpop.f32.mrb[74].mxu1  ;;  %v7187_v22 = vpop.f32.mrb[75].mxu0  ;;  %8621 = vmatmul.mubr.bf16.gmra.mrb[100].mxu0 %v7760_v20  ;;  %8847 = vmatmul.mubr.bf16.gmra.mrb[100].mxu1 %v7760_v20  ;;  %v7708_v11 = vmax.f32 %v10805_v30, 0.0  ;;  %v12176_v30 = vld [vmem:[#allocation11 + $0x2a0] ss:$16 sps:$4 sm:$0xff]  }
 0x4ac   :  { %v10839_v1 = vadd.f32 %v7637_v14, %v13163_v23  ;;  %v10808_v46 = vadd.f32 %v7187_v22, %v13166_v47  ;;  %v7639_v50 = vpop.f32.mrb[75].mxu1  ;;  %8696 = vmatpush1.bf16.msra.mxu0 %v12158_v55  ;;  %8922 = vmatpush1.bf16.msra.mxu1 %v12161_v38  ;;  %v7710_v59 = vmax.f32 %v10837_v4, 0.0  ;;  %v7709_v33 = vmax.f32 %v10806_v34, 0.0  ;;  %v12184_v4 = vld [vmem:[#allocation11 + $0x2c4] ss:$16 sps:$4 sm:$0xff]  }
 0x4ad   :  { %v7712_v15 = vmax.f32 %v10807_v58, 0.0  ;;  %v10840_v9 = vadd.f32 %v7639_v50, %v13169_v48  ;;  %8697 = vmatprep.subr.bf16.mxu0 %v12166_v0  ;;  %8923 = vmatprep.subr.bf16.mxu1 %v12169_v31  ;;  %v7711_v40 = vmax.f32 %v10838_v10, 0.0  ;;  %v12187_v34 = vld [vmem:[#allocation11 + $0x2cc] ss:$16 sps:$4 sm:$0xff]  }
 0x4ae   :  { %v7714_v63 = vmax.f32 %v10839_v1, 0.0  ;;  %v7713_v26 = vmax.f32 %v10808_v46, 0.0 }
 0x4af   :  { %v7764_v41 = vpack.c.bf16 %v7712_v15, %v7708_v11  ;;  %v7715_v8 = vmax.f32 %v10840_v9, 0.0  ;;  %v12185_v11 = vld [vmem:[#allocation11 + $0x2c8] ss:$16 sps:$4 sm:$0xff]  }
 0x4b0   :  { %v13203_v24 = vpack.c.bf16 %v7714_v63, %v7710_v59  ;;  %v7765_v61 = vpack.c.bf16 %v7713_v26, %v7709_v33  ;;  %v7191_v35 = vpop.f32.mrb[76].mxu0  ;;  %8698 = vmatpush1.bf16.msra.mxu0 %v12164_v28  ;;  %8924 = vmatpush1.bf16.msra.mxu1 %v12167_v7  ;;  %v12182_v7 = vld [vmem:[#allocation11 + $0x2c0] ss:$16 sps:$4 sm:$0xff]   ;;  %v12190_v59 = vld [vmem:[#allocation11 + $0x2e4] ss:$16 sps:$4 sm:$0xff]  }
 0x4b1   :  { %v13205_v36 = vpack.c.bf16 %v7715_v8, %v7711_v40  ;;  %v10809_v39 = vadd.f32 %v7191_v35, %v13160_v3  ;;  %v7643_v53 = vpop.f32.mrb[76].mxu1  ;;  %v7193_v42 = vpop.f32.mrb[77].mxu0  ;;  %8699 = vmatprep.subr.bf16.mxu0 %v12172_v16  ;;  %8925 = vmatprep.subr.bf16.mxu1 %v12175_v62  ;;  %v12193_v33 = vld [vmem:[#allocation11 + $0x2ec] ss:$16 sps:$4 sm:$0xff]  }
 0x4b2   :  { %v10841_v52 = vadd.f32 %v7643_v53, %v13163_v23  ;;  %v10810_v29 = vadd.f32 %v7193_v42, %v13166_v47  ;;  %v7645_v32 = vpop.f32.mrb[77].mxu1  ;;  %v7195_v25 = vpop.f32.mrb[78].mxu0  ;;  %8630 = vmatprep.mubr.bf16.mxu0 %v7765_v61  ;;  %8856 = vmatprep.mubr.bf16.mxu1 %v7765_v61  ;;  %v12188_v42 = vld [vmem:[#allocation11 + $0x2e0] ss:$16 sps:$4 sm:$0xff]  }
 0x4b3   :  { %v10842_v57 = vadd.f32 %v7645_v32, %v13169_v48  ;;  %v10811_v20 = vadd.f32 %v7195_v25, %v13160_v3  ;;  %v7647_v49 = vpop.f32.mrb[78].mxu1  ;;  %v7197_v54 = vpop.f32.mrb[79].mxu0  ;;  %8631 = vmatmul.mubr.bf16.gmra.mrb[104].mxu0 %v7764_v41  ;;  %8857 = vmatmul.mubr.bf16.gmra.mrb[104].mxu1 %v7764_v41  ;;  %v7716_v19 = vmax.f32 %v10809_v39, 0.0  ;;  %v12196_v32 = vld [vmem:[#allocation11 + $0x304] ss:$16 sps:$4 sm:$0xff]  }
 0x4b4   :  { %v10843_v5 = vadd.f32 %v7647_v49, %v13163_v23  ;;  %v10812_v55 = vadd.f32 %v7197_v54, %v13166_v47  ;;  %v7649_v38 = vpop.f32.mrb[79].mxu1  ;;  %8700 = vmatpush1.bf16.msra.mxu0 %v12170_v51  ;;  %8926 = vmatpush1.bf16.msra.mxu1 %v12173_v6  ;;  %v7718_v43 = vmax.f32 %v10841_v52, 0.0  ;;  %v7717_v37 = vmax.f32 %v10810_v29, 0.0  ;;  %v12199_v25 = vld [vmem:[#allocation11 + $0x30c] ss:$16 sps:$4 sm:$0xff]  }
 0x4b5   :  { %v7720_v0 = vmax.f32 %v10811_v20, 0.0  ;;  %v10844_v31 = vadd.f32 %v7649_v38, %v13169_v48  ;;  %8701 = vmatprep.subr.bf16.mxu0 %v12178_v44  ;;  %8927 = vmatprep.subr.bf16.mxu1 %v12181_v45  ;;  %v7719_v14 = vmax.f32 %v10842_v57, 0.0  ;;  %v12191_v44 = vld [vmem:[#allocation11 + $0x2e8] ss:$16 sps:$4 sm:$0xff]  }
 0x4b6   :  { %v7722_v10 = vmax.f32 %v10843_v5, 0.0  ;;  %v7721_v58 = vmax.f32 %v10812_v55, 0.0 }
 0x4b7   :  { %v7768_v22 = vpack.c.bf16 %v7720_v0, %v7716_v19  ;;  %v7723_v1 = vmax.f32 %v10844_v31, 0.0  ;;  %v12194_v0 = vld [vmem:[#allocation11 + $0x300] ss:$16 sps:$4 sm:$0xff]   ;;  %v12197_v31 = vld [vmem:[#allocation11 + $0x308] ss:$16 sps:$4 sm:$0xff]  }
 0x4b8   :  { %v13215_v46 = vpack.c.bf16 %v7722_v10, %v7718_v43  ;;  %v7769_v50 = vpack.c.bf16 %v7721_v58, %v7717_v37  ;;  %v7201_v28 = vpop.f32.mrb[80].mxu0  ;;  %8702 = vmatpush1.bf16.msra.mxu0 %v12176_v30  ;;  %8928 = vmatpush1.bf16.msra.mxu1 %v12179_v2  ;;  %v12202_v10 = vld [vmem:[#allocation11 + $0x324] ss:$16 sps:$4 sm:$0xff]   ;;  %v12205_v58 = vld [vmem:[#allocation11 + $0x32c] ss:$16 sps:$4 sm:$0xff]  }
 0x4b9   :  { %v13217_v15 = vpack.c.bf16 %v7723_v1, %v7719_v14  ;;  %v10813_v9 = vadd.f32 %v7201_v28, %v13160_v3  ;;  %v7653_v16 = vpop.f32.mrb[80].mxu1  ;;  %v7203_v62 = vpop.f32.mrb[81].mxu0  ;;  %8703 = vmatprep.subr.bf16.mxu0 %v12184_v4  ;;  %8929 = vmatprep.subr.bf16.mxu1 %v12187_v34 }
 0x4ba   :  { %v10845_v63 = vadd.f32 %v7653_v16, %v13163_v23  ;;  %v10814_v26 = vadd.f32 %v7203_v62, %v13166_v47  ;;  %v7655_v40 = vpop.f32.mrb[81].mxu1  ;;  %v7205_v41 = vpop.f32.mrb[82].mxu0  ;;  %8640 = vmatprep.mubr.bf16.mxu0 %v7769_v50  ;;  %8866 = vmatprep.mubr.bf16.mxu1 %v7769_v50 }
 0x4bb   :  { %v10846_v8 = vadd.f32 %v7655_v40, %v13169_v48  ;;  %v10815_v61 = vadd.f32 %v7205_v41, %v13160_v3  ;;  %v7657_v35 = vpop.f32.mrb[82].mxu1  ;;  %v7207_v51 = vpop.f32.mrb[83].mxu0  ;;  %8641 = vmatmul.mubr.bf16.gmra.mrb[108].mxu0 %v7768_v22  ;;  %8867 = vmatmul.mubr.bf16.gmra.mrb[108].mxu1 %v7768_v22  ;;  %v7724_v45 = vmax.f32 %v10813_v9, 0.0 }
 0x4bc   :  { %v10847_v6 = vadd.f32 %v7657_v35, %v13163_v23  ;;  %v10816_v39 = vadd.f32 %v7207_v51, %v13166_v47  ;;  %v7659_v53 = vpop.f32.mrb[83].mxu1  ;;  %8704 = vmatpush1.bf16.msra.mxu0 %v12182_v7  ;;  %8930 = vmatpush1.bf16.msra.mxu1 %v12185_v11  ;;  %v7726_v57 = vmax.f32 %v10845_v63, 0.0  ;;  %v7725_v20 = vmax.f32 %v10814_v26, 0.0  ;;  %v12203_v63 = vld [vmem:[#allocation11 + $0x328] ss:$16 sps:$4 sm:$0xff]  }
 0x4bd   :  { %v7728_v52 = vmax.f32 %v10815_v61, 0.0  ;;  %v10848_v29 = vadd.f32 %v7659_v53, %v13169_v48  ;;  %8705 = vmatprep.subr.bf16.mxu0 %v12190_v59  ;;  %8931 = vmatprep.subr.bf16.mxu1 %v12193_v33  ;;  %v7727_v5 = vmax.f32 %v10846_v8, 0.0  ;;  %v12200_v33 = vld [vmem:[#allocation11 + $0x320] ss:$16 sps:$4 sm:$0xff]   ;;  %v12208_v8 = vld [vmem:[#allocation11 + $0x344] ss:$16 sps:$4 sm:$0xff]  }
 0x4be   :  { %v7730_v49 = vmax.f32 %v10847_v6, 0.0  ;;  %v7729_v54 = vmax.f32 %v10816_v39, 0.0  ;;  %v12211_v61 = vld [vmem:[#allocation11 + $0x34c] ss:$16 sps:$4 sm:$0xff]  }
 0x4bf   :  { %v7772_v55 = vpack.c.bf16 %v7728_v52, %v7724_v45  ;;  %v7731_v38 = vmax.f32 %v10848_v29, 0.0 }
 0x4c0   :  { %v13227_v30 = vpack.c.bf16 %v7730_v49, %v7726_v57  ;;  %v7773_v2 = vpack.c.bf16 %v7729_v54, %v7725_v20  ;;  %v7211_v19 = vpop.f32.mrb[84].mxu0  ;;  %8706 = vmatpush1.bf16.msra.mxu0 %v12188_v42  ;;  %8932 = vmatpush1.bf16.msra.mxu1 %v12191_v44 }
 0x4c1   :  { %v13229_v4 = vpack.c.bf16 %v7731_v38, %v7727_v5  ;;  %v10817_v34 = vadd.f32 %v7211_v19, %v13160_v3  ;;  %v7663_v43 = vpop.f32.mrb[84].mxu1  ;;  %v7213_v37 = vpop.f32.mrb[85].mxu0  ;;  %8707 = vmatprep.subr.bf16.mxu0 %v12196_v32  ;;  %8933 = vmatprep.subr.bf16.mxu1 %v12199_v25  ;;  %v12206_v32 = vld [vmem:[#allocation11 + $0x340] ss:$16 sps:$4 sm:$0xff]   ;;  %v12209_v25 = vld [vmem:[#allocation11 + $0x348] ss:$16 sps:$4 sm:$0xff]  }
 0x4c2   :  { %v10849_v14 = vadd.f32 %v7663_v43, %v13163_v23  ;;  %v10818_v22 = vadd.f32 %v7213_v37, %v13166_v47  ;;  %v7665_v1 = vpop.f32.mrb[85].mxu1  ;;  %v7215_v50 = vpop.f32.mrb[86].mxu0  ;;  %8650 = vmatprep.mubr.bf16.mxu0 %v7773_v2  ;;  %8876 = vmatprep.mubr.bf16.mxu1 %v7773_v2  ;;  %v12214_v5 = vld [vmem:[#allocation11 + $0x364] ss:$16 sps:$4 sm:$0xff]  }
 0x4c3   :  { %v10850_v28 = vadd.f32 %v7665_v1, %v13169_v48  ;;  %v10819_v7 = vadd.f32 %v7215_v50, %v13160_v3  ;;  %v7667_v11 = vpop.f32.mrb[86].mxu1  ;;  %v7217_v9 = vpop.f32.mrb[87].mxu0  ;;  %8651 = vmatmul.mubr.bf16.gmra.mrb[112].mxu0 %v7772_v55  ;;  %8877 = vmatmul.mubr.bf16.gmra.mrb[112].mxu1 %v7772_v55  ;;  %v7732_v26 = vmax.f32 %v10817_v34, 0.0  ;;  %v12217_v55 = vld [vmem:[#allocation11 + $0x36c] ss:$16 sps:$4 sm:$0xff]  }
 0x4c4   :  { %v10851_v16 = vadd.f32 %v7667_v11, %v13163_v23  ;;  %v10820_v62 = vadd.f32 %v7217_v9, %v13166_v47  ;;  %v7669_v59 = vpop.f32.mrb[87].mxu1  ;;  %8708 = vmatpush1.bf16.msra.mxu0 %v12194_v0  ;;  %8934 = vmatpush1.bf16.msra.mxu1 %v12197_v31  ;;  %v7734_v35 = vmax.f32 %v10849_v14, 0.0  ;;  %v7733_v51 = vmax.f32 %v10818_v22, 0.0  ;;  %v12212_v22 = vld [vmem:[#allocation11 + $0x360] ss:$16 sps:$4 sm:$0xff]  }
 0x4c5   :  { %v7736_v40 = vmax.f32 %v10819_v7, 0.0  ;;  %v10852_v41 = vadd.f32 %v7669_v59, %v13169_v48  ;;  %8709 = vmatprep.subr.bf16.mxu0 %v12202_v10  ;;  %8935 = vmatprep.subr.bf16.mxu1 %v12205_v58  ;;  %v7735_v53 = vmax.f32 %v10850_v28, 0.0  ;;  %v12215_v1 = vld [vmem:[#allocation11 + $0x368] ss:$16 sps:$4 sm:$0xff]   ;;  %v12220_v11 = vld [vmem:[#allocation11 + $0x384] ss:$16 sps:$4 sm:$0xff]  }
 0x4c6   :  { %v7738_v6 = vmax.f32 %v10851_v16, 0.0  ;;  %v7737_v39 = vmax.f32 %v10820_v62, 0.0  ;;  %v12223_v9 = vld [vmem:[#allocation11 + $0x38c] ss:$16 sps:$4 sm:$0xff]  }
 0x4c7   :  { %v7776_v42 = vpack.c.bf16 %v7736_v40, %v7732_v26  ;;  %v7739_v44 = vmax.f32 %v10852_v41, 0.0 }
 0x4c8   :  { %v13239_v45 = vpack.c.bf16 %v7738_v6, %v7734_v35  ;;  %v7777_v52 = vpack.c.bf16 %v7737_v39, %v7733_v51  ;;  %v7221_v29 = vpop.f32.mrb[88].mxu0  ;;  %8710 = vmatpush1.bf16.msra.mxu0 %v12200_v33  ;;  %8936 = vmatpush1.bf16.msra.mxu1 %v12203_v63  ;;  %v12218_v35 = vld [vmem:[#allocation11 + $0x380] ss:$16 sps:$4 sm:$0xff]   ;;  %v12221_v51 = vld [vmem:[#allocation11 + $0x388] ss:$16 sps:$4 sm:$0xff]  }
 0x4c9   :  { %v13241_v57 = vpack.c.bf16 %v7739_v44, %v7735_v53  ;;  %v10821_v20 = vadd.f32 %v7221_v29, %v13160_v3  ;;  %v7673_v49 = vpop.f32.mrb[88].mxu1  ;;  %v7223_v54 = vpop.f32.mrb[89].mxu0  ;;  %8711 = vmatprep.subr.bf16.mxu0 %v12208_v8  ;;  %8937 = vmatprep.subr.bf16.mxu1 %v12211_v61  ;;  %v12226_v44 = vld [vmem:[#allocation11 + $0x3a4] ss:$16 sps:$4 sm:$0xff]  }
 0x4ca   :  { %v10853_v38 = vadd.f32 %v7673_v49, %v13163_v23  ;;  %v10822_v2 = vadd.f32 %v7223_v54, %v13166_v47  ;;  %v7675_v19 = vpop.f32.mrb[89].mxu1  ;;  %v7225_v0 = vpop.f32.mrb[90].mxu0  ;;  %8660 = vmatprep.mubr.bf16.mxu0 %v7777_v52  ;;  %8886 = vmatprep.mubr.bf16.mxu1 %v7777_v52  ;;  %v12229_v52 = vld [vmem:[#allocation11 + $0x3ac] ss:$16 sps:$4 sm:$0xff]  }
 0x4cb   :  { %v10854_v31 = vadd.f32 %v7675_v19, %v13169_v48  ;;  %v10823_v34 = vadd.f32 %v7225_v0, %v13160_v3  ;;  %v7677_v43 = vpop.f32.mrb[90].mxu1  ;;  %v7227_v37 = vpop.f32.mrb[91].mxu0  ;;  %8661 = vmatmul.mubr.bf16.gmra.mrb[116].mxu0 %v7776_v42  ;;  %8887 = vmatmul.mubr.bf16.gmra.mrb[116].mxu1 %v7776_v42  ;;  %v7740_v50 = vmax.f32 %v10821_v20, 0.0  ;;  %v12224_v0 = vld [vmem:[#allocation11 + $0x3a0] ss:$16 sps:$4 sm:$0xff]  }
 0x4cc   :  { %v10855_v10 = vadd.f32 %v7677_v43, %v13163_v23  ;;  %v10824_v58 = vadd.f32 %v7227_v37, %v13166_v47  ;;  %v7679_v14 = vpop.f32.mrb[91].mxu1  ;;  %8712 = vmatpush1.bf16.msra.mxu0 %v12206_v32  ;;  %8938 = vmatpush1.bf16.msra.mxu1 %v12209_v25  ;;  %v7742_v16 = vmax.f32 %v10853_v38, 0.0  ;;  %v7741_v62 = vmax.f32 %v10822_v2, 0.0 }
 0x4cd   :  { %v7744_v28 = vmax.f32 %v10823_v34, 0.0  ;;  %v10856_v7 = vadd.f32 %v7679_v14, %v13169_v48  ;;  %8713 = vmatprep.subr.bf16.mxu0 %v12214_v5  ;;  %8939 = vmatprep.subr.bf16.mxu1 %v12217_v55  ;;  %v7743_v63 = vmax.f32 %v10854_v31, 0.0  ;;  %v12227_v31 = vld [vmem:[#allocation11 + $0x3a8] ss:$16 sps:$4 sm:$0xff]  }
 0x4ce   :  { %v7746_v59 = vmax.f32 %v10855_v10, 0.0  ;;  %v7745_v33 = vmax.f32 %v10824_v58, 0.0  ;;  %v12235_v10 = vld [vmem:[#allocation11 + $0x3cc] ss:$16 sps:$4 sm:$0xff]  }
 0x4cf   :  { %v7780_v26 = vpack.c.bf16 %v7744_v28, %v7740_v50  ;;  %v7747_v40 = vmax.f32 %v10856_v7, 0.0 }
 0x4d0   :  { %v13251_v41 = vpack.c.bf16 %v7746_v59, %v7742_v16  ;;  %v7781_v8 = vpack.c.bf16 %v7745_v33, %v7741_v62  ;;  %v7231_v61 = vpop.f32.mrb[92].mxu0  ;;  %8714 = vmatpush1.bf16.msra.mxu0 %v12212_v22  ;;  %8940 = vmatpush1.bf16.msra.mxu1 %v12215_v1  ;;  %v12238_v16 = vld [vmem:[#allocation11 + $0x3e4] ss:$16 sps:$4 sm:$0xff]   ;;  %v12241_v62 = vld [vmem:[#allocation11 + $0x3ec] ss:$16 sps:$4 sm:$0xff]  }
 0x4d1   :  { %v13253_v6 = vpack.c.bf16 %v7747_v40, %v7743_v63  ;;  %v10825_v39 = vadd.f32 %v7231_v61, %v13160_v3  ;;  %v7683_v53 = vpop.f32.mrb[92].mxu1  ;;  %v7233_v42 = vpop.f32.mrb[93].mxu0  ;;  %8715 = vmatprep.subr.bf16.mxu0 %v12220_v11  ;;  %8941 = vmatprep.subr.bf16.mxu1 %v12223_v9  ;;  %v12230_v11 = vld [vmem:[#allocation11 + $0x3c0] ss:$16 sps:$4 sm:$0xff]   ;;  %v12239_v33 = vld [vmem:[#allocation11 + $0x3e8] ss:$16 sps:$4 sm:$0xff]  }
 0x4d2   :  { %v10857_v29 = vadd.f32 %v7683_v53, %v13163_v23  ;;  %v10826_v32 = vadd.f32 %v7233_v42, %v13166_v47  ;;  %v7685_v25 = vpop.f32.mrb[93].mxu1  ;;  %v7235_v20 = vpop.f32.mrb[94].mxu0  ;;  %8670 = vmatprep.mubr.bf16.mxu0 %v7781_v8  ;;  %8896 = vmatprep.mubr.bf16.mxu1 %v7781_v8  ;;  %v12236_v59 = vld [vmem:[#allocation11 + $0x3e0] ss:$16 sps:$4 sm:$0xff]   ;;  %v12242_v63 = vld [vmem:[#allocation14 + $0x40] sm:$0xff]   ;;  %v12252_v53 = vld [vmem:[#allocation14 + $0xd0] sm:$0xff]  }
 0x4d3   :  { %v10858_v49 = vadd.f32 %v7685_v25, %v13169_v48  ;;  %v10827_v54 = vadd.f32 %v7235_v20, %v13160_v3  ;;  %v7687_v5 = vpop.f32.mrb[94].mxu1  ;;  %v7237_v55 = vpop.f32.mrb[95].mxu0  ;;  %8671 = vmatmul.mubr.bf16.gmra.mrb[120].mxu0 %v7780_v26  ;;  %8897 = vmatmul.mubr.bf16.gmra.mrb[120].mxu1 %v7780_v26  ;;  %v7748_v34 = vmax.f32 %v10825_v39, 0.0  ;;  %v12232_v3 = vld [vmem:[#allocation11 + $0x3c4] ss:$16 sps:$4 sm:$0xff]   ;;  %v12246_v61 = vld [vmem:[#allocation14 + $0x48] sm:$0xff]  }
 0x4d4   :  { %v10859_v38 = vadd.f32 %v7687_v5, %v13163_v23  ;;  %v10828_v2 = vadd.f32 %v7237_v55, %v13166_v47  ;;  %v7689_v19 = vpop.f32.mrb[95].mxu1  ;;  %8716 = vmatpush1.bf16.msra.mxu0 %v12218_v35  ;;  %8942 = vmatpush1.bf16.msra.mxu1 %v12221_v51  ;;  %v7750_v58 = vmax.f32 %v10857_v29, 0.0  ;;  %v7749_v14 = vmax.f32 %v10826_v32, 0.0  ;;  %v12244_v26 = vld [vmem:[#allocation14 + $0xc0] sm:$0xff]   ;;  %v12248_v35 = vld [vmem:[#allocation14 + $0xc8] sm:$0xff]   ;;  %v12250_v39 = vld [vmem:[#allocation14 + $0x50] sm:$0xff]  }
 0x4d5   :  { %v7752_v43 = vmax.f32 %v10827_v54, 0.0  ;;  %v10860_v37 = vadd.f32 %v7689_v19, %v13169_v48  ;;  %8717 = vmatprep.subr.bf16.mxu0 %v12226_v44  ;;  %8943 = vmatprep.subr.bf16.mxu1 %v12229_v52  ;;  %v7751_v23 = vmax.f32 %v10858_v49, 0.0  ;;  %v12233_v48 = vld [vmem:[#allocation11 + $0x3c8] ss:$16 sps:$4 sm:$0xff]   ;;  %v12249_v51 = vld [vmem:[#allocation14 + $0x88] sm:$0xff]   ;;  %v12254_v52 = vld [vmem:[#allocation14 + $0x58] sm:$0xff]  }
 0x4d6   :  { %v7754_v22 = vmax.f32 %v10859_v38, 0.0  ;;  %v7753_v1 = vmax.f32 %v10828_v2, 0.0  ;;  %v12243_v40 = vld [vmem:[#allocation14] sm:$0xff]   ;;  %v12251_v42 = vld [vmem:[#allocation14 + $0x10] sm:$0xff]   ;;  %v12257_v29 = vld [vmem:[#allocation14 + $0x98] sm:$0xff]  }
 0x4d7   :  { %v7784_v50 = vpack.c.bf16 %v7752_v43, %v7748_v34  ;;  %v7755_v47 = vmax.f32 %v10860_v37, 0.0  ;;  %v12245_v8 = vld [vmem:[#allocation14 + $0x80] sm:$0xff]   ;;  %v12253_v44 = vld [vmem:[#allocation14 + $0x90] sm:$0xff]   ;;  %v12262_v54 = vld [vmem:[#allocation14 + $0x68] sm:$0xff]  }
 0x4d8   :  { %v13263_v28 = vpack.c.bf16 %v7754_v22, %v7750_v58  ;;  %v7785_v7 = vpack.c.bf16 %v7753_v1, %v7749_v14  ;;  %8718 = vmatpush1.bf16.msra.mxu0 %v12224_v0  ;;  %8944 = vmatpush1.bf16.msra.mxu1 %v12227_v31  ;;  %v12258_v32 = vld [vmem:[#allocation14 + $0x60] sm:$0xff]   ;;  %v12265_v5 = vld [vmem:[#allocation14 + $0xa8] sm:$0xff]   ;;  %v12266_v55 = vld [vmem:[#allocation14 + $0x70] sm:$0xff]  }
 0x4d9   :  { %v13265_v9 = vpack.c.bf16 %v7755_v47, %v7751_v23  ;;  %8719 = vmatprep.subr.bf16.mxu0 %v12232_v3  ;;  %8945 = vmatprep.subr.bf16.mxu1 %v12235_v10  ;;  %v12260_v25 = vld [vmem:[#allocation14 + $0xe0] sm:$0xff]   ;;  %v12268_v38 = vld [vmem:[#allocation14 + $0xf0] sm:$0xff]  }
 0x4da   :  { %8680 = vmatprep.mubr.bf16.mxu0 %v7785_v7  ;;  %8906 = vmatprep.mubr.bf16.mxu1 %v7785_v7  ;;  %v12259_v20 = vld [vmem:[#allocation14 + $0x20] sm:$0xff]   ;;  %v12267_v2 = vld [vmem:[#allocation14 + $0x30] sm:$0xff]  }
 0x4db   :  { %8681 = vmatmul.mubr.bf16.gmra.mrb[124].mxu0 %v7784_v50  ;;  %8907 = vmatmul.mubr.bf16.gmra.mrb[124].mxu1 %v7784_v50  ;;  %v12261_v49 = vld [vmem:[#allocation14 + $0xa0] sm:$0xff]   ;;  %v12269_v19 = vld [vmem:[#allocation14 + $0xb0] sm:$0xff]  }
 0x4dc   :  { %8720 = vmatpush1.bf16.msra.mxu0 %v12230_v11  ;;  %8723 = vmatprep.mubr.bf16.mxu0 %v13181_v60 }
 0x4dd   :  { %8946 = vmatpush1.bf16.msra.mxu1 %v12233_v48  ;;  %8949 = vmatprep.mubr.bf16.mxu1 %v13181_v60  ;;  %v12247_v60 = vld [vmem:[#allocation14 + $0x8] sm:$0xff]  }
 0x4de   :  { %8721 = vmatprep.subr.bf16.mxu0 %v12238_v16  ;;  %8947 = vmatprep.subr.bf16.mxu1 %v12241_v62 }
 0x4e0   :  { %8722 = vmatpush1.bf16.msra.mxu0 %v12236_v59 }
 0x4e1   :  { %8948 = vmatpush1.bf16.msra.mxu1 %v12239_v33  ;;  %10541 = vmatprep.subr.bf16.mxu0 %v12242_v63 }
 0x4e2   :  { %10605 = vmatprep.subr.bf16.mxu1 %v12244_v26 }
 0x4e3   :  { %8724 = vmatmul.mubr.bf16.vlgmr.msra.gmra.mrb[96].mxu0 %v13179_v27 }
 0x4e4   :  { %8950 = vmatmul.mubr.bf16.vlgmr.msra.gmra.mrb[96].mxu1 %v13179_v27  ;;  %8733 = vmatprep.mubr.bf16.mxu0 %v13193_v56  ;;  %v12256_v27 = vld [vmem:[#allocation14 + $0xd8] sm:$0xff]  }
 0x4e5   :  { %8959 = vmatprep.mubr.bf16.mxu1 %v13193_v56  ;;  %10542 = vmatpush3.bf16.msra.mxu0 %v12243_v40  ;;  %v12255_v56 = vld [vmem:[#allocation14 + $0x18] sm:$0xff]  }
 0x4e6   :  { %10606 = vmatpush3.bf16.msra.mxu1 %v12245_v8  ;;  %10543 = vmatprep.subr.bf16.mxu0 %v12246_v61 }
 0x4e7   :  { %10607 = vmatprep.subr.bf16.mxu1 %v12248_v35 }
 0x4e9   :  { %10544 = vmatpush3.bf16.msra.mxu0 %v12247_v60 }
 0x4ea   :  { %10608 = vmatpush3.bf16.msra.mxu1 %v12249_v51  ;;  %10545 = vmatprep.subr.bf16.mxu0 %v12250_v39 }
 0x4eb   :  { %8734 = vmatmul.mubr.bf16.gmra.mrb[100].mxu0 %v13191_v13  ;;  %10609 = vmatprep.subr.bf16.mxu1 %v12252_v53 }
 0x4ec   :  { %8960 = vmatmul.mubr.bf16.gmra.mrb[100].mxu1 %v13191_v13  ;;  %8743 = vmatprep.mubr.bf16.mxu0 %v13205_v36  ;;  %v12264_v13 = vld [vmem:[#allocation14 + $0xe8] sm:$0xff]  }
 0x4ed   :  { %8969 = vmatprep.mubr.bf16.mxu1 %v13205_v36  ;;  %10546 = vmatpush3.bf16.msra.mxu0 %v12251_v42  ;;  %v12263_v36 = vld [vmem:[#allocation14 + $0x28] sm:$0xff]  }
 0x4ee   :  { %10610 = vmatpush3.bf16.msra.mxu1 %v12253_v44  ;;  %10547 = vmatprep.subr.bf16.mxu0 %v12254_v52 }
 0x4ef   :  { %10611 = vmatprep.subr.bf16.mxu1 %v12256_v27 }
 0x4f1   :  { %10548 = vmatpush3.bf16.msra.mxu0 %v12255_v56 }
 0x4f2   :  { %10612 = vmatpush3.bf16.msra.mxu1 %v12257_v29  ;;  %10549 = vmatprep.subr.bf16.mxu0 %v12258_v32 }
 0x4f3   :  { %8744 = vmatmul.mubr.bf16.gmra.mrb[104].mxu0 %v13203_v24  ;;  %10613 = vmatprep.subr.bf16.mxu1 %v12260_v25 }
 0x4f4   :  { %8970 = vmatmul.mubr.bf16.gmra.mrb[104].mxu1 %v13203_v24  ;;  %8753 = vmatprep.mubr.bf16.mxu0 %v13217_v15  ;;  %v12270_v24 = vld [vmem:[#allocation14 + $0x78] sm:$0xff]  }
 0x4f5   :  { %8979 = vmatprep.mubr.bf16.mxu1 %v13217_v15  ;;  %10550 = vmatpush3.bf16.msra.mxu0 %v12259_v20  ;;  %v12271_v15 = vld [vmem:[#allocation14 + $0x38] sm:$0xff]  }
 0x4f6   :  { %10614 = vmatpush3.bf16.msra.mxu1 %v12261_v49  ;;  %10551 = vmatprep.subr.bf16.mxu0 %v12262_v54 }
 0x4f7   :  { %10615 = vmatprep.subr.bf16.mxu1 %v12264_v13 }
 0x4f9   :  { %10552 = vmatpush3.bf16.msra.mxu0 %v12263_v36 }
 0x4fa   :  { %10616 = vmatpush3.bf16.msra.mxu1 %v12265_v5  ;;  %10553 = vmatprep.subr.bf16.mxu0 %v12266_v55 }
 0x4fb   :  { %8754 = vmatmul.mubr.bf16.gmra.mrb[108].mxu0 %v13215_v46  ;;  %10617 = vmatprep.subr.bf16.mxu1 %v12268_v38 }
 0x4fc   :  { %8980 = vmatmul.mubr.bf16.gmra.mrb[108].mxu1 %v13215_v46  ;;  %8763 = vmatprep.mubr.bf16.mxu0 %v13229_v4  ;;  %v12272_v46 = vld [vmem:[#allocation14 + $0xf8] sm:$0xff]  }
 0x4fd   :  { %8989 = vmatprep.mubr.bf16.mxu1 %v13229_v4  ;;  %10554 = vmatpush3.bf16.msra.mxu0 %v12267_v2  ;;  %v7916_v4 = vld [vmem:[#allocation13] sm:$0xf] }
 0x4fe   :  { %10618 = vmatpush3.bf16.msra.mxu1 %v12269_v19  ;;  %10555 = vmatprep.subr.bf16.mxu0 %v12270_v24 }
 0x4ff   :  { %10619 = vmatprep.subr.bf16.mxu1 %v12272_v46 }
 0x501   :  { %10556 = vmatpush3.bf16.msra.mxu0 %v12271_v15 }
 0x503   :  { %8764 = vmatmul.mubr.bf16.gmra.mrb[112].mxu0 %v13227_v30 }
 0x504   :  { %8990 = vmatmul.mubr.bf16.gmra.mrb[112].mxu1 %v13227_v30  ;;  %8773 = vmatprep.mubr.bf16.mxu0 %v13241_v57  ;;  %v12273_v30 = vld [vmem:[#allocation14 + $0xb8] sm:$0xff]  }
 0x505   :  { %8999 = vmatprep.mubr.bf16.mxu1 %v13241_v57  ;;  %10620 = vmatpush3.bf16.msra.mxu1 %v12273_v30  ;;  %v13303_v57 = vrot.slane %v7916_v4, %v12779_v17 }
 0x50b   :  { %8774 = vmatmul.mubr.bf16.gmra.mrb[116].mxu0 %v13239_v45 }
 0x50c   :  { %9000 = vmatmul.mubr.bf16.gmra.mrb[116].mxu1 %v13239_v45  ;;  %8783 = vmatprep.mubr.bf16.mxu0 %v13253_v6  ;;  %v13300_v45 = vrot.slane %v7916_v4, %v12776_v12 }
 0x50d   :  { %9009 = vmatprep.mubr.bf16.mxu1 %v13253_v6  ;;  %v13309_v6 = vrot.slane %v7916_v4, %v12785_v21 }
 0x513   :  { %8784 = vmatmul.mubr.bf16.gmra.mrb[120].mxu0 %v13251_v41 }
 0x514   :  { %9010 = vmatmul.mubr.bf16.gmra.mrb[120].mxu1 %v13251_v41  ;;  %8793 = vmatprep.mubr.bf16.mxu0 %v13265_v9  ;;  %v13306_v41 = vrot.slane %v7916_v4, %v12782_v18 }
 0x515   :  { %9019 = vmatprep.mubr.bf16.mxu1 %v13265_v9 }
 0x51b   :  { %8794 = vmatmul.mubr.bf16.gmra.mrb[124].mxu0 %v13263_v28 }
 0x51c   :  { %9020 = vmatmul.mubr.bf16.gmra.mrb[124].mxu1 %v13263_v28 }
 0x5b6   :  { %v8725_v0 = vpop.f32.mrb[96].mxu0 }
 0x5b7   :  { %v10861_v31 = vadd.f32 %v8725_v0, %v13300_v45  ;;  %v8951_v34 = vpop.f32.mrb[96].mxu1  ;;  %v8727_v43 = vpop.f32.mrb[97].mxu0 }
 0x5b8   :  { %v10893_v37 = vadd.f32 %v8951_v34, %v13303_v57  ;;  %v10862_v3 = vadd.f32 %v8727_v43, %v13306_v41  ;;  %v8953_v12 = vpop.f32.mrb[97].mxu1  ;;  %v8729_v10 = vpop.f32.mrb[98].mxu0 }
 0x5b9   :  { %v10894_v17 = vadd.f32 %v8953_v12, %v13309_v6  ;;  %v10863_v58 = vadd.f32 %v8729_v10, %v13300_v45  ;;  %v8955_v18 = vpop.f32.mrb[98].mxu1  ;;  %v8731_v14 = vpop.f32.mrb[99].mxu0  ;;  %v9030_v23 = vmax.f32 %v10861_v31, 0.0 }
 0x5ba   :  { %v10895_v21 = vadd.f32 %v8955_v18, %v13303_v57  ;;  %v10864_v22 = vadd.f32 %v8731_v14, %v13306_v41  ;;  %v8957_v1 = vpop.f32.mrb[99].mxu1  ;;  %v9032_v28 = vmax.f32 %v10893_v37, 0.0  ;;  %v9031_v7 = vmax.f32 %v10862_v3, 0.0 }
 0x5bb   :  { %v9034_v50 = vmax.f32 %v10863_v58, 0.0  ;;  %v10896_v47 = vadd.f32 %v8957_v1, %v13309_v6  ;;  %v9033_v48 = vmax.f32 %v10894_v17, 0.0 }
 0x5bc   :  { %v9036_v11 = vmax.f32 %v10895_v21, 0.0  ;;  %v9035_v9 = vmax.f32 %v10864_v22, 0.0 }
 0x5bd   :  { %v9094_v16 = vpack.c.bf16 %v9034_v50, %v9030_v23  ;;  %v9037_v62 = vmax.f32 %v10896_v47, 0.0 }
 0x5be   :  { %v9096_v59 = vpack.c.bf16 %v9036_v11, %v9032_v28  ;;  %v9095_v33 = vpack.c.bf16 %v9035_v9, %v9031_v7  ;;  %v8735_v63 = vpop.f32.mrb[100].mxu0 }
 0x5bf   :  { %v9097_v26 = vpack.c.bf16 %v9037_v62, %v9033_v48  ;;  %v10865_v40 = vadd.f32 %v8735_v63, %v13300_v45  ;;  %v8961_v8 = vpop.f32.mrb[100].mxu1  ;;  %v8737_v61 = vpop.f32.mrb[101].mxu0 }
 0x5c0   :  { %v10897_v35 = vadd.f32 %v8961_v8, %v13303_v57  ;;  %v10866_v60 = vadd.f32 %v8737_v61, %v13306_v41  ;;  %v8963_v51 = vpop.f32.mrb[101].mxu1  ;;  %v8739_v39 = vpop.f32.mrb[102].mxu0  ;;  %9421 = vmatprep.mubr.bf16.mxu0 %v9095_v33 }
 0x5c1   :  { %v10898_v53 = vadd.f32 %v8963_v51, %v13309_v6  ;;  %v10867_v42 = vadd.f32 %v8739_v39, %v13300_v45  ;;  %v8965_v44 = vpop.f32.mrb[102].mxu1  ;;  %9518 = vmatprep.mubr.bf16.mxu1 %v9097_v26  ;;  %v8741_v52 = vpop.f32.mrb[103].mxu0  ;;  %9422 = vmatmul.mubr.bf16.vlgmr.msra.gmra.mrb[128].mxu0 %v9094_v16  ;;  %v9038_v32 = vmax.f32 %v10865_v40, 0.0 }
 0x5c2   :  { %v10899_v27 = vadd.f32 %v8965_v44, %v13303_v57  ;;  %v10868_v56 = vadd.f32 %v8741_v52, %v13306_v41  ;;  %v8967_v29 = vpop.f32.mrb[103].mxu1  ;;  %9519 = vmatmul.mubr.bf16.vlgmr.msra.gmra.mrb[128].mxu1 %v9096_v59  ;;  %v9040_v49 = vmax.f32 %v10897_v35, 0.0  ;;  %v9039_v54 = vmax.f32 %v10866_v60, 0.0 }
 0x5c3   :  { %v9042_v25 = vmax.f32 %v10867_v42, 0.0  ;;  %v10900_v20 = vadd.f32 %v8967_v29, %v13309_v6  ;;  %v9041_v5 = vmax.f32 %v10898_v53, 0.0 }
 0x5c4   :  { %v9044_v13 = vmax.f32 %v10899_v27, 0.0  ;;  %v9043_v36 = vmax.f32 %v10868_v56, 0.0 }
 0x5c5   :  { %v9098_v55 = vpack.c.bf16 %v9042_v25, %v9038_v32  ;;  %v9045_v38 = vmax.f32 %v10900_v20, 0.0 }
 0x5c6   :  { %v9100_v2 = vpack.c.bf16 %v9044_v13, %v9040_v49  ;;  %v9099_v19 = vpack.c.bf16 %v9043_v36, %v9039_v54  ;;  %v8745_v24 = vpop.f32.mrb[104].mxu0 }
 0x5c7   :  { %v9101_v46 = vpack.c.bf16 %v9045_v38, %v9041_v5  ;;  %v10869_v15 = vadd.f32 %v8745_v24, %v13300_v45  ;;  %v8971_v30 = vpop.f32.mrb[104].mxu1  ;;  %v8747_v4 = vpop.f32.mrb[105].mxu0 }
 0x5c8   :  { %v10901_v0 = vadd.f32 %v8971_v30, %v13303_v57  ;;  %v10870_v31 = vadd.f32 %v8747_v4, %v13306_v41  ;;  %v8973_v34 = vpop.f32.mrb[105].mxu1  ;;  %v8749_v43 = vpop.f32.mrb[106].mxu0  ;;  %9429 = vmatprep.mubr.bf16.mxu0 %v9099_v19 }
 0x5c9   :  { %v10902_v37 = vadd.f32 %v8973_v34, %v13309_v6  ;;  %v10871_v3 = vadd.f32 %v8749_v43, %v13300_v45  ;;  %v8975_v12 = vpop.f32.mrb[106].mxu1  ;;  %9526 = vmatprep.mubr.bf16.mxu1 %v9101_v46  ;;  %v8751_v10 = vpop.f32.mrb[107].mxu0  ;;  %9430 = vmatmul.mubr.bf16.gmra.mrb[132].mxu0 %v9098_v55  ;;  %v9046_v14 = vmax.f32 %v10869_v15, 0.0 }
 0x5ca   :  { %v10903_v17 = vadd.f32 %v8975_v12, %v13303_v57  ;;  %v10872_v58 = vadd.f32 %v8751_v10, %v13306_v41  ;;  %v8977_v18 = vpop.f32.mrb[107].mxu1  ;;  %9527 = vmatmul.mubr.bf16.gmra.mrb[132].mxu1 %v9100_v2  ;;  %v9048_v1 = vmax.f32 %v10901_v0, 0.0  ;;  %v9047_v23 = vmax.f32 %v10870_v31, 0.0 }
 0x5cb   :  { %v9050_v21 = vmax.f32 %v10871_v3, 0.0  ;;  %v10904_v22 = vadd.f32 %v8977_v18, %v13309_v6  ;;  %v9049_v28 = vmax.f32 %v10902_v37, 0.0 }
 0x5cc   :  { %v9052_v50 = vmax.f32 %v10903_v17, 0.0  ;;  %v9051_v47 = vmax.f32 %v10872_v58, 0.0 }
 0x5cd   :  { %v9102_v7 = vpack.c.bf16 %v9050_v21, %v9046_v14  ;;  %v9053_v11 = vmax.f32 %v10904_v22, 0.0 }
 0x5ce   :  { %v9104_v9 = vpack.c.bf16 %v9052_v50, %v9048_v1  ;;  %v9103_v48 = vpack.c.bf16 %v9051_v47, %v9047_v23  ;;  %v8755_v16 = vpop.f32.mrb[108].mxu0 }
 0x5cf   :  { %v9105_v62 = vpack.c.bf16 %v9053_v11, %v9049_v28  ;;  %v10873_v59 = vadd.f32 %v8755_v16, %v13300_v45  ;;  %v8981_v33 = vpop.f32.mrb[108].mxu1  ;;  %v8757_v63 = vpop.f32.mrb[109].mxu0 }
 0x5d0   :  { %v10905_v26 = vadd.f32 %v8981_v33, %v13303_v57  ;;  %v10874_v40 = vadd.f32 %v8757_v63, %v13306_v41  ;;  %v8983_v8 = vpop.f32.mrb[109].mxu1  ;;  %v8759_v61 = vpop.f32.mrb[110].mxu0  ;;  %9437 = vmatprep.mubr.bf16.mxu0 %v9103_v48 }
 0x5d1   :  { %v10906_v35 = vadd.f32 %v8983_v8, %v13309_v6  ;;  %v10875_v60 = vadd.f32 %v8759_v61, %v13300_v45  ;;  %v8985_v51 = vpop.f32.mrb[110].mxu1  ;;  %9534 = vmatprep.mubr.bf16.mxu1 %v9105_v62  ;;  %v8761_v39 = vpop.f32.mrb[111].mxu0  ;;  %9438 = vmatmul.mubr.bf16.gmra.mrb[136].mxu0 %v9102_v7  ;;  %v9054_v52 = vmax.f32 %v10873_v59, 0.0 }
 0x5d2   :  { %v10907_v53 = vadd.f32 %v8985_v51, %v13303_v57  ;;  %v10876_v42 = vadd.f32 %v8761_v39, %v13306_v41  ;;  %v8987_v44 = vpop.f32.mrb[111].mxu1  ;;  %9535 = vmatmul.mubr.bf16.gmra.mrb[136].mxu1 %v9104_v9  ;;  %v9056_v29 = vmax.f32 %v10905_v26, 0.0  ;;  %v9055_v32 = vmax.f32 %v10874_v40, 0.0 }
 0x5d3   :  { %v9058_v27 = vmax.f32 %v10875_v60, 0.0  ;;  %v10908_v56 = vadd.f32 %v8987_v44, %v13309_v6  ;;  %v9057_v49 = vmax.f32 %v10906_v35, 0.0 }
 0x5d4   :  { %v9060_v25 = vmax.f32 %v10907_v53, 0.0  ;;  %v9059_v20 = vmax.f32 %v10876_v42, 0.0 }
 0x5d5   :  { %v9106_v54 = vpack.c.bf16 %v9058_v27, %v9054_v52  ;;  %v9061_v13 = vmax.f32 %v10908_v56, 0.0 }
 0x5d6   :  { %v9108_v36 = vpack.c.bf16 %v9060_v25, %v9056_v29  ;;  %v9107_v5 = vpack.c.bf16 %v9059_v20, %v9055_v32  ;;  %v8765_v55 = vpop.f32.mrb[112].mxu0 }
 0x5d7   :  { %v9109_v38 = vpack.c.bf16 %v9061_v13, %v9057_v49  ;;  %v10877_v2 = vadd.f32 %v8765_v55, %v13300_v45  ;;  %v8991_v19 = vpop.f32.mrb[112].mxu1  ;;  %v8767_v24 = vpop.f32.mrb[113].mxu0 }
 0x5d8   :  { %v10909_v46 = vadd.f32 %v8991_v19, %v13303_v57  ;;  %v10878_v15 = vadd.f32 %v8767_v24, %v13306_v41  ;;  %v8993_v30 = vpop.f32.mrb[113].mxu1  ;;  %v8769_v4 = vpop.f32.mrb[114].mxu0  ;;  %9445 = vmatprep.mubr.bf16.mxu0 %v9107_v5 }
 0x5d9   :  { %v10910_v0 = vadd.f32 %v8993_v30, %v13309_v6  ;;  %v10879_v31 = vadd.f32 %v8769_v4, %v13300_v45  ;;  %v8995_v34 = vpop.f32.mrb[114].mxu1  ;;  %9542 = vmatprep.mubr.bf16.mxu1 %v9109_v38  ;;  %v8771_v43 = vpop.f32.mrb[115].mxu0  ;;  %9446 = vmatmul.mubr.bf16.gmra.mrb[140].mxu0 %v9106_v54  ;;  %v9062_v10 = vmax.f32 %v10877_v2, 0.0 }
 0x5da   :  { %v10911_v37 = vadd.f32 %v8995_v34, %v13303_v57  ;;  %v10880_v3 = vadd.f32 %v8771_v43, %v13306_v41  ;;  %v8997_v12 = vpop.f32.mrb[115].mxu1  ;;  %9543 = vmatmul.mubr.bf16.gmra.mrb[140].mxu1 %v9108_v36  ;;  %v9064_v18 = vmax.f32 %v10909_v46, 0.0  ;;  %v9063_v14 = vmax.f32 %v10878_v15, 0.0 }
 0x5db   :  { %v9066_v17 = vmax.f32 %v10879_v31, 0.0  ;;  %v10912_v58 = vadd.f32 %v8997_v12, %v13309_v6  ;;  %v9065_v1 = vmax.f32 %v10910_v0, 0.0 }
 0x5dc   :  { %v9068_v21 = vmax.f32 %v10911_v37, 0.0  ;;  %v9067_v22 = vmax.f32 %v10880_v3, 0.0 }
 0x5dd   :  { %v9110_v23 = vpack.c.bf16 %v9066_v17, %v9062_v10  ;;  %v9069_v50 = vmax.f32 %v10912_v58, 0.0 }
 0x5de   :  { %v9112_v47 = vpack.c.bf16 %v9068_v21, %v9064_v18  ;;  %v9111_v28 = vpack.c.bf16 %v9067_v22, %v9063_v14  ;;  %v8775_v7 = vpop.f32.mrb[116].mxu0 }
 0x5df   :  { %v9113_v11 = vpack.c.bf16 %v9069_v50, %v9065_v1  ;;  %v10881_v9 = vadd.f32 %v8775_v7, %v13300_v45  ;;  %v9001_v48 = vpop.f32.mrb[116].mxu1  ;;  %v8777_v16 = vpop.f32.mrb[117].mxu0 }
 0x5e0   :  { %v10913_v62 = vadd.f32 %v9001_v48, %v13303_v57  ;;  %v10882_v59 = vadd.f32 %v8777_v16, %v13306_v41  ;;  %v9003_v33 = vpop.f32.mrb[117].mxu1  ;;  %v8779_v63 = vpop.f32.mrb[118].mxu0  ;;  %9453 = vmatprep.mubr.bf16.mxu0 %v9111_v28 }
 0x5e1   :  { %v10914_v26 = vadd.f32 %v9003_v33, %v13309_v6  ;;  %v10883_v40 = vadd.f32 %v8779_v63, %v13300_v45  ;;  %v9005_v8 = vpop.f32.mrb[118].mxu1  ;;  %9550 = vmatprep.mubr.bf16.mxu1 %v9113_v11  ;;  %v8781_v61 = vpop.f32.mrb[119].mxu0  ;;  %9454 = vmatmul.mubr.bf16.gmra.mrb[144].mxu0 %v9110_v23  ;;  %v9070_v39 = vmax.f32 %v10881_v9, 0.0 }
 0x5e2   :  { %v10915_v35 = vadd.f32 %v9005_v8, %v13303_v57  ;;  %v10884_v60 = vadd.f32 %v8781_v61, %v13306_v41  ;;  %v9007_v51 = vpop.f32.mrb[119].mxu1  ;;  %9551 = vmatmul.mubr.bf16.gmra.mrb[144].mxu1 %v9112_v47  ;;  %v9072_v44 = vmax.f32 %v10913_v62, 0.0  ;;  %v9071_v52 = vmax.f32 %v10882_v59, 0.0 }
 0x5e3   :  { %v9074_v53 = vmax.f32 %v10883_v40, 0.0  ;;  %v10916_v42 = vadd.f32 %v9007_v51, %v13309_v6  ;;  %v9073_v29 = vmax.f32 %v10914_v26, 0.0 }
 0x5e4   :  { %v9076_v27 = vmax.f32 %v10915_v35, 0.0  ;;  %v9075_v56 = vmax.f32 %v10884_v60, 0.0 }
 0x5e5   :  { %v9114_v32 = vpack.c.bf16 %v9074_v53, %v9070_v39  ;;  %v9077_v25 = vmax.f32 %v10916_v42, 0.0 }
 0x5e6   :  { %v9116_v20 = vpack.c.bf16 %v9076_v27, %v9072_v44  ;;  %v9115_v49 = vpack.c.bf16 %v9075_v56, %v9071_v52  ;;  %v8785_v54 = vpop.f32.mrb[120].mxu0 }
 0x5e7   :  { %v9117_v13 = vpack.c.bf16 %v9077_v25, %v9073_v29  ;;  %v10885_v36 = vadd.f32 %v8785_v54, %v13300_v45  ;;  %v9011_v5 = vpop.f32.mrb[120].mxu1  ;;  %v8787_v55 = vpop.f32.mrb[121].mxu0 }
 0x5e8   :  { %v10917_v38 = vadd.f32 %v9011_v5, %v13303_v57  ;;  %v10886_v2 = vadd.f32 %v8787_v55, %v13306_v41  ;;  %v9013_v19 = vpop.f32.mrb[121].mxu1  ;;  %v8789_v24 = vpop.f32.mrb[122].mxu0  ;;  %9461 = vmatprep.mubr.bf16.mxu0 %v9115_v49 }
 0x5e9   :  { %v10918_v46 = vadd.f32 %v9013_v19, %v13309_v6  ;;  %v10887_v15 = vadd.f32 %v8789_v24, %v13300_v45  ;;  %v9015_v30 = vpop.f32.mrb[122].mxu1  ;;  %9558 = vmatprep.mubr.bf16.mxu1 %v9117_v13  ;;  %v8791_v4 = vpop.f32.mrb[123].mxu0  ;;  %9462 = vmatmul.mubr.bf16.gmra.mrb[148].mxu0 %v9114_v32  ;;  %v9078_v43 = vmax.f32 %v10885_v36, 0.0  ;;  %v13375_v32 = vld [vmem:[#allocation16] ss:$0 sm:$0xff] }
 0x5ea   :  { %v10919_v0 = vadd.f32 %v9015_v30, %v13303_v57  ;;  %v10888_v31 = vadd.f32 %v8791_v4, %v13306_v41  ;;  %v9017_v34 = vpop.f32.mrb[123].mxu1  ;;  %9559 = vmatmul.mubr.bf16.gmra.mrb[148].mxu1 %v9116_v20  ;;  %v9080_v12 = vmax.f32 %v10917_v38, 0.0  ;;  %v9079_v10 = vmax.f32 %v10886_v2, 0.0 }
 0x5eb   :  { %v9082_v37 = vmax.f32 %v10887_v15, 0.0  ;;  %v10920_v3 = vadd.f32 %v9017_v34, %v13309_v6  ;;  %v9081_v18 = vmax.f32 %v10918_v46, 0.0 }
 0x5ec   :  { %v9084_v17 = vmax.f32 %v10919_v0, 0.0  ;;  %v9083_v58 = vmax.f32 %v10888_v31, 0.0 }
 0x5ed   :  { %v9118_v14 = vpack.c.bf16 %v9082_v37, %v9078_v43  ;;  %v9085_v21 = vmax.f32 %v10920_v3, 0.0 }
 0x5ee   :  { %v9120_v22 = vpack.c.bf16 %v9084_v17, %v9080_v12  ;;  %v9119_v1 = vpack.c.bf16 %v9083_v58, %v9079_v10  ;;  %v8795_v23 = vpop.f32.mrb[124].mxu0 }
 0x5ef   :  { %v9121_v50 = vpack.c.bf16 %v9085_v21, %v9081_v18  ;;  %v10889_v47 = vadd.f32 %v8795_v23, %v13300_v45  ;;  %v9021_v28 = vpop.f32.mrb[124].mxu1  ;;  %v8797_v7 = vpop.f32.mrb[125].mxu0 }
 0x5f0   :  { %v10921_v11 = vadd.f32 %v9021_v28, %v13303_v57  ;;  %v10890_v9 = vadd.f32 %v8797_v7, %v13306_v41  ;;  %v9023_v48 = vpop.f32.mrb[125].mxu1  ;;  %v8799_v16 = vpop.f32.mrb[126].mxu0  ;;  %9469 = vmatprep.mubr.bf16.mxu0 %v9119_v1 }
 0x5f1   :  { %v10922_v62 = vadd.f32 %v9023_v48, %v13309_v6  ;;  %v10891_v59 = vadd.f32 %v8799_v16, %v13300_v45  ;;  %v9025_v33 = vpop.f32.mrb[126].mxu1  ;;  %9566 = vmatprep.mubr.bf16.mxu1 %v9121_v50  ;;  %v8801_v63 = vpop.f32.mrb[127].mxu0  ;;  %9470 = vmatmul.mubr.bf16.gmra.mrb[152].mxu0 %v9118_v14  ;;  %v9086_v61 = vmax.f32 %v10889_v47, 0.0 }
 0x5f2   :  { %v10923_v26 = vadd.f32 %v9025_v33, %v13303_v57  ;;  %v10892_v40 = vadd.f32 %v8801_v63, %v13306_v41  ;;  %v9027_v8 = vpop.f32.mrb[127].mxu1  ;;  %9567 = vmatmul.mubr.bf16.gmra.mrb[152].mxu1 %v9120_v22  ;;  %v9088_v51 = vmax.f32 %v10921_v11, 0.0  ;;  %v9087_v39 = vmax.f32 %v10890_v9, 0.0 }
 0x5f3   :  { %v9090_v35 = vmax.f32 %v10891_v59, 0.0  ;;  %v10924_v60 = vadd.f32 %v9027_v8, %v13309_v6  ;;  %v9089_v44 = vmax.f32 %v10922_v62, 0.0 }
 0x5f4   :  { %v9092_v53 = vmax.f32 %v10923_v26, 0.0  ;;  %v9091_v42 = vmax.f32 %v10892_v40, 0.0 }
 0x5f5   :  { %v9122_v45 = vpack.c.bf16 %v9090_v35, %v9086_v61  ;;  %v9093_v52 = vmax.f32 %v10924_v60, 0.0 }
 0x5f6   :  { %v9124_v27 = vpack.c.bf16 %v9092_v53, %v9088_v51  ;;  %v9123_v56 = vpack.c.bf16 %v9091_v42, %v9087_v39 }
 0x5f7   :  { %v9125_v29 = vpack.c.bf16 %v9093_v52, %v9089_v44 }
 0x5f8   :  { %9477 = vmatprep.mubr.bf16.mxu0 %v9123_v56 }
 0x5f9   :  { %9574 = vmatprep.mubr.bf16.mxu1 %v9125_v29  ;;  %9478 = vmatmul.mubr.bf16.gmra.mrb[156].mxu0 %v9122_v45 }
 0x5fa   :  { %9575 = vmatmul.mubr.bf16.gmra.mrb[156].mxu1 %v9124_v27 }
 0x694   :  { %v10557_v57 = vpop.f32.mrb[128].mxu0 }
 0x695   :  { %v10621_v41 = vpop.f32.mrb[128].mxu1  ;;  %v10558_v25 = vpop.f32.mrb[129].mxu0 }
 0x696   :  { %v10559_v6 = vadd.f32 %v10558_v25, %v10557_v57  ;;  %v10622_v20 = vpop.f32.mrb[129].mxu1  ;;  %v10560_v49 = vpop.f32.mrb[130].mxu0 }
 0x697   :  { %v10623_v54 = vadd.f32 %v10622_v20, %v10621_v41  ;;  %v10624_v13 = vpop.f32.mrb[130].mxu1  ;;  %v10561_v36 = vpop.f32.mrb[131].mxu0 }
 0x698   :  { %v9424_v5 = vadd.f32 %v10559_v6, %v13375_v32  ;;  %v10562_v55 = vadd.f32 %v10561_v36, %v10560_v49  ;;  %v10625_v38 = vpop.f32.mrb[131].mxu1 }
 0x699   :  { %v10626_v2 = vadd.f32 %v10625_v38, %v10624_v13 }
 0x69a   :  { %v9521_v19 = vadd.f32 %v10623_v54, %v9424_v5  ;;  %v9427_v24 = vadd.f32 %v10562_v55, %v13375_v32 }
 0x69c   :  { %9583 = vst [vmem:[#allocation17] sm:$0xff] %v9521_v19  ;;  %v9524_v46 = vadd.f32 %v10626_v2, %v9427_v24  ;;  %v10563_v15 = vpop.f32.mrb[132].mxu0 }
 0x69d   :  { %v10627_v30 = vpop.f32.mrb[132].mxu1  ;;  %v10564_v4 = vpop.f32.mrb[133].mxu0 }
 0x69e   :  { %9584 = vst [vmem:[#allocation17 + $0x8] sm:$0xff] %v9524_v46  ;;  %v10565_v0 = vadd.f32 %v10564_v4, %v10563_v15  ;;  %v10628_v31 = vpop.f32.mrb[133].mxu1  ;;  %v10566_v34 = vpop.f32.mrb[134].mxu0 }
 0x69f   :  { %v10629_v43 = vadd.f32 %v10628_v31, %v10627_v30  ;;  %v10630_v37 = vpop.f32.mrb[134].mxu1  ;;  %v10567_v3 = vpop.f32.mrb[135].mxu0 }
 0x6a0   :  { %v9432_v12 = vadd.f32 %v10565_v0, %v13375_v32  ;;  %v10568_v10 = vadd.f32 %v10567_v3, %v10566_v34  ;;  %v10631_v17 = vpop.f32.mrb[135].mxu1 }
 0x6a1   :  { %v10632_v58 = vadd.f32 %v10631_v17, %v10630_v37 }
 0x6a2   :  { %v9529_v18 = vadd.f32 %v10629_v43, %v9432_v12  ;;  %v9435_v14 = vadd.f32 %v10568_v10, %v13375_v32 }
 0x6a4   :  { %9585 = vst [vmem:[#allocation17 + $0x10] sm:$0xff] %v9529_v18  ;;  %v9532_v21 = vadd.f32 %v10632_v58, %v9435_v14  ;;  %v10569_v22 = vpop.f32.mrb[136].mxu0 }
 0x6a5   :  { %v10633_v1 = vpop.f32.mrb[136].mxu1  ;;  %v10570_v23 = vpop.f32.mrb[137].mxu0 }
 0x6a6   :  { %9586 = vst [vmem:[#allocation17 + $0x18] sm:$0xff] %v9532_v21  ;;  %v10571_v50 = vadd.f32 %v10570_v23, %v10569_v22  ;;  %v10634_v47 = vpop.f32.mrb[137].mxu1  ;;  %v10572_v28 = vpop.f32.mrb[138].mxu0 }
 0x6a7   :  { %v10635_v7 = vadd.f32 %v10634_v47, %v10633_v1  ;;  %v10636_v11 = vpop.f32.mrb[138].mxu1  ;;  %v10573_v9 = vpop.f32.mrb[139].mxu0 }
 0x6a8   :  { %v9440_v48 = vadd.f32 %v10571_v50, %v13375_v32  ;;  %v10574_v16 = vadd.f32 %v10573_v9, %v10572_v28  ;;  %v10637_v62 = vpop.f32.mrb[139].mxu1 }
 0x6a9   :  { %v10638_v59 = vadd.f32 %v10637_v62, %v10636_v11 }
 0x6aa   :  { %v9537_v33 = vadd.f32 %v10635_v7, %v9440_v48  ;;  %v9443_v63 = vadd.f32 %v10574_v16, %v13375_v32 }
 0x6ac   :  { %9587 = vst [vmem:[#allocation17 + $0x20] sm:$0xff] %v9537_v33  ;;  %v9540_v26 = vadd.f32 %v10638_v59, %v9443_v63  ;;  %v10575_v40 = vpop.f32.mrb[140].mxu0 }
 0x6ad   :  { %v10639_v8 = vpop.f32.mrb[140].mxu1  ;;  %v10576_v61 = vpop.f32.mrb[141].mxu0 }
 0x6ae   :  { %9588 = vst [vmem:[#allocation17 + $0x28] sm:$0xff] %v9540_v26  ;;  %v10577_v35 = vadd.f32 %v10576_v61, %v10575_v40  ;;  %v10640_v60 = vpop.f32.mrb[141].mxu1  ;;  %v10578_v51 = vpop.f32.mrb[142].mxu0 }
 0x6af   :  { %v10641_v39 = vadd.f32 %v10640_v60, %v10639_v8  ;;  %v10642_v53 = vpop.f32.mrb[142].mxu1  ;;  %v10579_v42 = vpop.f32.mrb[143].mxu0 }
 0x6b0   :  { %v9448_v44 = vadd.f32 %v10577_v35, %v13375_v32  ;;  %v10580_v45 = vadd.f32 %v10579_v42, %v10578_v51  ;;  %v10643_v52 = vpop.f32.mrb[143].mxu1 }
 0x6b1   :  { %v10644_v27 = vadd.f32 %v10643_v52, %v10642_v53 }
 0x6b2   :  { %v9545_v56 = vadd.f32 %v10641_v39, %v9448_v44  ;;  %v9451_v29 = vadd.f32 %v10580_v45, %v13375_v32 }
 0x6b4   :  { %9589 = vst [vmem:[#allocation17 + $0x30] sm:$0xff] %v9545_v56  ;;  %v9548_v57 = vadd.f32 %v10644_v27, %v9451_v29  ;;  %v10581_v41 = vpop.f32.mrb[144].mxu0 }
 0x6b5   :  { %v10645_v25 = vpop.f32.mrb[144].mxu1  ;;  %v10582_v6 = vpop.f32.mrb[145].mxu0 }
 0x6b6   :  { %9590 = vst [vmem:[#allocation17 + $0x38] sm:$0xff] %v9548_v57  ;;  %v10583_v20 = vadd.f32 %v10582_v6, %v10581_v41  ;;  %v10646_v49 = vpop.f32.mrb[145].mxu1  ;;  %v10584_v54 = vpop.f32.mrb[146].mxu0 }
 0x6b7   :  { %v10647_v13 = vadd.f32 %v10646_v49, %v10645_v25  ;;  %v10648_v36 = vpop.f32.mrb[146].mxu1  ;;  %v10585_v5 = vpop.f32.mrb[147].mxu0 }
 0x6b8   :  { %v9456_v55 = vadd.f32 %v10583_v20, %v13375_v32  ;;  %v10586_v38 = vadd.f32 %v10585_v5, %v10584_v54  ;;  %v10649_v2 = vpop.f32.mrb[147].mxu1 }
 0x6b9   :  { %v10650_v19 = vadd.f32 %v10649_v2, %v10648_v36 }
 0x6ba   :  { %v9553_v24 = vadd.f32 %v10647_v13, %v9456_v55  ;;  %v9459_v46 = vadd.f32 %v10586_v38, %v13375_v32 }
 0x6bc   :  { %9591 = vst [vmem:[#allocation17 + $0x40] sm:$0xff] %v9553_v24  ;;  %v9556_v15 = vadd.f32 %v10650_v19, %v9459_v46  ;;  %v10587_v30 = vpop.f32.mrb[148].mxu0 }
 0x6bd   :  { %v10651_v4 = vpop.f32.mrb[148].mxu1  ;;  %v10588_v0 = vpop.f32.mrb[149].mxu0 }
 0x6be   :  { %9592 = vst [vmem:[#allocation17 + $0x48] sm:$0xff] %v9556_v15  ;;  %v10589_v31 = vadd.f32 %v10588_v0, %v10587_v30  ;;  %v10652_v34 = vpop.f32.mrb[149].mxu1  ;;  %v10590_v43 = vpop.f32.mrb[150].mxu0 }
 0x6bf   :  { %v10653_v37 = vadd.f32 %v10652_v34, %v10651_v4  ;;  %v10654_v3 = vpop.f32.mrb[150].mxu1  ;;  %v10591_v12 = vpop.f32.mrb[151].mxu0 }
 0x6c0   :  { %v9464_v10 = vadd.f32 %v10589_v31, %v13375_v32  ;;  %v10592_v17 = vadd.f32 %v10591_v12, %v10590_v43  ;;  %v10655_v58 = vpop.f32.mrb[151].mxu1 }
 0x6c1   :  { %v10656_v18 = vadd.f32 %v10655_v58, %v10654_v3 }
 0x6c2   :  { %v9561_v14 = vadd.f32 %v10653_v37, %v9464_v10  ;;  %v9467_v21 = vadd.f32 %v10592_v17, %v13375_v32 }
 0x6c4   :  { %9593 = vst [vmem:[#allocation17 + $0x50] sm:$0xff] %v9561_v14  ;;  %v9564_v22 = vadd.f32 %v10656_v18, %v9467_v21  ;;  %v10593_v1 = vpop.f32.mrb[152].mxu0 }
 0x6c5   :  { %v10657_v23 = vpop.f32.mrb[152].mxu1  ;;  %v10594_v50 = vpop.f32.mrb[153].mxu0 }
 0x6c6   :  { %9594 = vst [vmem:[#allocation17 + $0x58] sm:$0xff] %v9564_v22  ;;  %v10595_v47 = vadd.f32 %v10594_v50, %v10593_v1  ;;  %v10658_v28 = vpop.f32.mrb[153].mxu1  ;;  %v10596_v7 = vpop.f32.mrb[154].mxu0 }
 0x6c7   :  { %v10659_v11 = vadd.f32 %v10658_v28, %v10657_v23  ;;  %v10660_v9 = vpop.f32.mrb[154].mxu1  ;;  %v10597_v48 = vpop.f32.mrb[155].mxu0 }
 0x6c8   :  { %v9472_v16 = vadd.f32 %v10595_v47, %v13375_v32  ;;  %v10598_v62 = vadd.f32 %v10597_v48, %v10596_v7  ;;  %v10661_v59 = vpop.f32.mrb[155].mxu1 }
 0x6c9   :  { %v10662_v33 = vadd.f32 %v10661_v59, %v10660_v9 }
 0x6ca   :  { %v9569_v63 = vadd.f32 %v10659_v11, %v9472_v16  ;;  %v9475_v26 = vadd.f32 %v10598_v62, %v13375_v32 }
 0x6cc   :  { %9595 = vst [vmem:[#allocation17 + $0x60] sm:$0xff] %v9569_v63  ;;  %v9572_v40 = vadd.f32 %v10662_v33, %v9475_v26  ;;  %v10599_v8 = vpop.f32.mrb[156].mxu0 }
 0x6cd   :  { %v10663_v61 = vpop.f32.mrb[156].mxu1  ;;  %v10600_v35 = vpop.f32.mrb[157].mxu0 }
 0x6ce   :  { %9596 = vst [vmem:[#allocation17 + $0x68] sm:$0xff] %v9572_v40  ;;  %v10601_v60 = vadd.f32 %v10600_v35, %v10599_v8  ;;  %v10664_v51 = vpop.f32.mrb[157].mxu1  ;;  %v10602_v39 = vpop.f32.mrb[158].mxu0 }
 0x6cf   :  { %v10665_v53 = vadd.f32 %v10664_v51, %v10663_v61  ;;  %v10666_v42 = vpop.f32.mrb[158].mxu1  ;;  %v10603_v44 = vpop.f32.mrb[159].mxu0 }
 0x6d0   :  { %v9480_v45 = vadd.f32 %v10601_v60, %v13375_v32  ;;  %v10604_v52 = vadd.f32 %v10603_v44, %v10602_v39  ;;  %v10667_v27 = vpop.f32.mrb[159].mxu1 }
 0x6d1   :  { %v10668_v56 = vadd.f32 %v10667_v27, %v10666_v42 }
 0x6d2   :  { %v9577_v29 = vadd.f32 %v10665_v53, %v9480_v45  ;;  %v9483_v57 = vadd.f32 %v10604_v52, %v13375_v32 }
 0x6d4   :  { %9597 = vst [vmem:[#allocation17 + $0x70] sm:$0xff] %v9577_v29  ;;  %v9580_v41 = vadd.f32 %v10668_v56, %v9483_v57 }
 0x6d6   :  { %9598 = vst [vmem:[#allocation17 + $0x78] sm:$0xff] %v9580_v41 }
 0x6d7   :  { %12540 = shalt.err (!%p12537_p6)
}
 0x6d8   :  { %s12541_s18 = scalar_lea.hbm %s13414_s9, 2048 }
 0x6d9   :  { %p12542_p7 = scmp.ne.s32.totalorder %s13414_s9, %s12541_s18  ;;  %p12545_p8 = scmp.lt.u32.totalorder %s12541_s18, %s13414_s9 }
 0x6db   :  { %p12547_p9 = pnand %p12545_p8, %p12542_p7 }
 0x6dd   :  { %12550 = shalt.err (!%p12547_p9)
}
 0x6de   :  { %s12582_s11 = smov 128   ;;  %s12583_s13 = smov 8  }
 0x6df   :  { %9610 = dma.vmem_to_hbm [thread:$0]  %s9605_s3, 2048, %s13414_s9, [#allocation4], %s12582_s11, %s12582_s11, %s12583_s13  }
 0x6e0   :  { %12561 = dma.done.wait [#allocation4], 2048  }
 0x6e1   :  { %12562 = vsyncadd [#allocation4], 4294965248 }
 0x6e2   :  { %9614 = vsyncpa [#allocation3], 1 }
 0x6e3   :  { %9615 = vsyncpa [#allocation6], 1 }
 0x6e4   :  { %9616 = vsyncpa [#allocation9], 1 }
 0x6e5   :  { %9617 = vsyncpa [#allocation12], 1 }
 0x6e6   :  { %9618 = vsyncpa [#allocation15], 1 }
 0x6e7   :  { %9619 = vsyncpa [#allocation4], 1 }

</bundles_post_ra>
